<compile_context>
chip_gen: v7x
topology: tpu7x:2x2x1
jax: 0.10.0
libtpu: 0.0.40
codegen_flags: <defaults>
</compile_context>

<pallas_src>
import jax
import jax.numpy as jnp
from jax import lax
from jax.experimental import pallas as pl
from jax.experimental.pallas import tpu as pltpu

_VMEM = pl.BlockSpec(memory_space=pltpu.MemorySpace.VMEM)

_SGD_LR = 1e-4
_SGD_STEPS = 1000
_SGD_BETA = _SGD_LR * 2.0 / 8.0     # lr * d(MSE)/d(pred) factor (mean over the 8 samples)
_AUG = 16                           # padded width of the augmented [w(8), b, 1] parameter row


# ----------------------------------------------------------------------------
# The single fused Pallas kernel
# ----------------------------------------------------------------------------
def _hvae_fwd_kernel(
    x_ref,
    e1w1, e1b1, e1w2, e1b2, e1w3, e1b3,
    e2w1, e2b1, e2w2, e2b2,
    e3w1, e3b1, e3w2, e3b2,
    d1w1, d1b1, d1w2, d1b2,
    d2w1, d2b1, d2w2, d2b2,
    d3w1, d3b1, d3w2, d3b2,
    d4w1, d4b1, d4w2, d4b2,
    p0_ref, eps_z1_ref, a_ref, eps_ref,
    loss_ref,
):
    f32 = jnp.float32

    def dot(a, b):
        return jnp.dot(a, b, preferred_element_type=f32)

    def relu(v):
        return jnp.maximum(v, 0.0)

    def reparam(mu, logvar, eps):
        return mu + eps * jnp.exp(0.5 * logvar)

    # ---- iota-built constant matrices (no dense literals, hoisted once) ----
    def iota(shape, d):
        return lax.broadcasted_iota(jnp.int32, shape, d)

    eye8 = jnp.where(iota((8, 8), 0) == iota((8, 8), 1), 1.0, 0.0).astype(f32)
    eyeA = jnp.where(iota((_AUG, _AUG), 0) == iota((_AUG, _AUG), 1), 1.0, 0.0).astype(f32)
    row9 = jnp.where(iota((_AUG, _AUG), 0) == 9, 1.0, 0.0).astype(f32)
    place = jnp.where(iota((8, _AUG), 0) == iota((8, _AUG), 1), 1.0, 0.0).astype(f32)   # embed z in cols 0..7
    ones_col = jnp.where(iota((8, _AUG), 1) == 8, 1.0, 0.0).astype(f32)                  # bias feature (col 8)
    place_t = jnp.where(iota((_AUG, 8), 0) == iota((_AUG, 8), 1), 1.0, 0.0).astype(f32)
    bias_row = jnp.where(iota((_AUG, 8), 0) == 8, 1.0, 0.0).astype(f32)
    rows816 = iota((8, _AUG), 0)
    colsA8 = iota((_AUG, 8), 1)

    def transpose8(z):
        # [8,8] transpose built from lane slices + sublane reductions
        # (avoids tpu.transpose / transposed-contraction dot_general entirely).
        zt = jnp.zeros((8, 8), f32)
        for r in range(8):
            col = z[:, r:r + 1]                                      # [8,1] = z[:, r]
            row = jnp.sum(col * eye8, axis=0, keepdims=True)         # [1,8], lane j = z[j, r]
            zt = zt + eye8[:, r:r + 1] * row                         # becomes row r of z^T
        return zt

    def matpow(t, n):
        # t ** n (n is a static Python int) by square-and-multiply (~14 matmuls for 1000).
        acc = None
        while n:
            if n & 1:
                acc = t if acc is None else dot(acc, t)
            n >>= 1
            if n:
                t = dot(t, t)
        return acc

    def projection(p_aug, mu, logvar, eps):
        # Closed form of HVAE.Projection: 8 sequential 1000-step SGD trainings of the
        # shared Linear(8->1) on MSE.  One SGD step is the affine map
        #   p -> p @ M + c,  M = I9 - beta * Xa^T Xa,  c = beta * y^T Xa
        # (Xa = [X, 1], X = z with row i zeroed, y = z[i]).  In homogeneous coordinates
        # p_aug = [w, b, 1, 0...] the 1000 steps collapse to p_aug @ T**1000 with
        # T = [[M, 0], [c, 1]], computed by repeated squaring.
        z = reparam(mu, logvar, eps)                                 # [8,8] == ai_list rows
        zt = transpose8(z)
        zb = dot(z, place) + ones_col                                # [8,16]  == [z | 1 | 0]
        zbt = dot(place_t, zt) + bias_row                            # [16,8]  == zb^T
        for i in range(8):                                           # unrolled: factors independent
            xb = jnp.where(rows816 == i, ones_col, zb)               # zero sample i (bias stays 1)
            xbt = jnp.where(colsA8 == i, bias_row, zbt)
            g = dot(xbt, xb)                                         # [16,16]  Xa^T Xa (padded)
            y = z[i:i + 1, :]                                        # [1,8] regression target
            c = _SGD_BETA * dot(y, xb)                               # [1,16]
            t = eyeA - _SGD_BETA * g + row9 * c                      # one-step affine map
            p_aug = dot(p_aug, matpow(t, _SGD_STEPS))
        return p_aug

    def head16(z, a, w1, b1, w2, b2, sig=True):
        # MLP on cat([z, A], -1); the first linear is split over the two 8-wide input
        # halves so no in-kernel concatenation is needed.
        h = relu(dot(z, w1[0:8, :]) + dot(a, w1[8:16, :]) + b1[...])
        o = dot(h, w2[...]) + b2[...]
        return jax.nn.sigmoid(o) if sig else o

    def head24(z, w_row, a, w1, b1, w2, b2):
        # MLP on cat([z, projection, A], -1); every projection row aliases the live
        # regressor weight (torch `.data` semantics), so the [1,8] row broadcasts.
        h = relu(dot(z, w1[0:8, :]) + dot(w_row, w1[8:16, :])
                 + dot(a, w1[16:24, :]) + b1[...])
        return jax.nn.sigmoid(dot(h, w2[...]) + b2[...])

    # ---------------- encoder1 ----------------
    h = relu(dot(x_ref[...], e1w1[...]) + e1b1[...])
    h = relu(dot(h, e1w2[...]) + e1b2[...])
    o1 = jax.nn.sigmoid(dot(h, e1w3[...]) + e1b3[...])              # [1,16]
    mu1, logvar1 = o1[:, 0:8], o1[:, 8:16]
    z1 = reparam(mu1, logvar1, eps_z1_ref[...])                     # [1,8]

    # ---------------- Encoder2 (8 factors batched as rows) ----------------
    h2 = relu(dot(a_ref[0], e2w1[0:8, :]) + dot(z1, e2w1[8:16, :]) + e2b1[...])
    o2 = jax.nn.sigmoid(dot(h2, e2w2[...]) + e2b2[...])             # [8,16]
    e2mu, e2lv = o2[:, 0:8], o2[:, 8:16]

    # ---------------- Projection #1 ----------------
    p = projection(p0_ref[...], e2mu, e2lv, eps_ref[0])
    w_live = p[:, 0:8]

    # ---------------- Encoder3, pass 1 ----------------
    z2 = reparam(e2mu, e2lv, eps_ref[1])
    o3 = head24(z2, w_live, a_ref[1], e3w1, e3b1, e3w2, e3b2)
    mu3e, lv3e = o3[:, 0:8], o3[:, 8:16]

    # ---------------- Projection #2 ----------------
    p = projection(p, mu3e, lv3e, eps_ref[2])
    w_live = p[:, 0:8]        # project_list and project_list2 both alias this weight now

    # ---------------- Encoder3, pass 2 ("encoder4") ----------------
    z3e = reparam(mu3e, lv3e, eps_ref[3])
    o4 = head24(z3e, w_live, a_ref[2], e3w1, e3b1, e3w2, e3b2)
    mu4, lv4 = o4[:, 0:8], o4[:, 8:16]

    # ---------------- UHA optimisation ----------------
    # TODO(synk): the external UHA MCMC class is not provided; (mu4, lv4) pass through.
    z3 = reparam(mu4, lv4, eps_ref[4])

    # ---------------- decoders ----------------
    od1 = head24(z3, w_live, a_ref[3], d1w1, d1b1, d1w2, d1b2)
    d1mu, d1var = od1[:, 0:8], od1[:, 8:16]
    xr1 = reparam(d1mu, d1var, eps_ref[5])

    od2 = head24(xr1, w_live, a_ref[4], d2w1, d2b1, d2w2, d2b2)
    d2mu, d2var = od2[:, 0:8], od2[:, 8:16]
    xr2 = reparam(d2mu, d2var, eps_ref[6])

    od3 = head16(xr2, a_ref[5], d3w1, d3b1, d3w2, d3b2)
    d3mu, d3var = od3[:, 0:8], od3[:, 8:16]
    xr3 = reparam(d3mu, d3var, eps_ref[7])

    # decoder4's output is unused by the loss (as in the PyTorch forward).
    _ = head16(xr3, a_ref[6], d4w1, d4b1, d4w2, d4b2, sig=False)

    # ---------------- loss ----------------
    s = -jnp.sum(jnp.log(logvar1), keepdims=True)       # encoder01_var
    s = s - jnp.sum(jnp.log(e2lv), keepdims=True)       # encoder02_var (all 8 factors)
    s = s - jnp.sum(jnp.log(lv3e), keepdims=True)       # encoder03_var = Encoder3 pass-1 logvar
    s = s - jnp.sum(jnp.log(lv4), keepdims=True)        # encoder04_var
    # mu_sum is re-assigned inside the PyTorch loop, so only i == 7 survives; both
    # encoder03_mu and decoder03_mu alias decoder3's mu at loss-assembly time.
    d31 = d3mu[7:8, :] - d1mu[7:8, :]
    d22 = e2mu[7:8, :] - d2mu[7:8, :]
    d13 = mu1 - d3mu[7:8, :]
    mu_sum = (jnp.mean(d31 * d31, keepdims=True)
              + jnp.mean(d22 * d22, keepdims=True)
              + jnp.mean(d13 * d13, keepdims=True))
    loss_ref[...] = s + mu_sum


# ----------------------------------------------------------------------------
# Host-side glue: parameter init, noise generation, the single pallas_call
# ----------------------------------------------------------------------------
def init_linear(key, din, dout):
    kw, kb = jax.random.split(key)
    bound = 1.0 / jnp.sqrt(jnp.float32(din))
    w = jax.random.uniform(kw, (din, dout), jnp.float32, -bound, bound)
    b = jax.random.uniform(kb, (1, dout), jnp.float32, -bound, bound)
    return w, b


def init_params(key, input_size, h1, lat1, h2, lat2):
    ks = iter(jax.random.split(key, 24))
    lin = lambda di, do: init_linear(next(ks), di, do)
    P = {}
    P["enc1"] = lin(input_size, h1) + lin(h1, 64) + lin(64, lat1 * 2)
    P["enc2"] = lin(lat1 * 2, h2) + lin(h2, 16)
    P["enc3"] = lin(24, h2) + lin(h2, 16)
    P["enc4"] = lin(24, h2) + lin(h2, lat2 * 2)   # present in PyTorch but unused in forward
    P["dec1"] = lin(24, h2) + lin(h2, 16)
    P["dec2"] = lin(24, h2) + lin(h2, 16)
    P["dec3"] = lin(16, h2) + lin(h2, 16)
    P["dec4"] = lin(16, h1) + lin(h1, input_size)
    kw, kb = jax.random.split(next(ks))
    # shared linear_regression Linear(8 -> 1), stored as w [1,8], b [1,1]
    P["linreg"] = (jax.random.uniform(kw, (1, 8), jnp.float32, -0.35, 0.35),
                   jax.random.uniform(kb, (1, 1), jnp.float32, -0.35, 0.35))
    return P


@jax.jit
def hvae_forward(x, P, a_mu, a_logvar, key):
    k1, k2, k3 = jax.random.split(key, 3)
    # Pre-generated reparameterization noise (kernel consumes raw eps tensors).
    eps_z1 = jax.random.normal(k1, (1, 8), jnp.float32)
    eps_a = jax.random.normal(k2, (7, 8), jnp.float32)
    eps88 = jax.random.normal(k3, (8, 8, 8), jnp.float32)

    # A_i = reparameterize(a_mu[i], a_logvar[i]) for each of the 7 places the prior
    # factors are concatenated in, expanded to the [8, 8] row layout the kernel uses.
    a_samp = a_mu[None, :] + eps_a * jnp.exp(0.5 * a_logvar)[None, :]        # [7, 8]
    a_bcast = jnp.broadcast_to(a_samp[:, :, None], (7, 8, 8))

    # Augmented regressor parameters in homogeneous coordinates: [w(8), b, 1, zeros].
    lw, lb = P["linreg"]
    p0 = jnp.concatenate(
        [lw, lb, jnp.ones((1, 1), jnp.float32), jnp.zeros((1, _AUG - 10), jnp.float32)],
        axis=1)                                                              # [1, 16]

    operands = (
        x,
        *P["enc1"], *P["enc2"], *P["enc3"],
        *P["dec1"], *P["dec2"], *P["dec3"], *P["dec4"],
        p0, eps_z1, a_bcast, eps88,
    )
    loss = pl.pallas_call(
        _hvae_fwd_kernel,
        out_shape=jax.ShapeDtypeStruct((1, 1), jnp.float32),
        in_specs=[_VMEM] * len(operands),
        out_specs=_VMEM,
        compiler_params=pltpu.CompilerParams(vmem_limit_bytes=16 * 1024 * 1024),
    )(*operands)
    return loss[0, 0]


# ----------------------------------------------------------------------------
if __name__ == "__main__":
    input_size, hidden_size1, latent_size1, hidden_size2, latent_size2 = 32, 32, 8, 32, 8
    assert latent_size1 == 8, "HVAE's concat logic requires latent_size1 == 8"

    root = jax.random.PRNGKey(0)
    k_param, k_data, k_noise = jax.random.split(root, 3)

    params = init_params(k_param, input_size, hidden_size1, latent_size1,
                         hidden_size2, latent_size2)
    # deterministic stand-in for np.load('../00_data/mean_var_list.npy')
    a_mu = jnp.linspace(0.1, 0.8, 8).astype(jnp.float32)
    a_logvar = jnp.linspace(-1.0, -0.3, 8).astype(jnp.float32)

    x = jax.random.normal(k_data, (1, input_size), jnp.float32)

    total_loss = hvae_forward(x, params, a_mu, a_logvar, k_noise)
    jax.block_until_ready(total_loss)
    print("KERNEL_OK")
</pallas_src>

<mosaic_0001>
module attributes {stable_mosaic.version = 11 : i64} {
  func.func @_hvae_fwd_kernel(%arg0: memref<1x32xf32, #tpu.memory_space<vmem>>, %arg1: memref<32x32xf32, #tpu.memory_space<vmem>>, %arg2: memref<1x32xf32, #tpu.memory_space<vmem>>, %arg3: memref<32x64xf32, #tpu.memory_space<vmem>>, %arg4: memref<1x64xf32, #tpu.memory_space<vmem>>, %arg5: memref<64x16xf32, #tpu.memory_space<vmem>>, %arg6: memref<1x16xf32, #tpu.memory_space<vmem>>, %arg7: memref<16x32xf32, #tpu.memory_space<vmem>>, %arg8: memref<1x32xf32, #tpu.memory_space<vmem>>, %arg9: memref<32x16xf32, #tpu.memory_space<vmem>>, %arg10: memref<1x16xf32, #tpu.memory_space<vmem>>, %arg11: memref<24x32xf32, #tpu.memory_space<vmem>>, %arg12: memref<1x32xf32, #tpu.memory_space<vmem>>, %arg13: memref<32x16xf32, #tpu.memory_space<vmem>>, %arg14: memref<1x16xf32, #tpu.memory_space<vmem>>, %arg15: memref<24x32xf32, #tpu.memory_space<vmem>>, %arg16: memref<1x32xf32, #tpu.memory_space<vmem>>, %arg17: memref<32x16xf32, #tpu.memory_space<vmem>>, %arg18: memref<1x16xf32, #tpu.memory_space<vmem>>, %arg19: memref<24x32xf32, #tpu.memory_space<vmem>>, %arg20: memref<1x32xf32, #tpu.memory_space<vmem>>, %arg21: memref<32x16xf32, #tpu.memory_space<vmem>>, %arg22: memref<1x16xf32, #tpu.memory_space<vmem>>, %arg23: memref<16x32xf32, #tpu.memory_space<vmem>>, %arg24: memref<1x32xf32, #tpu.memory_space<vmem>>, %arg25: memref<32x16xf32, #tpu.memory_space<vmem>>, %arg26: memref<1x16xf32, #tpu.memory_space<vmem>>, %arg27: memref<16x32xf32, #tpu.memory_space<vmem>>, %arg28: memref<1x32xf32, #tpu.memory_space<vmem>>, %arg29: memref<32x32xf32, #tpu.memory_space<vmem>>, %arg30: memref<1x32xf32, #tpu.memory_space<vmem>>, %arg31: memref<1x16xf32, #tpu.memory_space<vmem>>, %arg32: memref<1x8xf32, #tpu.memory_space<vmem>>, %arg33: memref<7x8x8xf32, #tpu.memory_space<vmem>>, %arg34: memref<8x8x8xf32, #tpu.memory_space<vmem>>, %arg35: memref<1x1xf32, #tpu.memory_space<vmem>>) attributes {dimension_semantics = [], scalar_prefetch = 0 : i64, scratch_operands = 0 : i64, tpu.core_type = #tpu.core_type<tc>} {
    %0 = tpu.iota {dimensions = array<i32: 0>} : vector<8x8xi32>
    %1 = tpu.iota {dimensions = array<i32: 1>} : vector<8x8xi32>
    %2 = arith.cmpi eq, %0, %1 : vector<8x8xi32>
    %cst = arith.constant 1.000000e+00 : f32
    %cst_0 = arith.constant 0.000000e+00 : f32
    %3 = vector.broadcast %cst : f32 to vector<8x8xf32>
    %4 = vector.broadcast %cst_0 : f32 to vector<8x8xf32>
    %5 = arith.select %2, %3, %4 : vector<8x8xi1>, vector<8x8xf32>
    %6 = tpu.iota {dimensions = array<i32: 0>} : vector<16x16xi32>
    %7 = tpu.iota {dimensions = array<i32: 1>} : vector<16x16xi32>
    %8 = arith.cmpi eq, %6, %7 : vector<16x16xi32>
    %cst_1 = arith.constant 1.000000e+00 : f32
    %cst_2 = arith.constant 0.000000e+00 : f32
    %9 = vector.broadcast %cst_1 : f32 to vector<16x16xf32>
    %10 = vector.broadcast %cst_2 : f32 to vector<16x16xf32>
    %11 = arith.select %8, %9, %10 : vector<16x16xi1>, vector<16x16xf32>
    %12 = tpu.iota {dimensions = array<i32: 0>} : vector<16x16xi32>
    %c9_i32 = arith.constant 9 : i32
    %13 = vector.broadcast %c9_i32 : i32 to vector<16x16xi32>
    %14 = arith.cmpi eq, %12, %13 : vector<16x16xi32>
    %cst_3 = arith.constant 1.000000e+00 : f32
    %cst_4 = arith.constant 0.000000e+00 : f32
    %15 = vector.broadcast %cst_3 : f32 to vector<16x16xf32>
    %16 = vector.broadcast %cst_4 : f32 to vector<16x16xf32>
    %17 = arith.select %14, %15, %16 : vector<16x16xi1>, vector<16x16xf32>
    %18 = tpu.iota {dimensions = array<i32: 0>} : vector<8x16xi32>
    %19 = tpu.iota {dimensions = array<i32: 1>} : vector<8x16xi32>
    %20 = arith.cmpi eq, %18, %19 : vector<8x16xi32>
    %cst_5 = arith.constant 1.000000e+00 : f32
    %cst_6 = arith.constant 0.000000e+00 : f32
    %21 = vector.broadcast %cst_5 : f32 to vector<8x16xf32>
    %22 = vector.broadcast %cst_6 : f32 to vector<8x16xf32>
    %23 = arith.select %20, %21, %22 : vector<8x16xi1>, vector<8x16xf32>
    %24 = tpu.iota {dimensions = array<i32: 1>} : vector<8x16xi32>
    %c8_i32 = arith.constant 8 : i32
    %25 = vector.broadcast %c8_i32 : i32 to vector<8x16xi32>
    %26 = arith.cmpi eq, %24, %25 : vector<8x16xi32>
    %cst_7 = arith.constant 1.000000e+00 : f32
    %cst_8 = arith.constant 0.000000e+00 : f32
    %27 = vector.broadcast %cst_7 : f32 to vector<8x16xf32>
    %28 = vector.broadcast %cst_8 : f32 to vector<8x16xf32>
    %29 = arith.select %26, %27, %28 : vector<8x16xi1>, vector<8x16xf32>
    %30 = tpu.iota {dimensions = array<i32: 0>} : vector<16x8xi32>
    %31 = tpu.iota {dimensions = array<i32: 1>} : vector<16x8xi32>
    %32 = arith.cmpi eq, %30, %31 : vector<16x8xi32>
    %cst_9 = arith.constant 1.000000e+00 : f32
    %cst_10 = arith.constant 0.000000e+00 : f32
    %33 = vector.broadcast %cst_9 : f32 to vector<16x8xf32>
    %34 = vector.broadcast %cst_10 : f32 to vector<16x8xf32>
    %35 = arith.select %32, %33, %34 : vector<16x8xi1>, vector<16x8xf32>
    %36 = tpu.iota {dimensions = array<i32: 0>} : vector<16x8xi32>
    %c8_i32_11 = arith.constant 8 : i32
    %37 = vector.broadcast %c8_i32_11 : i32 to vector<16x8xi32>
    %38 = arith.cmpi eq, %36, %37 : vector<16x8xi32>
    %cst_12 = arith.constant 1.000000e+00 : f32
    %cst_13 = arith.constant 0.000000e+00 : f32
    %39 = vector.broadcast %cst_12 : f32 to vector<16x8xf32>
    %40 = vector.broadcast %cst_13 : f32 to vector<16x8xf32>
    %41 = arith.select %38, %39, %40 : vector<16x8xi1>, vector<16x8xf32>
    %42 = tpu.iota {dimensions = array<i32: 0>} : vector<8x16xi32>
    %43 = tpu.iota {dimensions = array<i32: 1>} : vector<16x8xi32>
    %c0 = arith.constant 0 : index
    %c0_14 = arith.constant 0 : index
    %44 = vector.load %arg0[%c0, %c0_14] : memref<1x32xf32, #tpu.memory_space<vmem>>, vector<1x32xf32>
    %c0_15 = arith.constant 0 : index
    %c0_16 = arith.constant 0 : index
    %45 = vector.load %arg1[%c0_15, %c0_16] : memref<32x32xf32, #tpu.memory_space<vmem>>, vector<32x32xf32>
    %cst_17 = arith.constant dense<0.000000e+00> : vector<1x32xf32>
    %46 = tpu.matmul %44, %45, %cst_17 {dimension_numbers = #tpu.dot_dimension_numbers<[1], [0], [0], [1], [0, 0, 1, 1], [], []>} : vector<1x32xf32>, vector<32x32xf32>, vector<1x32xf32> -> vector<1x32xf32>
    %c0_18 = arith.constant 0 : index
    %c0_19 = arith.constant 0 : index
    %47 = vector.load %arg2[%c0_18, %c0_19] : memref<1x32xf32, #tpu.memory_space<vmem>>, vector<1x32xf32>
    %48 = arith.addf %46, %47 : vector<1x32xf32>
    %cst_20 = arith.constant 0.000000e+00 : f32
    %49 = vector.broadcast %cst_20 : f32 to vector<1x32xf32>
    %50 = arith.maximumf %48, %49 : vector<1x32xf32>
    %c0_21 = arith.constant 0 : index
    %c0_22 = arith.constant 0 : index
    %51 = vector.load %arg3[%c0_21, %c0_22] : memref<32x64xf32, #tpu.memory_space<vmem>>, vector<32x64xf32>
    %cst_23 = arith.constant dense<0.000000e+00> : vector<1x64xf32>
    %52 = tpu.matmul %50, %51, %cst_23 {dimension_numbers = #tpu.dot_dimension_numbers<[1], [0], [0], [1], [0, 0, 1, 1], [], []>} : vector<1x32xf32>, vector<32x64xf32>, vector<1x64xf32> -> vector<1x64xf32>
    %c0_24 = arith.constant 0 : index
    %c0_25 = arith.constant 0 : index
    %53 = vector.load %arg4[%c0_24, %c0_25] : memref<1x64xf32, #tpu.memory_space<vmem>>, vector<1x64xf32>
    %54 = arith.addf %52, %53 : vector<1x64xf32>
    %cst_26 = arith.constant 0.000000e+00 : f32
    %55 = vector.broadcast %cst_26 : f32 to vector<1x64xf32>
    %56 = arith.maximumf %54, %55 : vector<1x64xf32>
    %c0_27 = arith.constant 0 : index
    %c0_28 = arith.constant 0 : index
    %57 = vector.load %arg5[%c0_27, %c0_28] : memref<64x16xf32, #tpu.memory_space<vmem>>, vector<64x16xf32>
    %cst_29 = arith.constant dense<0.000000e+00> : vector<1x16xf32>
    %58 = tpu.matmul %56, %57, %cst_29 {dimension_numbers = #tpu.dot_dimension_numbers<[1], [0], [0], [1], [0, 0, 1, 1], [], []>} : vector<1x64xf32>, vector<64x16xf32>, vector<1x16xf32> -> vector<1x16xf32>
    %c0_30 = arith.constant 0 : index
    %c0_31 = arith.constant 0 : index
    %59 = vector.load %arg6[%c0_30, %c0_31] : memref<1x16xf32, #tpu.memory_space<vmem>>, vector<1x16xf32>
    %60 = arith.addf %58, %59 : vector<1x16xf32>
    %61 = arith.negf %60 : vector<1x16xf32>
    %62 = math.exp %61 : vector<1x16xf32>
    %cst_32 = arith.constant 1.000000e+00 : f32
    %63 = vector.broadcast %cst_32 : f32 to vector<1x16xf32>
    %64 = arith.addf %63, %62 : vector<1x16xf32>
    %65 = arith.divf %63, %64 : vector<1x16xf32>
    %66 = vector.extract_strided_slice %65 {offsets = [0, 0], sizes = [1, 8], strides = [1, 1]} : vector<1x16xf32> to vector<1x8xf32>
    %67 = vector.extract_strided_slice %65 {offsets = [0, 8], sizes = [1, 8], strides = [1, 1]} : vector<1x16xf32> to vector<1x8xf32>
    %c0_33 = arith.constant 0 : index
    %c0_34 = arith.constant 0 : index
    %68 = vector.load %arg32[%c0_33, %c0_34] : memref<1x8xf32, #tpu.memory_space<vmem>>, vector<1x8xf32>
    %cst_35 = arith.constant 5.000000e-01 : f32
    %69 = vector.broadcast %cst_35 : f32 to vector<1x8xf32>
    %70 = arith.mulf %69, %67 : vector<1x8xf32>
    %71 = math.exp %70 : vector<1x8xf32>
    %72 = arith.mulf %68, %71 : vector<1x8xf32>
    %73 = arith.addf %66, %72 : vector<1x8xf32>
    %c0_36 = arith.constant 0 : index
    %c0_37 = arith.constant 0 : index
    %c0_38 = arith.constant 0 : index
    %74 = vector.load %arg33[%c0_36, %c0_37, %c0_38] : memref<7x8x8xf32, #tpu.memory_space<vmem>>, vector<1x8x8xf32>
    %75 = vector.shape_cast %74 : vector<1x8x8xf32> to vector<8x8xf32>
    %c0_39 = arith.constant 0 : index
    %c0_40 = arith.constant 0 : index
    %76 = vector.load %arg7[%c0_39, %c0_40] : memref<16x32xf32, #tpu.memory_space<vmem>>, vector<8x32xf32>
    %cst_41 = arith.constant dense<0.000000e+00> : vector<8x32xf32>
    %77 = tpu.matmul %75, %76, %cst_41 {dimension_numbers = #tpu.dot_dimension_numbers<[1], [0], [0], [1], [0, 0, 1, 1], [], []>} : vector<8x8xf32>, vector<8x32xf32>, vector<8x32xf32> -> vector<8x32xf32>
    %c8 = arith.constant 8 : index
    %c0_42 = arith.constant 0 : index
    %78 = vector.load %arg7[%c8, %c0_42] : memref<16x32xf32, #tpu.memory_space<vmem>>, vector<8x32xf32>
    %cst_43 = arith.constant dense<0.000000e+00> : vector<1x32xf32>
    %79 = tpu.matmul %73, %78, %cst_43 {dimension_numbers = #tpu.dot_dimension_numbers<[1], [0], [0], [1], [0, 0, 1, 1], [], []>} : vector<1x8xf32>, vector<8x32xf32>, vector<1x32xf32> -> vector<1x32xf32>
    %80 = vector.broadcast %79 : vector<1x32xf32> to vector<8x32xf32>
    %81 = arith.addf %77, %80 : vector<8x32xf32>
    %c0_44 = arith.constant 0 : index
    %c0_45 = arith.constant 0 : index
    %82 = vector.load %arg8[%c0_44, %c0_45] : memref<1x32xf32, #tpu.memory_space<vmem>>, vector<1x32xf32>
    %83 = vector.broadcast %82 : vector<1x32xf32> to vector<8x32xf32>
    %84 = arith.addf %81, %83 : vector<8x32xf32>
    %cst_46 = arith.constant 0.000000e+00 : f32
    %85 = vector.broadcast %cst_46 : f32 to vector<8x32xf32>
    %86 = arith.maximumf %84, %85 : vector<8x32xf32>
    %c0_47 = arith.constant 0 : index
    %c0_48 = arith.constant 0 : index
    %87 = vector.load %arg9[%c0_47, %c0_48] : memref<32x16xf32, #tpu.memory_space<vmem>>, vector<32x16xf32>
    %cst_49 = arith.constant dense<0.000000e+00> : vector<8x16xf32>
    %88 = tpu.matmul %86, %87, %cst_49 {dimension_numbers = #tpu.dot_dimension_numbers<[1], [0], [0], [1], [0, 0, 1, 1], [], []>} : vector<8x32xf32>, vector<32x16xf32>, vector<8x16xf32> -> vector<8x16xf32>
    %c0_50 = arith.constant 0 : index
    %c0_51 = arith.constant 0 : index
    %89 = vector.load %arg10[%c0_50, %c0_51] : memref<1x16xf32, #tpu.memory_space<vmem>>, vector<1x16xf32>
    %90 = vector.broadcast %89 : vector<1x16xf32> to vector<8x16xf32>
    %91 = arith.addf %88, %90 : vector<8x16xf32>
    %92 = arith.negf %91 : vector<8x16xf32>
    %93 = math.exp %92 : vector<8x16xf32>
    %cst_52 = arith.constant 1.000000e+00 : f32
    %94 = vector.broadcast %cst_52 : f32 to vector<8x16xf32>
    %95 = arith.addf %94, %93 : vector<8x16xf32>
    %96 = arith.divf %94, %95 : vector<8x16xf32>
    %97 = vector.extract_strided_slice %96 {offsets = [0, 0], sizes = [8, 8], strides = [1, 1]} : vector<8x16xf32> to vector<8x8xf32>
    %98 = vector.extract_strided_slice %96 {offsets = [0, 8], sizes = [8, 8], strides = [1, 1]} : vector<8x16xf32> to vector<8x8xf32>
    %c0_53 = arith.constant 0 : index
    %c0_54 = arith.constant 0 : index
    %99 = vector.load %arg31[%c0_53, %c0_54] : memref<1x16xf32, #tpu.memory_space<vmem>>, vector<1x16xf32>
    %c0_55 = arith.constant 0 : index
    %c0_56 = arith.constant 0 : index
    %c0_57 = arith.constant 0 : index
    %100 = vector.load %arg34[%c0_55, %c0_56, %c0_57] : memref<8x8x8xf32, #tpu.memory_space<vmem>>, vector<1x8x8xf32>
    %101 = vector.shape_cast %100 : vector<1x8x8xf32> to vector<8x8xf32>
    %cst_58 = arith.constant 5.000000e-01 : f32
    %102 = vector.broadcast %cst_58 : f32 to vector<8x8xf32>
    %103 = arith.mulf %102, %98 : vector<8x8xf32>
    %104 = math.exp %103 : vector<8x8xf32>
    %105 = arith.mulf %101, %104 : vector<8x8xf32>
    %106 = arith.addf %97, %105 : vector<8x8xf32>
    %cst_59 = arith.constant 0.000000e+00 : f32
    %107 = vector.broadcast %cst_59 : f32 to vector<8x8xf32>
    %108 = vector.extract_strided_slice %106 {offsets = [0, 0], sizes = [8, 1], strides = [1, 1]} : vector<8x8xf32> to vector<8x1xf32>
    %109 = vector.broadcast %108 : vector<8x1xf32> to vector<8x8xf32>
    %110 = arith.mulf %109, %5 : vector<8x8xf32>
    %cst_60 = arith.constant dense<0.000000e+00> : vector<8xf32>
    %111 = vector.multi_reduction <add>, %110, %cst_60 [0] : vector<8x8xf32> to vector<8xf32>
    %112 = vector.shape_cast %111 : vector<8xf32> to vector<1x8xf32>
    %113 = vector.extract_strided_slice %5 {offsets = [0, 0], sizes = [8, 1], strides = [1, 1]} : vector<8x8xf32> to vector<8x1xf32>
    %114 = vector.broadcast %113 : vector<8x1xf32> to vector<8x8xf32>
    %115 = vector.broadcast %112 : vector<1x8xf32> to vector<8x8xf32>
    %116 = arith.mulf %114, %115 : vector<8x8xf32>
    %117 = arith.addf %107, %116 : vector<8x8xf32>
    %118 = vector.extract_strided_slice %106 {offsets = [0, 1], sizes = [8, 1], strides = [1, 1]} : vector<8x8xf32> to vector<8x1xf32>
    %119 = vector.broadcast %118 : vector<8x1xf32> to vector<8x8xf32>
    %120 = arith.mulf %119, %5 : vector<8x8xf32>
    %cst_61 = arith.constant dense<0.000000e+00> : vector<8xf32>
    %121 = vector.multi_reduction <add>, %120, %cst_61 [0] : vector<8x8xf32> to vector<8xf32>
    %122 = vector.shape_cast %121 : vector<8xf32> to vector<1x8xf32>
    %123 = vector.extract_strided_slice %5 {offsets = [0, 1], sizes = [8, 1], strides = [1, 1]} : vector<8x8xf32> to vector<8x1xf32>
    %124 = vector.broadcast %123 : vector<8x1xf32> to vector<8x8xf32>
    %125 = vector.broadcast %122 : vector<1x8xf32> to vector<8x8xf32>
    %126 = arith.mulf %124, %125 : vector<8x8xf32>
    %127 = arith.addf %117, %126 : vector<8x8xf32>
    %128 = vector.extract_strided_slice %106 {offsets = [0, 2], sizes = [8, 1], strides = [1, 1]} : vector<8x8xf32> to vector<8x1xf32>
    %129 = vector.broadcast %128 : vector<8x1xf32> to vector<8x8xf32>
    %130 = arith.mulf %129, %5 : vector<8x8xf32>
    %cst_62 = arith.constant dense<0.000000e+00> : vector<8xf32>
    %131 = vector.multi_reduction <add>, %130, %cst_62 [0] : vector<8x8xf32> to vector<8xf32>
    %132 = vector.shape_cast %131 : vector<8xf32> to vector<1x8xf32>
    %133 = vector.extract_strided_slice %5 {offsets = [0, 2], sizes = [8, 1], strides = [1, 1]} : vector<8x8xf32> to vector<8x1xf32>
    %134 = vector.broadcast %133 : vector<8x1xf32> to vector<8x8xf32>
    %135 = vector.broadcast %132 : vector<1x8xf32> to vector<8x8xf32>
    %136 = arith.mulf %134, %135 : vector<8x8xf32>
    %137 = arith.addf %127, %136 : vector<8x8xf32>
    %138 = vector.extract_strided_slice %106 {offsets = [0, 3], sizes = [8, 1], strides = [1, 1]} : vector<8x8xf32> to vector<8x1xf32>
    %139 = vector.broadcast %138 : vector<8x1xf32> to vector<8x8xf32>
    %140 = arith.mulf %139, %5 : vector<8x8xf32>
    %cst_63 = arith.constant dense<0.000000e+00> : vector<8xf32>
    %141 = vector.multi_reduction <add>, %140, %cst_63 [0] : vector<8x8xf32> to vector<8xf32>
    %142 = vector.shape_cast %141 : vector<8xf32> to vector<1x8xf32>
    %143 = vector.extract_strided_slice %5 {offsets = [0, 3], sizes = [8, 1], strides = [1, 1]} : vector<8x8xf32> to vector<8x1xf32>
    %144 = vector.broadcast %143 : vector<8x1xf32> to vector<8x8xf32>
    %145 = vector.broadcast %142 : vector<1x8xf32> to vector<8x8xf32>
    %146 = arith.mulf %144, %145 : vector<8x8xf32>
    %147 = arith.addf %137, %146 : vector<8x8xf32>
    %148 = vector.extract_strided_slice %106 {offsets = [0, 4], sizes = [8, 1], strides = [1, 1]} : vector<8x8xf32> to vector<8x1xf32>
    %149 = vector.broadcast %148 : vector<8x1xf32> to vector<8x8xf32>
    %150 = arith.mulf %149, %5 : vector<8x8xf32>
    %cst_64 = arith.constant dense<0.000000e+00> : vector<8xf32>
    %151 = vector.multi_reduction <add>, %150, %cst_64 [0] : vector<8x8xf32> to vector<8xf32>
    %152 = vector.shape_cast %151 : vector<8xf32> to vector<1x8xf32>
    %153 = vector.extract_strided_slice %5 {offsets = [0, 4], sizes = [8, 1], strides = [1, 1]} : vector<8x8xf32> to vector<8x1xf32>
    %154 = vector.broadcast %153 : vector<8x1xf32> to vector<8x8xf32>
    %155 = vector.broadcast %152 : vector<1x8xf32> to vector<8x8xf32>
    %156 = arith.mulf %154, %155 : vector<8x8xf32>
    %157 = arith.addf %147, %156 : vector<8x8xf32>
    %158 = vector.extract_strided_slice %106 {offsets = [0, 5], sizes = [8, 1], strides = [1, 1]} : vector<8x8xf32> to vector<8x1xf32>
    %159 = vector.broadcast %158 : vector<8x1xf32> to vector<8x8xf32>
    %160 = arith.mulf %159, %5 : vector<8x8xf32>
    %cst_65 = arith.constant dense<0.000000e+00> : vector<8xf32>
    %161 = vector.multi_reduction <add>, %160, %cst_65 [0] : vector<8x8xf32> to vector<8xf32>
    %162 = vector.shape_cast %161 : vector<8xf32> to vector<1x8xf32>
    %163 = vector.extract_strided_slice %5 {offsets = [0, 5], sizes = [8, 1], strides = [1, 1]} : vector<8x8xf32> to vector<8x1xf32>
    %164 = vector.broadcast %163 : vector<8x1xf32> to vector<8x8xf32>
    %165 = vector.broadcast %162 : vector<1x8xf32> to vector<8x8xf32>
    %166 = arith.mulf %164, %165 : vector<8x8xf32>
    %167 = arith.addf %157, %166 : vector<8x8xf32>
    %168 = vector.extract_strided_slice %106 {offsets = [0, 6], sizes = [8, 1], strides = [1, 1]} : vector<8x8xf32> to vector<8x1xf32>
    %169 = vector.broadcast %168 : vector<8x1xf32> to vector<8x8xf32>
    %170 = arith.mulf %169, %5 : vector<8x8xf32>
    %cst_66 = arith.constant dense<0.000000e+00> : vector<8xf32>
    %171 = vector.multi_reduction <add>, %170, %cst_66 [0] : vector<8x8xf32> to vector<8xf32>
    %172 = vector.shape_cast %171 : vector<8xf32> to vector<1x8xf32>
    %173 = vector.extract_strided_slice %5 {offsets = [0, 6], sizes = [8, 1], strides = [1, 1]} : vector<8x8xf32> to vector<8x1xf32>
    %174 = vector.broadcast %173 : vector<8x1xf32> to vector<8x8xf32>
    %175 = vector.broadcast %172 : vector<1x8xf32> to vector<8x8xf32>
    %176 = arith.mulf %174, %175 : vector<8x8xf32>
    %177 = arith.addf %167, %176 : vector<8x8xf32>
    %178 = vector.extract_strided_slice %106 {offsets = [0, 7], sizes = [8, 1], strides = [1, 1]} : vector<8x8xf32> to vector<8x1xf32>
    %179 = vector.broadcast %178 : vector<8x1xf32> to vector<8x8xf32>
    %180 = arith.mulf %179, %5 : vector<8x8xf32>
    %cst_67 = arith.constant dense<0.000000e+00> : vector<8xf32>
    %181 = vector.multi_reduction <add>, %180, %cst_67 [0] : vector<8x8xf32> to vector<8xf32>
    %182 = vector.shape_cast %181 : vector<8xf32> to vector<1x8xf32>
    %183 = vector.extract_strided_slice %5 {offsets = [0, 7], sizes = [8, 1], strides = [1, 1]} : vector<8x8xf32> to vector<8x1xf32>
    %184 = vector.broadcast %183 : vector<8x1xf32> to vector<8x8xf32>
    %185 = vector.broadcast %182 : vector<1x8xf32> to vector<8x8xf32>
    %186 = arith.mulf %184, %185 : vector<8x8xf32>
    %187 = arith.addf %177, %186 : vector<8x8xf32>
    %cst_68 = arith.constant dense<0.000000e+00> : vector<8x16xf32>
    %188 = tpu.matmul %106, %23, %cst_68 {dimension_numbers = #tpu.dot_dimension_numbers<[1], [0], [0], [1], [0, 0, 1, 1], [], []>} : vector<8x8xf32>, vector<8x16xf32>, vector<8x16xf32> -> vector<8x16xf32>
    %189 = arith.addf %188, %29 : vector<8x16xf32>
    %cst_69 = arith.constant dense<0.000000e+00> : vector<16x8xf32>
    %190 = tpu.matmul %35, %187, %cst_69 {dimension_numbers = #tpu.dot_dimension_numbers<[1], [0], [0], [1], [0, 0, 1, 1], [], []>} : vector<16x8xf32>, vector<8x8xf32>, vector<16x8xf32> -> vector<16x8xf32>
    %191 = arith.addf %190, %41 : vector<16x8xf32>
    %c0_i32 = arith.constant 0 : i32
    %192 = vector.broadcast %c0_i32 : i32 to vector<8x16xi32>
    %193 = arith.cmpi eq, %42, %192 : vector<8x16xi32>
    %194 = arith.select %193, %29, %189 : vector<8x16xi1>, vector<8x16xf32>
    %c0_i32_70 = arith.constant 0 : i32
    %195 = vector.broadcast %c0_i32_70 : i32 to vector<16x8xi32>
    %196 = arith.cmpi eq, %43, %195 : vector<16x8xi32>
    %197 = arith.select %196, %41, %191 : vector<16x8xi1>, vector<16x8xf32>
    %cst_71 = arith.constant dense<0.000000e+00> : vector<16x16xf32>
    %198 = tpu.matmul %197, %194, %cst_71 {dimension_numbers = #tpu.dot_dimension_numbers<[1], [0], [0], [1], [0, 0, 1, 1], [], []>} : vector<16x8xf32>, vector<8x16xf32>, vector<16x16xf32> -> vector<16x16xf32>
    %199 = vector.extract_strided_slice %106 {offsets = [0, 0], sizes = [1, 8], strides = [1, 1]} : vector<8x8xf32> to vector<1x8xf32>
    %cst_72 = arith.constant dense<0.000000e+00> : vector<1x16xf32>
    %200 = tpu.matmul %199, %194, %cst_72 {dimension_numbers = #tpu.dot_dimension_numbers<[1], [0], [0], [1], [0, 0, 1, 1], [], []>} : vector<1x8xf32>, vector<8x16xf32>, vector<1x16xf32> -> vector<1x16xf32>
    %cst_73 = arith.constant 2.500000e-05 : f32
    %201 = vector.broadcast %cst_73 : f32 to vector<1x16xf32>
    %202 = arith.mulf %201, %200 : vector<1x16xf32>
    %cst_74 = arith.constant 2.500000e-05 : f32
    %203 = vector.broadcast %cst_74 : f32 to vector<16x16xf32>
    %204 = arith.mulf %203, %198 : vector<16x16xf32>
    %205 = arith.subf %11, %204 : vector<16x16xf32>
    %206 = vector.broadcast %202 : vector<1x16xf32> to vector<16x16xf32>
    %207 = arith.mulf %17, %206 : vector<16x16xf32>
    %208 = arith.addf %205, %207 : vector<16x16xf32>
    %cst_75 = arith.constant dense<0.000000e+00> : vector<16x16xf32>
    %209 = tpu.matmul %208, %208, %cst_75 {dimension_numbers = #tpu.dot_dimension_numbers<[1], [0], [0], [1], [0, 0, 1, 1], [], []>} : vector<16x16xf32>, vector<16x16xf32>, vector<16x16xf32> -> vector<16x16xf32>
    %cst_76 = arith.constant dense<0.000000e+00> : vector<16x16xf32>
    %210 = tpu.matmul %209, %209, %cst_76 {dimension_numbers = #tpu.dot_dimension_numbers<[1], [0], [0], [1], [0, 0, 1, 1], [], []>} : vector<16x16xf32>, vector<16x16xf32>, vector<16x16xf32> -> vector<16x16xf32>
    %cst_77 = arith.constant dense<0.000000e+00> : vector<16x16xf32>
    %211 = tpu.matmul %210, %210, %cst_77 {dimension_numbers = #tpu.dot_dimension_numbers<[1], [0], [0], [1], [0, 0, 1, 1], [], []>} : vector<16x16xf32>, vector<16x16xf32>, vector<16x16xf32> -> vector<16x16xf32>
    %cst_78 = arith.constant dense<0.000000e+00> : vector<16x16xf32>
    %212 = tpu.matmul %211, %211, %cst_78 {dimension_numbers = #tpu.dot_dimension_numbers<[1], [0], [0], [1], [0, 0, 1, 1], [], []>} : vector<16x16xf32>, vector<16x16xf32>, vector<16x16xf32> -> vector<16x16xf32>
    %cst_79 = arith.constant dense<0.000000e+00> : vector<16x16xf32>
    %213 = tpu.matmul %212, %212, %cst_79 {dimension_numbers = #tpu.dot_dimension_numbers<[1], [0], [0], [1], [0, 0, 1, 1], [], []>} : vector<16x16xf32>, vector<16x16xf32>, vector<16x16xf32> -> vector<16x16xf32>
    %cst_80 = arith.constant dense<0.000000e+00> : vector<16x16xf32>
    %214 = tpu.matmul %211, %213, %cst_80 {dimension_numbers = #tpu.dot_dimension_numbers<[1], [0], [0], [1], [0, 0, 1, 1], [], []>} : vector<16x16xf32>, vector<16x16xf32>, vector<16x16xf32> -> vector<16x16xf32>
    %cst_81 = arith.constant dense<0.000000e+00> : vector<16x16xf32>
    %215 = tpu.matmul %213, %213, %cst_81 {dimension_numbers = #tpu.dot_dimension_numbers<[1], [0], [0], [1], [0, 0, 1, 1], [], []>} : vector<16x16xf32>, vector<16x16xf32>, vector<16x16xf32> -> vector<16x16xf32>
    %cst_82 = arith.constant dense<0.000000e+00> : vector<16x16xf32>
    %216 = tpu.matmul %214, %215, %cst_82 {dimension_numbers = #tpu.dot_dimension_numbers<[1], [0], [0], [1], [0, 0, 1, 1], [], []>} : vector<16x16xf32>, vector<16x16xf32>, vector<16x16xf32> -> vector<16x16xf32>
    %cst_83 = arith.constant dense<0.000000e+00> : vector<16x16xf32>
    %217 = tpu.matmul %215, %215, %cst_83 {dimension_numbers = #tpu.dot_dimension_numbers<[1], [0], [0], [1], [0, 0, 1, 1], [], []>} : vector<16x16xf32>, vector<16x16xf32>, vector<16x16xf32> -> vector<16x16xf32>
    %cst_84 = arith.constant dense<0.000000e+00> : vector<16x16xf32>
    %218 = tpu.matmul %216, %217, %cst_84 {dimension_numbers = #tpu.dot_dimension_numbers<[1], [0], [0], [1], [0, 0, 1, 1], [], []>} : vector<16x16xf32>, vector<16x16xf32>, vector<16x16xf32> -> vector<16x16xf32>
    %cst_85 = arith.constant dense<0.000000e+00> : vector<16x16xf32>
    %219 = tpu.matmul %217, %217, %cst_85 {dimension_numbers = #tpu.dot_dimension_numbers<[1], [0], [0], [1], [0, 0, 1, 1], [], []>} : vector<16x16xf32>, vector<16x16xf32>, vector<16x16xf32> -> vector<16x16xf32>
    %cst_86 = arith.constant dense<0.000000e+00> : vector<16x16xf32>
    %220 = tpu.matmul %218, %219, %cst_86 {dimension_numbers = #tpu.dot_dimension_numbers<[1], [0], [0], [1], [0, 0, 1, 1], [], []>} : vector<16x16xf32>, vector<16x16xf32>, vector<16x16xf32> -> vector<16x16xf32>
    %cst_87 = arith.constant dense<0.000000e+00> : vector<16x16xf32>
    %221 = tpu.matmul %219, %219, %cst_87 {dimension_numbers = #tpu.dot_dimension_numbers<[1], [0], [0], [1], [0, 0, 1, 1], [], []>} : vector<16x16xf32>, vector<16x16xf32>, vector<16x16xf32> -> vector<16x16xf32>
    %cst_88 = arith.constant dense<0.000000e+00> : vector<16x16xf32>
    %222 = tpu.matmul %220, %221, %cst_88 {dimension_numbers = #tpu.dot_dimension_numbers<[1], [0], [0], [1], [0, 0, 1, 1], [], []>} : vector<16x16xf32>, vector<16x16xf32>, vector<16x16xf32> -> vector<16x16xf32>
    %cst_89 = arith.constant dense<0.000000e+00> : vector<1x16xf32>
    %223 = tpu.matmul %99, %222, %cst_89 {dimension_numbers = #tpu.dot_dimension_numbers<[1], [0], [0], [1], [0, 0, 1, 1], [], []>} : vector<1x16xf32>, vector<16x16xf32>, vector<1x16xf32> -> vector<1x16xf32>
    %c1_i32 = arith.constant 1 : i32
    %224 = vector.broadcast %c1_i32 : i32 to vector<8x16xi32>
    %225 = arith.cmpi eq, %42, %224 : vector<8x16xi32>
    %226 = arith.select %225, %29, %189 : vector<8x16xi1>, vector<8x16xf32>
    %c1_i32_90 = arith.constant 1 : i32
    %227 = vector.broadcast %c1_i32_90 : i32 to vector<16x8xi32>
    %228 = arith.cmpi eq, %43, %227 : vector<16x8xi32>
    %229 = arith.select %228, %41, %191 : vector<16x8xi1>, vector<16x8xf32>
    %cst_91 = arith.constant dense<0.000000e+00> : vector<16x16xf32>
    %230 = tpu.matmul %229, %226, %cst_91 {dimension_numbers = #tpu.dot_dimension_numbers<[1], [0], [0], [1], [0, 0, 1, 1], [], []>} : vector<16x8xf32>, vector<8x16xf32>, vector<16x16xf32> -> vector<16x16xf32>
    %231 = vector.extract_strided_slice %106 {offsets = [1, 0], sizes = [1, 8], strides = [1, 1]} : vector<8x8xf32> to vector<1x8xf32>
    %cst_92 = arith.constant dense<0.000000e+00> : vector<1x16xf32>
    %232 = tpu.matmul %231, %226, %cst_92 {dimension_numbers = #tpu.dot_dimension_numbers<[1], [0], [0], [1], [0, 0, 1, 1], [], []>} : vector<1x8xf32>, vector<8x16xf32>, vector<1x16xf32> -> vector<1x16xf32>
    %cst_93 = arith.constant 2.500000e-05 : f32
    %233 = vector.broadcast %cst_93 : f32 to vector<1x16xf32>
    %234 = arith.mulf %233, %232 : vector<1x16xf32>
    %cst_94 = arith.constant 2.500000e-05 : f32
    %235 = vector.broadcast %cst_94 : f32 to vector<16x16xf32>
    %236 = arith.mulf %235, %230 : vector<16x16xf32>
    %237 = arith.subf %11, %236 : vector<16x16xf32>
    %238 = vector.broadcast %234 : vector<1x16xf32> to vector<16x16xf32>
    %239 = arith.mulf %17, %238 : vector<16x16xf32>
    %240 = arith.addf %237, %239 : vector<16x16xf32>
    %cst_95 = arith.constant dense<0.000000e+00> : vector<16x16xf32>
    %241 = tpu.matmul %240, %240, %cst_95 {dimension_numbers = #tpu.dot_dimension_numbers<[1], [0], [0], [1], [0, 0, 1, 1], [], []>} : vector<16x16xf32>, vector<16x16xf32>, vector<16x16xf32> -> vector<16x16xf32>
    %cst_96 = arith.constant dense<0.000000e+00> : vector<16x16xf32>
    %242 = tpu.matmul %241, %241, %cst_96 {dimension_numbers = #tpu.dot_dimension_numbers<[1], [0], [0], [1], [0, 0, 1, 1], [], []>} : vector<16x16xf32>, vector<16x16xf32>, vector<16x16xf32> -> vector<16x16xf32>
    %cst_97 = arith.constant dense<0.000000e+00> : vector<16x16xf32>
    %243 = tpu.matmul %242, %242, %cst_97 {dimension_numbers = #tpu.dot_dimension_numbers<[1], [0], [0], [1], [0, 0, 1, 1], [], []>} : vector<16x16xf32>, vector<16x16xf32>, vector<16x16xf32> -> vector<16x16xf32>
    %cst_98 = arith.constant dense<0.000000e+00> : vector<16x16xf32>
    %244 = tpu.matmul %243, %243, %cst_98 {dimension_numbers = #tpu.dot_dimension_numbers<[1], [0], [0], [1], [0, 0, 1, 1], [], []>} : vector<16x16xf32>, vector<16x16xf32>, vector<16x16xf32> -> vector<16x16xf32>
    %cst_99 = arith.constant dense<0.000000e+00> : vector<16x16xf32>
    %245 = tpu.matmul %244, %244, %cst_99 {dimension_numbers = #tpu.dot_dimension_numbers<[1], [0], [0], [1], [0, 0, 1, 1], [], []>} : vector<16x16xf32>, vector<16x16xf32>, vector<16x16xf32> -> vector<16x16xf32>
    %cst_100 = arith.constant dense<0.000000e+00> : vector<16x16xf32>
    %246 = tpu.matmul %243, %245, %cst_100 {dimension_numbers = #tpu.dot_dimension_numbers<[1], [0], [0], [1], [0, 0, 1, 1], [], []>} : vector<16x16xf32>, vector<16x16xf32>, vector<16x16xf32> -> vector<16x16xf32>
    %cst_101 = arith.constant dense<0.000000e+00> : vector<16x16xf32>
    %247 = tpu.matmul %245, %245, %cst_101 {dimension_numbers = #tpu.dot_dimension_numbers<[1], [0], [0], [1], [0, 0, 1, 1], [], []>} : vector<16x16xf32>, vector<16x16xf32>, vector<16x16xf32> -> vector<16x16xf32>
    %cst_102 = arith.constant dense<0.000000e+00> : vector<16x16xf32>
    %248 = tpu.matmul %246, %247, %cst_102 {dimension_numbers = #tpu.dot_dimension_numbers<[1], [0], [0], [1], [0, 0, 1, 1], [], []>} : vector<16x16xf32>, vector<16x16xf32>, vector<16x16xf32> -> vector<16x16xf32>
    %cst_103 = arith.constant dense<0.000000e+00> : vector<16x16xf32>
    %249 = tpu.matmul %247, %247, %cst_103 {dimension_numbers = #tpu.dot_dimension_numbers<[1], [0], [0], [1], [0, 0, 1, 1], [], []>} : vector<16x16xf32>, vector<16x16xf32>, vector<16x16xf32> -> vector<16x16xf32>
    %cst_104 = arith.constant dense<0.000000e+00> : vector<16x16xf32>
    %250 = tpu.matmul %248, %249, %cst_104 {dimension_numbers = #tpu.dot_dimension_numbers<[1], [0], [0], [1], [0, 0, 1, 1], [], []>} : vector<16x16xf32>, vector<16x16xf32>, vector<16x16xf32> -> vector<16x16xf32>
    %cst_105 = arith.constant dense<0.000000e+00> : vector<16x16xf32>
    %251 = tpu.matmul %249, %249, %cst_105 {dimension_numbers = #tpu.dot_dimension_numbers<[1], [0], [0], [1], [0, 0, 1, 1], [], []>} : vector<16x16xf32>, vector<16x16xf32>, vector<16x16xf32> -> vector<16x16xf32>
    %cst_106 = arith.constant dense<0.000000e+00> : vector<16x16xf32>
    %252 = tpu.matmul %250, %251, %cst_106 {dimension_numbers = #tpu.dot_dimension_numbers<[1], [0], [0], [1], [0, 0, 1, 1], [], []>} : vector<16x16xf32>, vector<16x16xf32>, vector<16x16xf32> -> vector<16x16xf32>
    %cst_107 = arith.constant dense<0.000000e+00> : vector<16x16xf32>
    %253 = tpu.matmul %251, %251, %cst_107 {dimension_numbers = #tpu.dot_dimension_numbers<[1], [0], [0], [1], [0, 0, 1, 1], [], []>} : vector<16x16xf32>, vector<16x16xf32>, vector<16x16xf32> -> vector<16x16xf32>
    %cst_108 = arith.constant dense<0.000000e+00> : vector<16x16xf32>
    %254 = tpu.matmul %252, %253, %cst_108 {dimension_numbers = #tpu.dot_dimension_numbers<[1], [0], [0], [1], [0, 0, 1, 1], [], []>} : vector<16x16xf32>, vector<16x16xf32>, vector<16x16xf32> -> vector<16x16xf32>
    %cst_109 = arith.constant dense<0.000000e+00> : vector<1x16xf32>
    %255 = tpu.matmul %223, %254, %cst_109 {dimension_numbers = #tpu.dot_dimension_numbers<[1], [0], [0], [1], [0, 0, 1, 1], [], []>} : vector<1x16xf32>, vector<16x16xf32>, vector<1x16xf32> -> vector<1x16xf32>
    %c2_i32 = arith.constant 2 : i32
    %256 = vector.broadcast %c2_i32 : i32 to vector<8x16xi32>
    %257 = arith.cmpi eq, %42, %256 : vector<8x16xi32>
    %258 = arith.select %257, %29, %189 : vector<8x16xi1>, vector<8x16xf32>
    %c2_i32_110 = arith.constant 2 : i32
    %259 = vector.broadcast %c2_i32_110 : i32 to vector<16x8xi32>
    %260 = arith.cmpi eq, %43, %259 : vector<16x8xi32>
    %261 = arith.select %260, %41, %191 : vector<16x8xi1>, vector<16x8xf32>
    %cst_111 = arith.constant dense<0.000000e+00> : vector<16x16xf32>
    %262 = tpu.matmul %261, %258, %cst_111 {dimension_numbers = #tpu.dot_dimension_numbers<[1], [0], [0], [1], [0, 0, 1, 1], [], []>} : vector<16x8xf32>, vector<8x16xf32>, vector<16x16xf32> -> vector<16x16xf32>
    %263 = vector.extract_strided_slice %106 {offsets = [2, 0], sizes = [1, 8], strides = [1, 1]} : vector<8x8xf32> to vector<1x8xf32>
    %cst_112 = arith.constant dense<0.000000e+00> : vector<1x16xf32>
    %264 = tpu.matmul %263, %258, %cst_112 {dimension_numbers = #tpu.dot_dimension_numbers<[1], [0], [0], [1], [0, 0, 1, 1], [], []>} : vector<1x8xf32>, vector<8x16xf32>, vector<1x16xf32> -> vector<1x16xf32>
    %cst_113 = arith.constant 2.500000e-05 : f32
    %265 = vector.broadcast %cst_113 : f32 to vector<1x16xf32>
    %266 = arith.mulf %265, %264 : vector<1x16xf32>
    %cst_114 = arith.constant 2.500000e-05 : f32
    %267 = vector.broadcast %cst_114 : f32 to vector<16x16xf32>
    %268 = arith.mulf %267, %262 : vector<16x16xf32>
    %269 = arith.subf %11, %268 : vector<16x16xf32>
    %270 = vector.broadcast %266 : vector<1x16xf32> to vector<16x16xf32>
    %271 = arith.mulf %17, %270 : vector<16x16xf32>
    %272 = arith.addf %269, %271 : vector<16x16xf32>
    %cst_115 = arith.constant dense<0.000000e+00> : vector<16x16xf32>
    %273 = tpu.matmul %272, %272, %cst_115 {dimension_numbers = #tpu.dot_dimension_numbers<[1], [0], [0], [1], [0, 0, 1, 1], [], []>} : vector<16x16xf32>, vector<16x16xf32>, vector<16x16xf32> -> vector<16x16xf32>
    %cst_116 = arith.constant dense<0.000000e+00> : vector<16x16xf32>
    %274 = tpu.matmul %273, %273, %cst_116 {dimension_numbers = #tpu.dot_dimension_numbers<[1], [0], [0], [1], [0, 0, 1, 1], [], []>} : vector<16x16xf32>, vector<16x16xf32>, vector<16x16xf32> -> vector<16x16xf32>
    %cst_117 = arith.constant dense<0.000000e+00> : vector<16x16xf32>
    %275 = tpu.matmul %274, %274, %cst_117 {dimension_numbers = #tpu.dot_dimension_numbers<[1], [0], [0], [1], [0, 0, 1, 1], [], []>} : vector<16x16xf32>, vector<16x16xf32>, vector<16x16xf32> -> vector<16x16xf32>
    %cst_118 = arith.constant dense<0.000000e+00> : vector<16x16xf32>
    %276 = tpu.matmul %275, %275, %cst_118 {dimension_numbers = #tpu.dot_dimension_numbers<[1], [0], [0], [1], [0, 0, 1, 1], [], []>} : vector<16x16xf32>, vector<16x16xf32>, vector<16x16xf32> -> vector<16x16xf32>
    %cst_119 = arith.constant dense<0.000000e+00> : vector<16x16xf32>
    %277 = tpu.matmul %276, %276, %cst_119 {dimension_numbers = #tpu.dot_dimension_numbers<[1], [0], [0], [1], [0, 0, 1, 1], [], []>} : vector<16x16xf32>, vector<16x16xf32>, vector<16x16xf32> -> vector<16x16xf32>
    %cst_120 = arith.constant dense<0.000000e+00> : vector<16x16xf32>
    %278 = tpu.matmul %275, %277, %cst_120 {dimension_numbers = #tpu.dot_dimension_numbers<[1], [0], [0], [1], [0, 0, 1, 1], [], []>} : vector<16x16xf32>, vector<16x16xf32>, vector<16x16xf32> -> vector<16x16xf32>
    %cst_121 = arith.constant dense<0.000000e+00> : vector<16x16xf32>
    %279 = tpu.matmul %277, %277, %cst_121 {dimension_numbers = #tpu.dot_dimension_numbers<[1], [0], [0], [1], [0, 0, 1, 1], [], []>} : vector<16x16xf32>, vector<16x16xf32>, vector<16x16xf32> -> vector<16x16xf32>
    %cst_122 = arith.constant dense<0.000000e+00> : vector<16x16xf32>
    %280 = tpu.matmul %278, %279, %cst_122 {dimension_numbers = #tpu.dot_dimension_numbers<[1], [0], [0], [1], [0, 0, 1, 1], [], []>} : vector<16x16xf32>, vector<16x16xf32>, vector<16x16xf32> -> vector<16x16xf32>
    %cst_123 = arith.constant dense<0.000000e+00> : vector<16x16xf32>
    %281 = tpu.matmul %279, %279, %cst_123 {dimension_numbers = #tpu.dot_dimension_numbers<[1], [0], [0], [1], [0, 0, 1, 1], [], []>} : vector<16x16xf32>, vector<16x16xf32>, vector<16x16xf32> -> vector<16x16xf32>
    %cst_124 = arith.constant dense<0.000000e+00> : vector<16x16xf32>
    %282 = tpu.matmul %280, %281, %cst_124 {dimension_numbers = #tpu.dot_dimension_numbers<[1], [0], [0], [1], [0, 0, 1, 1], [], []>} : vector<16x16xf32>, vector<16x16xf32>, vector<16x16xf32> -> vector<16x16xf32>
    %cst_125 = arith.constant dense<0.000000e+00> : vector<16x16xf32>
    %283 = tpu.matmul %281, %281, %cst_125 {dimension_numbers = #tpu.dot_dimension_numbers<[1], [0], [0], [1], [0, 0, 1, 1], [], []>} : vector<16x16xf32>, vector<16x16xf32>, vector<16x16xf32> -> vector<16x16xf32>
    %cst_126 = arith.constant dense<0.000000e+00> : vector<16x16xf32>
    %284 = tpu.matmul %282, %283, %cst_126 {dimension_numbers = #tpu.dot_dimension_numbers<[1], [0], [0], [1], [0, 0, 1, 1], [], []>} : vector<16x16xf32>, vector<16x16xf32>, vector<16x16xf32> -> vector<16x16xf32>
    %cst_127 = arith.constant dense<0.000000e+00> : vector<16x16xf32>
    %285 = tpu.matmul %283, %283, %cst_127 {dimension_numbers = #tpu.dot_dimension_numbers<[1], [0], [0], [1], [0, 0, 1, 1], [], []>} : vector<16x16xf32>, vector<16x16xf32>, vector<16x16xf32> -> vector<16x16xf32>
    %cst_128 = arith.constant dense<0.000000e+00> : vector<16x16xf32>
    %286 = tpu.matmul %284, %285, %cst_128 {dimension_numbers = #tpu.dot_dimension_numbers<[1], [0], [0], [1], [0, 0, 1, 1], [], []>} : vector<16x16xf32>, vector<16x16xf32>, vector<16x16xf32> -> vector<16x16xf32>
    %cst_129 = arith.constant dense<0.000000e+00> : vector<1x16xf32>
    %287 = tpu.matmul %255, %286, %cst_129 {dimension_numbers = #tpu.dot_dimension_numbers<[1], [0], [0], [1], [0, 0, 1, 1], [], []>} : vector<1x16xf32>, vector<16x16xf32>, vector<1x16xf32> -> vector<1x16xf32>
    %c3_i32 = arith.constant 3 : i32
    %288 = vector.broadcast %c3_i32 : i32 to vector<8x16xi32>
    %289 = arith.cmpi eq, %42, %288 : vector<8x16xi32>
    %290 = arith.select %289, %29, %189 : vector<8x16xi1>, vector<8x16xf32>
    %c3_i32_130 = arith.constant 3 : i32
    %291 = vector.broadcast %c3_i32_130 : i32 to vector<16x8xi32>
    %292 = arith.cmpi eq, %43, %291 : vector<16x8xi32>
    %293 = arith.select %292, %41, %191 : vector<16x8xi1>, vector<16x8xf32>
    %cst_131 = arith.constant dense<0.000000e+00> : vector<16x16xf32>
    %294 = tpu.matmul %293, %290, %cst_131 {dimension_numbers = #tpu.dot_dimension_numbers<[1], [0], [0], [1], [0, 0, 1, 1], [], []>} : vector<16x8xf32>, vector<8x16xf32>, vector<16x16xf32> -> vector<16x16xf32>
    %295 = vector.extract_strided_slice %106 {offsets = [3, 0], sizes = [1, 8], strides = [1, 1]} : vector<8x8xf32> to vector<1x8xf32>
    %cst_132 = arith.constant dense<0.000000e+00> : vector<1x16xf32>
    %296 = tpu.matmul %295, %290, %cst_132 {dimension_numbers = #tpu.dot_dimension_numbers<[1], [0], [0], [1], [0, 0, 1, 1], [], []>} : vector<1x8xf32>, vector<8x16xf32>, vector<1x16xf32> -> vector<1x16xf32>
    %cst_133 = arith.constant 2.500000e-05 : f32
    %297 = vector.broadcast %cst_133 : f32 to vector<1x16xf32>
    %298 = arith.mulf %297, %296 : vector<1x16xf32>
    %cst_134 = arith.constant 2.500000e-05 : f32
    %299 = vector.broadcast %cst_134 : f32 to vector<16x16xf32>
    %300 = arith.mulf %299, %294 : vector<16x16xf32>
    %301 = arith.subf %11, %300 : vector<16x16xf32>
    %302 = vector.broadcast %298 : vector<1x16xf32> to vector<16x16xf32>
    %303 = arith.mulf %17, %302 : vector<16x16xf32>
    %304 = arith.addf %301, %303 : vector<16x16xf32>
    %cst_135 = arith.constant dense<0.000000e+00> : vector<16x16xf32>
    %305 = tpu.matmul %304, %304, %cst_135 {dimension_numbers = #tpu.dot_dimension_numbers<[1], [0], [0], [1], [0, 0, 1, 1], [], []>} : vector<16x16xf32>, vector<16x16xf32>, vector<16x16xf32> -> vector<16x16xf32>
    %cst_136 = arith.constant dense<0.000000e+00> : vector<16x16xf32>
    %306 = tpu.matmul %305, %305, %cst_136 {dimension_numbers = #tpu.dot_dimension_numbers<[1], [0], [0], [1], [0, 0, 1, 1], [], []>} : vector<16x16xf32>, vector<16x16xf32>, vector<16x16xf32> -> vector<16x16xf32>
    %cst_137 = arith.constant dense<0.000000e+00> : vector<16x16xf32>
    %307 = tpu.matmul %306, %306, %cst_137 {dimension_numbers = #tpu.dot_dimension_numbers<[1], [0], [0], [1], [0, 0, 1, 1], [], []>} : vector<16x16xf32>, vector<16x16xf32>, vector<16x16xf32> -> vector<16x16xf32>
    %cst_138 = arith.constant dense<0.000000e+00> : vector<16x16xf32>
    %308 = tpu.matmul %307, %307, %cst_138 {dimension_numbers = #tpu.dot_dimension_numbers<[1], [0], [0], [1], [0, 0, 1, 1], [], []>} : vector<16x16xf32>, vector<16x16xf32>, vector<16x16xf32> -> vector<16x16xf32>
    %cst_139 = arith.constant dense<0.000000e+00> : vector<16x16xf32>
    %309 = tpu.matmul %308, %308, %cst_139 {dimension_numbers = #tpu.dot_dimension_numbers<[1], [0], [0], [1], [0, 0, 1, 1], [], []>} : vector<16x16xf32>, vector<16x16xf32>, vector<16x16xf32> -> vector<16x16xf32>
    %cst_140 = arith.constant dense<0.000000e+00> : vector<16x16xf32>
    %310 = tpu.matmul %307, %309, %cst_140 {dimension_numbers = #tpu.dot_dimension_numbers<[1], [0], [0], [1], [0, 0, 1, 1], [], []>} : vector<16x16xf32>, vector<16x16xf32>, vector<16x16xf32> -> vector<16x16xf32>
    %cst_141 = arith.constant dense<0.000000e+00> : vector<16x16xf32>
    %311 = tpu.matmul %309, %309, %cst_141 {dimension_numbers = #tpu.dot_dimension_numbers<[1], [0], [0], [1], [0, 0, 1, 1], [], []>} : vector<16x16xf32>, vector<16x16xf32>, vector<16x16xf32> -> vector<16x16xf32>
    %cst_142 = arith.constant dense<0.000000e+00> : vector<16x16xf32>
    %312 = tpu.matmul %310, %311, %cst_142 {dimension_numbers = #tpu.dot_dimension_numbers<[1], [0], [0], [1], [0, 0, 1, 1], [], []>} : vector<16x16xf32>, vector<16x16xf32>, vector<16x16xf32> -> vector<16x16xf32>
    %cst_143 = arith.constant dense<0.000000e+00> : vector<16x16xf32>
    %313 = tpu.matmul %311, %311, %cst_143 {dimension_numbers = #tpu.dot_dimension_numbers<[1], [0], [0], [1], [0, 0, 1, 1], [], []>} : vector<16x16xf32>, vector<16x16xf32>, vector<16x16xf32> -> vector<16x16xf32>
    %cst_144 = arith.constant dense<0.000000e+00> : vector<16x16xf32>
    %314 = tpu.matmul %312, %313, %cst_144 {dimension_numbers = #tpu.dot_dimension_numbers<[1], [0], [0], [1], [0, 0, 1, 1], [], []>} : vector<16x16xf32>, vector<16x16xf32>, vector<16x16xf32> -> vector<16x16xf32>
    %cst_145 = arith.constant dense<0.000000e+00> : vector<16x16xf32>
    %315 = tpu.matmul %313, %313, %cst_145 {dimension_numbers = #tpu.dot_dimension_numbers<[1], [0], [0], [1], [0, 0, 1, 1], [], []>} : vector<16x16xf32>, vector<16x16xf32>, vector<16x16xf32> -> vector<16x16xf32>
    %cst_146 = arith.constant dense<0.000000e+00> : vector<16x16xf32>
    %316 = tpu.matmul %314, %315, %cst_146 {dimension_numbers = #tpu.dot_dimension_numbers<[1], [0], [0], [1], [0, 0, 1, 1], [], []>} : vector<16x16xf32>, vector<16x16xf32>, vector<16x16xf32> -> vector<16x16xf32>
    %cst_147 = arith.constant dense<0.000000e+00> : vector<16x16xf32>
    %317 = tpu.matmul %315, %315, %cst_147 {dimension_numbers = #tpu.dot_dimension_numbers<[1], [0], [0], [1], [0, 0, 1, 1], [], []>} : vector<16x16xf32>, vector<16x16xf32>, vector<16x16xf32> -> vector<16x16xf32>
    %cst_148 = arith.constant dense<0.000000e+00> : vector<16x16xf32>
    %318 = tpu.matmul %316, %317, %cst_148 {dimension_numbers = #tpu.dot_dimension_numbers<[1], [0], [0], [1], [0, 0, 1, 1], [], []>} : vector<16x16xf32>, vector<16x16xf32>, vector<16x16xf32> -> vector<16x16xf32>
    %cst_149 = arith.constant dense<0.000000e+00> : vector<1x16xf32>
    %319 = tpu.matmul %287, %318, %cst_149 {dimension_numbers = #tpu.dot_dimension_numbers<[1], [0], [0], [1], [0, 0, 1, 1], [], []>} : vector<1x16xf32>, vector<16x16xf32>, vector<1x16xf32> -> vector<1x16xf32>
    %c4_i32 = arith.constant 4 : i32
    %320 = vector.broadcast %c4_i32 : i32 to vector<8x16xi32>
    %321 = arith.cmpi eq, %42, %320 : vector<8x16xi32>
    %322 = arith.select %321, %29, %189 : vector<8x16xi1>, vector<8x16xf32>
    %c4_i32_150 = arith.constant 4 : i32
    %323 = vector.broadcast %c4_i32_150 : i32 to vector<16x8xi32>
    %324 = arith.cmpi eq, %43, %323 : vector<16x8xi32>
    %325 = arith.select %324, %41, %191 : vector<16x8xi1>, vector<16x8xf32>
    %cst_151 = arith.constant dense<0.000000e+00> : vector<16x16xf32>
    %326 = tpu.matmul %325, %322, %cst_151 {dimension_numbers = #tpu.dot_dimension_numbers<[1], [0], [0], [1], [0, 0, 1, 1], [], []>} : vector<16x8xf32>, vector<8x16xf32>, vector<16x16xf32> -> vector<16x16xf32>
    %327 = vector.extract_strided_slice %106 {offsets = [4, 0], sizes = [1, 8], strides = [1, 1]} : vector<8x8xf32> to vector<1x8xf32>
    %cst_152 = arith.constant dense<0.000000e+00> : vector<1x16xf32>
    %328 = tpu.matmul %327, %322, %cst_152 {dimension_numbers = #tpu.dot_dimension_numbers<[1], [0], [0], [1], [0, 0, 1, 1], [], []>} : vector<1x8xf32>, vector<8x16xf32>, vector<1x16xf32> -> vector<1x16xf32>
    %cst_153 = arith.constant 2.500000e-05 : f32
    %329 = vector.broadcast %cst_153 : f32 to vector<1x16xf32>
    %330 = arith.mulf %329, %328 : vector<1x16xf32>
    %cst_154 = arith.constant 2.500000e-05 : f32
    %331 = vector.broadcast %cst_154 : f32 to vector<16x16xf32>
    %332 = arith.mulf %331, %326 : vector<16x16xf32>
    %333 = arith.subf %11, %332 : vector<16x16xf32>
    %334 = vector.broadcast %330 : vector<1x16xf32> to vector<16x16xf32>
    %335 = arith.mulf %17, %334 : vector<16x16xf32>
    %336 = arith.addf %333, %335 : vector<16x16xf32>
    %cst_155 = arith.constant dense<0.000000e+00> : vector<16x16xf32>
    %337 = tpu.matmul %336, %336, %cst_155 {dimension_numbers = #tpu.dot_dimension_numbers<[1], [0], [0], [1], [0, 0, 1, 1], [], []>} : vector<16x16xf32>, vector<16x16xf32>, vector<16x16xf32> -> vector<16x16xf32>
    %cst_156 = arith.constant dense<0.000000e+00> : vector<16x16xf32>
    %338 = tpu.matmul %337, %337, %cst_156 {dimension_numbers = #tpu.dot_dimension_numbers<[1], [0], [0], [1], [0, 0, 1, 1], [], []>} : vector<16x16xf32>, vector<16x16xf32>, vector<16x16xf32> -> vector<16x16xf32>
    %cst_157 = arith.constant dense<0.000000e+00> : vector<16x16xf32>
    %339 = tpu.matmul %338, %338, %cst_157 {dimension_numbers = #tpu.dot_dimension_numbers<[1], [0], [0], [1], [0, 0, 1, 1], [], []>} : vector<16x16xf32>, vector<16x16xf32>, vector<16x16xf32> -> vector<16x16xf32>
    %cst_158 = arith.constant dense<0.000000e+00> : vector<16x16xf32>
    %340 = tpu.matmul %339, %339, %cst_158 {dimension_numbers = #tpu.dot_dimension_numbers<[1], [0], [0], [1], [0, 0, 1, 1], [], []>} : vector<16x16xf32>, vector<16x16xf32>, vector<16x16xf32> -> vector<16x16xf32>
    %cst_159 = arith.constant dense<0.000000e+00> : vector<16x16xf32>
    %341 = tpu.matmul %340, %340, %cst_159 {dimension_numbers = #tpu.dot_dimension_numbers<[1], [0], [0], [1], [0, 0, 1, 1], [], []>} : vector<16x16xf32>, vector<16x16xf32>, vector<16x16xf32> -> vector<16x16xf32>
    %cst_160 = arith.constant dense<0.000000e+00> : vector<16x16xf32>
    %342 = tpu.matmul %339, %341, %cst_160 {dimension_numbers = #tpu.dot_dimension_numbers<[1], [0], [0], [1], [0, 0, 1, 1], [], []>} : vector<16x16xf32>, vector<16x16xf32>, vector<16x16xf32> -> vector<16x16xf32>
    %cst_161 = arith.constant dense<0.000000e+00> : vector<16x16xf32>
    %343 = tpu.matmul %341, %341, %cst_161 {dimension_numbers = #tpu.dot_dimension_numbers<[1], [0], [0], [1], [0, 0, 1, 1], [], []>} : vector<16x16xf32>, vector<16x16xf32>, vector<16x16xf32> -> vector<16x16xf32>
    %cst_162 = arith.constant dense<0.000000e+00> : vector<16x16xf32>
    %344 = tpu.matmul %342, %343, %cst_162 {dimension_numbers = #tpu.dot_dimension_numbers<[1], [0], [0], [1], [0, 0, 1, 1], [], []>} : vector<16x16xf32>, vector<16x16xf32>, vector<16x16xf32> -> vector<16x16xf32>
    %cst_163 = arith.constant dense<0.000000e+00> : vector<16x16xf32>
    %345 = tpu.matmul %343, %343, %cst_163 {dimension_numbers = #tpu.dot_dimension_numbers<[1], [0], [0], [1], [0, 0, 1, 1], [], []>} : vector<16x16xf32>, vector<16x16xf32>, vector<16x16xf32> -> vector<16x16xf32>
    %cst_164 = arith.constant dense<0.000000e+00> : vector<16x16xf32>
    %346 = tpu.matmul %344, %345, %cst_164 {dimension_numbers = #tpu.dot_dimension_numbers<[1], [0], [0], [1], [0, 0, 1, 1], [], []>} : vector<16x16xf32>, vector<16x16xf32>, vector<16x16xf32> -> vector<16x16xf32>
    %cst_165 = arith.constant dense<0.000000e+00> : vector<16x16xf32>
    %347 = tpu.matmul %345, %345, %cst_165 {dimension_numbers = #tpu.dot_dimension_numbers<[1], [0], [0], [1], [0, 0, 1, 1], [], []>} : vector<16x16xf32>, vector<16x16xf32>, vector<16x16xf32> -> vector<16x16xf32>
    %cst_166 = arith.constant dense<0.000000e+00> : vector<16x16xf32>
    %348 = tpu.matmul %346, %347, %cst_166 {dimension_numbers = #tpu.dot_dimension_numbers<[1], [0], [0], [1], [0, 0, 1, 1], [], []>} : vector<16x16xf32>, vector<16x16xf32>, vector<16x16xf32> -> vector<16x16xf32>
    %cst_167 = arith.constant dense<0.000000e+00> : vector<16x16xf32>
    %349 = tpu.matmul %347, %347, %cst_167 {dimension_numbers = #tpu.dot_dimension_numbers<[1], [0], [0], [1], [0, 0, 1, 1], [], []>} : vector<16x16xf32>, vector<16x16xf32>, vector<16x16xf32> -> vector<16x16xf32>
    %cst_168 = arith.constant dense<0.000000e+00> : vector<16x16xf32>
    %350 = tpu.matmul %348, %349, %cst_168 {dimension_numbers = #tpu.dot_dimension_numbers<[1], [0], [0], [1], [0, 0, 1, 1], [], []>} : vector<16x16xf32>, vector<16x16xf32>, vector<16x16xf32> -> vector<16x16xf32>
    %cst_169 = arith.constant dense<0.000000e+00> : vector<1x16xf32>
    %351 = tpu.matmul %319, %350, %cst_169 {dimension_numbers = #tpu.dot_dimension_numbers<[1], [0], [0], [1], [0, 0, 1, 1], [], []>} : vector<1x16xf32>, vector<16x16xf32>, vector<1x16xf32> -> vector<1x16xf32>
    %c5_i32 = arith.constant 5 : i32
    %352 = vector.broadcast %c5_i32 : i32 to vector<8x16xi32>
    %353 = arith.cmpi eq, %42, %352 : vector<8x16xi32>
    %354 = arith.select %353, %29, %189 : vector<8x16xi1>, vector<8x16xf32>
    %c5_i32_170 = arith.constant 5 : i32
    %355 = vector.broadcast %c5_i32_170 : i32 to vector<16x8xi32>
    %356 = arith.cmpi eq, %43, %355 : vector<16x8xi32>
    %357 = arith.select %356, %41, %191 : vector<16x8xi1>, vector<16x8xf32>
    %cst_171 = arith.constant dense<0.000000e+00> : vector<16x16xf32>
    %358 = tpu.matmul %357, %354, %cst_171 {dimension_numbers = #tpu.dot_dimension_numbers<[1], [0], [0], [1], [0, 0, 1, 1], [], []>} : vector<16x8xf32>, vector<8x16xf32>, vector<16x16xf32> -> vector<16x16xf32>
    %359 = vector.extract_strided_slice %106 {offsets = [5, 0], sizes = [1, 8], strides = [1, 1]} : vector<8x8xf32> to vector<1x8xf32>
    %cst_172 = arith.constant dense<0.000000e+00> : vector<1x16xf32>
    %360 = tpu.matmul %359, %354, %cst_172 {dimension_numbers = #tpu.dot_dimension_numbers<[1], [0], [0], [1], [0, 0, 1, 1], [], []>} : vector<1x8xf32>, vector<8x16xf32>, vector<1x16xf32> -> vector<1x16xf32>
    %cst_173 = arith.constant 2.500000e-05 : f32
    %361 = vector.broadcast %cst_173 : f32 to vector<1x16xf32>
    %362 = arith.mulf %361, %360 : vector<1x16xf32>
    %cst_174 = arith.constant 2.500000e-05 : f32
    %363 = vector.broadcast %cst_174 : f32 to vector<16x16xf32>
    %364 = arith.mulf %363, %358 : vector<16x16xf32>
    %365 = arith.subf %11, %364 : vector<16x16xf32>
    %366 = vector.broadcast %362 : vector<1x16xf32> to vector<16x16xf32>
    %367 = arith.mulf %17, %366 : vector<16x16xf32>
    %368 = arith.addf %365, %367 : vector<16x16xf32>
    %cst_175 = arith.constant dense<0.000000e+00> : vector<16x16xf32>
    %369 = tpu.matmul %368, %368, %cst_175 {dimension_numbers = #tpu.dot_dimension_numbers<[1], [0], [0], [1], [0, 0, 1, 1], [], []>} : vector<16x16xf32>, vector<16x16xf32>, vector<16x16xf32> -> vector<16x16xf32>
    %cst_176 = arith.constant dense<0.000000e+00> : vector<16x16xf32>
    %370 = tpu.matmul %369, %369, %cst_176 {dimension_numbers = #tpu.dot_dimension_numbers<[1], [0], [0], [1], [0, 0, 1, 1], [], []>} : vector<16x16xf32>, vector<16x16xf32>, vector<16x16xf32> -> vector<16x16xf32>
    %cst_177 = arith.constant dense<0.000000e+00> : vector<16x16xf32>
    %371 = tpu.matmul %370, %370, %cst_177 {dimension_numbers = #tpu.dot_dimension_numbers<[1], [0], [0], [1], [0, 0, 1, 1], [], []>} : vector<16x16xf32>, vector<16x16xf32>, vector<16x16xf32> -> vector<16x16xf32>
    %cst_178 = arith.constant dense<0.000000e+00> : vector<16x16xf32>
    %372 = tpu.matmul %371, %371, %cst_178 {dimension_numbers = #tpu.dot_dimension_numbers<[1], [0], [0], [1], [0, 0, 1, 1], [], []>} : vector<16x16xf32>, vector<16x16xf32>, vector<16x16xf32> -> vector<16x16xf32>
    %cst_179 = arith.constant dense<0.000000e+00> : vector<16x16xf32>
    %373 = tpu.matmul %372, %372, %cst_179 {dimension_numbers = #tpu.dot_dimension_numbers<[1], [0], [0], [1], [0, 0, 1, 1], [], []>} : vector<16x16xf32>, vector<16x16xf32>, vector<16x16xf32> -> vector<16x16xf32>
    %cst_180 = arith.constant dense<0.000000e+00> : vector<16x16xf32>
    %374 = tpu.matmul %371, %373, %cst_180 {dimension_numbers = #tpu.dot_dimension_numbers<[1], [0], [0], [1], [0, 0, 1, 1], [], []>} : vector<16x16xf32>, vector<16x16xf32>, vector<16x16xf32> -> vector<16x16xf32>
    %cst_181 = arith.constant dense<0.000000e+00> : vector<16x16xf32>
    %375 = tpu.matmul %373, %373, %cst_181 {dimension_numbers = #tpu.dot_dimension_numbers<[1], [0], [0], [1], [0, 0, 1, 1], [], []>} : vector<16x16xf32>, vector<16x16xf32>, vector<16x16xf32> -> vector<16x16xf32>
    %cst_182 = arith.constant dense<0.000000e+00> : vector<16x16xf32>
    %376 = tpu.matmul %374, %375, %cst_182 {dimension_numbers = #tpu.dot_dimension_numbers<[1], [0], [0], [1], [0, 0, 1, 1], [], []>} : vector<16x16xf32>, vector<16x16xf32>, vector<16x16xf32> -> vector<16x16xf32>
    %cst_183 = arith.constant dense<0.000000e+00> : vector<16x16xf32>
    %377 = tpu.matmul %375, %375, %cst_183 {dimension_numbers = #tpu.dot_dimension_numbers<[1], [0], [0], [1], [0, 0, 1, 1], [], []>} : vector<16x16xf32>, vector<16x16xf32>, vector<16x16xf32> -> vector<16x16xf32>
    %cst_184 = arith.constant dense<0.000000e+00> : vector<16x16xf32>
    %378 = tpu.matmul %376, %377, %cst_184 {dimension_numbers = #tpu.dot_dimension_numbers<[1], [0], [0], [1], [0, 0, 1, 1], [], []>} : vector<16x16xf32>, vector<16x16xf32>, vector<16x16xf32> -> vector<16x16xf32>
    %cst_185 = arith.constant dense<0.000000e+00> : vector<16x16xf32>
    %379 = tpu.matmul %377, %377, %cst_185 {dimension_numbers = #tpu.dot_dimension_numbers<[1], [0], [0], [1], [0, 0, 1, 1], [], []>} : vector<16x16xf32>, vector<16x16xf32>, vector<16x16xf32> -> vector<16x16xf32>
    %cst_186 = arith.constant dense<0.000000e+00> : vector<16x16xf32>
    %380 = tpu.matmul %378, %379, %cst_186 {dimension_numbers = #tpu.dot_dimension_numbers<[1], [0], [0], [1], [0, 0, 1, 1], [], []>} : vector<16x16xf32>, vector<16x16xf32>, vector<16x16xf32> -> vector<16x16xf32>
    %cst_187 = arith.constant dense<0.000000e+00> : vector<16x16xf32>
    %381 = tpu.matmul %379, %379, %cst_187 {dimension_numbers = #tpu.dot_dimension_numbers<[1], [0], [0], [1], [0, 0, 1, 1], [], []>} : vector<16x16xf32>, vector<16x16xf32>, vector<16x16xf32> -> vector<16x16xf32>
    %cst_188 = arith.constant dense<0.000000e+00> : vector<16x16xf32>
    %382 = tpu.matmul %380, %381, %cst_188 {dimension_numbers = #tpu.dot_dimension_numbers<[1], [0], [0], [1], [0, 0, 1, 1], [], []>} : vector<16x16xf32>, vector<16x16xf32>, vector<16x16xf32> -> vector<16x16xf32>
    %cst_189 = arith.constant dense<0.000000e+00> : vector<1x16xf32>
    %383 = tpu.matmul %351, %382, %cst_189 {dimension_numbers = #tpu.dot_dimension_numbers<[1], [0], [0], [1], [0, 0, 1, 1], [], []>} : vector<1x16xf32>, vector<16x16xf32>, vector<1x16xf32> -> vector<1x16xf32>
    %c6_i32 = arith.constant 6 : i32
    %384 = vector.broadcast %c6_i32 : i32 to vector<8x16xi32>
    %385 = arith.cmpi eq, %42, %384 : vector<8x16xi32>
    %386 = arith.select %385, %29, %189 : vector<8x16xi1>, vector<8x16xf32>
    %c6_i32_190 = arith.constant 6 : i32
    %387 = vector.broadcast %c6_i32_190 : i32 to vector<16x8xi32>
    %388 = arith.cmpi eq, %43, %387 : vector<16x8xi32>
    %389 = arith.select %388, %41, %191 : vector<16x8xi1>, vector<16x8xf32>
    %cst_191 = arith.constant dense<0.000000e+00> : vector<16x16xf32>
    %390 = tpu.matmul %389, %386, %cst_191 {dimension_numbers = #tpu.dot_dimension_numbers<[1], [0], [0], [1], [0, 0, 1, 1], [], []>} : vector<16x8xf32>, vector<8x16xf32>, vector<16x16xf32> -> vector<16x16xf32>
    %391 = vector.extract_strided_slice %106 {offsets = [6, 0], sizes = [1, 8], strides = [1, 1]} : vector<8x8xf32> to vector<1x8xf32>
    %cst_192 = arith.constant dense<0.000000e+00> : vector<1x16xf32>
    %392 = tpu.matmul %391, %386, %cst_192 {dimension_numbers = #tpu.dot_dimension_numbers<[1], [0], [0], [1], [0, 0, 1, 1], [], []>} : vector<1x8xf32>, vector<8x16xf32>, vector<1x16xf32> -> vector<1x16xf32>
    %cst_193 = arith.constant 2.500000e-05 : f32
    %393 = vector.broadcast %cst_193 : f32 to vector<1x16xf32>
    %394 = arith.mulf %393, %392 : vector<1x16xf32>
    %cst_194 = arith.constant 2.500000e-05 : f32
    %395 = vector.broadcast %cst_194 : f32 to vector<16x16xf32>
    %396 = arith.mulf %395, %390 : vector<16x16xf32>
    %397 = arith.subf %11, %396 : vector<16x16xf32>
    %398 = vector.broadcast %394 : vector<1x16xf32> to vector<16x16xf32>
    %399 = arith.mulf %17, %398 : vector<16x16xf32>
    %400 = arith.addf %397, %399 : vector<16x16xf32>
    %cst_195 = arith.constant dense<0.000000e+00> : vector<16x16xf32>
    %401 = tpu.matmul %400, %400, %cst_195 {dimension_numbers = #tpu.dot_dimension_numbers<[1], [0], [0], [1], [0, 0, 1, 1], [], []>} : vector<16x16xf32>, vector<16x16xf32>, vector<16x16xf32> -> vector<16x16xf32>
    %cst_196 = arith.constant dense<0.000000e+00> : vector<16x16xf32>
    %402 = tpu.matmul %401, %401, %cst_196 {dimension_numbers = #tpu.dot_dimension_numbers<[1], [0], [0], [1], [0, 0, 1, 1], [], []>} : vector<16x16xf32>, vector<16x16xf32>, vector<16x16xf32> -> vector<16x16xf32>
    %cst_197 = arith.constant dense<0.000000e+00> : vector<16x16xf32>
    %403 = tpu.matmul %402, %402, %cst_197 {dimension_numbers = #tpu.dot_dimension_numbers<[1], [0], [0], [1], [0, 0, 1, 1], [], []>} : vector<16x16xf32>, vector<16x16xf32>, vector<16x16xf32> -> vector<16x16xf32>
    %cst_198 = arith.constant dense<0.000000e+00> : vector<16x16xf32>
    %404 = tpu.matmul %403, %403, %cst_198 {dimension_numbers = #tpu.dot_dimension_numbers<[1], [0], [0], [1], [0, 0, 1, 1], [], []>} : vector<16x16xf32>, vector<16x16xf32>, vector<16x16xf32> -> vector<16x16xf32>
    %cst_199 = arith.constant dense<0.000000e+00> : vector<16x16xf32>
    %405 = tpu.matmul %404, %404, %cst_199 {dimension_numbers = #tpu.dot_dimension_numbers<[1], [0], [0], [1], [0, 0, 1, 1], [], []>} : vector<16x16xf32>, vector<16x16xf32>, vector<16x16xf32> -> vector<16x16xf32>
    %cst_200 = arith.constant dense<0.000000e+00> : vector<16x16xf32>
    %406 = tpu.matmul %403, %405, %cst_200 {dimension_numbers = #tpu.dot_dimension_numbers<[1], [0], [0], [1], [0, 0, 1, 1], [], []>} : vector<16x16xf32>, vector<16x16xf32>, vector<16x16xf32> -> vector<16x16xf32>
    %cst_201 = arith.constant dense<0.000000e+00> : vector<16x16xf32>
    %407 = tpu.matmul %405, %405, %cst_201 {dimension_numbers = #tpu.dot_dimension_numbers<[1], [0], [0], [1], [0, 0, 1, 1], [], []>} : vector<16x16xf32>, vector<16x16xf32>, vector<16x16xf32> -> vector<16x16xf32>
    %cst_202 = arith.constant dense<0.000000e+00> : vector<16x16xf32>
    %408 = tpu.matmul %406, %407, %cst_202 {dimension_numbers = #tpu.dot_dimension_numbers<[1], [0], [0], [1], [0, 0, 1, 1], [], []>} : vector<16x16xf32>, vector<16x16xf32>, vector<16x16xf32> -> vector<16x16xf32>
    %cst_203 = arith.constant dense<0.000000e+00> : vector<16x16xf32>
    %409 = tpu.matmul %407, %407, %cst_203 {dimension_numbers = #tpu.dot_dimension_numbers<[1], [0], [0], [1], [0, 0, 1, 1], [], []>} : vector<16x16xf32>, vector<16x16xf32>, vector<16x16xf32> -> vector<16x16xf32>
    %cst_204 = arith.constant dense<0.000000e+00> : vector<16x16xf32>
    %410 = tpu.matmul %408, %409, %cst_204 {dimension_numbers = #tpu.dot_dimension_numbers<[1], [0], [0], [1], [0, 0, 1, 1], [], []>} : vector<16x16xf32>, vector<16x16xf32>, vector<16x16xf32> -> vector<16x16xf32>
    %cst_205 = arith.constant dense<0.000000e+00> : vector<16x16xf32>
    %411 = tpu.matmul %409, %409, %cst_205 {dimension_numbers = #tpu.dot_dimension_numbers<[1], [0], [0], [1], [0, 0, 1, 1], [], []>} : vector<16x16xf32>, vector<16x16xf32>, vector<16x16xf32> -> vector<16x16xf32>
    %cst_206 = arith.constant dense<0.000000e+00> : vector<16x16xf32>
    %412 = tpu.matmul %410, %411, %cst_206 {dimension_numbers = #tpu.dot_dimension_numbers<[1], [0], [0], [1], [0, 0, 1, 1], [], []>} : vector<16x16xf32>, vector<16x16xf32>, vector<16x16xf32> -> vector<16x16xf32>
    %cst_207 = arith.constant dense<0.000000e+00> : vector<16x16xf32>
    %413 = tpu.matmul %411, %411, %cst_207 {dimension_numbers = #tpu.dot_dimension_numbers<[1], [0], [0], [1], [0, 0, 1, 1], [], []>} : vector<16x16xf32>, vector<16x16xf32>, vector<16x16xf32> -> vector<16x16xf32>
    %cst_208 = arith.constant dense<0.000000e+00> : vector<16x16xf32>
    %414 = tpu.matmul %412, %413, %cst_208 {dimension_numbers = #tpu.dot_dimension_numbers<[1], [0], [0], [1], [0, 0, 1, 1], [], []>} : vector<16x16xf32>, vector<16x16xf32>, vector<16x16xf32> -> vector<16x16xf32>
    %cst_209 = arith.constant dense<0.000000e+00> : vector<1x16xf32>
    %415 = tpu.matmul %383, %414, %cst_209 {dimension_numbers = #tpu.dot_dimension_numbers<[1], [0], [0], [1], [0, 0, 1, 1], [], []>} : vector<1x16xf32>, vector<16x16xf32>, vector<1x16xf32> -> vector<1x16xf32>
    %c7_i32 = arith.constant 7 : i32
    %416 = vector.broadcast %c7_i32 : i32 to vector<8x16xi32>
    %417 = arith.cmpi eq, %42, %416 : vector<8x16xi32>
    %418 = arith.select %417, %29, %189 : vector<8x16xi1>, vector<8x16xf32>
    %c7_i32_210 = arith.constant 7 : i32
    %419 = vector.broadcast %c7_i32_210 : i32 to vector<16x8xi32>
    %420 = arith.cmpi eq, %43, %419 : vector<16x8xi32>
    %421 = arith.select %420, %41, %191 : vector<16x8xi1>, vector<16x8xf32>
    %cst_211 = arith.constant dense<0.000000e+00> : vector<16x16xf32>
    %422 = tpu.matmul %421, %418, %cst_211 {dimension_numbers = #tpu.dot_dimension_numbers<[1], [0], [0], [1], [0, 0, 1, 1], [], []>} : vector<16x8xf32>, vector<8x16xf32>, vector<16x16xf32> -> vector<16x16xf32>
    %423 = vector.extract_strided_slice %106 {offsets = [7, 0], sizes = [1, 8], strides = [1, 1]} : vector<8x8xf32> to vector<1x8xf32>
    %cst_212 = arith.constant dense<0.000000e+00> : vector<1x16xf32>
    %424 = tpu.matmul %423, %418, %cst_212 {dimension_numbers = #tpu.dot_dimension_numbers<[1], [0], [0], [1], [0, 0, 1, 1], [], []>} : vector<1x8xf32>, vector<8x16xf32>, vector<1x16xf32> -> vector<1x16xf32>
    %cst_213 = arith.constant 2.500000e-05 : f32
    %425 = vector.broadcast %cst_213 : f32 to vector<1x16xf32>
    %426 = arith.mulf %425, %424 : vector<1x16xf32>
    %cst_214 = arith.constant 2.500000e-05 : f32
    %427 = vector.broadcast %cst_214 : f32 to vector<16x16xf32>
    %428 = arith.mulf %427, %422 : vector<16x16xf32>
    %429 = arith.subf %11, %428 : vector<16x16xf32>
    %430 = vector.broadcast %426 : vector<1x16xf32> to vector<16x16xf32>
    %431 = arith.mulf %17, %430 : vector<16x16xf32>
    %432 = arith.addf %429, %431 : vector<16x16xf32>
    %cst_215 = arith.constant dense<0.000000e+00> : vector<16x16xf32>
    %433 = tpu.matmul %432, %432, %cst_215 {dimension_numbers = #tpu.dot_dimension_numbers<[1], [0], [0], [1], [0, 0, 1, 1], [], []>} : vector<16x16xf32>, vector<16x16xf32>, vector<16x16xf32> -> vector<16x16xf32>
    %cst_216 = arith.constant dense<0.000000e+00> : vector<16x16xf32>
    %434 = tpu.matmul %433, %433, %cst_216 {dimension_numbers = #tpu.dot_dimension_numbers<[1], [0], [0], [1], [0, 0, 1, 1], [], []>} : vector<16x16xf32>, vector<16x16xf32>, vector<16x16xf32> -> vector<16x16xf32>
    %cst_217 = arith.constant dense<0.000000e+00> : vector<16x16xf32>
    %435 = tpu.matmul %434, %434, %cst_217 {dimension_numbers = #tpu.dot_dimension_numbers<[1], [0], [0], [1], [0, 0, 1, 1], [], []>} : vector<16x16xf32>, vector<16x16xf32>, vector<16x16xf32> -> vector<16x16xf32>
    %cst_218 = arith.constant dense<0.000000e+00> : vector<16x16xf32>
    %436 = tpu.matmul %435, %435, %cst_218 {dimension_numbers = #tpu.dot_dimension_numbers<[1], [0], [0], [1], [0, 0, 1, 1], [], []>} : vector<16x16xf32>, vector<16x16xf32>, vector<16x16xf32> -> vector<16x16xf32>
    %cst_219 = arith.constant dense<0.000000e+00> : vector<16x16xf32>
    %437 = tpu.matmul %436, %436, %cst_219 {dimension_numbers = #tpu.dot_dimension_numbers<[1], [0], [0], [1], [0, 0, 1, 1], [], []>} : vector<16x16xf32>, vector<16x16xf32>, vector<16x16xf32> -> vector<16x16xf32>
    %cst_220 = arith.constant dense<0.000000e+00> : vector<16x16xf32>
    %438 = tpu.matmul %435, %437, %cst_220 {dimension_numbers = #tpu.dot_dimension_numbers<[1], [0], [0], [1], [0, 0, 1, 1], [], []>} : vector<16x16xf32>, vector<16x16xf32>, vector<16x16xf32> -> vector<16x16xf32>
    %cst_221 = arith.constant dense<0.000000e+00> : vector<16x16xf32>
    %439 = tpu.matmul %437, %437, %cst_221 {dimension_numbers = #tpu.dot_dimension_numbers<[1], [0], [0], [1], [0, 0, 1, 1], [], []>} : vector<16x16xf32>, vector<16x16xf32>, vector<16x16xf32> -> vector<16x16xf32>
    %cst_222 = arith.constant dense<0.000000e+00> : vector<16x16xf32>
    %440 = tpu.matmul %438, %439, %cst_222 {dimension_numbers = #tpu.dot_dimension_numbers<[1], [0], [0], [1], [0, 0, 1, 1], [], []>} : vector<16x16xf32>, vector<16x16xf32>, vector<16x16xf32> -> vector<16x16xf32>
    %cst_223 = arith.constant dense<0.000000e+00> : vector<16x16xf32>
    %441 = tpu.matmul %439, %439, %cst_223 {dimension_numbers = #tpu.dot_dimension_numbers<[1], [0], [0], [1], [0, 0, 1, 1], [], []>} : vector<16x16xf32>, vector<16x16xf32>, vector<16x16xf32> -> vector<16x16xf32>
    %cst_224 = arith.constant dense<0.000000e+00> : vector<16x16xf32>
    %442 = tpu.matmul %440, %441, %cst_224 {dimension_numbers = #tpu.dot_dimension_numbers<[1], [0], [0], [1], [0, 0, 1, 1], [], []>} : vector<16x16xf32>, vector<16x16xf32>, vector<16x16xf32> -> vector<16x16xf32>
    %cst_225 = arith.constant dense<0.000000e+00> : vector<16x16xf32>
    %443 = tpu.matmul %441, %441, %cst_225 {dimension_numbers = #tpu.dot_dimension_numbers<[1], [0], [0], [1], [0, 0, 1, 1], [], []>} : vector<16x16xf32>, vector<16x16xf32>, vector<16x16xf32> -> vector<16x16xf32>
    %cst_226 = arith.constant dense<0.000000e+00> : vector<16x16xf32>
    %444 = tpu.matmul %442, %443, %cst_226 {dimension_numbers = #tpu.dot_dimension_numbers<[1], [0], [0], [1], [0, 0, 1, 1], [], []>} : vector<16x16xf32>, vector<16x16xf32>, vector<16x16xf32> -> vector<16x16xf32>
    %cst_227 = arith.constant dense<0.000000e+00> : vector<16x16xf32>
    %445 = tpu.matmul %443, %443, %cst_227 {dimension_numbers = #tpu.dot_dimension_numbers<[1], [0], [0], [1], [0, 0, 1, 1], [], []>} : vector<16x16xf32>, vector<16x16xf32>, vector<16x16xf32> -> vector<16x16xf32>
    %cst_228 = arith.constant dense<0.000000e+00> : vector<16x16xf32>
    %446 = tpu.matmul %444, %445, %cst_228 {dimension_numbers = #tpu.dot_dimension_numbers<[1], [0], [0], [1], [0, 0, 1, 1], [], []>} : vector<16x16xf32>, vector<16x16xf32>, vector<16x16xf32> -> vector<16x16xf32>
    %cst_229 = arith.constant dense<0.000000e+00> : vector<1x16xf32>
    %447 = tpu.matmul %415, %446, %cst_229 {dimension_numbers = #tpu.dot_dimension_numbers<[1], [0], [0], [1], [0, 0, 1, 1], [], []>} : vector<1x16xf32>, vector<16x16xf32>, vector<1x16xf32> -> vector<1x16xf32>
    %448 = vector.extract_strided_slice %447 {offsets = [0, 0], sizes = [1, 8], strides = [1, 1]} : vector<1x16xf32> to vector<1x8xf32>
    %c1 = arith.constant 1 : index
    %c0_230 = arith.constant 0 : index
    %c0_231 = arith.constant 0 : index
    %449 = vector.load %arg34[%c1, %c0_230, %c0_231] : memref<8x8x8xf32, #tpu.memory_space<vmem>>, vector<1x8x8xf32>
    %450 = vector.shape_cast %449 : vector<1x8x8xf32> to vector<8x8xf32>
    %cst_232 = arith.constant 5.000000e-01 : f32
    %451 = vector.broadcast %cst_232 : f32 to vector<8x8xf32>
    %452 = arith.mulf %451, %98 : vector<8x8xf32>
    %453 = math.exp %452 : vector<8x8xf32>
    %454 = arith.mulf %450, %453 : vector<8x8xf32>
    %455 = arith.addf %97, %454 : vector<8x8xf32>
    %c1_233 = arith.constant 1 : index
    %c0_234 = arith.constant 0 : index
    %c0_235 = arith.constant 0 : index
    %456 = vector.load %arg33[%c1_233, %c0_234, %c0_235] : memref<7x8x8xf32, #tpu.memory_space<vmem>>, vector<1x8x8xf32>
    %457 = vector.shape_cast %456 : vector<1x8x8xf32> to vector<8x8xf32>
    %c0_236 = arith.constant 0 : index
    %c0_237 = arith.constant 0 : index
    %458 = vector.load %arg11[%c0_236, %c0_237] : memref<24x32xf32, #tpu.memory_space<vmem>>, vector<8x32xf32>
    %cst_238 = arith.constant dense<0.000000e+00> : vector<8x32xf32>
    %459 = tpu.matmul %455, %458, %cst_238 {dimension_numbers = #tpu.dot_dimension_numbers<[1], [0], [0], [1], [0, 0, 1, 1], [], []>} : vector<8x8xf32>, vector<8x32xf32>, vector<8x32xf32> -> vector<8x32xf32>
    %c8_239 = arith.constant 8 : index
    %c0_240 = arith.constant 0 : index
    %460 = vector.load %arg11[%c8_239, %c0_240] : memref<24x32xf32, #tpu.memory_space<vmem>>, vector<8x32xf32>
    %cst_241 = arith.constant dense<0.000000e+00> : vector<1x32xf32>
    %461 = tpu.matmul %448, %460, %cst_241 {dimension_numbers = #tpu.dot_dimension_numbers<[1], [0], [0], [1], [0, 0, 1, 1], [], []>} : vector<1x8xf32>, vector<8x32xf32>, vector<1x32xf32> -> vector<1x32xf32>
    %462 = vector.broadcast %461 : vector<1x32xf32> to vector<8x32xf32>
    %463 = arith.addf %459, %462 : vector<8x32xf32>
    %c16 = arith.constant 16 : index
    %c0_242 = arith.constant 0 : index
    %464 = vector.load %arg11[%c16, %c0_242] : memref<24x32xf32, #tpu.memory_space<vmem>>, vector<8x32xf32>
    %cst_243 = arith.constant dense<0.000000e+00> : vector<8x32xf32>
    %465 = tpu.matmul %457, %464, %cst_243 {dimension_numbers = #tpu.dot_dimension_numbers<[1], [0], [0], [1], [0, 0, 1, 1], [], []>} : vector<8x8xf32>, vector<8x32xf32>, vector<8x32xf32> -> vector<8x32xf32>
    %466 = arith.addf %463, %465 : vector<8x32xf32>
    %c0_244 = arith.constant 0 : index
    %c0_245 = arith.constant 0 : index
    %467 = vector.load %arg12[%c0_244, %c0_245] : memref<1x32xf32, #tpu.memory_space<vmem>>, vector<1x32xf32>
    %468 = vector.broadcast %467 : vector<1x32xf32> to vector<8x32xf32>
    %469 = arith.addf %466, %468 : vector<8x32xf32>
    %cst_246 = arith.constant 0.000000e+00 : f32
    %470 = vector.broadcast %cst_246 : f32 to vector<8x32xf32>
    %471 = arith.maximumf %469, %470 : vector<8x32xf32>
    %c0_247 = arith.constant 0 : index
    %c0_248 = arith.constant 0 : index
    %472 = vector.load %arg13[%c0_247, %c0_248] : memref<32x16xf32, #tpu.memory_space<vmem>>, vector<32x16xf32>
    %cst_249 = arith.constant dense<0.000000e+00> : vector<8x16xf32>
    %473 = tpu.matmul %471, %472, %cst_249 {dimension_numbers = #tpu.dot_dimension_numbers<[1], [0], [0], [1], [0, 0, 1, 1], [], []>} : vector<8x32xf32>, vector<32x16xf32>, vector<8x16xf32> -> vector<8x16xf32>
    %c0_250 = arith.constant 0 : index
    %c0_251 = arith.constant 0 : index
    %474 = vector.load %arg14[%c0_250, %c0_251] : memref<1x16xf32, #tpu.memory_space<vmem>>, vector<1x16xf32>
    %475 = vector.broadcast %474 : vector<1x16xf32> to vector<8x16xf32>
    %476 = arith.addf %473, %475 : vector<8x16xf32>
    %477 = arith.negf %476 : vector<8x16xf32>
    %478 = math.exp %477 : vector<8x16xf32>
    %cst_252 = arith.constant 1.000000e+00 : f32
    %479 = vector.broadcast %cst_252 : f32 to vector<8x16xf32>
    %480 = arith.addf %479, %478 : vector<8x16xf32>
    %481 = arith.divf %479, %480 : vector<8x16xf32>
    %482 = vector.extract_strided_slice %481 {offsets = [0, 0], sizes = [8, 8], strides = [1, 1]} : vector<8x16xf32> to vector<8x8xf32>
    %483 = vector.extract_strided_slice %481 {offsets = [0, 8], sizes = [8, 8], strides = [1, 1]} : vector<8x16xf32> to vector<8x8xf32>
    %c2 = arith.constant 2 : index
    %c0_253 = arith.constant 0 : index
    %c0_254 = arith.constant 0 : index
    %484 = vector.load %arg34[%c2, %c0_253, %c0_254] : memref<8x8x8xf32, #tpu.memory_space<vmem>>, vector<1x8x8xf32>
    %485 = vector.shape_cast %484 : vector<1x8x8xf32> to vector<8x8xf32>
    %cst_255 = arith.constant 5.000000e-01 : f32
    %486 = vector.broadcast %cst_255 : f32 to vector<8x8xf32>
    %487 = arith.mulf %486, %483 : vector<8x8xf32>
    %488 = math.exp %487 : vector<8x8xf32>
    %489 = arith.mulf %485, %488 : vector<8x8xf32>
    %490 = arith.addf %482, %489 : vector<8x8xf32>
    %cst_256 = arith.constant 0.000000e+00 : f32
    %491 = vector.broadcast %cst_256 : f32 to vector<8x8xf32>
    %492 = vector.extract_strided_slice %490 {offsets = [0, 0], sizes = [8, 1], strides = [1, 1]} : vector<8x8xf32> to vector<8x1xf32>
    %493 = vector.broadcast %492 : vector<8x1xf32> to vector<8x8xf32>
    %494 = arith.mulf %493, %5 : vector<8x8xf32>
    %cst_257 = arith.constant dense<0.000000e+00> : vector<8xf32>
    %495 = vector.multi_reduction <add>, %494, %cst_257 [0] : vector<8x8xf32> to vector<8xf32>
    %496 = vector.shape_cast %495 : vector<8xf32> to vector<1x8xf32>
    %497 = vector.extract_strided_slice %5 {offsets = [0, 0], sizes = [8, 1], strides = [1, 1]} : vector<8x8xf32> to vector<8x1xf32>
    %498 = vector.broadcast %497 : vector<8x1xf32> to vector<8x8xf32>
    %499 = vector.broadcast %496 : vector<1x8xf32> to vector<8x8xf32>
    %500 = arith.mulf %498, %499 : vector<8x8xf32>
    %501 = arith.addf %491, %500 : vector<8x8xf32>
    %502 = vector.extract_strided_slice %490 {offsets = [0, 1], sizes = [8, 1], strides = [1, 1]} : vector<8x8xf32> to vector<8x1xf32>
    %503 = vector.broadcast %502 : vector<8x1xf32> to vector<8x8xf32>
    %504 = arith.mulf %503, %5 : vector<8x8xf32>
    %cst_258 = arith.constant dense<0.000000e+00> : vector<8xf32>
    %505 = vector.multi_reduction <add>, %504, %cst_258 [0] : vector<8x8xf32> to vector<8xf32>
    %506 = vector.shape_cast %505 : vector<8xf32> to vector<1x8xf32>
    %507 = vector.extract_strided_slice %5 {offsets = [0, 1], sizes = [8, 1], strides = [1, 1]} : vector<8x8xf32> to vector<8x1xf32>
    %508 = vector.broadcast %507 : vector<8x1xf32> to vector<8x8xf32>
    %509 = vector.broadcast %506 : vector<1x8xf32> to vector<8x8xf32>
    %510 = arith.mulf %508, %509 : vector<8x8xf32>
    %511 = arith.addf %501, %510 : vector<8x8xf32>
    %512 = vector.extract_strided_slice %490 {offsets = [0, 2], sizes = [8, 1], strides = [1, 1]} : vector<8x8xf32> to vector<8x1xf32>
    %513 = vector.broadcast %512 : vector<8x1xf32> to vector<8x8xf32>
    %514 = arith.mulf %513, %5 : vector<8x8xf32>
    %cst_259 = arith.constant dense<0.000000e+00> : vector<8xf32>
    %515 = vector.multi_reduction <add>, %514, %cst_259 [0] : vector<8x8xf32> to vector<8xf32>
    %516 = vector.shape_cast %515 : vector<8xf32> to vector<1x8xf32>
    %517 = vector.extract_strided_slice %5 {offsets = [0, 2], sizes = [8, 1], strides = [1, 1]} : vector<8x8xf32> to vector<8x1xf32>
    %518 = vector.broadcast %517 : vector<8x1xf32> to vector<8x8xf32>
    %519 = vector.broadcast %516 : vector<1x8xf32> to vector<8x8xf32>
    %520 = arith.mulf %518, %519 : vector<8x8xf32>
    %521 = arith.addf %511, %520 : vector<8x8xf32>
    %522 = vector.extract_strided_slice %490 {offsets = [0, 3], sizes = [8, 1], strides = [1, 1]} : vector<8x8xf32> to vector<8x1xf32>
    %523 = vector.broadcast %522 : vector<8x1xf32> to vector<8x8xf32>
    %524 = arith.mulf %523, %5 : vector<8x8xf32>
    %cst_260 = arith.constant dense<0.000000e+00> : vector<8xf32>
    %525 = vector.multi_reduction <add>, %524, %cst_260 [0] : vector<8x8xf32> to vector<8xf32>
    %526 = vector.shape_cast %525 : vector<8xf32> to vector<1x8xf32>
    %527 = vector.extract_strided_slice %5 {offsets = [0, 3], sizes = [8, 1], strides = [1, 1]} : vector<8x8xf32> to vector<8x1xf32>
    %528 = vector.broadcast %527 : vector<8x1xf32> to vector<8x8xf32>
    %529 = vector.broadcast %526 : vector<1x8xf32> to vector<8x8xf32>
    %530 = arith.mulf %528, %529 : vector<8x8xf32>
    %531 = arith.addf %521, %530 : vector<8x8xf32>
    %532 = vector.extract_strided_slice %490 {offsets = [0, 4], sizes = [8, 1], strides = [1, 1]} : vector<8x8xf32> to vector<8x1xf32>
    %533 = vector.broadcast %532 : vector<8x1xf32> to vector<8x8xf32>
    %534 = arith.mulf %533, %5 : vector<8x8xf32>
    %cst_261 = arith.constant dense<0.000000e+00> : vector<8xf32>
    %535 = vector.multi_reduction <add>, %534, %cst_261 [0] : vector<8x8xf32> to vector<8xf32>
    %536 = vector.shape_cast %535 : vector<8xf32> to vector<1x8xf32>
    %537 = vector.extract_strided_slice %5 {offsets = [0, 4], sizes = [8, 1], strides = [1, 1]} : vector<8x8xf32> to vector<8x1xf32>
    %538 = vector.broadcast %537 : vector<8x1xf32> to vector<8x8xf32>
    %539 = vector.broadcast %536 : vector<1x8xf32> to vector<8x8xf32>
    %540 = arith.mulf %538, %539 : vector<8x8xf32>
    %541 = arith.addf %531, %540 : vector<8x8xf32>
    %542 = vector.extract_strided_slice %490 {offsets = [0, 5], sizes = [8, 1], strides = [1, 1]} : vector<8x8xf32> to vector<8x1xf32>
    %543 = vector.broadcast %542 : vector<8x1xf32> to vector<8x8xf32>
    %544 = arith.mulf %543, %5 : vector<8x8xf32>
    %cst_262 = arith.constant dense<0.000000e+00> : vector<8xf32>
    %545 = vector.multi_reduction <add>, %544, %cst_262 [0] : vector<8x8xf32> to vector<8xf32>
    %546 = vector.shape_cast %545 : vector<8xf32> to vector<1x8xf32>
    %547 = vector.extract_strided_slice %5 {offsets = [0, 5], sizes = [8, 1], strides = [1, 1]} : vector<8x8xf32> to vector<8x1xf32>
    %548 = vector.broadcast %547 : vector<8x1xf32> to vector<8x8xf32>
    %549 = vector.broadcast %546 : vector<1x8xf32> to vector<8x8xf32>
    %550 = arith.mulf %548, %549 : vector<8x8xf32>
    %551 = arith.addf %541, %550 : vector<8x8xf32>
    %552 = vector.extract_strided_slice %490 {offsets = [0, 6], sizes = [8, 1], strides = [1, 1]} : vector<8x8xf32> to vector<8x1xf32>
    %553 = vector.broadcast %552 : vector<8x1xf32> to vector<8x8xf32>
    %554 = arith.mulf %553, %5 : vector<8x8xf32>
    %cst_263 = arith.constant dense<0.000000e+00> : vector<8xf32>
    %555 = vector.multi_reduction <add>, %554, %cst_263 [0] : vector<8x8xf32> to vector<8xf32>
    %556 = vector.shape_cast %555 : vector<8xf32> to vector<1x8xf32>
    %557 = vector.extract_strided_slice %5 {offsets = [0, 6], sizes = [8, 1], strides = [1, 1]} : vector<8x8xf32> to vector<8x1xf32>
    %558 = vector.broadcast %557 : vector<8x1xf32> to vector<8x8xf32>
    %559 = vector.broadcast %556 : vector<1x8xf32> to vector<8x8xf32>
    %560 = arith.mulf %558, %559 : vector<8x8xf32>
    %561 = arith.addf %551, %560 : vector<8x8xf32>
    %562 = vector.extract_strided_slice %490 {offsets = [0, 7], sizes = [8, 1], strides = [1, 1]} : vector<8x8xf32> to vector<8x1xf32>
    %563 = vector.broadcast %562 : vector<8x1xf32> to vector<8x8xf32>
    %564 = arith.mulf %563, %5 : vector<8x8xf32>
    %cst_264 = arith.constant dense<0.000000e+00> : vector<8xf32>
    %565 = vector.multi_reduction <add>, %564, %cst_264 [0] : vector<8x8xf32> to vector<8xf32>
    %566 = vector.shape_cast %565 : vector<8xf32> to vector<1x8xf32>
    %567 = vector.extract_strided_slice %5 {offsets = [0, 7], sizes = [8, 1], strides = [1, 1]} : vector<8x8xf32> to vector<8x1xf32>
    %568 = vector.broadcast %567 : vector<8x1xf32> to vector<8x8xf32>
    %569 = vector.broadcast %566 : vector<1x8xf32> to vector<8x8xf32>
    %570 = arith.mulf %568, %569 : vector<8x8xf32>
    %571 = arith.addf %561, %570 : vector<8x8xf32>
    %cst_265 = arith.constant dense<0.000000e+00> : vector<8x16xf32>
    %572 = tpu.matmul %490, %23, %cst_265 {dimension_numbers = #tpu.dot_dimension_numbers<[1], [0], [0], [1], [0, 0, 1, 1], [], []>} : vector<8x8xf32>, vector<8x16xf32>, vector<8x16xf32> -> vector<8x16xf32>
    %573 = arith.addf %572, %29 : vector<8x16xf32>
    %cst_266 = arith.constant dense<0.000000e+00> : vector<16x8xf32>
    %574 = tpu.matmul %35, %571, %cst_266 {dimension_numbers = #tpu.dot_dimension_numbers<[1], [0], [0], [1], [0, 0, 1, 1], [], []>} : vector<16x8xf32>, vector<8x8xf32>, vector<16x8xf32> -> vector<16x8xf32>
    %575 = arith.addf %574, %41 : vector<16x8xf32>
    %c0_i32_267 = arith.constant 0 : i32
    %576 = vector.broadcast %c0_i32_267 : i32 to vector<8x16xi32>
    %577 = arith.cmpi eq, %42, %576 : vector<8x16xi32>
    %578 = arith.select %577, %29, %573 : vector<8x16xi1>, vector<8x16xf32>
    %c0_i32_268 = arith.constant 0 : i32
    %579 = vector.broadcast %c0_i32_268 : i32 to vector<16x8xi32>
    %580 = arith.cmpi eq, %43, %579 : vector<16x8xi32>
    %581 = arith.select %580, %41, %575 : vector<16x8xi1>, vector<16x8xf32>
    %cst_269 = arith.constant dense<0.000000e+00> : vector<16x16xf32>
    %582 = tpu.matmul %581, %578, %cst_269 {dimension_numbers = #tpu.dot_dimension_numbers<[1], [0], [0], [1], [0, 0, 1, 1], [], []>} : vector<16x8xf32>, vector<8x16xf32>, vector<16x16xf32> -> vector<16x16xf32>
    %583 = vector.extract_strided_slice %490 {offsets = [0, 0], sizes = [1, 8], strides = [1, 1]} : vector<8x8xf32> to vector<1x8xf32>
    %cst_270 = arith.constant dense<0.000000e+00> : vector<1x16xf32>
    %584 = tpu.matmul %583, %578, %cst_270 {dimension_numbers = #tpu.dot_dimension_numbers<[1], [0], [0], [1], [0, 0, 1, 1], [], []>} : vector<1x8xf32>, vector<8x16xf32>, vector<1x16xf32> -> vector<1x16xf32>
    %cst_271 = arith.constant 2.500000e-05 : f32
    %585 = vector.broadcast %cst_271 : f32 to vector<1x16xf32>
    %586 = arith.mulf %585, %584 : vector<1x16xf32>
    %cst_272 = arith.constant 2.500000e-05 : f32
    %587 = vector.broadcast %cst_272 : f32 to vector<16x16xf32>
    %588 = arith.mulf %587, %582 : vector<16x16xf32>
    %589 = arith.subf %11, %588 : vector<16x16xf32>
    %590 = vector.broadcast %586 : vector<1x16xf32> to vector<16x16xf32>
    %591 = arith.mulf %17, %590 : vector<16x16xf32>
    %592 = arith.addf %589, %591 : vector<16x16xf32>
    %cst_273 = arith.constant dense<0.000000e+00> : vector<16x16xf32>
    %593 = tpu.matmul %592, %592, %cst_273 {dimension_numbers = #tpu.dot_dimension_numbers<[1], [0], [0], [1], [0, 0, 1, 1], [], []>} : vector<16x16xf32>, vector<16x16xf32>, vector<16x16xf32> -> vector<16x16xf32>
    %cst_274 = arith.constant dense<0.000000e+00> : vector<16x16xf32>
    %594 = tpu.matmul %593, %593, %cst_274 {dimension_numbers = #tpu.dot_dimension_numbers<[1], [0], [0], [1], [0, 0, 1, 1], [], []>} : vector<16x16xf32>, vector<16x16xf32>, vector<16x16xf32> -> vector<16x16xf32>
    %cst_275 = arith.constant dense<0.000000e+00> : vector<16x16xf32>
    %595 = tpu.matmul %594, %594, %cst_275 {dimension_numbers = #tpu.dot_dimension_numbers<[1], [0], [0], [1], [0, 0, 1, 1], [], []>} : vector<16x16xf32>, vector<16x16xf32>, vector<16x16xf32> -> vector<16x16xf32>
    %cst_276 = arith.constant dense<0.000000e+00> : vector<16x16xf32>
    %596 = tpu.matmul %595, %595, %cst_276 {dimension_numbers = #tpu.dot_dimension_numbers<[1], [0], [0], [1], [0, 0, 1, 1], [], []>} : vector<16x16xf32>, vector<16x16xf32>, vector<16x16xf32> -> vector<16x16xf32>
    %cst_277 = arith.constant dense<0.000000e+00> : vector<16x16xf32>
    %597 = tpu.matmul %596, %596, %cst_277 {dimension_numbers = #tpu.dot_dimension_numbers<[1], [0], [0], [1], [0, 0, 1, 1], [], []>} : vector<16x16xf32>, vector<16x16xf32>, vector<16x16xf32> -> vector<16x16xf32>
    %cst_278 = arith.constant dense<0.000000e+00> : vector<16x16xf32>
    %598 = tpu.matmul %595, %597, %cst_278 {dimension_numbers = #tpu.dot_dimension_numbers<[1], [0], [0], [1], [0, 0, 1, 1], [], []>} : vector<16x16xf32>, vector<16x16xf32>, vector<16x16xf32> -> vector<16x16xf32>
    %cst_279 = arith.constant dense<0.000000e+00> : vector<16x16xf32>
    %599 = tpu.matmul %597, %597, %cst_279 {dimension_numbers = #tpu.dot_dimension_numbers<[1], [0], [0], [1], [0, 0, 1, 1], [], []>} : vector<16x16xf32>, vector<16x16xf32>, vector<16x16xf32> -> vector<16x16xf32>
    %cst_280 = arith.constant dense<0.000000e+00> : vector<16x16xf32>
    %600 = tpu.matmul %598, %599, %cst_280 {dimension_numbers = #tpu.dot_dimension_numbers<[1], [0], [0], [1], [0, 0, 1, 1], [], []>} : vector<16x16xf32>, vector<16x16xf32>, vector<16x16xf32> -> vector<16x16xf32>
    %cst_281 = arith.constant dense<0.000000e+00> : vector<16x16xf32>
    %601 = tpu.matmul %599, %599, %cst_281 {dimension_numbers = #tpu.dot_dimension_numbers<[1], [0], [0], [1], [0, 0, 1, 1], [], []>} : vector<16x16xf32>, vector<16x16xf32>, vector<16x16xf32> -> vector<16x16xf32>
    %cst_282 = arith.constant dense<0.000000e+00> : vector<16x16xf32>
    %602 = tpu.matmul %600, %601, %cst_282 {dimension_numbers = #tpu.dot_dimension_numbers<[1], [0], [0], [1], [0, 0, 1, 1], [], []>} : vector<16x16xf32>, vector<16x16xf32>, vector<16x16xf32> -> vector<16x16xf32>
    %cst_283 = arith.constant dense<0.000000e+00> : vector<16x16xf32>
    %603 = tpu.matmul %601, %601, %cst_283 {dimension_numbers = #tpu.dot_dimension_numbers<[1], [0], [0], [1], [0, 0, 1, 1], [], []>} : vector<16x16xf32>, vector<16x16xf32>, vector<16x16xf32> -> vector<16x16xf32>
    %cst_284 = arith.constant dense<0.000000e+00> : vector<16x16xf32>
    %604 = tpu.matmul %602, %603, %cst_284 {dimension_numbers = #tpu.dot_dimension_numbers<[1], [0], [0], [1], [0, 0, 1, 1], [], []>} : vector<16x16xf32>, vector<16x16xf32>, vector<16x16xf32> -> vector<16x16xf32>
    %cst_285 = arith.constant dense<0.000000e+00> : vector<16x16xf32>
    %605 = tpu.matmul %603, %603, %cst_285 {dimension_numbers = #tpu.dot_dimension_numbers<[1], [0], [0], [1], [0, 0, 1, 1], [], []>} : vector<16x16xf32>, vector<16x16xf32>, vector<16x16xf32> -> vector<16x16xf32>
    %cst_286 = arith.constant dense<0.000000e+00> : vector<16x16xf32>
    %606 = tpu.matmul %604, %605, %cst_286 {dimension_numbers = #tpu.dot_dimension_numbers<[1], [0], [0], [1], [0, 0, 1, 1], [], []>} : vector<16x16xf32>, vector<16x16xf32>, vector<16x16xf32> -> vector<16x16xf32>
    %cst_287 = arith.constant dense<0.000000e+00> : vector<1x16xf32>
    %607 = tpu.matmul %447, %606, %cst_287 {dimension_numbers = #tpu.dot_dimension_numbers<[1], [0], [0], [1], [0, 0, 1, 1], [], []>} : vector<1x16xf32>, vector<16x16xf32>, vector<1x16xf32> -> vector<1x16xf32>
    %c1_i32_288 = arith.constant 1 : i32
    %608 = vector.broadcast %c1_i32_288 : i32 to vector<8x16xi32>
    %609 = arith.cmpi eq, %42, %608 : vector<8x16xi32>
    %610 = arith.select %609, %29, %573 : vector<8x16xi1>, vector<8x16xf32>
    %c1_i32_289 = arith.constant 1 : i32
    %611 = vector.broadcast %c1_i32_289 : i32 to vector<16x8xi32>
    %612 = arith.cmpi eq, %43, %611 : vector<16x8xi32>
    %613 = arith.select %612, %41, %575 : vector<16x8xi1>, vector<16x8xf32>
    %cst_290 = arith.constant dense<0.000000e+00> : vector<16x16xf32>
    %614 = tpu.matmul %613, %610, %cst_290 {dimension_numbers = #tpu.dot_dimension_numbers<[1], [0], [0], [1], [0, 0, 1, 1], [], []>} : vector<16x8xf32>, vector<8x16xf32>, vector<16x16xf32> -> vector<16x16xf32>
    %615 = vector.extract_strided_slice %490 {offsets = [1, 0], sizes = [1, 8], strides = [1, 1]} : vector<8x8xf32> to vector<1x8xf32>
    %cst_291 = arith.constant dense<0.000000e+00> : vector<1x16xf32>
    %616 = tpu.matmul %615, %610, %cst_291 {dimension_numbers = #tpu.dot_dimension_numbers<[1], [0], [0], [1], [0, 0, 1, 1], [], []>} : vector<1x8xf32>, vector<8x16xf32>, vector<1x16xf32> -> vector<1x16xf32>
    %cst_292 = arith.constant 2.500000e-05 : f32
    %617 = vector.broadcast %cst_292 : f32 to vector<1x16xf32>
    %618 = arith.mulf %617, %616 : vector<1x16xf32>
    %cst_293 = arith.constant 2.500000e-05 : f32
    %619 = vector.broadcast %cst_293 : f32 to vector<16x16xf32>
    %620 = arith.mulf %619, %614 : vector<16x16xf32>
    %621 = arith.subf %11, %620 : vector<16x16xf32>
    %622 = vector.broadcast %618 : vector<1x16xf32> to vector<16x16xf32>
    %623 = arith.mulf %17, %622 : vector<16x16xf32>
    %624 = arith.addf %621, %623 : vector<16x16xf32>
    %cst_294 = arith.constant dense<0.000000e+00> : vector<16x16xf32>
    %625 = tpu.matmul %624, %624, %cst_294 {dimension_numbers = #tpu.dot_dimension_numbers<[1], [0], [0], [1], [0, 0, 1, 1], [], []>} : vector<16x16xf32>, vector<16x16xf32>, vector<16x16xf32> -> vector<16x16xf32>
    %cst_295 = arith.constant dense<0.000000e+00> : vector<16x16xf32>
    %626 = tpu.matmul %625, %625, %cst_295 {dimension_numbers = #tpu.dot_dimension_numbers<[1], [0], [0], [1], [0, 0, 1, 1], [], []>} : vector<16x16xf32>, vector<16x16xf32>, vector<16x16xf32> -> vector<16x16xf32>
    %cst_296 = arith.constant dense<0.000000e+00> : vector<16x16xf32>
    %627 = tpu.matmul %626, %626, %cst_296 {dimension_numbers = #tpu.dot_dimension_numbers<[1], [0], [0], [1], [0, 0, 1, 1], [], []>} : vector<16x16xf32>, vector<16x16xf32>, vector<16x16xf32> -> vector<16x16xf32>
    %cst_297 = arith.constant dense<0.000000e+00> : vector<16x16xf32>
    %628 = tpu.matmul %627, %627, %cst_297 {dimension_numbers = #tpu.dot_dimension_numbers<[1], [0], [0], [1], [0, 0, 1, 1], [], []>} : vector<16x16xf32>, vector<16x16xf32>, vector<16x16xf32> -> vector<16x16xf32>
    %cst_298 = arith.constant dense<0.000000e+00> : vector<16x16xf32>
    %629 = tpu.matmul %628, %628, %cst_298 {dimension_numbers = #tpu.dot_dimension_numbers<[1], [0], [0], [1], [0, 0, 1, 1], [], []>} : vector<16x16xf32>, vector<16x16xf32>, vector<16x16xf32> -> vector<16x16xf32>
    %cst_299 = arith.constant dense<0.000000e+00> : vector<16x16xf32>
    %630 = tpu.matmul %627, %629, %cst_299 {dimension_numbers = #tpu.dot_dimension_numbers<[1], [0], [0], [1], [0, 0, 1, 1], [], []>} : vector<16x16xf32>, vector<16x16xf32>, vector<16x16xf32> -> vector<16x16xf32>
    %cst_300 = arith.constant dense<0.000000e+00> : vector<16x16xf32>
    %631 = tpu.matmul %629, %629, %cst_300 {dimension_numbers = #tpu.dot_dimension_numbers<[1], [0], [0], [1], [0, 0, 1, 1], [], []>} : vector<16x16xf32>, vector<16x16xf32>, vector<16x16xf32> -> vector<16x16xf32>
    %cst_301 = arith.constant dense<0.000000e+00> : vector<16x16xf32>
    %632 = tpu.matmul %630, %631, %cst_301 {dimension_numbers = #tpu.dot_dimension_numbers<[1], [0], [0], [1], [0, 0, 1, 1], [], []>} : vector<16x16xf32>, vector<16x16xf32>, vector<16x16xf32> -> vector<16x16xf32>
    %cst_302 = arith.constant dense<0.000000e+00> : vector<16x16xf32>
    %633 = tpu.matmul %631, %631, %cst_302 {dimension_numbers = #tpu.dot_dimension_numbers<[1], [0], [0], [1], [0, 0, 1, 1], [], []>} : vector<16x16xf32>, vector<16x16xf32>, vector<16x16xf32> -> vector<16x16xf32>
    %cst_303 = arith.constant dense<0.000000e+00> : vector<16x16xf32>
    %634 = tpu.matmul %632, %633, %cst_303 {dimension_numbers = #tpu.dot_dimension_numbers<[1], [0], [0], [1], [0, 0, 1, 1], [], []>} : vector<16x16xf32>, vector<16x16xf32>, vector<16x16xf32> -> vector<16x16xf32>
    %cst_304 = arith.constant dense<0.000000e+00> : vector<16x16xf32>
    %635 = tpu.matmul %633, %633, %cst_304 {dimension_numbers = #tpu.dot_dimension_numbers<[1], [0], [0], [1], [0, 0, 1, 1], [], []>} : vector<16x16xf32>, vector<16x16xf32>, vector<16x16xf32> -> vector<16x16xf32>
    %cst_305 = arith.constant dense<0.000000e+00> : vector<16x16xf32>
    %636 = tpu.matmul %634, %635, %cst_305 {dimension_numbers = #tpu.dot_dimension_numbers<[1], [0], [0], [1], [0, 0, 1, 1], [], []>} : vector<16x16xf32>, vector<16x16xf32>, vector<16x16xf32> -> vector<16x16xf32>
    %cst_306 = arith.constant dense<0.000000e+00> : vector<16x16xf32>
    %637 = tpu.matmul %635, %635, %cst_306 {dimension_numbers = #tpu.dot_dimension_numbers<[1], [0], [0], [1], [0, 0, 1, 1], [], []>} : vector<16x16xf32>, vector<16x16xf32>, vector<16x16xf32> -> vector<16x16xf32>
    %cst_307 = arith.constant dense<0.000000e+00> : vector<16x16xf32>
    %638 = tpu.matmul %636, %637, %cst_307 {dimension_numbers = #tpu.dot_dimension_numbers<[1], [0], [0], [1], [0, 0, 1, 1], [], []>} : vector<16x16xf32>, vector<16x16xf32>, vector<16x16xf32> -> vector<16x16xf32>
    %cst_308 = arith.constant dense<0.000000e+00> : vector<1x16xf32>
    %639 = tpu.matmul %607, %638, %cst_308 {dimension_numbers = #tpu.dot_dimension_numbers<[1], [0], [0], [1], [0, 0, 1, 1], [], []>} : vector<1x16xf32>, vector<16x16xf32>, vector<1x16xf32> -> vector<1x16xf32>
    %c2_i32_309 = arith.constant 2 : i32
    %640 = vector.broadcast %c2_i32_309 : i32 to vector<8x16xi32>
    %641 = arith.cmpi eq, %42, %640 : vector<8x16xi32>
    %642 = arith.select %641, %29, %573 : vector<8x16xi1>, vector<8x16xf32>
    %c2_i32_310 = arith.constant 2 : i32
    %643 = vector.broadcast %c2_i32_310 : i32 to vector<16x8xi32>
    %644 = arith.cmpi eq, %43, %643 : vector<16x8xi32>
    %645 = arith.select %644, %41, %575 : vector<16x8xi1>, vector<16x8xf32>
    %cst_311 = arith.constant dense<0.000000e+00> : vector<16x16xf32>
    %646 = tpu.matmul %645, %642, %cst_311 {dimension_numbers = #tpu.dot_dimension_numbers<[1], [0], [0], [1], [0, 0, 1, 1], [], []>} : vector<16x8xf32>, vector<8x16xf32>, vector<16x16xf32> -> vector<16x16xf32>
    %647 = vector.extract_strided_slice %490 {offsets = [2, 0], sizes = [1, 8], strides = [1, 1]} : vector<8x8xf32> to vector<1x8xf32>
    %cst_312 = arith.constant dense<0.000000e+00> : vector<1x16xf32>
    %648 = tpu.matmul %647, %642, %cst_312 {dimension_numbers = #tpu.dot_dimension_numbers<[1], [0], [0], [1], [0, 0, 1, 1], [], []>} : vector<1x8xf32>, vector<8x16xf32>, vector<1x16xf32> -> vector<1x16xf32>
    %cst_313 = arith.constant 2.500000e-05 : f32
    %649 = vector.broadcast %cst_313 : f32 to vector<1x16xf32>
    %650 = arith.mulf %649, %648 : vector<1x16xf32>
    %cst_314 = arith.constant 2.500000e-05 : f32
    %651 = vector.broadcast %cst_314 : f32 to vector<16x16xf32>
    %652 = arith.mulf %651, %646 : vector<16x16xf32>
    %653 = arith.subf %11, %652 : vector<16x16xf32>
    %654 = vector.broadcast %650 : vector<1x16xf32> to vector<16x16xf32>
    %655 = arith.mulf %17, %654 : vector<16x16xf32>
    %656 = arith.addf %653, %655 : vector<16x16xf32>
    %cst_315 = arith.constant dense<0.000000e+00> : vector<16x16xf32>
    %657 = tpu.matmul %656, %656, %cst_315 {dimension_numbers = #tpu.dot_dimension_numbers<[1], [0], [0], [1], [0, 0, 1, 1], [], []>} : vector<16x16xf32>, vector<16x16xf32>, vector<16x16xf32> -> vector<16x16xf32>
    %cst_316 = arith.constant dense<0.000000e+00> : vector<16x16xf32>
    %658 = tpu.matmul %657, %657, %cst_316 {dimension_numbers = #tpu.dot_dimension_numbers<[1], [0], [0], [1], [0, 0, 1, 1], [], []>} : vector<16x16xf32>, vector<16x16xf32>, vector<16x16xf32> -> vector<16x16xf32>
    %cst_317 = arith.constant dense<0.000000e+00> : vector<16x16xf32>
    %659 = tpu.matmul %658, %658, %cst_317 {dimension_numbers = #tpu.dot_dimension_numbers<[1], [0], [0], [1], [0, 0, 1, 1], [], []>} : vector<16x16xf32>, vector<16x16xf32>, vector<16x16xf32> -> vector<16x16xf32>
    %cst_318 = arith.constant dense<0.000000e+00> : vector<16x16xf32>
    %660 = tpu.matmul %659, %659, %cst_318 {dimension_numbers = #tpu.dot_dimension_numbers<[1], [0], [0], [1], [0, 0, 1, 1], [], []>} : vector<16x16xf32>, vector<16x16xf32>, vector<16x16xf32> -> vector<16x16xf32>
    %cst_319 = arith.constant dense<0.000000e+00> : vector<16x16xf32>
    %661 = tpu.matmul %660, %660, %cst_319 {dimension_numbers = #tpu.dot_dimension_numbers<[1], [0], [0], [1], [0, 0, 1, 1], [], []>} : vector<16x16xf32>, vector<16x16xf32>, vector<16x16xf32> -> vector<16x16xf32>
    %cst_320 = arith.constant dense<0.000000e+00> : vector<16x16xf32>
    %662 = tpu.matmul %659, %661, %cst_320 {dimension_numbers = #tpu.dot_dimension_numbers<[1], [0], [0], [1], [0, 0, 1, 1], [], []>} : vector<16x16xf32>, vector<16x16xf32>, vector<16x16xf32> -> vector<16x16xf32>
    %cst_321 = arith.constant dense<0.000000e+00> : vector<16x16xf32>
    %663 = tpu.matmul %661, %661, %cst_321 {dimension_numbers = #tpu.dot_dimension_numbers<[1], [0], [0], [1], [0, 0, 1, 1], [], []>} : vector<16x16xf32>, vector<16x16xf32>, vector<16x16xf32> -> vector<16x16xf32>
    %cst_322 = arith.constant dense<0.000000e+00> : vector<16x16xf32>
    %664 = tpu.matmul %662, %663, %cst_322 {dimension_numbers = #tpu.dot_dimension_numbers<[1], [0], [0], [1], [0, 0, 1, 1], [], []>} : vector<16x16xf32>, vector<16x16xf32>, vector<16x16xf32> -> vector<16x16xf32>
    %cst_323 = arith.constant dense<0.000000e+00> : vector<16x16xf32>
    %665 = tpu.matmul %663, %663, %cst_323 {dimension_numbers = #tpu.dot_dimension_numbers<[1], [0], [0], [1], [0, 0, 1, 1], [], []>} : vector<16x16xf32>, vector<16x16xf32>, vector<16x16xf32> -> vector<16x16xf32>
    %cst_324 = arith.constant dense<0.000000e+00> : vector<16x16xf32>
    %666 = tpu.matmul %664, %665, %cst_324 {dimension_numbers = #tpu.dot_dimension_numbers<[1], [0], [0], [1], [0, 0, 1, 1], [], []>} : vector<16x16xf32>, vector<16x16xf32>, vector<16x16xf32> -> vector<16x16xf32>
    %cst_325 = arith.constant dense<0.000000e+00> : vector<16x16xf32>
    %667 = tpu.matmul %665, %665, %cst_325 {dimension_numbers = #tpu.dot_dimension_numbers<[1], [0], [0], [1], [0, 0, 1, 1], [], []>} : vector<16x16xf32>, vector<16x16xf32>, vector<16x16xf32> -> vector<16x16xf32>
    %cst_326 = arith.constant dense<0.000000e+00> : vector<16x16xf32>
    %668 = tpu.matmul %666, %667, %cst_326 {dimension_numbers = #tpu.dot_dimension_numbers<[1], [0], [0], [1], [0, 0, 1, 1], [], []>} : vector<16x16xf32>, vector<16x16xf32>, vector<16x16xf32> -> vector<16x16xf32>
    %cst_327 = arith.constant dense<0.000000e+00> : vector<16x16xf32>
    %669 = tpu.matmul %667, %667, %cst_327 {dimension_numbers = #tpu.dot_dimension_numbers<[1], [0], [0], [1], [0, 0, 1, 1], [], []>} : vector<16x16xf32>, vector<16x16xf32>, vector<16x16xf32> -> vector<16x16xf32>
    %cst_328 = arith.constant dense<0.000000e+00> : vector<16x16xf32>
    %670 = tpu.matmul %668, %669, %cst_328 {dimension_numbers = #tpu.dot_dimension_numbers<[1], [0], [0], [1], [0, 0, 1, 1], [], []>} : vector<16x16xf32>, vector<16x16xf32>, vector<16x16xf32> -> vector<16x16xf32>
    %cst_329 = arith.constant dense<0.000000e+00> : vector<1x16xf32>
    %671 = tpu.matmul %639, %670, %cst_329 {dimension_numbers = #tpu.dot_dimension_numbers<[1], [0], [0], [1], [0, 0, 1, 1], [], []>} : vector<1x16xf32>, vector<16x16xf32>, vector<1x16xf32> -> vector<1x16xf32>
    %c3_i32_330 = arith.constant 3 : i32
    %672 = vector.broadcast %c3_i32_330 : i32 to vector<8x16xi32>
    %673 = arith.cmpi eq, %42, %672 : vector<8x16xi32>
    %674 = arith.select %673, %29, %573 : vector<8x16xi1>, vector<8x16xf32>
    %c3_i32_331 = arith.constant 3 : i32
    %675 = vector.broadcast %c3_i32_331 : i32 to vector<16x8xi32>
    %676 = arith.cmpi eq, %43, %675 : vector<16x8xi32>
    %677 = arith.select %676, %41, %575 : vector<16x8xi1>, vector<16x8xf32>
    %cst_332 = arith.constant dense<0.000000e+00> : vector<16x16xf32>
    %678 = tpu.matmul %677, %674, %cst_332 {dimension_numbers = #tpu.dot_dimension_numbers<[1], [0], [0], [1], [0, 0, 1, 1], [], []>} : vector<16x8xf32>, vector<8x16xf32>, vector<16x16xf32> -> vector<16x16xf32>
    %679 = vector.extract_strided_slice %490 {offsets = [3, 0], sizes = [1, 8], strides = [1, 1]} : vector<8x8xf32> to vector<1x8xf32>
    %cst_333 = arith.constant dense<0.000000e+00> : vector<1x16xf32>
    %680 = tpu.matmul %679, %674, %cst_333 {dimension_numbers = #tpu.dot_dimension_numbers<[1], [0], [0], [1], [0, 0, 1, 1], [], []>} : vector<1x8xf32>, vector<8x16xf32>, vector<1x16xf32> -> vector<1x16xf32>
    %cst_334 = arith.constant 2.500000e-05 : f32
    %681 = vector.broadcast %cst_334 : f32 to vector<1x16xf32>
    %682 = arith.mulf %681, %680 : vector<1x16xf32>
    %cst_335 = arith.constant 2.500000e-05 : f32
    %683 = vector.broadcast %cst_335 : f32 to vector<16x16xf32>
    %684 = arith.mulf %683, %678 : vector<16x16xf32>
    %685 = arith.subf %11, %684 : vector<16x16xf32>
    %686 = vector.broadcast %682 : vector<1x16xf32> to vector<16x16xf32>
    %687 = arith.mulf %17, %686 : vector<16x16xf32>
    %688 = arith.addf %685, %687 : vector<16x16xf32>
    %cst_336 = arith.constant dense<0.000000e+00> : vector<16x16xf32>
    %689 = tpu.matmul %688, %688, %cst_336 {dimension_numbers = #tpu.dot_dimension_numbers<[1], [0], [0], [1], [0, 0, 1, 1], [], []>} : vector<16x16xf32>, vector<16x16xf32>, vector<16x16xf32> -> vector<16x16xf32>
    %cst_337 = arith.constant dense<0.000000e+00> : vector<16x16xf32>
    %690 = tpu.matmul %689, %689, %cst_337 {dimension_numbers = #tpu.dot_dimension_numbers<[1], [0], [0], [1], [0, 0, 1, 1], [], []>} : vector<16x16xf32>, vector<16x16xf32>, vector<16x16xf32> -> vector<16x16xf32>
    %cst_338 = arith.constant dense<0.000000e+00> : vector<16x16xf32>
    %691 = tpu.matmul %690, %690, %cst_338 {dimension_numbers = #tpu.dot_dimension_numbers<[1], [0], [0], [1], [0, 0, 1, 1], [], []>} : vector<16x16xf32>, vector<16x16xf32>, vector<16x16xf32> -> vector<16x16xf32>
    %cst_339 = arith.constant dense<0.000000e+00> : vector<16x16xf32>
    %692 = tpu.matmul %691, %691, %cst_339 {dimension_numbers = #tpu.dot_dimension_numbers<[1], [0], [0], [1], [0, 0, 1, 1], [], []>} : vector<16x16xf32>, vector<16x16xf32>, vector<16x16xf32> -> vector<16x16xf32>
    %cst_340 = arith.constant dense<0.000000e+00> : vector<16x16xf32>
    %693 = tpu.matmul %692, %692, %cst_340 {dimension_numbers = #tpu.dot_dimension_numbers<[1], [0], [0], [1], [0, 0, 1, 1], [], []>} : vector<16x16xf32>, vector<16x16xf32>, vector<16x16xf32> -> vector<16x16xf32>
    %cst_341 = arith.constant dense<0.000000e+00> : vector<16x16xf32>
    %694 = tpu.matmul %691, %693, %cst_341 {dimension_numbers = #tpu.dot_dimension_numbers<[1], [0], [0], [1], [0, 0, 1, 1], [], []>} : vector<16x16xf32>, vector<16x16xf32>, vector<16x16xf32> -> vector<16x16xf32>
    %cst_342 = arith.constant dense<0.000000e+00> : vector<16x16xf32>
    %695 = tpu.matmul %693, %693, %cst_342 {dimension_numbers = #tpu.dot_dimension_numbers<[1], [0], [0], [1], [0, 0, 1, 1], [], []>} : vector<16x16xf32>, vector<16x16xf32>, vector<16x16xf32> -> vector<16x16xf32>
    %cst_343 = arith.constant dense<0.000000e+00> : vector<16x16xf32>
    %696 = tpu.matmul %694, %695, %cst_343 {dimension_numbers = #tpu.dot_dimension_numbers<[1], [0], [0], [1], [0, 0, 1, 1], [], []>} : vector<16x16xf32>, vector<16x16xf32>, vector<16x16xf32> -> vector<16x16xf32>
    %cst_344 = arith.constant dense<0.000000e+00> : vector<16x16xf32>
    %697 = tpu.matmul %695, %695, %cst_344 {dimension_numbers = #tpu.dot_dimension_numbers<[1], [0], [0], [1], [0, 0, 1, 1], [], []>} : vector<16x16xf32>, vector<16x16xf32>, vector<16x16xf32> -> vector<16x16xf32>
    %cst_345 = arith.constant dense<0.000000e+00> : vector<16x16xf32>
    %698 = tpu.matmul %696, %697, %cst_345 {dimension_numbers = #tpu.dot_dimension_numbers<[1], [0], [0], [1], [0, 0, 1, 1], [], []>} : vector<16x16xf32>, vector<16x16xf32>, vector<16x16xf32> -> vector<16x16xf32>
    %cst_346 = arith.constant dense<0.000000e+00> : vector<16x16xf32>
    %699 = tpu.matmul %697, %697, %cst_346 {dimension_numbers = #tpu.dot_dimension_numbers<[1], [0], [0], [1], [0, 0, 1, 1], [], []>} : vector<16x16xf32>, vector<16x16xf32>, vector<16x16xf32> -> vector<16x16xf32>
    %cst_347 = arith.constant dense<0.000000e+00> : vector<16x16xf32>
    %700 = tpu.matmul %698, %699, %cst_347 {dimension_numbers = #tpu.dot_dimension_numbers<[1], [0], [0], [1], [0, 0, 1, 1], [], []>} : vector<16x16xf32>, vector<16x16xf32>, vector<16x16xf32> -> vector<16x16xf32>
    %cst_348 = arith.constant dense<0.000000e+00> : vector<16x16xf32>
    %701 = tpu.matmul %699, %699, %cst_348 {dimension_numbers = #tpu.dot_dimension_numbers<[1], [0], [0], [1], [0, 0, 1, 1], [], []>} : vector<16x16xf32>, vector<16x16xf32>, vector<16x16xf32> -> vector<16x16xf32>
    %cst_349 = arith.constant dense<0.000000e+00> : vector<16x16xf32>
    %702 = tpu.matmul %700, %701, %cst_349 {dimension_numbers = #tpu.dot_dimension_numbers<[1], [0], [0], [1], [0, 0, 1, 1], [], []>} : vector<16x16xf32>, vector<16x16xf32>, vector<16x16xf32> -> vector<16x16xf32>
    %cst_350 = arith.constant dense<0.000000e+00> : vector<1x16xf32>
    %703 = tpu.matmul %671, %702, %cst_350 {dimension_numbers = #tpu.dot_dimension_numbers<[1], [0], [0], [1], [0, 0, 1, 1], [], []>} : vector<1x16xf32>, vector<16x16xf32>, vector<1x16xf32> -> vector<1x16xf32>
    %c4_i32_351 = arith.constant 4 : i32
    %704 = vector.broadcast %c4_i32_351 : i32 to vector<8x16xi32>
    %705 = arith.cmpi eq, %42, %704 : vector<8x16xi32>
    %706 = arith.select %705, %29, %573 : vector<8x16xi1>, vector<8x16xf32>
    %c4_i32_352 = arith.constant 4 : i32
    %707 = vector.broadcast %c4_i32_352 : i32 to vector<16x8xi32>
    %708 = arith.cmpi eq, %43, %707 : vector<16x8xi32>
    %709 = arith.select %708, %41, %575 : vector<16x8xi1>, vector<16x8xf32>
    %cst_353 = arith.constant dense<0.000000e+00> : vector<16x16xf32>
    %710 = tpu.matmul %709, %706, %cst_353 {dimension_numbers = #tpu.dot_dimension_numbers<[1], [0], [0], [1], [0, 0, 1, 1], [], []>} : vector<16x8xf32>, vector<8x16xf32>, vector<16x16xf32> -> vector<16x16xf32>
    %711 = vector.extract_strided_slice %490 {offsets = [4, 0], sizes = [1, 8], strides = [1, 1]} : vector<8x8xf32> to vector<1x8xf32>
    %cst_354 = arith.constant dense<0.000000e+00> : vector<1x16xf32>
    %712 = tpu.matmul %711, %706, %cst_354 {dimension_numbers = #tpu.dot_dimension_numbers<[1], [0], [0], [1], [0, 0, 1, 1], [], []>} : vector<1x8xf32>, vector<8x16xf32>, vector<1x16xf32> -> vector<1x16xf32>
    %cst_355 = arith.constant 2.500000e-05 : f32
    %713 = vector.broadcast %cst_355 : f32 to vector<1x16xf32>
    %714 = arith.mulf %713, %712 : vector<1x16xf32>
    %cst_356 = arith.constant 2.500000e-05 : f32
    %715 = vector.broadcast %cst_356 : f32 to vector<16x16xf32>
    %716 = arith.mulf %715, %710 : vector<16x16xf32>
    %717 = arith.subf %11, %716 : vector<16x16xf32>
    %718 = vector.broadcast %714 : vector<1x16xf32> to vector<16x16xf32>
    %719 = arith.mulf %17, %718 : vector<16x16xf32>
    %720 = arith.addf %717, %719 : vector<16x16xf32>
    %cst_357 = arith.constant dense<0.000000e+00> : vector<16x16xf32>
    %721 = tpu.matmul %720, %720, %cst_357 {dimension_numbers = #tpu.dot_dimension_numbers<[1], [0], [0], [1], [0, 0, 1, 1], [], []>} : vector<16x16xf32>, vector<16x16xf32>, vector<16x16xf32> -> vector<16x16xf32>
    %cst_358 = arith.constant dense<0.000000e+00> : vector<16x16xf32>
    %722 = tpu.matmul %721, %721, %cst_358 {dimension_numbers = #tpu.dot_dimension_numbers<[1], [0], [0], [1], [0, 0, 1, 1], [], []>} : vector<16x16xf32>, vector<16x16xf32>, vector<16x16xf32> -> vector<16x16xf32>
    %cst_359 = arith.constant dense<0.000000e+00> : vector<16x16xf32>
    %723 = tpu.matmul %722, %722, %cst_359 {dimension_numbers = #tpu.dot_dimension_numbers<[1], [0], [0], [1], [0, 0, 1, 1], [], []>} : vector<16x16xf32>, vector<16x16xf32>, vector<16x16xf32> -> vector<16x16xf32>
    %cst_360 = arith.constant dense<0.000000e+00> : vector<16x16xf32>
    %724 = tpu.matmul %723, %723, %cst_360 {dimension_numbers = #tpu.dot_dimension_numbers<[1], [0], [0], [1], [0, 0, 1, 1], [], []>} : vector<16x16xf32>, vector<16x16xf32>, vector<16x16xf32> -> vector<16x16xf32>
    %cst_361 = arith.constant dense<0.000000e+00> : vector<16x16xf32>
    %725 = tpu.matmul %724, %724, %cst_361 {dimension_numbers = #tpu.dot_dimension_numbers<[1], [0], [0], [1], [0, 0, 1, 1], [], []>} : vector<16x16xf32>, vector<16x16xf32>, vector<16x16xf32> -> vector<16x16xf32>
    %cst_362 = arith.constant dense<0.000000e+00> : vector<16x16xf32>
    %726 = tpu.matmul %723, %725, %cst_362 {dimension_numbers = #tpu.dot_dimension_numbers<[1], [0], [0], [1], [0, 0, 1, 1], [], []>} : vector<16x16xf32>, vector<16x16xf32>, vector<16x16xf32> -> vector<16x16xf32>
    %cst_363 = arith.constant dense<0.000000e+00> : vector<16x16xf32>
    %727 = tpu.matmul %725, %725, %cst_363 {dimension_numbers = #tpu.dot_dimension_numbers<[1], [0], [0], [1], [0, 0, 1, 1], [], []>} : vector<16x16xf32>, vector<16x16xf32>, vector<16x16xf32> -> vector<16x16xf32>
    %cst_364 = arith.constant dense<0.000000e+00> : vector<16x16xf32>
    %728 = tpu.matmul %726, %727, %cst_364 {dimension_numbers = #tpu.dot_dimension_numbers<[1], [0], [0], [1], [0, 0, 1, 1], [], []>} : vector<16x16xf32>, vector<16x16xf32>, vector<16x16xf32> -> vector<16x16xf32>
    %cst_365 = arith.constant dense<0.000000e+00> : vector<16x16xf32>
    %729 = tpu.matmul %727, %727, %cst_365 {dimension_numbers = #tpu.dot_dimension_numbers<[1], [0], [0], [1], [0, 0, 1, 1], [], []>} : vector<16x16xf32>, vector<16x16xf32>, vector<16x16xf32> -> vector<16x16xf32>
    %cst_366 = arith.constant dense<0.000000e+00> : vector<16x16xf32>
    %730 = tpu.matmul %728, %729, %cst_366 {dimension_numbers = #tpu.dot_dimension_numbers<[1], [0], [0], [1], [0, 0, 1, 1], [], []>} : vector<16x16xf32>, vector<16x16xf32>, vector<16x16xf32> -> vector<16x16xf32>
    %cst_367 = arith.constant dense<0.000000e+00> : vector<16x16xf32>
    %731 = tpu.matmul %729, %729, %cst_367 {dimension_numbers = #tpu.dot_dimension_numbers<[1], [0], [0], [1], [0, 0, 1, 1], [], []>} : vector<16x16xf32>, vector<16x16xf32>, vector<16x16xf32> -> vector<16x16xf32>
    %cst_368 = arith.constant dense<0.000000e+00> : vector<16x16xf32>
    %732 = tpu.matmul %730, %731, %cst_368 {dimension_numbers = #tpu.dot_dimension_numbers<[1], [0], [0], [1], [0, 0, 1, 1], [], []>} : vector<16x16xf32>, vector<16x16xf32>, vector<16x16xf32> -> vector<16x16xf32>
    %cst_369 = arith.constant dense<0.000000e+00> : vector<16x16xf32>
    %733 = tpu.matmul %731, %731, %cst_369 {dimension_numbers = #tpu.dot_dimension_numbers<[1], [0], [0], [1], [0, 0, 1, 1], [], []>} : vector<16x16xf32>, vector<16x16xf32>, vector<16x16xf32> -> vector<16x16xf32>
    %cst_370 = arith.constant dense<0.000000e+00> : vector<16x16xf32>
    %734 = tpu.matmul %732, %733, %cst_370 {dimension_numbers = #tpu.dot_dimension_numbers<[1], [0], [0], [1], [0, 0, 1, 1], [], []>} : vector<16x16xf32>, vector<16x16xf32>, vector<16x16xf32> -> vector<16x16xf32>
    %cst_371 = arith.constant dense<0.000000e+00> : vector<1x16xf32>
    %735 = tpu.matmul %703, %734, %cst_371 {dimension_numbers = #tpu.dot_dimension_numbers<[1], [0], [0], [1], [0, 0, 1, 1], [], []>} : vector<1x16xf32>, vector<16x16xf32>, vector<1x16xf32> -> vector<1x16xf32>
    %c5_i32_372 = arith.constant 5 : i32
    %736 = vector.broadcast %c5_i32_372 : i32 to vector<8x16xi32>
    %737 = arith.cmpi eq, %42, %736 : vector<8x16xi32>
    %738 = arith.select %737, %29, %573 : vector<8x16xi1>, vector<8x16xf32>
    %c5_i32_373 = arith.constant 5 : i32
    %739 = vector.broadcast %c5_i32_373 : i32 to vector<16x8xi32>
    %740 = arith.cmpi eq, %43, %739 : vector<16x8xi32>
    %741 = arith.select %740, %41, %575 : vector<16x8xi1>, vector<16x8xf32>
    %cst_374 = arith.constant dense<0.000000e+00> : vector<16x16xf32>
    %742 = tpu.matmul %741, %738, %cst_374 {dimension_numbers = #tpu.dot_dimension_numbers<[1], [0], [0], [1], [0, 0, 1, 1], [], []>} : vector<16x8xf32>, vector<8x16xf32>, vector<16x16xf32> -> vector<16x16xf32>
    %743 = vector.extract_strided_slice %490 {offsets = [5, 0], sizes = [1, 8], strides = [1, 1]} : vector<8x8xf32> to vector<1x8xf32>
    %cst_375 = arith.constant dense<0.000000e+00> : vector<1x16xf32>
    %744 = tpu.matmul %743, %738, %cst_375 {dimension_numbers = #tpu.dot_dimension_numbers<[1], [0], [0], [1], [0, 0, 1, 1], [], []>} : vector<1x8xf32>, vector<8x16xf32>, vector<1x16xf32> -> vector<1x16xf32>
    %cst_376 = arith.constant 2.500000e-05 : f32
    %745 = vector.broadcast %cst_376 : f32 to vector<1x16xf32>
    %746 = arith.mulf %745, %744 : vector<1x16xf32>
    %cst_377 = arith.constant 2.500000e-05 : f32
    %747 = vector.broadcast %cst_377 : f32 to vector<16x16xf32>
    %748 = arith.mulf %747, %742 : vector<16x16xf32>
    %749 = arith.subf %11, %748 : vector<16x16xf32>
    %750 = vector.broadcast %746 : vector<1x16xf32> to vector<16x16xf32>
    %751 = arith.mulf %17, %750 : vector<16x16xf32>
    %752 = arith.addf %749, %751 : vector<16x16xf32>
    %cst_378 = arith.constant dense<0.000000e+00> : vector<16x16xf32>
    %753 = tpu.matmul %752, %752, %cst_378 {dimension_numbers = #tpu.dot_dimension_numbers<[1], [0], [0], [1], [0, 0, 1, 1], [], []>} : vector<16x16xf32>, vector<16x16xf32>, vector<16x16xf32> -> vector<16x16xf32>
    %cst_379 = arith.constant dense<0.000000e+00> : vector<16x16xf32>
    %754 = tpu.matmul %753, %753, %cst_379 {dimension_numbers = #tpu.dot_dimension_numbers<[1], [0], [0], [1], [0, 0, 1, 1], [], []>} : vector<16x16xf32>, vector<16x16xf32>, vector<16x16xf32> -> vector<16x16xf32>
    %cst_380 = arith.constant dense<0.000000e+00> : vector<16x16xf32>
    %755 = tpu.matmul %754, %754, %cst_380 {dimension_numbers = #tpu.dot_dimension_numbers<[1], [0], [0], [1], [0, 0, 1, 1], [], []>} : vector<16x16xf32>, vector<16x16xf32>, vector<16x16xf32> -> vector<16x16xf32>
    %cst_381 = arith.constant dense<0.000000e+00> : vector<16x16xf32>
    %756 = tpu.matmul %755, %755, %cst_381 {dimension_numbers = #tpu.dot_dimension_numbers<[1], [0], [0], [1], [0, 0, 1, 1], [], []>} : vector<16x16xf32>, vector<16x16xf32>, vector<16x16xf32> -> vector<16x16xf32>
    %cst_382 = arith.constant dense<0.000000e+00> : vector<16x16xf32>
    %757 = tpu.matmul %756, %756, %cst_382 {dimension_numbers = #tpu.dot_dimension_numbers<[1], [0], [0], [1], [0, 0, 1, 1], [], []>} : vector<16x16xf32>, vector<16x16xf32>, vector<16x16xf32> -> vector<16x16xf32>
    %cst_383 = arith.constant dense<0.000000e+00> : vector<16x16xf32>
    %758 = tpu.matmul %755, %757, %cst_383 {dimension_numbers = #tpu.dot_dimension_numbers<[1], [0], [0], [1], [0, 0, 1, 1], [], []>} : vector<16x16xf32>, vector<16x16xf32>, vector<16x16xf32> -> vector<16x16xf32>
    %cst_384 = arith.constant dense<0.000000e+00> : vector<16x16xf32>
    %759 = tpu.matmul %757, %757, %cst_384 {dimension_numbers = #tpu.dot_dimension_numbers<[1], [0], [0], [1], [0, 0, 1, 1], [], []>} : vector<16x16xf32>, vector<16x16xf32>, vector<16x16xf32> -> vector<16x16xf32>
    %cst_385 = arith.constant dense<0.000000e+00> : vector<16x16xf32>
    %760 = tpu.matmul %758, %759, %cst_385 {dimension_numbers = #tpu.dot_dimension_numbers<[1], [0], [0], [1], [0, 0, 1, 1], [], []>} : vector<16x16xf32>, vector<16x16xf32>, vector<16x16xf32> -> vector<16x16xf32>
    %cst_386 = arith.constant dense<0.000000e+00> : vector<16x16xf32>
    %761 = tpu.matmul %759, %759, %cst_386 {dimension_numbers = #tpu.dot_dimension_numbers<[1], [0], [0], [1], [0, 0, 1, 1], [], []>} : vector<16x16xf32>, vector<16x16xf32>, vector<16x16xf32> -> vector<16x16xf32>
    %cst_387 = arith.constant dense<0.000000e+00> : vector<16x16xf32>
    %762 = tpu.matmul %760, %761, %cst_387 {dimension_numbers = #tpu.dot_dimension_numbers<[1], [0], [0], [1], [0, 0, 1, 1], [], []>} : vector<16x16xf32>, vector<16x16xf32>, vector<16x16xf32> -> vector<16x16xf32>
    %cst_388 = arith.constant dense<0.000000e+00> : vector<16x16xf32>
    %763 = tpu.matmul %761, %761, %cst_388 {dimension_numbers = #tpu.dot_dimension_numbers<[1], [0], [0], [1], [0, 0, 1, 1], [], []>} : vector<16x16xf32>, vector<16x16xf32>, vector<16x16xf32> -> vector<16x16xf32>
    %cst_389 = arith.constant dense<0.000000e+00> : vector<16x16xf32>
    %764 = tpu.matmul %762, %763, %cst_389 {dimension_numbers = #tpu.dot_dimension_numbers<[1], [0], [0], [1], [0, 0, 1, 1], [], []>} : vector<16x16xf32>, vector<16x16xf32>, vector<16x16xf32> -> vector<16x16xf32>
    %cst_390 = arith.constant dense<0.000000e+00> : vector<16x16xf32>
    %765 = tpu.matmul %763, %763, %cst_390 {dimension_numbers = #tpu.dot_dimension_numbers<[1], [0], [0], [1], [0, 0, 1, 1], [], []>} : vector<16x16xf32>, vector<16x16xf32>, vector<16x16xf32> -> vector<16x16xf32>
    %cst_391 = arith.constant dense<0.000000e+00> : vector<16x16xf32>
    %766 = tpu.matmul %764, %765, %cst_391 {dimension_numbers = #tpu.dot_dimension_numbers<[1], [0], [0], [1], [0, 0, 1, 1], [], []>} : vector<16x16xf32>, vector<16x16xf32>, vector<16x16xf32> -> vector<16x16xf32>
    %cst_392 = arith.constant dense<0.000000e+00> : vector<1x16xf32>
    %767 = tpu.matmul %735, %766, %cst_392 {dimension_numbers = #tpu.dot_dimension_numbers<[1], [0], [0], [1], [0, 0, 1, 1], [], []>} : vector<1x16xf32>, vector<16x16xf32>, vector<1x16xf32> -> vector<1x16xf32>
    %c6_i32_393 = arith.constant 6 : i32
    %768 = vector.broadcast %c6_i32_393 : i32 to vector<8x16xi32>
    %769 = arith.cmpi eq, %42, %768 : vector<8x16xi32>
    %770 = arith.select %769, %29, %573 : vector<8x16xi1>, vector<8x16xf32>
    %c6_i32_394 = arith.constant 6 : i32
    %771 = vector.broadcast %c6_i32_394 : i32 to vector<16x8xi32>
    %772 = arith.cmpi eq, %43, %771 : vector<16x8xi32>
    %773 = arith.select %772, %41, %575 : vector<16x8xi1>, vector<16x8xf32>
    %cst_395 = arith.constant dense<0.000000e+00> : vector<16x16xf32>
    %774 = tpu.matmul %773, %770, %cst_395 {dimension_numbers = #tpu.dot_dimension_numbers<[1], [0], [0], [1], [0, 0, 1, 1], [], []>} : vector<16x8xf32>, vector<8x16xf32>, vector<16x16xf32> -> vector<16x16xf32>
    %775 = vector.extract_strided_slice %490 {offsets = [6, 0], sizes = [1, 8], strides = [1, 1]} : vector<8x8xf32> to vector<1x8xf32>
    %cst_396 = arith.constant dense<0.000000e+00> : vector<1x16xf32>
    %776 = tpu.matmul %775, %770, %cst_396 {dimension_numbers = #tpu.dot_dimension_numbers<[1], [0], [0], [1], [0, 0, 1, 1], [], []>} : vector<1x8xf32>, vector<8x16xf32>, vector<1x16xf32> -> vector<1x16xf32>
    %cst_397 = arith.constant 2.500000e-05 : f32
    %777 = vector.broadcast %cst_397 : f32 to vector<1x16xf32>
    %778 = arith.mulf %777, %776 : vector<1x16xf32>
    %cst_398 = arith.constant 2.500000e-05 : f32
    %779 = vector.broadcast %cst_398 : f32 to vector<16x16xf32>
    %780 = arith.mulf %779, %774 : vector<16x16xf32>
    %781 = arith.subf %11, %780 : vector<16x16xf32>
    %782 = vector.broadcast %778 : vector<1x16xf32> to vector<16x16xf32>
    %783 = arith.mulf %17, %782 : vector<16x16xf32>
    %784 = arith.addf %781, %783 : vector<16x16xf32>
    %cst_399 = arith.constant dense<0.000000e+00> : vector<16x16xf32>
    %785 = tpu.matmul %784, %784, %cst_399 {dimension_numbers = #tpu.dot_dimension_numbers<[1], [0], [0], [1], [0, 0, 1, 1], [], []>} : vector<16x16xf32>, vector<16x16xf32>, vector<16x16xf32> -> vector<16x16xf32>
    %cst_400 = arith.constant dense<0.000000e+00> : vector<16x16xf32>
    %786 = tpu.matmul %785, %785, %cst_400 {dimension_numbers = #tpu.dot_dimension_numbers<[1], [0], [0], [1], [0, 0, 1, 1], [], []>} : vector<16x16xf32>, vector<16x16xf32>, vector<16x16xf32> -> vector<16x16xf32>
    %cst_401 = arith.constant dense<0.000000e+00> : vector<16x16xf32>
    %787 = tpu.matmul %786, %786, %cst_401 {dimension_numbers = #tpu.dot_dimension_numbers<[1], [0], [0], [1], [0, 0, 1, 1], [], []>} : vector<16x16xf32>, vector<16x16xf32>, vector<16x16xf32> -> vector<16x16xf32>
    %cst_402 = arith.constant dense<0.000000e+00> : vector<16x16xf32>
    %788 = tpu.matmul %787, %787, %cst_402 {dimension_numbers = #tpu.dot_dimension_numbers<[1], [0], [0], [1], [0, 0, 1, 1], [], []>} : vector<16x16xf32>, vector<16x16xf32>, vector<16x16xf32> -> vector<16x16xf32>
    %cst_403 = arith.constant dense<0.000000e+00> : vector<16x16xf32>
    %789 = tpu.matmul %788, %788, %cst_403 {dimension_numbers = #tpu.dot_dimension_numbers<[1], [0], [0], [1], [0, 0, 1, 1], [], []>} : vector<16x16xf32>, vector<16x16xf32>, vector<16x16xf32> -> vector<16x16xf32>
    %cst_404 = arith.constant dense<0.000000e+00> : vector<16x16xf32>
    %790 = tpu.matmul %787, %789, %cst_404 {dimension_numbers = #tpu.dot_dimension_numbers<[1], [0], [0], [1], [0, 0, 1, 1], [], []>} : vector<16x16xf32>, vector<16x16xf32>, vector<16x16xf32> -> vector<16x16xf32>
    %cst_405 = arith.constant dense<0.000000e+00> : vector<16x16xf32>
    %791 = tpu.matmul %789, %789, %cst_405 {dimension_numbers = #tpu.dot_dimension_numbers<[1], [0], [0], [1], [0, 0, 1, 1], [], []>} : vector<16x16xf32>, vector<16x16xf32>, vector<16x16xf32> -> vector<16x16xf32>
    %cst_406 = arith.constant dense<0.000000e+00> : vector<16x16xf32>
    %792 = tpu.matmul %790, %791, %cst_406 {dimension_numbers = #tpu.dot_dimension_numbers<[1], [0], [0], [1], [0, 0, 1, 1], [], []>} : vector<16x16xf32>, vector<16x16xf32>, vector<16x16xf32> -> vector<16x16xf32>
    %cst_407 = arith.constant dense<0.000000e+00> : vector<16x16xf32>
    %793 = tpu.matmul %791, %791, %cst_407 {dimension_numbers = #tpu.dot_dimension_numbers<[1], [0], [0], [1], [0, 0, 1, 1], [], []>} : vector<16x16xf32>, vector<16x16xf32>, vector<16x16xf32> -> vector<16x16xf32>
    %cst_408 = arith.constant dense<0.000000e+00> : vector<16x16xf32>
    %794 = tpu.matmul %792, %793, %cst_408 {dimension_numbers = #tpu.dot_dimension_numbers<[1], [0], [0], [1], [0, 0, 1, 1], [], []>} : vector<16x16xf32>, vector<16x16xf32>, vector<16x16xf32> -> vector<16x16xf32>
    %cst_409 = arith.constant dense<0.000000e+00> : vector<16x16xf32>
    %795 = tpu.matmul %793, %793, %cst_409 {dimension_numbers = #tpu.dot_dimension_numbers<[1], [0], [0], [1], [0, 0, 1, 1], [], []>} : vector<16x16xf32>, vector<16x16xf32>, vector<16x16xf32> -> vector<16x16xf32>
    %cst_410 = arith.constant dense<0.000000e+00> : vector<16x16xf32>
    %796 = tpu.matmul %794, %795, %cst_410 {dimension_numbers = #tpu.dot_dimension_numbers<[1], [0], [0], [1], [0, 0, 1, 1], [], []>} : vector<16x16xf32>, vector<16x16xf32>, vector<16x16xf32> -> vector<16x16xf32>
    %cst_411 = arith.constant dense<0.000000e+00> : vector<16x16xf32>
    %797 = tpu.matmul %795, %795, %cst_411 {dimension_numbers = #tpu.dot_dimension_numbers<[1], [0], [0], [1], [0, 0, 1, 1], [], []>} : vector<16x16xf32>, vector<16x16xf32>, vector<16x16xf32> -> vector<16x16xf32>
    %cst_412 = arith.constant dense<0.000000e+00> : vector<16x16xf32>
    %798 = tpu.matmul %796, %797, %cst_412 {dimension_numbers = #tpu.dot_dimension_numbers<[1], [0], [0], [1], [0, 0, 1, 1], [], []>} : vector<16x16xf32>, vector<16x16xf32>, vector<16x16xf32> -> vector<16x16xf32>
    %cst_413 = arith.constant dense<0.000000e+00> : vector<1x16xf32>
    %799 = tpu.matmul %767, %798, %cst_413 {dimension_numbers = #tpu.dot_dimension_numbers<[1], [0], [0], [1], [0, 0, 1, 1], [], []>} : vector<1x16xf32>, vector<16x16xf32>, vector<1x16xf32> -> vector<1x16xf32>
    %c7_i32_414 = arith.constant 7 : i32
    %800 = vector.broadcast %c7_i32_414 : i32 to vector<8x16xi32>
    %801 = arith.cmpi eq, %42, %800 : vector<8x16xi32>
    %802 = arith.select %801, %29, %573 : vector<8x16xi1>, vector<8x16xf32>
    %c7_i32_415 = arith.constant 7 : i32
    %803 = vector.broadcast %c7_i32_415 : i32 to vector<16x8xi32>
    %804 = arith.cmpi eq, %43, %803 : vector<16x8xi32>
    %805 = arith.select %804, %41, %575 : vector<16x8xi1>, vector<16x8xf32>
    %cst_416 = arith.constant dense<0.000000e+00> : vector<16x16xf32>
    %806 = tpu.matmul %805, %802, %cst_416 {dimension_numbers = #tpu.dot_dimension_numbers<[1], [0], [0], [1], [0, 0, 1, 1], [], []>} : vector<16x8xf32>, vector<8x16xf32>, vector<16x16xf32> -> vector<16x16xf32>
    %807 = vector.extract_strided_slice %490 {offsets = [7, 0], sizes = [1, 8], strides = [1, 1]} : vector<8x8xf32> to vector<1x8xf32>
    %cst_417 = arith.constant dense<0.000000e+00> : vector<1x16xf32>
    %808 = tpu.matmul %807, %802, %cst_417 {dimension_numbers = #tpu.dot_dimension_numbers<[1], [0], [0], [1], [0, 0, 1, 1], [], []>} : vector<1x8xf32>, vector<8x16xf32>, vector<1x16xf32> -> vector<1x16xf32>
    %cst_418 = arith.constant 2.500000e-05 : f32
    %809 = vector.broadcast %cst_418 : f32 to vector<1x16xf32>
    %810 = arith.mulf %809, %808 : vector<1x16xf32>
    %cst_419 = arith.constant 2.500000e-05 : f32
    %811 = vector.broadcast %cst_419 : f32 to vector<16x16xf32>
    %812 = arith.mulf %811, %806 : vector<16x16xf32>
    %813 = arith.subf %11, %812 : vector<16x16xf32>
    %814 = vector.broadcast %810 : vector<1x16xf32> to vector<16x16xf32>
    %815 = arith.mulf %17, %814 : vector<16x16xf32>
    %816 = arith.addf %813, %815 : vector<16x16xf32>
    %cst_420 = arith.constant dense<0.000000e+00> : vector<16x16xf32>
    %817 = tpu.matmul %816, %816, %cst_420 {dimension_numbers = #tpu.dot_dimension_numbers<[1], [0], [0], [1], [0, 0, 1, 1], [], []>} : vector<16x16xf32>, vector<16x16xf32>, vector<16x16xf32> -> vector<16x16xf32>
    %cst_421 = arith.constant dense<0.000000e+00> : vector<16x16xf32>
    %818 = tpu.matmul %817, %817, %cst_421 {dimension_numbers = #tpu.dot_dimension_numbers<[1], [0], [0], [1], [0, 0, 1, 1], [], []>} : vector<16x16xf32>, vector<16x16xf32>, vector<16x16xf32> -> vector<16x16xf32>
    %cst_422 = arith.constant dense<0.000000e+00> : vector<16x16xf32>
    %819 = tpu.matmul %818, %818, %cst_422 {dimension_numbers = #tpu.dot_dimension_numbers<[1], [0], [0], [1], [0, 0, 1, 1], [], []>} : vector<16x16xf32>, vector<16x16xf32>, vector<16x16xf32> -> vector<16x16xf32>
    %cst_423 = arith.constant dense<0.000000e+00> : vector<16x16xf32>
    %820 = tpu.matmul %819, %819, %cst_423 {dimension_numbers = #tpu.dot_dimension_numbers<[1], [0], [0], [1], [0, 0, 1, 1], [], []>} : vector<16x16xf32>, vector<16x16xf32>, vector<16x16xf32> -> vector<16x16xf32>
    %cst_424 = arith.constant dense<0.000000e+00> : vector<16x16xf32>
    %821 = tpu.matmul %820, %820, %cst_424 {dimension_numbers = #tpu.dot_dimension_numbers<[1], [0], [0], [1], [0, 0, 1, 1], [], []>} : vector<16x16xf32>, vector<16x16xf32>, vector<16x16xf32> -> vector<16x16xf32>
    %cst_425 = arith.constant dense<0.000000e+00> : vector<16x16xf32>
    %822 = tpu.matmul %819, %821, %cst_425 {dimension_numbers = #tpu.dot_dimension_numbers<[1], [0], [0], [1], [0, 0, 1, 1], [], []>} : vector<16x16xf32>, vector<16x16xf32>, vector<16x16xf32> -> vector<16x16xf32>
    %cst_426 = arith.constant dense<0.000000e+00> : vector<16x16xf32>
    %823 = tpu.matmul %821, %821, %cst_426 {dimension_numbers = #tpu.dot_dimension_numbers<[1], [0], [0], [1], [0, 0, 1, 1], [], []>} : vector<16x16xf32>, vector<16x16xf32>, vector<16x16xf32> -> vector<16x16xf32>
    %cst_427 = arith.constant dense<0.000000e+00> : vector<16x16xf32>
    %824 = tpu.matmul %822, %823, %cst_427 {dimension_numbers = #tpu.dot_dimension_numbers<[1], [0], [0], [1], [0, 0, 1, 1], [], []>} : vector<16x16xf32>, vector<16x16xf32>, vector<16x16xf32> -> vector<16x16xf32>
    %cst_428 = arith.constant dense<0.000000e+00> : vector<16x16xf32>
    %825 = tpu.matmul %823, %823, %cst_428 {dimension_numbers = #tpu.dot_dimension_numbers<[1], [0], [0], [1], [0, 0, 1, 1], [], []>} : vector<16x16xf32>, vector<16x16xf32>, vector<16x16xf32> -> vector<16x16xf32>
    %cst_429 = arith.constant dense<0.000000e+00> : vector<16x16xf32>
    %826 = tpu.matmul %824, %825, %cst_429 {dimension_numbers = #tpu.dot_dimension_numbers<[1], [0], [0], [1], [0, 0, 1, 1], [], []>} : vector<16x16xf32>, vector<16x16xf32>, vector<16x16xf32> -> vector<16x16xf32>
    %cst_430 = arith.constant dense<0.000000e+00> : vector<16x16xf32>
    %827 = tpu.matmul %825, %825, %cst_430 {dimension_numbers = #tpu.dot_dimension_numbers<[1], [0], [0], [1], [0, 0, 1, 1], [], []>} : vector<16x16xf32>, vector<16x16xf32>, vector<16x16xf32> -> vector<16x16xf32>
    %cst_431 = arith.constant dense<0.000000e+00> : vector<16x16xf32>
    %828 = tpu.matmul %826, %827, %cst_431 {dimension_numbers = #tpu.dot_dimension_numbers<[1], [0], [0], [1], [0, 0, 1, 1], [], []>} : vector<16x16xf32>, vector<16x16xf32>, vector<16x16xf32> -> vector<16x16xf32>
    %cst_432 = arith.constant dense<0.000000e+00> : vector<16x16xf32>
    %829 = tpu.matmul %827, %827, %cst_432 {dimension_numbers = #tpu.dot_dimension_numbers<[1], [0], [0], [1], [0, 0, 1, 1], [], []>} : vector<16x16xf32>, vector<16x16xf32>, vector<16x16xf32> -> vector<16x16xf32>
    %cst_433 = arith.constant dense<0.000000e+00> : vector<16x16xf32>
    %830 = tpu.matmul %828, %829, %cst_433 {dimension_numbers = #tpu.dot_dimension_numbers<[1], [0], [0], [1], [0, 0, 1, 1], [], []>} : vector<16x16xf32>, vector<16x16xf32>, vector<16x16xf32> -> vector<16x16xf32>
    %cst_434 = arith.constant dense<0.000000e+00> : vector<1x16xf32>
    %831 = tpu.matmul %799, %830, %cst_434 {dimension_numbers = #tpu.dot_dimension_numbers<[1], [0], [0], [1], [0, 0, 1, 1], [], []>} : vector<1x16xf32>, vector<16x16xf32>, vector<1x16xf32> -> vector<1x16xf32>
    %832 = vector.extract_strided_slice %831 {offsets = [0, 0], sizes = [1, 8], strides = [1, 1]} : vector<1x16xf32> to vector<1x8xf32>
    %c3 = arith.constant 3 : index
    %c0_435 = arith.constant 0 : index
    %c0_436 = arith.constant 0 : index
    %833 = vector.load %arg34[%c3, %c0_435, %c0_436] : memref<8x8x8xf32, #tpu.memory_space<vmem>>, vector<1x8x8xf32>
    %834 = vector.shape_cast %833 : vector<1x8x8xf32> to vector<8x8xf32>
    %cst_437 = arith.constant 5.000000e-01 : f32
    %835 = vector.broadcast %cst_437 : f32 to vector<8x8xf32>
    %836 = arith.mulf %835, %483 : vector<8x8xf32>
    %837 = math.exp %836 : vector<8x8xf32>
    %838 = arith.mulf %834, %837 : vector<8x8xf32>
    %839 = arith.addf %482, %838 : vector<8x8xf32>
    %c2_438 = arith.constant 2 : index
    %c0_439 = arith.constant 0 : index
    %c0_440 = arith.constant 0 : index
    %840 = vector.load %arg33[%c2_438, %c0_439, %c0_440] : memref<7x8x8xf32, #tpu.memory_space<vmem>>, vector<1x8x8xf32>
    %841 = vector.shape_cast %840 : vector<1x8x8xf32> to vector<8x8xf32>
    %c0_441 = arith.constant 0 : index
    %c0_442 = arith.constant 0 : index
    %842 = vector.load %arg11[%c0_441, %c0_442] : memref<24x32xf32, #tpu.memory_space<vmem>>, vector<8x32xf32>
    %cst_443 = arith.constant dense<0.000000e+00> : vector<8x32xf32>
    %843 = tpu.matmul %839, %842, %cst_443 {dimension_numbers = #tpu.dot_dimension_numbers<[1], [0], [0], [1], [0, 0, 1, 1], [], []>} : vector<8x8xf32>, vector<8x32xf32>, vector<8x32xf32> -> vector<8x32xf32>
    %c8_444 = arith.constant 8 : index
    %c0_445 = arith.constant 0 : index
    %844 = vector.load %arg11[%c8_444, %c0_445] : memref<24x32xf32, #tpu.memory_space<vmem>>, vector<8x32xf32>
    %cst_446 = arith.constant dense<0.000000e+00> : vector<1x32xf32>
    %845 = tpu.matmul %832, %844, %cst_446 {dimension_numbers = #tpu.dot_dimension_numbers<[1], [0], [0], [1], [0, 0, 1, 1], [], []>} : vector<1x8xf32>, vector<8x32xf32>, vector<1x32xf32> -> vector<1x32xf32>
    %846 = vector.broadcast %845 : vector<1x32xf32> to vector<8x32xf32>
    %847 = arith.addf %843, %846 : vector<8x32xf32>
    %c16_447 = arith.constant 16 : index
    %c0_448 = arith.constant 0 : index
    %848 = vector.load %arg11[%c16_447, %c0_448] : memref<24x32xf32, #tpu.memory_space<vmem>>, vector<8x32xf32>
    %cst_449 = arith.constant dense<0.000000e+00> : vector<8x32xf32>
    %849 = tpu.matmul %841, %848, %cst_449 {dimension_numbers = #tpu.dot_dimension_numbers<[1], [0], [0], [1], [0, 0, 1, 1], [], []>} : vector<8x8xf32>, vector<8x32xf32>, vector<8x32xf32> -> vector<8x32xf32>
    %850 = arith.addf %847, %849 : vector<8x32xf32>
    %c0_450 = arith.constant 0 : index
    %c0_451 = arith.constant 0 : index
    %851 = vector.load %arg12[%c0_450, %c0_451] : memref<1x32xf32, #tpu.memory_space<vmem>>, vector<1x32xf32>
    %852 = vector.broadcast %851 : vector<1x32xf32> to vector<8x32xf32>
    %853 = arith.addf %850, %852 : vector<8x32xf32>
    %cst_452 = arith.constant 0.000000e+00 : f32
    %854 = vector.broadcast %cst_452 : f32 to vector<8x32xf32>
    %855 = arith.maximumf %853, %854 : vector<8x32xf32>
    %c0_453 = arith.constant 0 : index
    %c0_454 = arith.constant 0 : index
    %856 = vector.load %arg13[%c0_453, %c0_454] : memref<32x16xf32, #tpu.memory_space<vmem>>, vector<32x16xf32>
    %cst_455 = arith.constant dense<0.000000e+00> : vector<8x16xf32>
    %857 = tpu.matmul %855, %856, %cst_455 {dimension_numbers = #tpu.dot_dimension_numbers<[1], [0], [0], [1], [0, 0, 1, 1], [], []>} : vector<8x32xf32>, vector<32x16xf32>, vector<8x16xf32> -> vector<8x16xf32>
    %c0_456 = arith.constant 0 : index
    %c0_457 = arith.constant 0 : index
    %858 = vector.load %arg14[%c0_456, %c0_457] : memref<1x16xf32, #tpu.memory_space<vmem>>, vector<1x16xf32>
    %859 = vector.broadcast %858 : vector<1x16xf32> to vector<8x16xf32>
    %860 = arith.addf %857, %859 : vector<8x16xf32>
    %861 = arith.negf %860 : vector<8x16xf32>
    %862 = math.exp %861 : vector<8x16xf32>
    %cst_458 = arith.constant 1.000000e+00 : f32
    %863 = vector.broadcast %cst_458 : f32 to vector<8x16xf32>
    %864 = arith.addf %863, %862 : vector<8x16xf32>
    %865 = arith.divf %863, %864 : vector<8x16xf32>
    %866 = vector.extract_strided_slice %865 {offsets = [0, 0], sizes = [8, 8], strides = [1, 1]} : vector<8x16xf32> to vector<8x8xf32>
    %867 = vector.extract_strided_slice %865 {offsets = [0, 8], sizes = [8, 8], strides = [1, 1]} : vector<8x16xf32> to vector<8x8xf32>
    %c4 = arith.constant 4 : index
    %c0_459 = arith.constant 0 : index
    %c0_460 = arith.constant 0 : index
    %868 = vector.load %arg34[%c4, %c0_459, %c0_460] : memref<8x8x8xf32, #tpu.memory_space<vmem>>, vector<1x8x8xf32>
    %869 = vector.shape_cast %868 : vector<1x8x8xf32> to vector<8x8xf32>
    %cst_461 = arith.constant 5.000000e-01 : f32
    %870 = vector.broadcast %cst_461 : f32 to vector<8x8xf32>
    %871 = arith.mulf %870, %867 : vector<8x8xf32>
    %872 = math.exp %871 : vector<8x8xf32>
    %873 = arith.mulf %869, %872 : vector<8x8xf32>
    %874 = arith.addf %866, %873 : vector<8x8xf32>
    %c3_462 = arith.constant 3 : index
    %c0_463 = arith.constant 0 : index
    %c0_464 = arith.constant 0 : index
    %875 = vector.load %arg33[%c3_462, %c0_463, %c0_464] : memref<7x8x8xf32, #tpu.memory_space<vmem>>, vector<1x8x8xf32>
    %876 = vector.shape_cast %875 : vector<1x8x8xf32> to vector<8x8xf32>
    %c0_465 = arith.constant 0 : index
    %c0_466 = arith.constant 0 : index
    %877 = vector.load %arg15[%c0_465, %c0_466] : memref<24x32xf32, #tpu.memory_space<vmem>>, vector<8x32xf32>
    %cst_467 = arith.constant dense<0.000000e+00> : vector<8x32xf32>
    %878 = tpu.matmul %874, %877, %cst_467 {dimension_numbers = #tpu.dot_dimension_numbers<[1], [0], [0], [1], [0, 0, 1, 1], [], []>} : vector<8x8xf32>, vector<8x32xf32>, vector<8x32xf32> -> vector<8x32xf32>
    %c8_468 = arith.constant 8 : index
    %c0_469 = arith.constant 0 : index
    %879 = vector.load %arg15[%c8_468, %c0_469] : memref<24x32xf32, #tpu.memory_space<vmem>>, vector<8x32xf32>
    %cst_470 = arith.constant dense<0.000000e+00> : vector<1x32xf32>
    %880 = tpu.matmul %832, %879, %cst_470 {dimension_numbers = #tpu.dot_dimension_numbers<[1], [0], [0], [1], [0, 0, 1, 1], [], []>} : vector<1x8xf32>, vector<8x32xf32>, vector<1x32xf32> -> vector<1x32xf32>
    %881 = vector.broadcast %880 : vector<1x32xf32> to vector<8x32xf32>
    %882 = arith.addf %878, %881 : vector<8x32xf32>
    %c16_471 = arith.constant 16 : index
    %c0_472 = arith.constant 0 : index
    %883 = vector.load %arg15[%c16_471, %c0_472] : memref<24x32xf32, #tpu.memory_space<vmem>>, vector<8x32xf32>
    %cst_473 = arith.constant dense<0.000000e+00> : vector<8x32xf32>
    %884 = tpu.matmul %876, %883, %cst_473 {dimension_numbers = #tpu.dot_dimension_numbers<[1], [0], [0], [1], [0, 0, 1, 1], [], []>} : vector<8x8xf32>, vector<8x32xf32>, vector<8x32xf32> -> vector<8x32xf32>
    %885 = arith.addf %882, %884 : vector<8x32xf32>
    %c0_474 = arith.constant 0 : index
    %c0_475 = arith.constant 0 : index
    %886 = vector.load %arg16[%c0_474, %c0_475] : memref<1x32xf32, #tpu.memory_space<vmem>>, vector<1x32xf32>
    %887 = vector.broadcast %886 : vector<1x32xf32> to vector<8x32xf32>
    %888 = arith.addf %885, %887 : vector<8x32xf32>
    %cst_476 = arith.constant 0.000000e+00 : f32
    %889 = vector.broadcast %cst_476 : f32 to vector<8x32xf32>
    %890 = arith.maximumf %888, %889 : vector<8x32xf32>
    %c0_477 = arith.constant 0 : index
    %c0_478 = arith.constant 0 : index
    %891 = vector.load %arg17[%c0_477, %c0_478] : memref<32x16xf32, #tpu.memory_space<vmem>>, vector<32x16xf32>
    %cst_479 = arith.constant dense<0.000000e+00> : vector<8x16xf32>
    %892 = tpu.matmul %890, %891, %cst_479 {dimension_numbers = #tpu.dot_dimension_numbers<[1], [0], [0], [1], [0, 0, 1, 1], [], []>} : vector<8x32xf32>, vector<32x16xf32>, vector<8x16xf32> -> vector<8x16xf32>
    %c0_480 = arith.constant 0 : index
    %c0_481 = arith.constant 0 : index
    %893 = vector.load %arg18[%c0_480, %c0_481] : memref<1x16xf32, #tpu.memory_space<vmem>>, vector<1x16xf32>
    %894 = vector.broadcast %893 : vector<1x16xf32> to vector<8x16xf32>
    %895 = arith.addf %892, %894 : vector<8x16xf32>
    %896 = arith.negf %895 : vector<8x16xf32>
    %897 = math.exp %896 : vector<8x16xf32>
    %cst_482 = arith.constant 1.000000e+00 : f32
    %898 = vector.broadcast %cst_482 : f32 to vector<8x16xf32>
    %899 = arith.addf %898, %897 : vector<8x16xf32>
    %900 = arith.divf %898, %899 : vector<8x16xf32>
    %901 = vector.extract_strided_slice %900 {offsets = [0, 0], sizes = [8, 8], strides = [1, 1]} : vector<8x16xf32> to vector<8x8xf32>
    %902 = vector.extract_strided_slice %900 {offsets = [0, 8], sizes = [8, 8], strides = [1, 1]} : vector<8x16xf32> to vector<8x8xf32>
    %c5 = arith.constant 5 : index
    %c0_483 = arith.constant 0 : index
    %c0_484 = arith.constant 0 : index
    %903 = vector.load %arg34[%c5, %c0_483, %c0_484] : memref<8x8x8xf32, #tpu.memory_space<vmem>>, vector<1x8x8xf32>
    %904 = vector.shape_cast %903 : vector<1x8x8xf32> to vector<8x8xf32>
    %cst_485 = arith.constant 5.000000e-01 : f32
    %905 = vector.broadcast %cst_485 : f32 to vector<8x8xf32>
    %906 = arith.mulf %905, %902 : vector<8x8xf32>
    %907 = math.exp %906 : vector<8x8xf32>
    %908 = arith.mulf %904, %907 : vector<8x8xf32>
    %909 = arith.addf %901, %908 : vector<8x8xf32>
    %c4_486 = arith.constant 4 : index
    %c0_487 = arith.constant 0 : index
    %c0_488 = arith.constant 0 : index
    %910 = vector.load %arg33[%c4_486, %c0_487, %c0_488] : memref<7x8x8xf32, #tpu.memory_space<vmem>>, vector<1x8x8xf32>
    %911 = vector.shape_cast %910 : vector<1x8x8xf32> to vector<8x8xf32>
    %c0_489 = arith.constant 0 : index
    %c0_490 = arith.constant 0 : index
    %912 = vector.load %arg19[%c0_489, %c0_490] : memref<24x32xf32, #tpu.memory_space<vmem>>, vector<8x32xf32>
    %cst_491 = arith.constant dense<0.000000e+00> : vector<8x32xf32>
    %913 = tpu.matmul %909, %912, %cst_491 {dimension_numbers = #tpu.dot_dimension_numbers<[1], [0], [0], [1], [0, 0, 1, 1], [], []>} : vector<8x8xf32>, vector<8x32xf32>, vector<8x32xf32> -> vector<8x32xf32>
    %c8_492 = arith.constant 8 : index
    %c0_493 = arith.constant 0 : index
    %914 = vector.load %arg19[%c8_492, %c0_493] : memref<24x32xf32, #tpu.memory_space<vmem>>, vector<8x32xf32>
    %cst_494 = arith.constant dense<0.000000e+00> : vector<1x32xf32>
    %915 = tpu.matmul %832, %914, %cst_494 {dimension_numbers = #tpu.dot_dimension_numbers<[1], [0], [0], [1], [0, 0, 1, 1], [], []>} : vector<1x8xf32>, vector<8x32xf32>, vector<1x32xf32> -> vector<1x32xf32>
    %916 = vector.broadcast %915 : vector<1x32xf32> to vector<8x32xf32>
    %917 = arith.addf %913, %916 : vector<8x32xf32>
    %c16_495 = arith.constant 16 : index
    %c0_496 = arith.constant 0 : index
    %918 = vector.load %arg19[%c16_495, %c0_496] : memref<24x32xf32, #tpu.memory_space<vmem>>, vector<8x32xf32>
    %cst_497 = arith.constant dense<0.000000e+00> : vector<8x32xf32>
    %919 = tpu.matmul %911, %918, %cst_497 {dimension_numbers = #tpu.dot_dimension_numbers<[1], [0], [0], [1], [0, 0, 1, 1], [], []>} : vector<8x8xf32>, vector<8x32xf32>, vector<8x32xf32> -> vector<8x32xf32>
    %920 = arith.addf %917, %919 : vector<8x32xf32>
    %c0_498 = arith.constant 0 : index
    %c0_499 = arith.constant 0 : index
    %921 = vector.load %arg20[%c0_498, %c0_499] : memref<1x32xf32, #tpu.memory_space<vmem>>, vector<1x32xf32>
    %922 = vector.broadcast %921 : vector<1x32xf32> to vector<8x32xf32>
    %923 = arith.addf %920, %922 : vector<8x32xf32>
    %cst_500 = arith.constant 0.000000e+00 : f32
    %924 = vector.broadcast %cst_500 : f32 to vector<8x32xf32>
    %925 = arith.maximumf %923, %924 : vector<8x32xf32>
    %c0_501 = arith.constant 0 : index
    %c0_502 = arith.constant 0 : index
    %926 = vector.load %arg21[%c0_501, %c0_502] : memref<32x16xf32, #tpu.memory_space<vmem>>, vector<32x16xf32>
    %cst_503 = arith.constant dense<0.000000e+00> : vector<8x16xf32>
    %927 = tpu.matmul %925, %926, %cst_503 {dimension_numbers = #tpu.dot_dimension_numbers<[1], [0], [0], [1], [0, 0, 1, 1], [], []>} : vector<8x32xf32>, vector<32x16xf32>, vector<8x16xf32> -> vector<8x16xf32>
    %c0_504 = arith.constant 0 : index
    %c0_505 = arith.constant 0 : index
    %928 = vector.load %arg22[%c0_504, %c0_505] : memref<1x16xf32, #tpu.memory_space<vmem>>, vector<1x16xf32>
    %929 = vector.broadcast %928 : vector<1x16xf32> to vector<8x16xf32>
    %930 = arith.addf %927, %929 : vector<8x16xf32>
    %931 = arith.negf %930 : vector<8x16xf32>
    %932 = math.exp %931 : vector<8x16xf32>
    %cst_506 = arith.constant 1.000000e+00 : f32
    %933 = vector.broadcast %cst_506 : f32 to vector<8x16xf32>
    %934 = arith.addf %933, %932 : vector<8x16xf32>
    %935 = arith.divf %933, %934 : vector<8x16xf32>
    %936 = vector.extract_strided_slice %935 {offsets = [0, 0], sizes = [8, 8], strides = [1, 1]} : vector<8x16xf32> to vector<8x8xf32>
    %937 = vector.extract_strided_slice %935 {offsets = [0, 8], sizes = [8, 8], strides = [1, 1]} : vector<8x16xf32> to vector<8x8xf32>
    %c6 = arith.constant 6 : index
    %c0_507 = arith.constant 0 : index
    %c0_508 = arith.constant 0 : index
    %938 = vector.load %arg34[%c6, %c0_507, %c0_508] : memref<8x8x8xf32, #tpu.memory_space<vmem>>, vector<1x8x8xf32>
    %939 = vector.shape_cast %938 : vector<1x8x8xf32> to vector<8x8xf32>
    %cst_509 = arith.constant 5.000000e-01 : f32
    %940 = vector.broadcast %cst_509 : f32 to vector<8x8xf32>
    %941 = arith.mulf %940, %937 : vector<8x8xf32>
    %942 = math.exp %941 : vector<8x8xf32>
    %943 = arith.mulf %939, %942 : vector<8x8xf32>
    %944 = arith.addf %936, %943 : vector<8x8xf32>
    %c5_510 = arith.constant 5 : index
    %c0_511 = arith.constant 0 : index
    %c0_512 = arith.constant 0 : index
    %945 = vector.load %arg33[%c5_510, %c0_511, %c0_512] : memref<7x8x8xf32, #tpu.memory_space<vmem>>, vector<1x8x8xf32>
    %946 = vector.shape_cast %945 : vector<1x8x8xf32> to vector<8x8xf32>
    %c0_513 = arith.constant 0 : index
    %c0_514 = arith.constant 0 : index
    %947 = vector.load %arg23[%c0_513, %c0_514] : memref<16x32xf32, #tpu.memory_space<vmem>>, vector<8x32xf32>
    %cst_515 = arith.constant dense<0.000000e+00> : vector<8x32xf32>
    %948 = tpu.matmul %944, %947, %cst_515 {dimension_numbers = #tpu.dot_dimension_numbers<[1], [0], [0], [1], [0, 0, 1, 1], [], []>} : vector<8x8xf32>, vector<8x32xf32>, vector<8x32xf32> -> vector<8x32xf32>
    %c8_516 = arith.constant 8 : index
    %c0_517 = arith.constant 0 : index
    %949 = vector.load %arg23[%c8_516, %c0_517] : memref<16x32xf32, #tpu.memory_space<vmem>>, vector<8x32xf32>
    %cst_518 = arith.constant dense<0.000000e+00> : vector<8x32xf32>
    %950 = tpu.matmul %946, %949, %cst_518 {dimension_numbers = #tpu.dot_dimension_numbers<[1], [0], [0], [1], [0, 0, 1, 1], [], []>} : vector<8x8xf32>, vector<8x32xf32>, vector<8x32xf32> -> vector<8x32xf32>
    %951 = arith.addf %948, %950 : vector<8x32xf32>
    %c0_519 = arith.constant 0 : index
    %c0_520 = arith.constant 0 : index
    %952 = vector.load %arg24[%c0_519, %c0_520] : memref<1x32xf32, #tpu.memory_space<vmem>>, vector<1x32xf32>
    %953 = vector.broadcast %952 : vector<1x32xf32> to vector<8x32xf32>
    %954 = arith.addf %951, %953 : vector<8x32xf32>
    %cst_521 = arith.constant 0.000000e+00 : f32
    %955 = vector.broadcast %cst_521 : f32 to vector<8x32xf32>
    %956 = arith.maximumf %954, %955 : vector<8x32xf32>
    %c0_522 = arith.constant 0 : index
    %c0_523 = arith.constant 0 : index
    %957 = vector.load %arg25[%c0_522, %c0_523] : memref<32x16xf32, #tpu.memory_space<vmem>>, vector<32x16xf32>
    %cst_524 = arith.constant dense<0.000000e+00> : vector<8x16xf32>
    %958 = tpu.matmul %956, %957, %cst_524 {dimension_numbers = #tpu.dot_dimension_numbers<[1], [0], [0], [1], [0, 0, 1, 1], [], []>} : vector<8x32xf32>, vector<32x16xf32>, vector<8x16xf32> -> vector<8x16xf32>
    %c0_525 = arith.constant 0 : index
    %c0_526 = arith.constant 0 : index
    %959 = vector.load %arg26[%c0_525, %c0_526] : memref<1x16xf32, #tpu.memory_space<vmem>>, vector<1x16xf32>
    %960 = vector.broadcast %959 : vector<1x16xf32> to vector<8x16xf32>
    %961 = arith.addf %958, %960 : vector<8x16xf32>
    %962 = arith.negf %961 : vector<8x16xf32>
    %963 = math.exp %962 : vector<8x16xf32>
    %cst_527 = arith.constant 1.000000e+00 : f32
    %964 = vector.broadcast %cst_527 : f32 to vector<8x16xf32>
    %965 = arith.addf %964, %963 : vector<8x16xf32>
    %966 = arith.divf %964, %965 : vector<8x16xf32>
    %967 = vector.extract_strided_slice %966 {offsets = [0, 0], sizes = [8, 8], strides = [1, 1]} : vector<8x16xf32> to vector<8x8xf32>
    %968 = math.log %67 : vector<1x8xf32>
    %969 = vector.shape_cast %968 : vector<1x8xf32> to vector<1x1x8xf32>
    %cst_528 = arith.constant dense<0.000000e+00> : vector<1xf32>
    %970 = vector.multi_reduction <add>, %969, %cst_528 [1, 2] : vector<1x1x8xf32> to vector<1xf32>
    %971 = vector.shape_cast %970 : vector<1xf32> to vector<1x1x1xf32>
    %972 = vector.extract %971[0, 0, 0] : f32 from vector<1x1x1xf32>
    %973 = vector.broadcast %972 : f32 to vector<1x1xf32>
    %cst_529 = arith.constant 0.000000e+00 : f32
    %974 = vector.broadcast %cst_529 : f32 to vector<1x1xf32>
    %975 = arith.subf %974, %973 : vector<1x1xf32>
    %976 = math.log %98 : vector<8x8xf32>
    %977 = vector.shape_cast %976 : vector<8x8xf32> to vector<1x8x8xf32>
    %cst_530 = arith.constant dense<0.000000e+00> : vector<1xf32>
    %978 = vector.multi_reduction <add>, %977, %cst_530 [1, 2] : vector<1x8x8xf32> to vector<1xf32>
    %979 = vector.shape_cast %978 : vector<1xf32> to vector<1x1x1xf32>
    %980 = vector.extract %979[0, 0, 0] : f32 from vector<1x1x1xf32>
    %981 = vector.broadcast %980 : f32 to vector<1x1xf32>
    %982 = arith.subf %975, %981 : vector<1x1xf32>
    %983 = math.log %483 : vector<8x8xf32>
    %984 = vector.shape_cast %983 : vector<8x8xf32> to vector<1x8x8xf32>
    %cst_531 = arith.constant dense<0.000000e+00> : vector<1xf32>
    %985 = vector.multi_reduction <add>, %984, %cst_531 [1, 2] : vector<1x8x8xf32> to vector<1xf32>
    %986 = vector.shape_cast %985 : vector<1xf32> to vector<1x1x1xf32>
    %987 = vector.extract %986[0, 0, 0] : f32 from vector<1x1x1xf32>
    %988 = vector.broadcast %987 : f32 to vector<1x1xf32>
    %989 = arith.subf %982, %988 : vector<1x1xf32>
    %990 = math.log %867 : vector<8x8xf32>
    %991 = vector.shape_cast %990 : vector<8x8xf32> to vector<1x8x8xf32>
    %cst_532 = arith.constant dense<0.000000e+00> : vector<1xf32>
    %992 = vector.multi_reduction <add>, %991, %cst_532 [1, 2] : vector<1x8x8xf32> to vector<1xf32>
    %993 = vector.shape_cast %992 : vector<1xf32> to vector<1x1x1xf32>
    %994 = vector.extract %993[0, 0, 0] : f32 from vector<1x1x1xf32>
    %995 = vector.broadcast %994 : f32 to vector<1x1xf32>
    %996 = arith.subf %989, %995 : vector<1x1xf32>
    %997 = vector.extract_strided_slice %967 {offsets = [7, 0], sizes = [1, 8], strides = [1, 1]} : vector<8x8xf32> to vector<1x8xf32>
    %998 = vector.extract_strided_slice %901 {offsets = [7, 0], sizes = [1, 8], strides = [1, 1]} : vector<8x8xf32> to vector<1x8xf32>
    %999 = arith.subf %997, %998 : vector<1x8xf32>
    %1000 = vector.extract_strided_slice %97 {offsets = [7, 0], sizes = [1, 8], strides = [1, 1]} : vector<8x8xf32> to vector<1x8xf32>
    %1001 = vector.extract_strided_slice %936 {offsets = [7, 0], sizes = [1, 8], strides = [1, 1]} : vector<8x8xf32> to vector<1x8xf32>
    %1002 = arith.subf %1000, %1001 : vector<1x8xf32>
    %1003 = vector.extract_strided_slice %967 {offsets = [7, 0], sizes = [1, 8], strides = [1, 1]} : vector<8x8xf32> to vector<1x8xf32>
    %1004 = arith.subf %66, %1003 : vector<1x8xf32>
    %1005 = arith.mulf %999, %999 : vector<1x8xf32>
    %1006 = vector.shape_cast %1005 : vector<1x8xf32> to vector<1x1x8xf32>
    %cst_533 = arith.constant dense<0.000000e+00> : vector<1xf32>
    %1007 = vector.multi_reduction <add>, %1006, %cst_533 [1, 2] : vector<1x1x8xf32> to vector<1xf32>
    %1008 = vector.shape_cast %1007 : vector<1xf32> to vector<1x1x1xf32>
    %1009 = vector.extract %1008[0, 0, 0] : f32 from vector<1x1x1xf32>
    %1010 = vector.broadcast %1009 : f32 to vector<1x1xf32>
    %cst_534 = arith.constant 8.000000e+00 : f32
    %1011 = vector.broadcast %cst_534 : f32 to vector<1x1xf32>
    %1012 = arith.divf %1010, %1011 : vector<1x1xf32>
    %1013 = arith.mulf %1002, %1002 : vector<1x8xf32>
    %1014 = vector.shape_cast %1013 : vector<1x8xf32> to vector<1x1x8xf32>
    %cst_535 = arith.constant dense<0.000000e+00> : vector<1xf32>
    %1015 = vector.multi_reduction <add>, %1014, %cst_535 [1, 2] : vector<1x1x8xf32> to vector<1xf32>
    %1016 = vector.shape_cast %1015 : vector<1xf32> to vector<1x1x1xf32>
    %1017 = vector.extract %1016[0, 0, 0] : f32 from vector<1x1x1xf32>
    %1018 = vector.broadcast %1017 : f32 to vector<1x1xf32>
    %cst_536 = arith.constant 8.000000e+00 : f32
    %1019 = vector.broadcast %cst_536 : f32 to vector<1x1xf32>
    %1020 = arith.divf %1018, %1019 : vector<1x1xf32>
    %1021 = arith.addf %1012, %1020 : vector<1x1xf32>
    %1022 = arith.mulf %1004, %1004 : vector<1x8xf32>
    %1023 = vector.shape_cast %1022 : vector<1x8xf32> to vector<1x1x8xf32>
    %cst_537 = arith.constant dense<0.000000e+00> : vector<1xf32>
    %1024 = vector.multi_reduction <add>, %1023, %cst_537 [1, 2] : vector<1x1x8xf32> to vector<1xf32>
    %1025 = vector.shape_cast %1024 : vector<1xf32> to vector<1x1x1xf32>
    %1026 = vector.extract %1025[0, 0, 0] : f32 from vector<1x1x1xf32>
    %1027 = vector.broadcast %1026 : f32 to vector<1x1xf32>
    %cst_538 = arith.constant 8.000000e+00 : f32
    %1028 = vector.broadcast %cst_538 : f32 to vector<1x1xf32>
    %1029 = arith.divf %1027, %1028 : vector<1x1xf32>
    %1030 = arith.addf %1021, %1029 : vector<1x1xf32>
    %1031 = arith.addf %996, %1030 : vector<1x1xf32>
    %c0_539 = arith.constant 0 : index
    %c0_540 = arith.constant 0 : index
    %1032 = vector.load %arg35[%c0_539, %c0_540] : memref<1x1xf32, #tpu.memory_space<vmem>>, vector<1x1xf32>
    tpu.vector_store %arg35[%c0_539, %c0_540], %1031 {strides = array<i32>} : memref<1x1xf32, #tpu.memory_space<vmem>>, vector<1x1xf32>,
    return
  }
}

</mosaic_0001>

<bundles_post_ra>
// kernel: hvae_forward.3
= control target key start
LH: loop header
LB: loop body
LE: loop exit
PB: predicated region body
PF: predicated region fallthrough
CT: control target
= control target key end

     0   :  { %s29869_s6 = smov 1   ;;  %s29870_s10 = smov 2   ;;  %s31457_s0 = inlined_call_operand.smem [shape: u32[36], index: -1, kind: input, shape index: {}] }
   0x1   :  { %s29923_s5 = sld [smem:[%s31457_s0]]   ;;  %s29871_s14 = smov 3  }
   0x2   :  { %s29928_s9 = sld [smem:[%s31457_s0 + %s29869_s6]]   ;;  %s29872_s18 = smov 4  }
   0x3   :  { %s29933_s13 = sld [smem:[%s31457_s0 + %s29870_s10]]   ;;  %s29873_s22 = smov 5  }
   0x4   :  { %s29938_s17 = sld [smem:[%s31457_s0 + %s29871_s14]]   ;;  %s29874_s26 = smov 6  }
   0x5   :  { %s29943_s21 = sld [smem:[%s31457_s0 + %s29872_s18]]   ;;  %s29875_s30 = smov 7  }
   0x6   :  { %s29948_s25 = sld [smem:[%s31457_s0 + %s29873_s22]]   ;;  %s29876_s4 = smov 8  }
   0x7   :  { %s29953_s29 = sld [smem:[%s31457_s0 + %s29874_s26]]   ;;  %s29877_s10 = smov 9  }
   0x8   :  { %s29958_s3 = sld [smem:[%s31457_s0 + %s29875_s30]]   ;;  %s29878_s15 = smov 10  }
   0x9   :  { %s29963_s8 = sld [smem:[%s31457_s0 + %s29876_s4]]   ;;  %s29879_s20 = smov 11  }
   0xa   :  { %s29968_s14 = sld [smem:[%s31457_s0 + %s29877_s10]]   ;;  %s29880_s26 = smov 12  }
   0xb   :  { %s29973_s19 = sld [smem:[%s31457_s0 + %s29878_s15]]   ;;  %s29881_s1 = smov 13  }
   0xc   :  { %s29978_s24 = sld [smem:[%s31457_s0 + %s29879_s20]]   ;;  %s29882_s7 = smov 14  }
   0xd   :  { %s29983_s30 = sld [smem:[%s31457_s0 + %s29880_s26]]   ;;  %s29883_s15 = smov 15  }
   0xe   :  { %s29988_s6 = sld [smem:[%s31457_s0 + %s29881_s1]]   ;;  %s29884_s22 = smov 16  }
   0xf   :  { %s29993_s12 = sld [smem:[%s31457_s0 + %s29882_s7]]   ;;  %s29885_s28 = smov 17  }
  0x10   :  { %s29998_s20 = sld [smem:[%s31457_s0 + %s29883_s15]]   ;;  %s29886_s7 = smov 18  }
  0x11   :  { %s30003_s27 = sld [smem:[%s31457_s0 + %s29884_s22]]   ;;  %s29887_s15 = smov 19  }
  0x12   :  { %s30008_s4 = sld [smem:[%s31457_s0 + %s29885_s28]]   ;;  %s29888_s22 = smov 20  }
  0x13   :  { %31471 = sst [smem:[#allocation5_spill]] %s29983_s30  ;;  %s29889_s28 = smov 21  }
  0x15   :  { %31472 = sst [smem:[#allocation6_spill]] %s29993_s12 }
  0x16   :  { %31473 = sst [smem:[#allocation7_spill]] %s29998_s20 }
  0x17   :  { %31474 = sst [smem:[#allocation8_spill]] %s30003_s27 }
  0x18   :  { %31475 = sst [smem:[#allocation9_spill]] %s30008_s4 }
  0x19   :  { %s30013_s12 = sld [smem:[%s31457_s0 + %s29886_s7]]   ;;  %s29890_s7 = smov 22  }
  0x1a   :  { %s30018_s20 = sld [smem:[%s31457_s0 + %s29887_s15]]   ;;  %s29891_s15 = smov 23  }
  0x1b   :  { %s30023_s27 = sld [smem:[%s31457_s0 + %s29888_s22]]   ;;  %s29892_s22 = smov 24  }
  0x1c   :  { %s30028_s4 = sld [smem:[%s31457_s0 + %s29889_s28]]   ;;  %s29893_s28 = smov 25  }
  0x1f   :  { %31476 = sst [smem:[#allocation10_spill]] %s30013_s12 }
  0x20   :  { %31477 = sst [smem:[#allocation11_spill]] %s30018_s20 }
  0x21   :  { %31478 = sst [smem:[#allocation12_spill]] %s30023_s27 }
  0x22   :  { %31479 = sst [smem:[#allocation13_spill]] %s30028_s4 }
  0x23   :  { %s30033_s12 = sld [smem:[%s31457_s0 + %s29890_s7]]   ;;  %s29894_s7 = smov 26  }
  0x24   :  { %s30038_s20 = sld [smem:[%s31457_s0 + %s29891_s15]]   ;;  %s29895_s15 = smov 31  }
  0x25   :  { %s30043_s27 = sld [smem:[%s31457_s0 + %s29892_s22]]   ;;  %s29896_s22 = smov 32  }
  0x26   :  { %s30048_s4 = sld [smem:[%s31457_s0 + %s29893_s28]]   ;;  %s29897_s28 = smov 33  }
  0x29   :  { %31480 = sst [smem:[#allocation14_spill]] %s30033_s12 }
  0x2a   :  { %31481 = sst [smem:[#allocation15_spill]] %s30038_s20 }
  0x2b   :  { %31482 = sst [smem:[#allocation16_spill]] %s30043_s27 }
  0x2c   :  { %31483 = sst [smem:[#allocation17_spill]] %s30048_s4 }
  0x2d   :  { %s30053_s12 = sld [smem:[%s31457_s0 + %s29894_s7]]   ;;  %s29898_s7 = smov 34  }
  0x2e   :  { %s30058_s20 = sld [smem:[%s31457_s0 + %s29895_s15]]   ;;  %s29899_s15 = smov 35  }
  0x2f   :  { %s30063_s27 = sld [smem:[%s31457_s0 + %s29896_s22]]  }
  0x30   :  { %s30068_s4 = sld [smem:[%s31457_s0 + %s29897_s28]]  }
  0x31   :  { %s30078_s30 = sld [smem:[%s31457_s0 + %s29899_s15]]  }
  0x33   :  { %31484 = sst [smem:[#allocation18_spill]] %s30053_s12 }
  0x34   :  { %s30073_s12 = sld [smem:[%s31457_s0 + %s29898_s7]]  }
  0x35   :  { %v167_v0 = vld [vmem:[%s29928_s9] sm:$0xff]  ;;  %v168_v1 = vld [vmem:[%s29928_s9 + $0x8] sm:$0xff]  ;;  %v169_v2 = vld [vmem:[%s29928_s9 + $0x10] sm:$0xff]  ;;  %v29900_v3 = vmov 0.0|0.0   ;;  %vm29901_vm0 = vmmov 0   ;;  %v29902_v6 = vmov 0.0  }
  0x36   :  { %28703 = vmatprep.subr.bf16.mxu0 %v29900_v3  ;;  %v28704_v4 = vpack.c.bf16 %v168_v1, %v167_v0  ;;  %v170_v5 = vld [vmem:[%s29928_s9 + $0x18] sm:$0xff]  ;;  %26664 = vmatprep.mubr.msk.f32.mxu0 %vm29901_vm0, %v29902_v6  ;;  %v247_v7 = vld [vmem:[%s29938_s17] sm:$0xff]  ;;  %v248_v8 = vld [vmem:[%s29938_s17 + $0x8] sm:$0xff] }
  0x37   :  { %28709 = vmatprep.subr.bf16.mxu1 %v29900_v3  ;;  %26675 = vmatprep.mubr.msk.f32.mxu1 %vm29901_vm0, %v29902_v6 }
  0x38   :  { %76 = vsyncpa [#allocation3], 0  ;;  %28705 = vmatpush3.bf16.msra.mxu0 %v28704_v4  ;;  %v28707_v9 = vpack.c.bf16 %v170_v5, %v169_v2  ;;  %v28710_v10 = vpack.c.bf16 %v248_v8, %v247_v7  ;;  %v166_v11 = vld [vmem:[%s29923_s5] sm:$0x1]  ;;  %vm172_vm1 = vcmask 261120   ;;  %v249_v12 = vld [vmem:[%s29938_s17 + $0x10] sm:$0xff]  ;;  %v147_v47 = vlaneseq }
  0x39   :  { %28706 = vmatprep.subr.bf16.mxu0 %v29900_v3  ;;  %v250_v13 = vld [vmem:[%s29938_s17 + $0x18] sm:$0xff]  ;;  %v326_v15 = vld [vmem:[%s29948_s25] sm:$0xff]  ;;  %v327_v16 = vld [vmem:[%s29948_s25 + $0x8] sm:$0xff]  ;;  %vm335_vm2 = vcmask 523264   ;;  %v29903_v48 = vmov 1966171168  }
  0x3a   :  { %28711 = vmatpush3.bf16.msra.mxu1 %v28710_v10  ;;  %v28713_v14 = vpack.c.bf16 %v250_v13, %v249_v12  ;;  %v328_v17 = vld [vmem:[%s29948_s25 + $0x10] sm:$0xff]  ;;  %v28716_v18 = vpack.c.bf16 %v327_v16, %v326_v15  ;;  %v329_v19 = vld [vmem:[%s29948_s25 + $0x18] sm:$0xff]  ;;  %v330_v21 = vld [vmem:[%s29948_s25 + $0x20] sm:$0xff]  ;;  %v421_v49 = vunpack.c.l.s4 %v29903_v48  ;;  %v30122_v50 = vshrl.u32 %v147_v47, 7  ;;  %s29904_s0 = smov 120   ;;  %s31485_s5 = sld [smem:[#allocation5_spill]] }
  0x3b   :  { %28712 = vmatprep.subr.bf16.mxu1 %v29900_v3  ;;  %v28719_v20 = vpack.c.bf16 %v329_v19, %v328_v17  ;;  %v331_v22 = vld [vmem:[%s29948_s25 + $0x28] sm:$0xff]  ;;  %v171_v24 = vld [vmem:[%s29933_s13] sm:$0x1]  ;;  %v332_v29 = vld [vmem:[%s29948_s25 + $0x30] sm:$0xff]  ;;  %vm442_vm3 = vcmask 64512   ;;  %vm1170_vm11 = vcmask 130048  }
  0x3c   :  { %28708 = vmatpush3.bf16.msra.mxu0 %v28707_v9  ;;  %v28722_v23 = vpack.c.bf16 %v331_v22, %v330_v21  ;;  %v333_v30 = vld [vmem:[%s29948_s25 + $0x38] sm:$0xff]  ;;  %v251_v32 = vld [vmem:[%s29943_s21] sm:$0x1]  ;;  %v422_v51 = vunpack.c.0.s8 %v421_v49  ;;  %v441_v52 = vld [vmem:[%s29958_s3 + $0x8] sm:$0xff]  ;;  %v30146_v7 = vsub.s32 0, %v30122_v50  ;;  %vm1001_vm7 = vcmp.eq.s32.totalorder %v30122_v50, 0 }
  0x3d   :  { %28715 = vmatprep.subr.bf16.mxu0 %v29900_v3  ;;  %v28725_v31 = vpack.c.bf16 %v333_v30, %v332_v29  ;;  %v334_v37 = vld [vmem:[%s29953_s29] sm:$0x1]  ;;  %v603_v0 = vld [vmem:[%s29968_s14 + $0x8] sm:$0xff]  ;;  %v604_v2 = vld [vmem:[%s29968_s14 + $0x10] sm:$0xff]  ;;  %v29906_v29 = vmov 0   ;;  %v29907_v30 = vmov 1.0  }
  0x3e   :  { %28714 = vmatpush3.bf16.msra.mxu1 %v28713_v14  ;;  %v425_v53 = vsub.s32 %v422_v51, %v30122_v50  ;;  %v415_v57 = vld [vmem:[%s30063_s27] sm:$0x1]  ;;  %v605_v4 = vld [vmem:[%s29968_s14 + $0x18] sm:$0xff]  ;;  %29767 = vset.pattern.permute.xlu1 %v29906_v29  ;;  %vm2372_vm12 = vcmp.eq.s32.totalorder %v30122_v50, 1  ;;  %vm3745_vm14 = vcmp.eq.s32.totalorder %v30122_v50, 2  ;;  %s31486_s9 = sld [smem:[#allocation6_spill]] }
  0x3f   :  { %26665 = vmatmul.mubr.msk.f32.vlgmr.msra.gmra.mrb[0].mxu0 %vm172_vm1, %v166_v11  ;;  %26697 = vmatprep.subr.mxu1 %v29902_v6  ;;  %v440_v61 = vld [vmem:[%s29958_s3] sm:$0xff]  ;;  %v28731_v5 = vpack.c.bf16 %v605_v4, %v604_v2  ;;  %s31495_s13 = sld [smem:[#allocation7_spill]]  ;;  %s31496_s17 = sld [smem:[#allocation11_spill]] }
  0x40   :  { %26694 = vmatprep.mubr.msk.f32.mxu0 %vm29901_vm0, %v29902_v6  ;;  %28717 = vmatpush3.bf16.msra.mxu0 %v28716_v18  ;;  %v439_v62 = vld [vmem:[%s30068_s4] sm:$0xff]  ;;  %s31497_s21 = sld [smem:[#allocation9_spill]]  ;;  %s31498_s25 = sld [smem:[#allocation8_spill]] }
  0x41   :  { %28718 = vmatprep.subr.bf16.mxu0 %v29900_v3  ;;  %v602_v63 = vld [vmem:[%s29968_s14] sm:$0xff]  ;;  %s31499_s29 = sld [smem:[#allocation10_spill]]  ;;  %s31500_s3 = sld [smem:[#allocation13_spill]] }
  0x42   :  { %v28728_v1 = vpack.c.bf16 %v603_v0, %v602_v63  ;;  %v24974_v12 = vld [vmem:[%s29963_s8] ss:$0 sm:$0xff]  ;;  %s31501_s8 = sld [smem:[#allocation12_spill]]  ;;  %s31502_s14 = sld [smem:[#allocation15_spill]] }
  0x43   :  { %v24975_v17 = vld [vmem:[%s29973_s19] ss:$0 sm:$0xff]  ;;  %s31503_s19 = sld [smem:[#allocation14_spill]]  ;;  %s29914_s1 = smov [#allocation2]  }
  0x44   :  { %28720 = vmatpush3.bf16.msra.mxu0 %v28719_v20  ;;  %s24929_s2 = sshll.u32 %s29914_s1, 4  ;;  %s24930_s2 = int_to_ptr.vmem [resolvable:$true] %s24929_s2 }
  0x45   :  { %28721 = vmatprep.subr.bf16.mxu0 %v29900_v3  ;;  %s29845_s7 = scalar_lea.vmem %s24930_s2, 16  ;;  %s29849_s10 = scalar_lea.vmem %s24930_s2, 32 }
  0x46   :  { %p29846_p0 = scmp.ne.s32.totalorder %s24930_s2, %s29845_s7  ;;  %p29850_p1 = scmp.lt.s32.totalorder %s24930_s2, %s24930_s2 }
  0x47   :  { %p29851_p2 = scmp.lt.s32.totalorder %s29849_s10, %s29845_s7 }
  0x48   :  { %28723 = vmatpush3.bf16.msra.mxu0 %v28722_v23 }
  0x49   :  { %28724 = vmatprep.subr.bf16.mxu0 %v29900_v3  ;;  %p29852_p3 = por %p29851_p2, %p29850_p1 }
  0x4b   :  { %p29853_p4 = pnand %p29852_p3, %p29846_p0 }
  0x4c   :  { %28726 = vmatpush3.bf16.msra.mxu0 %v28725_v31 }
 0x112   :  { %v242_v25 = vpop.f32.mrb[0].mxu0 }
 0x113   :  { %v243_v26 = vadd.f32 %v242_v25, %v171_v24  ;;  %v26666_v27 = vpop.f32.mrb[1].mxu0 }
 0x114   :  { %v30157_v27 = vand.u32 127, %v147_v47 }
 0x115   :  { %v246_v28 = vmax.f32 %v243_v26, 0.0 }
 0x116   :  { %vm151_vm4 = vcmp.eq.s32.totalorder %v30122_v50, %v30157_v27  ;;  %vm160_vm6 = vcmp.eq.s32.totalorder %v30157_v27, 8  ;;  %vm1003_vm9 = vcmp.eq.s32.totalorder %v30157_v27, 0  ;;  %vm2374_vm13 = vcmp.eq.s32.totalorder %v30157_v27, 1 }
 0x117   :  { %26676 = vmatmul.mubr.msk.f32.vlgmr.msra.gmra.mrb[0].mxu1 %vm172_vm1, %v246_v28  ;;  %v29905_v28 = vmov 2   ;;  %vm3747_vm15 = vcmp.eq.s32.totalorder %v30157_v27, 2 }
 0x118   :  { %26699 = vmatprep.mubr.msk.f32.mxu1 %vm29901_vm0, %v29902_v6  ;;  %26698 = vmatpush3.msra.mxu1 %v441_v52 }
 0x119   :  { %26702 = vmatprep.subr.mxu1 %v29902_v6  ;;  %29769 = vset.pattern.permute.xlu0 %v29905_v28 }
 0x1ea   :  { %v321_v33 = vpop.f32.mrb[0].mxu1 }
 0x1eb   :  { %v322_v34 = vadd.f32 %v321_v33, %v251_v32  ;;  %v26677_v35 = vpop.f32.mrb[1].mxu1  ;;  %v693_v32 = vld [vmem:[%s30073_s12] sm:$0xff] }
 0x1ed   :  { %v325_v36 = vmax.f32 %v322_v34, 0.0 }
 0x1ef   :  { %26695 = vmatmul.mubr.msk.f32.vlgmr.msra.gmra.mrb[2].mxu0 %vm335_vm2, %v325_v36  ;;  %v30180_v36 = vsel %vm151_vm4, 1.0, %v29902_v6  ;;  %vm5118_vm2 = vcmp.eq.s32.totalorder %v30122_v50, 3 }
 0x2c2   :  { %v405_v38 = vpop.f32.mrb[2].mxu0 }
 0x2c3   :  { %v406_v39 = vadd.f32 %v405_v38, %v334_v37  ;;  %v26696_v40 = vpop.f32.mrb[3].mxu0  ;;  %v29908_v37 = vmov 5   ;;  %v29909_v38 = vmov 1  }
 0x2c4   :  { %v29911_v40 = vmov 4  }
 0x2c5   :  { %v24971_v41 = vmul.f32 -1.442695, %v406_v39  ;;  %v29910_v39 = vmov 3  }
 0x2c7   :  { %29792 = vpow2.f32 %v24971_v41  ;;  %v29912_v41 = vmov 6  }
 0x2d1   :  { %v29793_v42 = vpop.eup %29792 }
 0x2d2   :  { %v412_v43 = vadd.f32 1.0, %v29793_v42  ;;  %v29913_v42 = vmov 7  }
 0x2d4   :  { %29794 = vrcp.f32 %v412_v43 }
 0x2de   :  { %v30119_v44 = vpop.eup %29794 }
 0x2df   :  { %v416_v45 = vmul.f32 0.5, %v30119_v44 }
 0x2e1   :  { %v417_v46 = vmul.f32 1.442695, %v416_v45 }
 0x2e3   :  { %29796 = vpow2.f32 %v417_v46 }
 0x2ed   :  { %v29797_v54 = vpop.eup %29796 }
 0x2ee   :  { %v426_v55 = vrot.slane %v29797_v54, %v425_v53 }
 0x2f0   :  { %v433_v56 = vrot.slane %v426_v55, %v425_v53 }
 0x2f2   :  { %434 = vrot.lane.b32.xlu0 %v433_v56, %s29904_s0 }
 0x364   :  { %v435_v58 = vpop.permute.xlu0 %434 }
 0x365   :  { %v437_v59 = vmul.f32 %v435_v58, %v415_v57 }
 0x367   :  { %v438_v60 = vadd.f32 %v30119_v44, %v437_v59 }
 0x369   :  { %26700 = vmatmul.mubr.msk.f32.vlgmr.msra.gmra.mrb[2].mxu1 %vm442_vm3, %v438_v60 }
 0x36a   :  { %26703 = vmatpush3.msra.mxu1 %v440_v61  ;;  %26704 = vmatprep.mubr.msk.f32.mxu1 %vm29901_vm0, %v29902_v6 }
 0x36b   :  { %28727 = vmatprep.subr.bf16.mxu1 %v29900_v3 }
 0x36d   :  { %26705 = vmatmul.mubr.msk.f32.vlgmr.msra.gmra.mrb[4].mxu1 %vm442_vm3, %v439_v62 }
 0x36e   :  { %26715 = vmatprep.mubr.msk.f32.mxu1 %vm29901_vm0, %v29902_v6  ;;  %28729 = vmatpush3.bf16.msra.mxu1 %v28728_v1 }
 0x36f   :  { %28730 = vmatprep.subr.bf16.mxu1 %v29900_v3 }
 0x372   :  { %28732 = vmatpush3.bf16.msra.mxu1 %v28731_v5 }
 0x373   :  { %26718 = vmatprep.subr.mxu1 %v29902_v6 }
 0x43c   :  { %v512_v8 = vpop.f32.mrb[2].mxu1 }
 0x43d   :  { %v26701_v9 = vpop.f32.mrb[3].mxu1  ;;  %v519_v10 = vrot.slane %v512_v8, %v30146_v7 }
 0x440   :  { %v589_v11 = vpop.f32.mrb[4].mxu1 }
 0x441   :  { %v590_v13 = vadd.f32 %v589_v11, %v519_v10  ;;  %v26706_v14 = vpop.f32.mrb[5].mxu1 }
 0x443   :  { %v600_v15 = vadd.f32 %v24974_v12, %v590_v13 }
 0x445   :  { %v601_v16 = vmax.f32 %v600_v15, 0.0 }
 0x447   :  { %26716 = vmatmul.mubr.msk.f32.vlgmr.msra.gmra.mrb[6].mxu1 %vm172_vm1, %v601_v16 }
 0x448   :  { %26720 = vmatprep.mubr.msk.f32.mxu1 %vm29901_vm0, %v29902_v6  ;;  %26719 = vmatpush3.msk.msra.mxu1 %vm151_vm4, %v29907_v30 }
 0x51a   :  { %v682_v18 = vpop.f32.mrb[6].mxu1 }
 0x51b   :  { %v683_v19 = vadd.f32 %v24975_v17, %v682_v18  ;;  %v26717_v20 = vpop.f32.mrb[7].mxu1 }
 0x51d   :  { %v24977_v21 = vmul.f32 -1.442695, %v683_v19 }
 0x51f   :  { %29798 = vpow2.f32 %v24977_v21 }
 0x529   :  { %v29799_v22 = vpop.eup %29798 }
 0x52a   :  { %v689_v23 = vadd.f32 1.0, %v29799_v22 }
 0x52c   :  { %29800 = vrcp.f32 %v689_v23 }
 0x536   :  { %v30154_v24 = vpop.eup %29800 }
 0x537   :  { %v694_v25 = vmul.f32 0.5, %v30154_v24 }
 0x539   :  { %v695_v26 = vmul.f32 1.442695, %v694_v25 }
 0x53b   :  { %29802 = vpow2.f32 %v695_v26 }
 0x545   :  { %v29803_v31 = vpop.eup %29802 }
 0x546   :  { %698 = vrot.lane.b32.xlu0 %v29803_v31, %s29904_s0 }
 0x5b8   :  { %v30168_v33 = vpop.permute.xlu0 %698 }
 0x5b9   :  { %v701_v34 = vmul.f32 %v30168_v33, %v693_v32 }
 0x5bb   :  { %v30172_v35 = vadd.f32 %v30154_v24, %v701_v34 }
 0x5bd   :  { %742 = vperm.xlu0 %29769, %v30172_v35   ;;  %705 = vperm.xlu1 %29767, %v30172_v35  }
 0x5be   :  { %26721 = vmatmul.mubr.msk.f32.vlgmr.msra.gmra.mrb[8].mxu1 %vm442_vm3, %v30172_v35 }
 0x5bf   :  { %26725 = vmatprep.mubr.msk.f32.mxu1 %vm442_vm3, %v30180_v36 }
 0x5c1   :  { %29772 = vset.pattern.permute.xlu0 %v29908_v37  ;;  %29768 = vset.pattern.permute.xlu1 %v29909_v38 }
 0x5c2   :  { %796 = vperm.xlu0 %29772, %v30172_v35   ;;  %724 = vperm.xlu1 %29768, %v30172_v35  }
 0x5c6   :  { %29770 = vset.pattern.permute.xlu1 %v29910_v39  ;;  %29773 = vset.pattern.permute.xlu0 %v29906_v29 }
 0x5c7   :  { %760 = vperm.xlu1 %29770, %v30172_v35   ;;  %718 = vperm.xlu0 %29773, %v30180_v36  }
 0x5cb   :  { %29771 = vset.pattern.permute.xlu1 %v29911_v40  ;;  %29778 = vset.pattern.permute.xlu0 %v29910_v39 }
 0x5cc   :  { %778 = vperm.xlu1 %29771, %v30172_v35   ;;  %772 = vperm.xlu0 %29778, %v30180_v36  }
 0x5d0   :  { %29774 = vset.pattern.permute.xlu1 %v29909_v38  ;;  %29781 = vset.pattern.permute.xlu0 %v29912_v41 }
 0x5d1   :  { %736 = vperm.xlu1 %29774, %v30180_v36   ;;  %826 = vperm.xlu0 %29781, %v30180_v36  }
 0x5d5   :  { %29775 = vset.pattern.permute.xlu1 %v29912_v41  ;;  %29783 = vset.pattern.permute.xlu0 %v29906_v29 }
 0x5d6   :  { %814 = vperm.xlu1 %29775, %v30172_v35  }
 0x5da   :  { %29776 = vset.pattern.permute.xlu1 %v29913_v42 }
 0x5db   :  { %832 = vperm.xlu1 %29776, %v30172_v35  }
 0x5df   :  { %29777 = vset.pattern.permute.xlu1 %v29905_v28 }
 0x5e0   :  { %754 = vperm.xlu1 %29777, %v30180_v36  }
 0x5e4   :  { %29779 = vset.pattern.permute.xlu1 %v29911_v40 }
 0x5e5   :  { %790 = vperm.xlu1 %29779, %v30180_v36  }
 0x5e9   :  { %29780 = vset.pattern.permute.xlu1 %v29908_v37 }
 0x5ea   :  { %808 = vperm.xlu1 %29780, %v30180_v36  }
 0x5ee   :  { %29782 = vset.pattern.permute.xlu1 %v29913_v42 }
 0x5ef   :  { %844 = vperm.xlu1 %29782, %v30180_v36  }
 0x5f3   :  { %29784 = vset.pattern.permute.xlu1 %v29909_v38 }
 0x63c   :  { %v706_v43 = vpop.permute.xlu1 %705  ;;  %v743_v46 = vpop.permute.xlu0 %742 }
 0x63d   :  { %v708_v45 = vmul.f32 %v706_v43, %v30180_v36  ;;  %v745_v51 = vmul.f32 %v743_v46, %v30180_v36 }
 0x63f   :  { %v709_v48 = vsel %vm442_vm3, %v708_v45, 0.0  ;;  %v746_v56 = vsel %vm442_vm3, %v745_v51, 0.0 }
 0x640   :  { %v710_v53 = vrot.slane %v709_v48, 4  ;;  %v747_v62 = vrot.slane %v746_v56, 4 }
 0x641   :  { %v725_v47 = vpop.permute.xlu1 %724  ;;  %v797_v59 = vpop.permute.xlu0 %796 }
 0x642   :  { %v727_v49 = vmul.f32 %v725_v47, %v30180_v36  ;;  %v711_v60 = vadd.f32 %v710_v53, %v709_v48  ;;  %v799_v63 = vmul.f32 %v797_v59, %v30180_v36  ;;  %v748_v8 = vadd.f32 %v747_v62, %v746_v56 }
 0x644   :  { %v728_v52 = vsel %vm442_vm3, %v727_v49, 0.0  ;;  %v712_v5 = vrot.slane %v711_v60, 2  ;;  %v800_v10 = vsel %vm442_vm3, %v799_v63, 0.0  ;;  %v749_v16 = vrot.slane %v748_v8, 2 }
 0x645   :  { %v729_v54 = vrot.slane %v728_v52, 4  ;;  %v801_v17 = vrot.slane %v800_v10, 4 }
 0x646   :  { %v761_v55 = vpop.permute.xlu1 %760  ;;  %v713_v15 = vadd.f32 %v712_v5, %v711_v60  ;;  %v750_v23 = vadd.f32 %v749_v16, %v748_v8  ;;  %v30227_v46 = vpop.permute.xlu0 %718 }
 0x647   :  { %v730_v57 = vadd.f32 %v729_v54, %v728_v52  ;;  %v763_v58 = vmul.f32 %v761_v55, %v30180_v36  ;;  %v802_v25 = vadd.f32 %v801_v17, %v800_v10 }
 0x648   :  { %v714_v21 = vrot.slane %v713_v15, 1  ;;  %v751_v48 = vrot.slane %v750_v23, 1 }
 0x649   :  { %v764_v61 = vsel %vm442_vm3, %v763_v58, 0.0  ;;  %v731_v0 = vrot.slane %v730_v57, 2  ;;  %v803_v45 = vrot.slane %v802_v25, 2 }
 0x64a   :  { %v765_v1 = vrot.slane %v764_v61, 4  ;;  %v715_v38 = vadd.f32 %v714_v21, %v713_v15  ;;  %v752_v59 = vadd.f32 %v751_v48, %v750_v23 }
 0x64b   :  { %v779_v2 = vpop.permute.xlu1 %778  ;;  %v732_v11 = vadd.f32 %v731_v0, %v730_v57  ;;  %v804_v60 = vadd.f32 %v803_v45, %v802_v25  ;;  %v30236_v5 = vpop.permute.xlu0 %772 }
 0x64c   :  { %v781_v4 = vmul.f32 %v779_v2, %v30180_v36  ;;  %v766_v12 = vadd.f32 %v765_v1, %v764_v61  ;;  %v721_v55 = vmul.f32 %v30227_v46, %v715_v38 }
 0x64d   :  { %v733_v19 = vrot.slane %v732_v11, 1  ;;  %v805_v15 = vrot.slane %v804_v60, 1 }
 0x64e   :  { %v782_v9 = vsel %vm442_vm3, %v781_v4, 0.0  ;;  %v767_v18 = vrot.slane %v766_v12, 2 }
 0x64f   :  { %v783_v13 = vrot.slane %v782_v9, 4  ;;  %v734_v31 = vadd.f32 %v733_v19, %v732_v11 }
 0x650   :  { %v30223_v14 = vpop.permute.xlu1 %736  ;;  %v768_v29 = vadd.f32 %v767_v18, %v766_v12  ;;  %v30242_v21 = vpop.permute.xlu0 %826 }
 0x651   :  { %v784_v20 = vadd.f32 %v783_v13, %v782_v9  ;;  %v739_v49 = vmul.f32 %v30223_v14, %v734_v31 }
 0x652   :  { %v769_v52 = vrot.slane %v768_v29, 1 }
 0x653   :  { %v785_v32 = vrot.slane %v784_v20, 2  ;;  %v740_v61 = vadd.f32 %v739_v49, %v721_v55  ;;  %v30263_v49 = vsel %vm160_vm6, 1.0, %v29902_v6  ;;  %vm6491_vm6 = vcmp.eq.s32.totalorder %v30122_v50, 4 }
 0x654   :  { %v770_v62 = vadd.f32 %v769_v52, %v768_v29  ;;  %v153_v29 = vadd.s32 8, %v30122_v50 }
 0x655   :  { %v815_v22 = vpop.permute.xlu1 %814  ;;  %v786_v54 = vadd.f32 %v785_v32, %v784_v20  ;;  %v806_v20 = vadd.f32 %v805_v15, %v804_v60 }
 0x656   :  { %v817_v26 = vmul.f32 %v815_v22, %v30180_v36  ;;  %v775_v10 = vmul.f32 %v30236_v5, %v770_v62  ;;  %vm154_vm5 = vcmp.eq.s32.totalorder %v153_v29, %v30157_v27  ;;  %vm163_vm8 = vcmp.eq.s32.totalorder %v153_v29, 8 }
 0x657   :  { %v787_v4 = vrot.slane %v786_v54, 1  ;;  %v30254_v48 = vsel %vm154_vm5, 1.0, %v29902_v6  ;;  %v30276_v55 = vsel %vm163_vm8, 1.0, %v29902_v6  ;;  %vm157_vm10 = vcmp.eq.s32.totalorder %v153_v29, 9 }
 0x658   :  { %v818_v34 = vsel %vm442_vm3, %v817_v26, 0.0  ;;  %vm5120_vm5 = vcmp.eq.s32.totalorder %v30157_v27, 3  ;;  %vm31466_vm8 = vcmp.eq.s32.totalorder %v30157_v27, 4 }
 0x659   :  { %v819_v43 = vrot.slane %v818_v34, 4  ;;  %v788_v12 = vadd.f32 %v787_v4, %v786_v54 }
 0x65a   :  { %v833_v47 = vpop.permute.xlu1 %832 }
 0x65b   :  { %v820_v51 = vadd.f32 %v819_v43, %v818_v34  ;;  %v835_v53 = vmul.f32 %v833_v47, %v30180_v36 }
 0x65d   :  { %v821_v56 = vrot.slane %v820_v51, 2  ;;  %v836_v57 = vsel %vm442_vm3, %v835_v53, 0.0 }
 0x65e   :  { %v837_v58 = vrot.slane %v836_v57, 4 }
 0x65f   :  { %v30233_v63 = vpop.permute.xlu1 %754  ;;  %v822_v0 = vadd.f32 %v821_v56, %v820_v51 }
 0x660   :  { %v838_v1 = vadd.f32 %v837_v58, %v836_v57  ;;  %v757_v2 = vmul.f32 %v30233_v63, %v752_v59 }
 0x661   :  { %v823_v13 = vrot.slane %v822_v0, 1 }
 0x662   :  { %v839_v8 = vrot.slane %v838_v1, 2  ;;  %v758_v9 = vadd.f32 %v757_v2, %v740_v61  ;;  %v30295_v2 = vsel %vm157_vm10, 1.0, %v29902_v6  ;;  %vm31468_vm10 = vcmp.eq.s32.totalorder %v30122_v50, 5 }
 0x663   :  { %v824_v19 = vadd.f32 %v823_v13, %v822_v0 }
 0x664   :  { %v30239_v11 = vpop.permute.xlu1 %790  ;;  %v840_v16 = vadd.f32 %v839_v8, %v838_v1  ;;  %v776_v17 = vadd.f32 %v775_v10, %v758_v9 }
 0x665   :  { %v793_v18 = vmul.f32 %v30239_v11, %v788_v12  ;;  %v829_v31 = vmul.f32 %v30242_v21, %v824_v19 }
 0x666   :  { %v841_v23 = vrot.slane %v840_v16, 1 }
 0x667   :  { %v794_v25 = vadd.f32 %v793_v18, %v776_v17 }
 0x668   :  { %v842_v34 = vadd.f32 %v841_v23, %v840_v16 }
 0x669   :  { %v30244_v22 = vpop.permute.xlu1 %808 }
 0x66a   :  { %v811_v26 = vmul.f32 %v30244_v22, %v806_v20 }
 0x66c   :  { %v812_v32 = vadd.f32 %v811_v26, %v794_v25 }
 0x66e   :  { %v30249_v38 = vpop.permute.xlu1 %844  ;;  %v830_v43 = vadd.f32 %v829_v31, %v812_v32 }
 0x66f   :  { %v847_v45 = vmul.f32 %v30249_v38, %v842_v34 }
 0x671   :  { %v848_v47 = vadd.f32 %v847_v45, %v830_v43 }
 0x673   :  { %26723 = vmatprep.subr.mxu1 %v848_v47 }
 0x674   :  { %26724 = vmatpush3.msra.mxu1 %v848_v47 }
 0x675   :  { %26726 = vmatmul.mubr.msk.f32.vlgmr.msra.gmra.mrb[10].mxu1 %vm442_vm3, %v30254_v48  ;;  %26733 = vmatprep.subr.mxu1 %v29902_v6 }
 0x676   :  { %26735 = vmatprep.mubr.msk.f32.mxu1 %vm29901_vm0, %v29902_v6 }
 0x691   :  { %v917_v51 = vpop.f32.mrb[8].mxu1 }
 0x692   :  { %v30267_v52 = vadd.f32 %v917_v51, %v30263_v49  ;;  %v26722_v53 = vpop.f32.mrb[9].mxu1 }
 0x694   :  { %v1002_v54 = vsel %vm1001_vm7, %v30263_v49, %v30267_v52 }
 0x695   :  { %26728 = vmatprep.subr.mxu0 %v1002_v54  ;;  %26734 = vmatpush3.msra.mxu1 %v1002_v54 }
 0x696   :  { %26729 = vmatpush3.msra.mxu0 %v1002_v54  ;;  %26736 = vmatmul.mubr.msk.f32.vlgmr.msra.gmra.mrb[12].mxu1 %vm442_vm3, %v30172_v35 }
 0x748   :  { %v26727_v56 = vpop.f32.mrb[10].mxu1 }
 0x749   :  { %v30280_v57 = vadd.f32 %v26727_v56, %v30276_v55  ;;  %v30282_v58 = vpop.f32.mrb[11].mxu1 }
 0x74a   :  { %v1004_v59 = vsel %vm1003_vm9, 0.0, %v30282_v58 }
 0x74b   :  { %26730 = vmatprep.mubr.msk.f32.mxu0 %vm442_vm3, %v1004_v59  ;;  %v1005_v60 = vsel %vm1003_vm9, %v30276_v55, %v30280_v57 }
 0x74c   :  { %26731 = vmatmul.mubr.msk.f32.vlgmr.msra.gmra.mrb[4].mxu0 %vm442_vm3, %v1005_v60 }
 0x769   :  { %v1153_v61 = vpop.f32.mrb[12].mxu1 }
 0x76a   :  { %v26737_v62 = vpop.f32.mrb[13].mxu1  ;;  %v1157_v0 = vmul.f32 2.5e-05, %v1153_v61 }
 0x76c   :  { %v1165_v1 = vrot.slane %v1157_v0, %v30146_v7 }
 0x76e   :  { %v1167_v12 = vmul.f32 %v1165_v1, %v30295_v2  ;;  %v1166_v15 = vmul.f32 0.0, %v1165_v1 }
 0x81f   :  { %v26732_v4 = vpop.f32.mrb[4].mxu0 }
 0x820   :  { %v1159_v8 = vmul.f32 2.5e-05, %v26732_v4  ;;  %v1078_v9 = vpop.f32.mrb[5].mxu0 }
 0x821   :  { %v1158_v10 = vmul.f32 2.5e-05, %v1078_v9 }
 0x822   :  { %v1161_v13 = vsub.f32 %v30254_v48, %v1159_v8 }
 0x823   :  { %v1160_v16 = vsub.f32 %v30180_v36, %v1158_v10 }
 0x824   :  { %v1169_v17 = vadd.f32 %v1167_v12, %v1161_v13 }
 0x825   :  { %v1168_v18 = vadd.f32 %v1166_v15, %v1160_v16 }
 0x827   :  { %26742 = vmatprep.mubr.msk.f32.mxu0 %vm1170_vm11, %v1168_v18  ;;  %v28733_v19 = vpack.c.bf16 %v1169_v17, %v1168_v18 }
 0x829   :  { %28734 = vmatprep.subr.bf16.mxu0 %v28733_v19 }
 0x82a   :  { %28736 = vmatpush3.bf16.msra.mxu0 %v28733_v19 }
 0x82d   :  { %26743 = vmatmul.mubr.msk.f32.vlgmr.msra.gmra.mrb[6].mxu0 %vm1170_vm11, %v1169_v17 }
 0x900   :  { %v26744_v20 = vpop.f32.mrb[6].mxu0 }
 0x901   :  { %v1243_v23 = vpop.f32.mrb[7].mxu0 }
 0x902   :  { %26749 = vmatprep.mubr.msk.f32.mxu1 %vm1170_vm11, %v1243_v23  ;;  %v28737_v25 = vpack.c.bf16 %v26744_v20, %v1243_v23 }
 0x904   :  { %28738 = vmatprep.subr.bf16.mxu1 %v28737_v25 }
 0x905   :  { %28740 = vmatpush3.bf16.msra.mxu1 %v28737_v25 }
 0x908   :  { %26750 = vmatmul.mubr.msk.f32.vlgmr.msra.gmra.mrb[14].mxu1 %vm1170_vm11, %v26744_v20 }
 0x9db   :  { %v26751_v26 = vpop.f32.mrb[14].mxu1 }
 0x9dc   :  { %v1324_v29 = vpop.f32.mrb[15].mxu1 }
 0x9dd   :  { %26756 = vmatprep.mubr.msk.f32.mxu0 %vm1170_vm11, %v1324_v29  ;;  %v28741_v31 = vpack.c.bf16 %v26751_v26, %v1324_v29  ;;  %v2375_v29 = vsel %vm2374_vm13, 0.0, %v30282_v58 }
 0x9df   :  { %28742 = vmatprep.subr.bf16.mxu0 %v28741_v31 }
 0x9e0   :  { %28744 = vmatpush3.bf16.msra.mxu0 %v28741_v31  ;;  %v2376_v31 = vsel %vm2374_vm13, %v30276_v55, %v30280_v57 }
 0x9e3   :  { %26757 = vmatmul.mubr.msk.f32.vlgmr.msra.gmra.mrb[8].mxu0 %vm1170_vm11, %v26751_v26  ;;  %v2373_v26 = vsel %vm2372_vm12, %v30263_v49, %v30267_v52 }
 0xab6   :  { %v26758_v32 = vpop.f32.mrb[8].mxu0 }
 0xab7   :  { %v1405_v34 = vpop.f32.mrb[9].mxu0 }
 0xab8   :  { %26763 = vmatprep.mubr.msk.f32.mxu1 %vm1170_vm11, %v1405_v34  ;;  %v28745_v43 = vpack.c.bf16 %v26758_v32, %v1405_v34 }
 0xaba   :  { %28746 = vmatprep.subr.bf16.mxu1 %v28745_v43 }
 0xabb   :  { %28748 = vmatpush3.bf16.msra.mxu1 %v28745_v43 }
 0xabe   :  { %26764 = vmatmul.mubr.msk.f32.vlgmr.msra.gmra.mrb[16].mxu1 %vm1170_vm11, %v26758_v32 }
 0xabf   :  { %26777 = vmatprep.mubr.msk.f32.mxu1 %vm1170_vm11, %v1405_v34 }
 0xb91   :  { %v26765_v45 = vpop.f32.mrb[16].mxu1 }
 0xb92   :  { %v1486_v47 = vpop.f32.mrb[17].mxu1 }
 0xb93   :  { %26770 = vmatprep.mubr.msk.f32.mxu0 %vm1170_vm11, %v1486_v47  ;;  %v28749_v51 = vpack.c.bf16 %v26765_v45, %v1486_v47  ;;  %v692_v47 = vld [vmem:[%s30058_s20] sm:$0x1] }
 0xb95   :  { %28750 = vmatprep.subr.bf16.mxu0 %v28749_v51 }
 0xb96   :  { %28752 = vmatpush3.bf16.msra.mxu0 %v28749_v51 }
 0xb99   :  { %26771 = vmatmul.mubr.msk.f32.vlgmr.msra.gmra.mrb[10].mxu0 %vm1170_vm11, %v26765_v45 }
 0xc6c   :  { %v26772_v53 = vpop.f32.mrb[10].mxu0 }
 0xc6d   :  { %v1567_v54 = vpop.f32.mrb[11].mxu0 }
 0xc6e   :  { %v28753_v56 = vpack.c.bf16 %v26772_v53, %v1567_v54  ;;  %26784 = vmatprep.mubr.msk.f32.mxu0 %vm1170_vm11, %v1567_v54 }
 0xc70   :  { %28754 = vmatprep.subr.bf16.mxu1 %v28753_v56  ;;  %28758 = vmatprep.subr.bf16.mxu0 %v28753_v56 }
 0xc71   :  { %28756 = vmatpush3.bf16.msra.mxu1 %v28753_v56  ;;  %28760 = vmatpush3.bf16.msra.mxu0 %v28753_v56 }
 0xc74   :  { %26778 = vmatmul.mubr.msk.f32.vlgmr.msra.gmra.mrb[18].mxu1 %vm1170_vm11, %v26758_v32  ;;  %26785 = vmatmul.mubr.msk.f32.vlgmr.msra.gmra.mrb[12].mxu0 %vm1170_vm11, %v26772_v53  ;;  %v2458_v53 = vrot.slane %v30172_v35, 1 }
 0xd47   :  { %v26779_v59 = vpop.f32.mrb[18].mxu1  ;;  %v26786_v60 = vpop.f32.mrb[12].mxu0 }
 0xd48   :  { %v1642_v61 = vpop.f32.mrb[19].mxu1  ;;  %v1723_v62 = vpop.f32.mrb[13].mxu0 }
 0xd49   :  { %v28761_v0 = vpack.c.bf16 %v26786_v60, %v1723_v62  ;;  %26791 = vmatprep.mubr.msk.f32.mxu1 %vm1170_vm11, %v1642_v61  ;;  %26798 = vmatprep.mubr.msk.f32.mxu0 %vm1170_vm11, %v1723_v62 }
 0xd4b   :  { %28762 = vmatprep.subr.bf16.mxu1 %v28761_v0  ;;  %28766 = vmatprep.subr.bf16.mxu0 %v28761_v0 }
 0xd4c   :  { %28764 = vmatpush3.bf16.msra.mxu1 %v28761_v0  ;;  %28768 = vmatpush3.bf16.msra.mxu0 %v28761_v0 }
 0xd4f   :  { %26792 = vmatmul.mubr.msk.f32.vlgmr.msra.gmra.mrb[20].mxu1 %vm1170_vm11, %v26779_v59  ;;  %26799 = vmatmul.mubr.msk.f32.vlgmr.msra.gmra.mrb[14].mxu0 %vm1170_vm11, %v26786_v60 }
 0xe22   :  { %v26793_v1 = vpop.f32.mrb[20].mxu1  ;;  %v26800_v4 = vpop.f32.mrb[14].mxu0 }
 0xe23   :  { %v1804_v8 = vpop.f32.mrb[21].mxu1  ;;  %v1885_v9 = vpop.f32.mrb[15].mxu0 }
 0xe24   :  { %v28769_v10 = vpack.c.bf16 %v26800_v4, %v1885_v9  ;;  %26805 = vmatprep.mubr.msk.f32.mxu1 %vm1170_vm11, %v1804_v8  ;;  %26812 = vmatprep.mubr.msk.f32.mxu0 %vm1170_vm11, %v1885_v9 }
 0xe26   :  { %28770 = vmatprep.subr.bf16.mxu1 %v28769_v10  ;;  %28774 = vmatprep.subr.bf16.mxu0 %v28769_v10 }
 0xe27   :  { %28772 = vmatpush3.bf16.msra.mxu1 %v28769_v10  ;;  %28776 = vmatpush3.bf16.msra.mxu0 %v28769_v10 }
 0xe2a   :  { %26806 = vmatmul.mubr.msk.f32.vlgmr.msra.gmra.mrb[22].mxu1 %vm1170_vm11, %v26793_v1  ;;  %26813 = vmatmul.mubr.msk.f32.vlgmr.msra.gmra.mrb[16].mxu0 %vm1170_vm11, %v26800_v4 }
 0xefd   :  { %v26807_v12 = vpop.f32.mrb[22].mxu1  ;;  %v26814_v13 = vpop.f32.mrb[16].mxu0 }
 0xefe   :  { %v1966_v15 = vpop.f32.mrb[23].mxu1  ;;  %v2047_v16 = vpop.f32.mrb[17].mxu0 }
 0xeff   :  { %v28777_v17 = vpack.c.bf16 %v26814_v13, %v2047_v16  ;;  %26819 = vmatprep.mubr.msk.f32.mxu1 %vm1170_vm11, %v1966_v15  ;;  %26826 = vmatprep.mubr.msk.f32.mxu0 %vm1170_vm11, %v2047_v16 }
 0xf01   :  { %28778 = vmatprep.subr.bf16.mxu1 %v28777_v17  ;;  %28782 = vmatprep.subr.bf16.mxu0 %v28777_v17 }
 0xf02   :  { %28780 = vmatpush3.bf16.msra.mxu1 %v28777_v17  ;;  %28784 = vmatpush3.bf16.msra.mxu0 %v28777_v17 }
 0xf03   :  { %28789 = vmatprep.subr.bf16.mxu0 %v29900_v3 }
 0xf05   :  { %26820 = vmatmul.mubr.msk.f32.vlgmr.msra.gmra.mrb[24].mxu1 %vm1170_vm11, %v26807_v12  ;;  %26827 = vmatmul.mubr.msk.f32.vlgmr.msra.gmra.mrb[18].mxu0 %vm1170_vm11, %v26814_v13 }
 0xf06   :  { %26840 = vmatprep.mubr.msk.f32.mxu0 %vm29901_vm0, %v29902_v6 }
 0xfd8   :  { %v26821_v18 = vpop.f32.mrb[24].mxu1  ;;  %v26828_v19 = vpop.f32.mrb[18].mxu0 }
 0xfd9   :  { %v2128_v20 = vpop.f32.mrb[25].mxu1  ;;  %v2209_v23 = vpop.f32.mrb[19].mxu0 }
 0xfda   :  { %v28785_v25 = vpack.c.bf16 %v26828_v19, %v2209_v23  ;;  %26833 = vmatprep.mubr.msk.f32.mxu1 %vm1170_vm11, %v2128_v20 }
 0xfdc   :  { %28786 = vmatprep.subr.bf16.mxu1 %v28785_v25 }
 0xfdd   :  { %28788 = vmatpush3.bf16.msra.mxu1 %v28785_v25 }
 0xfde   :  { %26843 = vmatprep.subr.mxu1 %v2373_v26 }
 0xfe0   :  { %26834 = vmatmul.mubr.msk.f32.vlgmr.msra.gmra.mrb[26].mxu1 %vm1170_vm11, %v26821_v18 }
 0xfe1   :  { %26844 = vmatpush3.msra.mxu1 %v2373_v26  ;;  %26845 = vmatprep.mubr.msk.f32.mxu1 %vm442_vm3, %v2375_v29 }
 0xfe4   :  { %26846 = vmatmul.mubr.msk.f32.vlgmr.msra.gmra.mrb[28].mxu1 %vm442_vm3, %v2376_v31 }
0x10b3   :  { %v26835_v32 = vpop.f32.mrb[26].mxu1 }
0x10b4   :  { %v2290_v34 = vpop.f32.mrb[27].mxu1 }
0x10b5   :  { %v28790_v43 = vpack.c.bf16 %v26835_v32, %v2290_v34 }
0x10b7   :  { %28791 = vmatpush3.bf16.msra.mxu0 %v28790_v43  ;;  %v26847_v45 = vpop.f32.mrb[28].mxu1 }
0x10b8   :  { %v2449_v51 = vpop.f32.mrb[29].mxu1  ;;  %26848 = vmatprep.subr.mxu0 %v29902_v6  ;;  %v2533_v59 = vmul.f32 2.5e-05, %v26847_v45 }
0x10b9   :  { %v2532_v61 = vmul.f32 2.5e-05, %v2449_v51 }
0x10ba   :  { %26841 = vmatmul.mubr.msk.f32.vlgmr.msra.gmra.mrb[20].mxu0 %vm1170_vm11, %v692_v47  ;;  %v2535_v4 = vsub.f32 %v30254_v48, %v2533_v59 }
0x10bb   :  { %26849 = vmatpush3.msra.mxu0 %v2373_v26  ;;  %26850 = vmatprep.mubr.msk.f32.mxu0 %vm29901_vm0, %v29902_v6  ;;  %v2534_v8 = vsub.f32 %v30180_v36, %v2532_v61 }
0x10be   :  { %26851 = vmatmul.mubr.msk.f32.vlgmr.msra.gmra.mrb[22].mxu0 %vm442_vm3, %v2458_v53 }
0x118d   :  { %v30353_v54 = vpop.f32.mrb[20].mxu0 }
0x118e   :  { %v26842_v56 = vpop.f32.mrb[21].mxu0 }
0x1191   :  { %v2527_v60 = vpop.f32.mrb[22].mxu0 }
0x1192   :  { %v2531_v62 = vmul.f32 2.5e-05, %v2527_v60  ;;  %v26852_v0 = vpop.f32.mrb[23].mxu0 }
0x1194   :  { %v2539_v1 = vrot.slane %v2531_v62, %v30146_v7 }
0x1196   :  { %v2540_v9 = vmul.f32 0.0, %v2539_v1  ;;  %v2541_v10 = vmul.f32 %v2539_v1, %v30295_v2 }
0x1198   :  { %v2542_v12 = vadd.f32 %v2540_v9, %v2534_v8  ;;  %v2543_v13 = vadd.f32 %v2541_v10, %v2535_v4 }
0x119a   :  { %26857 = vmatprep.mubr.msk.f32.mxu1 %vm1170_vm11, %v2542_v12  ;;  %v28792_v15 = vpack.c.bf16 %v2543_v13, %v2542_v12 }
0x119c   :  { %28793 = vmatprep.subr.bf16.mxu1 %v28792_v15 }
0x119d   :  { %28795 = vmatpush3.bf16.msra.mxu1 %v28792_v15 }
0x11a0   :  { %26858 = vmatmul.mubr.msk.f32.vlgmr.msra.gmra.mrb[30].mxu1 %vm1170_vm11, %v2543_v13 }
0x1273   :  { %v26859_v16 = vpop.f32.mrb[30].mxu1 }
0x1274   :  { %v2616_v17 = vpop.f32.mrb[31].mxu1 }
0x1275   :  { %26864 = vmatprep.mubr.msk.f32.mxu0 %vm1170_vm11, %v2616_v17  ;;  %v28796_v18 = vpack.c.bf16 %v26859_v16, %v2616_v17 }
0x1277   :  { %28797 = vmatprep.subr.bf16.mxu0 %v28796_v18 }
0x1278   :  { %28799 = vmatpush3.bf16.msra.mxu0 %v28796_v18 }
0x127b   :  { %26865 = vmatmul.mubr.msk.f32.vlgmr.msra.gmra.mrb[24].mxu0 %vm1170_vm11, %v26859_v16 }
0x134e   :  { %v26866_v19 = vpop.f32.mrb[24].mxu0 }
0x134f   :  { %v2697_v20 = vpop.f32.mrb[25].mxu0 }
0x1350   :  { %26871 = vmatprep.mubr.msk.f32.mxu1 %vm1170_vm11, %v2697_v20  ;;  %v28800_v23 = vpack.c.bf16 %v26866_v19, %v2697_v20  ;;  %v3746_v20 = vsel %vm3745_vm14, %v30263_v49, %v30267_v52 }
0x1352   :  { %28801 = vmatprep.subr.bf16.mxu1 %v28800_v23 }
0x1353   :  { %28803 = vmatpush3.bf16.msra.mxu1 %v28800_v23  ;;  %v3748_v23 = vsel %vm3747_vm15, 0.0, %v30282_v58 }
0x1356   :  { %26872 = vmatmul.mubr.msk.f32.vlgmr.msra.gmra.mrb[32].mxu1 %vm1170_vm11, %v26866_v19 }
0x1429   :  { %v26873_v25 = vpop.f32.mrb[32].mxu1 }
0x142a   :  { %v2778_v26 = vpop.f32.mrb[33].mxu1 }
0x142b   :  { %26878 = vmatprep.mubr.msk.f32.mxu0 %vm1170_vm11, %v2778_v26  ;;  %v28804_v29 = vpack.c.bf16 %v26873_v25, %v2778_v26 }
0x142d   :  { %28805 = vmatprep.subr.bf16.mxu0 %v28804_v29 }
0x142e   :  { %28807 = vmatpush3.bf16.msra.mxu0 %v28804_v29 }
0x1431   :  { %26879 = vmatmul.mubr.msk.f32.vlgmr.msra.gmra.mrb[26].mxu0 %vm1170_vm11, %v26873_v25 }
0x1432   :  { %26892 = vmatprep.mubr.msk.f32.mxu0 %vm1170_vm11, %v2778_v26 }
0x1504   :  { %v26880_v31 = vpop.f32.mrb[26].mxu0 }
0x1505   :  { %v2859_v32 = vpop.f32.mrb[27].mxu0 }
0x1506   :  { %26885 = vmatprep.mubr.msk.f32.mxu1 %vm1170_vm11, %v2859_v32  ;;  %v28808_v34 = vpack.c.bf16 %v26880_v31, %v2859_v32 }
0x1508   :  { %28809 = vmatprep.subr.bf16.mxu1 %v28808_v34 }
0x1509   :  { %28811 = vmatpush3.bf16.msra.mxu1 %v28808_v34 }
0x150c   :  { %26886 = vmatmul.mubr.msk.f32.vlgmr.msra.gmra.mrb[34].mxu1 %vm1170_vm11, %v26880_v31 }
0x15df   :  { %v26887_v43 = vpop.f32.mrb[34].mxu1 }
0x15e0   :  { %v2940_v45 = vpop.f32.mrb[35].mxu1 }
0x15e1   :  { %v28812_v47 = vpack.c.bf16 %v26887_v43, %v2940_v45  ;;  %26899 = vmatprep.mubr.msk.f32.mxu1 %vm1170_vm11, %v2940_v45 }
0x15e3   :  { %28813 = vmatprep.subr.bf16.mxu0 %v28812_v47  ;;  %28817 = vmatprep.subr.bf16.mxu1 %v28812_v47 }
0x15e4   :  { %28815 = vmatpush3.bf16.msra.mxu0 %v28812_v47  ;;  %28819 = vmatpush3.bf16.msra.mxu1 %v28812_v47 }
0x15e7   :  { %26893 = vmatmul.mubr.msk.f32.vlgmr.msra.gmra.mrb[28].mxu0 %vm1170_vm11, %v26873_v25  ;;  %26900 = vmatmul.mubr.msk.f32.vlgmr.msra.gmra.mrb[36].mxu1 %vm1170_vm11, %v26887_v43  ;;  %v3749_v25 = vsel %vm3747_vm15, %v30276_v55, %v30280_v57  ;;  %v3831_v43 = vrot.slane %v30172_v35, 2 }
0x16ba   :  { %v26894_v51 = vpop.f32.mrb[28].mxu0  ;;  %v26901_v53 = vpop.f32.mrb[36].mxu1 }
0x16bb   :  { %v3015_v56 = vpop.f32.mrb[29].mxu0  ;;  %v3096_v59 = vpop.f32.mrb[37].mxu1 }
0x16bc   :  { %v28820_v60 = vpack.c.bf16 %v26901_v53, %v3096_v59  ;;  %26906 = vmatprep.mubr.msk.f32.mxu0 %vm1170_vm11, %v3015_v56  ;;  %26913 = vmatprep.mubr.msk.f32.mxu1 %vm1170_vm11, %v3096_v59 }
0x16be   :  { %28821 = vmatprep.subr.bf16.mxu0 %v28820_v60  ;;  %28825 = vmatprep.subr.bf16.mxu1 %v28820_v60 }
0x16bf   :  { %28823 = vmatpush3.bf16.msra.mxu0 %v28820_v60  ;;  %28827 = vmatpush3.bf16.msra.mxu1 %v28820_v60 }
0x16c2   :  { %26907 = vmatmul.mubr.msk.f32.vlgmr.msra.gmra.mrb[30].mxu0 %vm1170_vm11, %v26894_v51  ;;  %26914 = vmatmul.mubr.msk.f32.vlgmr.msra.gmra.mrb[38].mxu1 %vm1170_vm11, %v26901_v53 }
0x1795   :  { %v26908_v61 = vpop.f32.mrb[30].mxu0  ;;  %v26915_v62 = vpop.f32.mrb[38].mxu1 }
0x1796   :  { %v3177_v0 = vpop.f32.mrb[31].mxu0  ;;  %v3258_v1 = vpop.f32.mrb[39].mxu1 }
0x1797   :  { %v28828_v4 = vpack.c.bf16 %v26915_v62, %v3258_v1  ;;  %26920 = vmatprep.mubr.msk.f32.mxu0 %vm1170_vm11, %v3177_v0  ;;  %26927 = vmatprep.mubr.msk.f32.mxu1 %vm1170_vm11, %v3258_v1 }
0x1799   :  { %28829 = vmatprep.subr.bf16.mxu0 %v28828_v4  ;;  %28833 = vmatprep.subr.bf16.mxu1 %v28828_v4 }
0x179a   :  { %28831 = vmatpush3.bf16.msra.mxu0 %v28828_v4  ;;  %28835 = vmatpush3.bf16.msra.mxu1 %v28828_v4 }
0x179d   :  { %26921 = vmatmul.mubr.msk.f32.vlgmr.msra.gmra.mrb[32].mxu0 %vm1170_vm11, %v26908_v61  ;;  %26928 = vmatmul.mubr.msk.f32.vlgmr.msra.gmra.mrb[40].mxu1 %vm1170_vm11, %v26915_v62 }
0x1870   :  { %v26922_v8 = vpop.f32.mrb[32].mxu0  ;;  %v26929_v9 = vpop.f32.mrb[40].mxu1 }
0x1871   :  { %v3339_v10 = vpop.f32.mrb[33].mxu0  ;;  %v3420_v12 = vpop.f32.mrb[41].mxu1 }
0x1872   :  { %v28836_v13 = vpack.c.bf16 %v26929_v9, %v3420_v12  ;;  %26934 = vmatprep.mubr.msk.f32.mxu0 %vm1170_vm11, %v3339_v10  ;;  %26941 = vmatprep.mubr.msk.f32.mxu1 %vm1170_vm11, %v3420_v12 }
0x1874   :  { %28837 = vmatprep.subr.bf16.mxu0 %v28836_v13  ;;  %28841 = vmatprep.subr.bf16.mxu1 %v28836_v13 }
0x1875   :  { %28839 = vmatpush3.bf16.msra.mxu0 %v28836_v13  ;;  %28843 = vmatpush3.bf16.msra.mxu1 %v28836_v13 }
0x1876   :  { %28848 = vmatprep.subr.bf16.mxu1 %v29900_v3 }
0x1878   :  { %26935 = vmatmul.mubr.msk.f32.vlgmr.msra.gmra.mrb[34].mxu0 %vm1170_vm11, %v26922_v8  ;;  %26942 = vmatmul.mubr.msk.f32.vlgmr.msra.gmra.mrb[42].mxu1 %vm1170_vm11, %v26929_v9 }
0x1879   :  { %26955 = vmatprep.mubr.msk.f32.mxu1 %vm29901_vm0, %v29902_v6 }
0x194b   :  { %v26936_v15 = vpop.f32.mrb[34].mxu0  ;;  %v26943_v16 = vpop.f32.mrb[42].mxu1 }
0x194c   :  { %v3501_v17 = vpop.f32.mrb[35].mxu0  ;;  %v3582_v18 = vpop.f32.mrb[43].mxu1 }
0x194d   :  { %v28844_v19 = vpack.c.bf16 %v26943_v16, %v3582_v18  ;;  %26948 = vmatprep.mubr.msk.f32.mxu0 %vm1170_vm11, %v3501_v17 }
0x194f   :  { %28845 = vmatprep.subr.bf16.mxu0 %v28844_v19 }
0x1950   :  { %28847 = vmatpush3.bf16.msra.mxu0 %v28844_v19 }
0x1951   :  { %26958 = vmatprep.subr.mxu0 %v3746_v20 }
0x1953   :  { %26949 = vmatmul.mubr.msk.f32.vlgmr.msra.gmra.mrb[36].mxu0 %vm1170_vm11, %v26936_v15 }
0x1954   :  { %26959 = vmatpush3.msra.mxu0 %v3746_v20  ;;  %26960 = vmatprep.mubr.msk.f32.mxu0 %vm442_vm3, %v3748_v23 }
0x1957   :  { %26961 = vmatmul.mubr.msk.f32.vlgmr.msra.gmra.mrb[38].mxu0 %vm442_vm3, %v3749_v25 }
0x1a26   :  { %v26950_v26 = vpop.f32.mrb[36].mxu0 }
0x1a27   :  { %v3663_v29 = vpop.f32.mrb[37].mxu0 }
0x1a28   :  { %v28849_v31 = vpack.c.bf16 %v26950_v26, %v3663_v29 }
0x1a2a   :  { %28850 = vmatpush3.bf16.msra.mxu1 %v28849_v31  ;;  %v26962_v32 = vpop.f32.mrb[38].mxu0 }
0x1a2b   :  { %v3822_v34 = vpop.f32.mrb[39].mxu0  ;;  %26963 = vmatprep.subr.mxu1 %v29902_v6  ;;  %v3906_v51 = vmul.f32 2.5e-05, %v26962_v32 }
0x1a2c   :  { %v3905_v56 = vmul.f32 2.5e-05, %v3822_v34 }
0x1a2d   :  { %26956 = vmatmul.mubr.msk.f32.vlgmr.msra.gmra.mrb[44].mxu1 %vm1170_vm11, %v30353_v54  ;;  %v3908_v54 = vsub.f32 %v30254_v48, %v3906_v51 }
0x1a2e   :  { %26964 = vmatpush3.msra.mxu1 %v3746_v20  ;;  %26965 = vmatprep.mubr.msk.f32.mxu1 %vm29901_vm0, %v29902_v6  ;;  %v3907_v62 = vsub.f32 %v30180_v36, %v3905_v56 }
0x1a31   :  { %26966 = vmatmul.mubr.msk.f32.vlgmr.msra.gmra.mrb[46].mxu1 %vm442_vm3, %v3831_v43 }
0x1b00   :  { %v30412_v45 = vpop.f32.mrb[44].mxu1 }
0x1b01   :  { %v26957_v47 = vpop.f32.mrb[45].mxu1 }
0x1b04   :  { %v3900_v53 = vpop.f32.mrb[46].mxu1 }
0x1b05   :  { %v3904_v59 = vmul.f32 2.5e-05, %v3900_v53  ;;  %v26967_v60 = vpop.f32.mrb[47].mxu1 }
0x1b07   :  { %v3912_v61 = vrot.slane %v3904_v59, %v30146_v7 }
0x1b09   :  { %v3913_v0 = vmul.f32 0.0, %v3912_v61  ;;  %v3914_v1 = vmul.f32 %v3912_v61, %v30295_v2 }
0x1b0b   :  { %v3915_v4 = vadd.f32 %v3913_v0, %v3907_v62  ;;  %v3916_v8 = vadd.f32 %v3914_v1, %v3908_v54 }
0x1b0d   :  { %26972 = vmatprep.mubr.msk.f32.mxu0 %vm1170_vm11, %v3915_v4  ;;  %v28851_v9 = vpack.c.bf16 %v3916_v8, %v3915_v4 }
0x1b0f   :  { %28852 = vmatprep.subr.bf16.mxu0 %v28851_v9 }
0x1b10   :  { %28854 = vmatpush3.bf16.msra.mxu0 %v28851_v9 }
0x1b13   :  { %26973 = vmatmul.mubr.msk.f32.vlgmr.msra.gmra.mrb[40].mxu0 %vm1170_vm11, %v3916_v8 }
0x1be6   :  { %v26974_v10 = vpop.f32.mrb[40].mxu0 }
0x1be7   :  { %v3989_v12 = vpop.f32.mrb[41].mxu0 }
0x1be8   :  { %26979 = vmatprep.mubr.msk.f32.mxu1 %vm1170_vm11, %v3989_v12  ;;  %v28855_v13 = vpack.c.bf16 %v26974_v10, %v3989_v12 }
0x1bea   :  { %28856 = vmatprep.subr.bf16.mxu1 %v28855_v13 }
0x1beb   :  { %28858 = vmatpush3.bf16.msra.mxu1 %v28855_v13 }
0x1bee   :  { %26980 = vmatmul.mubr.msk.f32.vlgmr.msra.gmra.mrb[48].mxu1 %vm1170_vm11, %v26974_v10 }
0x1cc1   :  { %v26981_v15 = vpop.f32.mrb[48].mxu1 }
0x1cc2   :  { %v4070_v16 = vpop.f32.mrb[49].mxu1 }
0x1cc3   :  { %v28859_v17 = vpack.c.bf16 %v26981_v15, %v4070_v16  ;;  %26986 = vmatprep.mubr.msk.f32.mxu0 %vm1170_vm11, %v4070_v16  ;;  %v5119_v16 = vsel %vm5118_vm2, %v30263_v49, %v30267_v52 }
0x1cc5   :  { %28860 = vmatprep.subr.bf16.mxu0 %v28859_v17 }
0x1cc6   :  { %28862 = vmatpush3.bf16.msra.mxu0 %v28859_v17  ;;  %v5121_v17 = vsel %vm5120_vm5, 0.0, %v30282_v58 }
0x1cc9   :  { %26987 = vmatmul.mubr.msk.f32.vlgmr.msra.gmra.mrb[42].mxu0 %vm1170_vm11, %v26981_v15 }
0x1d9c   :  { %v26988_v18 = vpop.f32.mrb[42].mxu0 }
0x1d9d   :  { %v4151_v19 = vpop.f32.mrb[43].mxu0 }
0x1d9e   :  { %v28863_v20 = vpack.c.bf16 %v26988_v18, %v4151_v19  ;;  %26993 = vmatprep.mubr.msk.f32.mxu1 %vm1170_vm11, %v4151_v19 }
0x1da0   :  { %28864 = vmatprep.subr.bf16.mxu1 %v28863_v20 }
0x1da1   :  { %28866 = vmatpush3.bf16.msra.mxu1 %v28863_v20 }
0x1da4   :  { %26994 = vmatmul.mubr.msk.f32.vlgmr.msra.gmra.mrb[50].mxu1 %vm1170_vm11, %v26988_v18 }
0x1da5   :  { %27007 = vmatprep.mubr.msk.f32.mxu1 %vm1170_vm11, %v4151_v19 }
0x1e77   :  { %v26995_v23 = vpop.f32.mrb[50].mxu1 }
0x1e78   :  { %v4232_v25 = vpop.f32.mrb[51].mxu1 }
0x1e79   :  { %v28867_v26 = vpack.c.bf16 %v26995_v23, %v4232_v25  ;;  %27000 = vmatprep.mubr.msk.f32.mxu0 %vm1170_vm11, %v4232_v25 }
0x1e7b   :  { %28868 = vmatprep.subr.bf16.mxu0 %v28867_v26 }
0x1e7c   :  { %28870 = vmatpush3.bf16.msra.mxu0 %v28867_v26 }
0x1e7f   :  { %27001 = vmatmul.mubr.msk.f32.vlgmr.msra.gmra.mrb[44].mxu0 %vm1170_vm11, %v26995_v23 }
0x1f52   :  { %v27002_v29 = vpop.f32.mrb[44].mxu0 }
0x1f53   :  { %v4313_v31 = vpop.f32.mrb[45].mxu0 }
0x1f54   :  { %v28871_v32 = vpack.c.bf16 %v27002_v29, %v4313_v31  ;;  %27014 = vmatprep.mubr.msk.f32.mxu0 %vm1170_vm11, %v4313_v31 }
0x1f56   :  { %28872 = vmatprep.subr.bf16.mxu1 %v28871_v32  ;;  %28876 = vmatprep.subr.bf16.mxu0 %v28871_v32 }
0x1f57   :  { %28874 = vmatpush3.bf16.msra.mxu1 %v28871_v32  ;;  %28878 = vmatpush3.bf16.msra.mxu0 %v28871_v32 }
0x1f5a   :  { %27008 = vmatmul.mubr.msk.f32.vlgmr.msra.gmra.mrb[52].mxu1 %vm1170_vm11, %v26988_v18  ;;  %27015 = vmatmul.mubr.msk.f32.vlgmr.msra.gmra.mrb[46].mxu0 %vm1170_vm11, %v27002_v29  ;;  %v5122_v18 = vsel %vm5120_vm5, %v30276_v55, %v30280_v57  ;;  %v5204_v29 = vrot.slane %v30172_v35, 3 }
0x202d   :  { %v27009_v34 = vpop.f32.mrb[52].mxu1  ;;  %v27016_v43 = vpop.f32.mrb[46].mxu0 }
0x202e   :  { %v4388_v47 = vpop.f32.mrb[53].mxu1  ;;  %v4469_v51 = vpop.f32.mrb[47].mxu0 }
0x202f   :  { %v28879_v53 = vpack.c.bf16 %v27016_v43, %v4469_v51  ;;  %27021 = vmatprep.mubr.msk.f32.mxu1 %vm1170_vm11, %v4388_v47  ;;  %27028 = vmatprep.mubr.msk.f32.mxu0 %vm1170_vm11, %v4469_v51 }
0x2031   :  { %28880 = vmatprep.subr.bf16.mxu1 %v28879_v53  ;;  %28884 = vmatprep.subr.bf16.mxu0 %v28879_v53 }
0x2032   :  { %28882 = vmatpush3.bf16.msra.mxu1 %v28879_v53  ;;  %28886 = vmatpush3.bf16.msra.mxu0 %v28879_v53 }
0x2035   :  { %27022 = vmatmul.mubr.msk.f32.vlgmr.msra.gmra.mrb[54].mxu1 %vm1170_vm11, %v27009_v34  ;;  %27029 = vmatmul.mubr.msk.f32.vlgmr.msra.gmra.mrb[48].mxu0 %vm1170_vm11, %v27016_v43 }
0x2108   :  { %v27023_v56 = vpop.f32.mrb[54].mxu1  ;;  %v27030_v59 = vpop.f32.mrb[48].mxu0 }
0x2109   :  { %v4550_v60 = vpop.f32.mrb[55].mxu1  ;;  %v4631_v61 = vpop.f32.mrb[49].mxu0 }
0x210a   :  { %v28887_v54 = vpack.c.bf16 %v27030_v59, %v4631_v61  ;;  %27035 = vmatprep.mubr.msk.f32.mxu1 %vm1170_vm11, %v4550_v60  ;;  %27042 = vmatprep.mubr.msk.f32.mxu0 %vm1170_vm11, %v4631_v61 }
0x210c   :  { %28888 = vmatprep.subr.bf16.mxu1 %v28887_v54  ;;  %28892 = vmatprep.subr.bf16.mxu0 %v28887_v54 }
0x210d   :  { %28890 = vmatpush3.bf16.msra.mxu1 %v28887_v54  ;;  %28894 = vmatpush3.bf16.msra.mxu0 %v28887_v54 }
0x2110   :  { %27036 = vmatmul.mubr.msk.f32.vlgmr.msra.gmra.mrb[56].mxu1 %vm1170_vm11, %v27023_v56  ;;  %27043 = vmatmul.mubr.msk.f32.vlgmr.msra.gmra.mrb[50].mxu0 %vm1170_vm11, %v27030_v59 }
0x21e3   :  { %v27037_v62 = vpop.f32.mrb[56].mxu1  ;;  %v27044_v0 = vpop.f32.mrb[50].mxu0 }
0x21e4   :  { %v4712_v1 = vpop.f32.mrb[57].mxu1  ;;  %v4793_v4 = vpop.f32.mrb[51].mxu0 }
0x21e5   :  { %v28895_v8 = vpack.c.bf16 %v27044_v0, %v4793_v4  ;;  %27049 = vmatprep.mubr.msk.f32.mxu1 %vm1170_vm11, %v4712_v1  ;;  %27056 = vmatprep.mubr.msk.f32.mxu0 %vm1170_vm11, %v4793_v4 }
0x21e7   :  { %28896 = vmatprep.subr.bf16.mxu1 %v28895_v8  ;;  %28900 = vmatprep.subr.bf16.mxu0 %v28895_v8 }
0x21e8   :  { %28898 = vmatpush3.bf16.msra.mxu1 %v28895_v8  ;;  %28902 = vmatpush3.bf16.msra.mxu0 %v28895_v8 }
0x21e9   :  { %28907 = vmatprep.subr.bf16.mxu0 %v29900_v3 }
0x21eb   :  { %27050 = vmatmul.mubr.msk.f32.vlgmr.msra.gmra.mrb[58].mxu1 %vm1170_vm11, %v27037_v62  ;;  %27057 = vmatmul.mubr.msk.f32.vlgmr.msra.gmra.mrb[52].mxu0 %vm1170_vm11, %v27044_v0 }
0x21ec   :  { %27070 = vmatprep.mubr.msk.f32.mxu0 %vm29901_vm0, %v29902_v6 }
0x22be   :  { %v27051_v9 = vpop.f32.mrb[58].mxu1  ;;  %v27058_v10 = vpop.f32.mrb[52].mxu0 }
0x22bf   :  { %v4874_v12 = vpop.f32.mrb[59].mxu1  ;;  %v4955_v13 = vpop.f32.mrb[53].mxu0 }
0x22c0   :  { %v28903_v15 = vpack.c.bf16 %v27058_v10, %v4955_v13  ;;  %27063 = vmatprep.mubr.msk.f32.mxu1 %vm1170_vm11, %v4874_v12 }
0x22c2   :  { %28904 = vmatprep.subr.bf16.mxu1 %v28903_v15 }
0x22c3   :  { %28906 = vmatpush3.bf16.msra.mxu1 %v28903_v15 }
0x22c4   :  { %27073 = vmatprep.subr.mxu1 %v5119_v16 }
0x22c6   :  { %27064 = vmatmul.mubr.msk.f32.vlgmr.msra.gmra.mrb[60].mxu1 %vm1170_vm11, %v27051_v9 }
0x22c7   :  { %27074 = vmatpush3.msra.mxu1 %v5119_v16  ;;  %27075 = vmatprep.mubr.msk.f32.mxu1 %vm442_vm3, %v5121_v17 }
0x22ca   :  { %27076 = vmatmul.mubr.msk.f32.vlgmr.msra.gmra.mrb[62].mxu1 %vm442_vm3, %v5122_v18 }
0x2399   :  { %v27065_v19 = vpop.f32.mrb[60].mxu1 }
0x239a   :  { %v5036_v20 = vpop.f32.mrb[61].mxu1 }
0x239b   :  { %v28908_v23 = vpack.c.bf16 %v27065_v19, %v5036_v20 }
0x239d   :  { %28909 = vmatpush3.bf16.msra.mxu0 %v28908_v23  ;;  %v27077_v25 = vpop.f32.mrb[62].mxu1 }
0x239e   :  { %v5195_v26 = vpop.f32.mrb[63].mxu1  ;;  %27078 = vmatprep.subr.mxu0 %v29902_v6  ;;  %v5279_v34 = vmul.f32 2.5e-05, %v27077_v25 }
0x239f   :  { %v5278_v47 = vmul.f32 2.5e-05, %v5195_v26 }
0x23a0   :  { %27071 = vmatmul.mubr.msk.f32.vlgmr.msra.gmra.mrb[54].mxu0 %vm1170_vm11, %v30412_v45  ;;  %v5281_v45 = vsub.f32 %v30254_v48, %v5279_v34 }
0x23a1   :  { %27079 = vmatpush3.msra.mxu0 %v5119_v16  ;;  %27080 = vmatprep.mubr.msk.f32.mxu0 %vm29901_vm0, %v29902_v6  ;;  %v5280_v59 = vsub.f32 %v30180_v36, %v5278_v47 }
0x23a4   :  { %27081 = vmatmul.mubr.msk.f32.vlgmr.msra.gmra.mrb[56].mxu0 %vm442_vm3, %v5204_v29 }
0x2473   :  { %v30471_v31 = vpop.f32.mrb[54].mxu0 }
0x2474   :  { %v27072_v32 = vpop.f32.mrb[55].mxu0 }
0x2477   :  { %v5273_v43 = vpop.f32.mrb[56].mxu0 }
0x2478   :  { %v5277_v51 = vmul.f32 2.5e-05, %v5273_v43  ;;  %v27082_v53 = vpop.f32.mrb[57].mxu0 }
0x247a   :  { %v5285_v56 = vrot.slane %v5277_v51, %v30146_v7 }
0x247c   :  { %v5286_v60 = vmul.f32 0.0, %v5285_v56  ;;  %v5287_v61 = vmul.f32 %v5285_v56, %v30295_v2 }
0x247e   :  { %v5288_v54 = vadd.f32 %v5286_v60, %v5280_v59  ;;  %v5289_v62 = vadd.f32 %v5287_v61, %v5281_v45 }
0x2480   :  { %27087 = vmatprep.mubr.msk.f32.mxu1 %vm1170_vm11, %v5288_v54  ;;  %v28910_v0 = vpack.c.bf16 %v5289_v62, %v5288_v54 }
0x2482   :  { %28911 = vmatprep.subr.bf16.mxu1 %v28910_v0 }
0x2483   :  { %28913 = vmatpush3.bf16.msra.mxu1 %v28910_v0 }
0x2486   :  { %27088 = vmatmul.mubr.msk.f32.vlgmr.msra.gmra.mrb[64].mxu1 %vm1170_vm11, %v5289_v62 }
0x2559   :  { %v27089_v1 = vpop.f32.mrb[64].mxu1 }
0x255a   :  { %v5362_v4 = vpop.f32.mrb[65].mxu1 }
0x255b   :  { %v28914_v8 = vpack.c.bf16 %v27089_v1, %v5362_v4  ;;  %27094 = vmatprep.mubr.msk.f32.mxu0 %vm1170_vm11, %v5362_v4 }
0x255d   :  { %28915 = vmatprep.subr.bf16.mxu0 %v28914_v8 }
0x255e   :  { %28917 = vmatpush3.bf16.msra.mxu0 %v28914_v8 }
0x2561   :  { %27095 = vmatmul.mubr.msk.f32.vlgmr.msra.gmra.mrb[58].mxu0 %vm1170_vm11, %v27089_v1 }
0x2634   :  { %v27096_v9 = vpop.f32.mrb[58].mxu0 }
0x2635   :  { %v5443_v10 = vpop.f32.mrb[59].mxu0 }
0x2636   :  { %v28918_v12 = vpack.c.bf16 %v27096_v9, %v5443_v10  ;;  %27101 = vmatprep.mubr.msk.f32.mxu1 %vm1170_vm11, %v5443_v10  ;;  %v6492_v10 = vsel %vm6491_vm6, %v30263_v49, %v30267_v52 }
0x2638   :  { %28919 = vmatprep.subr.bf16.mxu1 %v28918_v12 }
0x2639   :  { %28921 = vmatpush3.bf16.msra.mxu1 %v28918_v12  ;;  %v6494_v12 = vsel %vm31466_vm8, 0.0, %v30282_v58 }
0x263c   :  { %27102 = vmatmul.mubr.msk.f32.vlgmr.msra.gmra.mrb[66].mxu1 %vm1170_vm11, %v27096_v9 }
0x270f   :  { %v27103_v13 = vpop.f32.mrb[66].mxu1 }
0x2710   :  { %v5524_v15 = vpop.f32.mrb[67].mxu1 }
0x2711   :  { %v28922_v16 = vpack.c.bf16 %v27103_v13, %v5524_v15  ;;  %27108 = vmatprep.mubr.msk.f32.mxu0 %vm1170_vm11, %v5524_v15 }
0x2713   :  { %28923 = vmatprep.subr.bf16.mxu0 %v28922_v16 }
0x2714   :  { %28925 = vmatpush3.bf16.msra.mxu0 %v28922_v16 }
0x2717   :  { %27109 = vmatmul.mubr.msk.f32.vlgmr.msra.gmra.mrb[60].mxu0 %vm1170_vm11, %v27103_v13 }
0x2718   :  { %27122 = vmatprep.mubr.msk.f32.mxu0 %vm1170_vm11, %v5524_v15 }
0x27ea   :  { %v27110_v17 = vpop.f32.mrb[60].mxu0 }
0x27eb   :  { %v5605_v18 = vpop.f32.mrb[61].mxu0 }
0x27ec   :  { %v28926_v19 = vpack.c.bf16 %v27110_v17, %v5605_v18  ;;  %27115 = vmatprep.mubr.msk.f32.mxu1 %vm1170_vm11, %v5605_v18 }
0x27ee   :  { %28927 = vmatprep.subr.bf16.mxu1 %v28926_v19 }
0x27ef   :  { %28929 = vmatpush3.bf16.msra.mxu1 %v28926_v19 }
0x27f2   :  { %27116 = vmatmul.mubr.msk.f32.vlgmr.msra.gmra.mrb[68].mxu1 %vm1170_vm11, %v27110_v17 }
0x28c5   :  { %v27117_v20 = vpop.f32.mrb[68].mxu1 }
0x28c6   :  { %v5686_v23 = vpop.f32.mrb[69].mxu1 }
0x28c7   :  { %v28930_v25 = vpack.c.bf16 %v27117_v20, %v5686_v23  ;;  %27129 = vmatprep.mubr.msk.f32.mxu1 %vm1170_vm11, %v5686_v23 }
0x28c9   :  { %28931 = vmatprep.subr.bf16.mxu0 %v28930_v25  ;;  %28935 = vmatprep.subr.bf16.mxu1 %v28930_v25 }
0x28ca   :  { %28933 = vmatpush3.bf16.msra.mxu0 %v28930_v25  ;;  %28937 = vmatpush3.bf16.msra.mxu1 %v28930_v25 }
0x28cd   :  { %27123 = vmatmul.mubr.msk.f32.vlgmr.msra.gmra.mrb[62].mxu0 %vm1170_vm11, %v27103_v13  ;;  %27130 = vmatmul.mubr.msk.f32.vlgmr.msra.gmra.mrb[70].mxu1 %vm1170_vm11, %v27117_v20  ;;  %v6495_v13 = vsel %vm31466_vm8, %v30276_v55, %v30280_v57  ;;  %v6577_v20 = vrot.slane %v30172_v35, 4  ;;  %vm31467_vm8 = vcmp.eq.s32.totalorder %v30157_v27, 5 }
0x29a0   :  { %v27124_v26 = vpop.f32.mrb[62].mxu0  ;;  %v27131_v29 = vpop.f32.mrb[70].mxu1 }
0x29a1   :  { %v5761_v32 = vpop.f32.mrb[63].mxu0  ;;  %v5842_v34 = vpop.f32.mrb[71].mxu1 }
0x29a2   :  { %v28938_v43 = vpack.c.bf16 %v27131_v29, %v5842_v34  ;;  %27136 = vmatprep.mubr.msk.f32.mxu0 %vm1170_vm11, %v5761_v32  ;;  %27143 = vmatprep.mubr.msk.f32.mxu1 %vm1170_vm11, %v5842_v34 }
0x29a4   :  { %28939 = vmatprep.subr.bf16.mxu0 %v28938_v43  ;;  %28943 = vmatprep.subr.bf16.mxu1 %v28938_v43 }
0x29a5   :  { %28941 = vmatpush3.bf16.msra.mxu0 %v28938_v43  ;;  %28945 = vmatpush3.bf16.msra.mxu1 %v28938_v43 }
0x29a8   :  { %27137 = vmatmul.mubr.msk.f32.vlgmr.msra.gmra.mrb[64].mxu0 %vm1170_vm11, %v27124_v26  ;;  %27144 = vmatmul.mubr.msk.f32.vlgmr.msra.gmra.mrb[72].mxu1 %vm1170_vm11, %v27131_v29 }
0x2a7b   :  { %v27138_v47 = vpop.f32.mrb[64].mxu0  ;;  %v27145_v51 = vpop.f32.mrb[72].mxu1 }
0x2a7c   :  { %v5923_v53 = vpop.f32.mrb[65].mxu0  ;;  %v6004_v56 = vpop.f32.mrb[73].mxu1 }
0x2a7d   :  { %v28946_v45 = vpack.c.bf16 %v27145_v51, %v6004_v56  ;;  %27150 = vmatprep.mubr.msk.f32.mxu0 %vm1170_vm11, %v5923_v53  ;;  %27157 = vmatprep.mubr.msk.f32.mxu1 %vm1170_vm11, %v6004_v56 }
0x2a7f   :  { %28947 = vmatprep.subr.bf16.mxu0 %v28946_v45  ;;  %28951 = vmatprep.subr.bf16.mxu1 %v28946_v45 }
0x2a80   :  { %28949 = vmatpush3.bf16.msra.mxu0 %v28946_v45  ;;  %28953 = vmatpush3.bf16.msra.mxu1 %v28946_v45 }
0x2a83   :  { %27151 = vmatmul.mubr.msk.f32.vlgmr.msra.gmra.mrb[66].mxu0 %vm1170_vm11, %v27138_v47  ;;  %27158 = vmatmul.mubr.msk.f32.vlgmr.msra.gmra.mrb[74].mxu1 %vm1170_vm11, %v27145_v51 }
0x2b56   :  { %v27152_v59 = vpop.f32.mrb[66].mxu0  ;;  %v27159_v60 = vpop.f32.mrb[74].mxu1 }
0x2b57   :  { %v6085_v61 = vpop.f32.mrb[67].mxu0  ;;  %v6166_v54 = vpop.f32.mrb[75].mxu1 }
0x2b58   :  { %v28954_v62 = vpack.c.bf16 %v27159_v60, %v6166_v54  ;;  %27164 = vmatprep.mubr.msk.f32.mxu0 %vm1170_vm11, %v6085_v61  ;;  %27171 = vmatprep.mubr.msk.f32.mxu1 %vm1170_vm11, %v6166_v54 }
0x2b5a   :  { %28955 = vmatprep.subr.bf16.mxu0 %v28954_v62  ;;  %28959 = vmatprep.subr.bf16.mxu1 %v28954_v62 }
0x2b5b   :  { %28957 = vmatpush3.bf16.msra.mxu0 %v28954_v62  ;;  %28961 = vmatpush3.bf16.msra.mxu1 %v28954_v62 }
0x2b5c   :  { %28966 = vmatprep.subr.bf16.mxu1 %v29900_v3 }
0x2b5e   :  { %27165 = vmatmul.mubr.msk.f32.vlgmr.msra.gmra.mrb[68].mxu0 %vm1170_vm11, %v27152_v59  ;;  %27172 = vmatmul.mubr.msk.f32.vlgmr.msra.gmra.mrb[76].mxu1 %vm1170_vm11, %v27159_v60 }
0x2b5f   :  { %27185 = vmatprep.mubr.msk.f32.mxu1 %vm29901_vm0, %v29902_v6 }
0x2c31   :  { %v27166_v0 = vpop.f32.mrb[68].mxu0  ;;  %v27173_v1 = vpop.f32.mrb[76].mxu1 }
0x2c32   :  { %v6247_v4 = vpop.f32.mrb[69].mxu0  ;;  %v6328_v8 = vpop.f32.mrb[77].mxu1 }
0x2c33   :  { %v28962_v9 = vpack.c.bf16 %v27173_v1, %v6328_v8  ;;  %27178 = vmatprep.mubr.msk.f32.mxu0 %vm1170_vm11, %v6247_v4 }
0x2c35   :  { %28963 = vmatprep.subr.bf16.mxu0 %v28962_v9 }
0x2c36   :  { %28965 = vmatpush3.bf16.msra.mxu0 %v28962_v9 }
0x2c37   :  { %27188 = vmatprep.subr.mxu0 %v6492_v10 }
0x2c39   :  { %27179 = vmatmul.mubr.msk.f32.vlgmr.msra.gmra.mrb[70].mxu0 %vm1170_vm11, %v27166_v0 }
0x2c3a   :  { %27189 = vmatpush3.msra.mxu0 %v6492_v10  ;;  %27190 = vmatprep.mubr.msk.f32.mxu0 %vm442_vm3, %v6494_v12 }
0x2c3d   :  { %27191 = vmatmul.mubr.msk.f32.vlgmr.msra.gmra.mrb[72].mxu0 %vm442_vm3, %v6495_v13 }
0x2d0c   :  { %v27180_v15 = vpop.f32.mrb[70].mxu0 }
0x2d0d   :  { %v6409_v16 = vpop.f32.mrb[71].mxu0 }
0x2d0e   :  { %v28967_v17 = vpack.c.bf16 %v27180_v15, %v6409_v16 }
0x2d10   :  { %28968 = vmatpush3.bf16.msra.mxu1 %v28967_v17  ;;  %v27192_v18 = vpop.f32.mrb[72].mxu0 }
0x2d11   :  { %v6568_v19 = vpop.f32.mrb[73].mxu0  ;;  %27193 = vmatprep.subr.mxu1 %v29902_v6  ;;  %v6652_v26 = vmul.f32 2.5e-05, %v27192_v18 }
0x2d12   :  { %v6651_v32 = vmul.f32 2.5e-05, %v6568_v19 }
0x2d13   :  { %27186 = vmatmul.mubr.msk.f32.vlgmr.msra.gmra.mrb[78].mxu1 %vm1170_vm11, %v30471_v31  ;;  %v6654_v31 = vsub.f32 %v30254_v48, %v6652_v26 }
0x2d14   :  { %27194 = vmatpush3.msra.mxu1 %v6492_v10  ;;  %27195 = vmatprep.mubr.msk.f32.mxu1 %vm29901_vm0, %v29902_v6  ;;  %v6653_v51 = vsub.f32 %v30180_v36, %v6651_v32 }
0x2d17   :  { %27196 = vmatmul.mubr.msk.f32.vlgmr.msra.gmra.mrb[80].mxu1 %vm442_vm3, %v6577_v20 }
0x2de6   :  { %v30530_v23 = vpop.f32.mrb[78].mxu1 }
0x2de7   :  { %v27187_v25 = vpop.f32.mrb[79].mxu1 }
0x2dea   :  { %v6646_v29 = vpop.f32.mrb[80].mxu1 }
0x2deb   :  { %v6650_v34 = vmul.f32 2.5e-05, %v6646_v29  ;;  %v27197_v43 = vpop.f32.mrb[81].mxu1 }
0x2ded   :  { %v6658_v47 = vrot.slane %v6650_v34, %v30146_v7 }
0x2def   :  { %v6659_v53 = vmul.f32 0.0, %v6658_v47  ;;  %v6660_v56 = vmul.f32 %v6658_v47, %v30295_v2 }
0x2df1   :  { %v6661_v45 = vadd.f32 %v6659_v53, %v6653_v51  ;;  %v6662_v59 = vadd.f32 %v6660_v56, %v6654_v31 }
0x2df3   :  { %27202 = vmatprep.mubr.msk.f32.mxu0 %vm1170_vm11, %v6661_v45  ;;  %v28969_v60 = vpack.c.bf16 %v6662_v59, %v6661_v45 }
0x2df5   :  { %28970 = vmatprep.subr.bf16.mxu0 %v28969_v60 }
0x2df6   :  { %28972 = vmatpush3.bf16.msra.mxu0 %v28969_v60 }
0x2df9   :  { %27203 = vmatmul.mubr.msk.f32.vlgmr.msra.gmra.mrb[74].mxu0 %vm1170_vm11, %v6662_v59 }
0x2ecc   :  { %v27204_v61 = vpop.f32.mrb[74].mxu0 }
0x2ecd   :  { %v6735_v54 = vpop.f32.mrb[75].mxu0 }
0x2ece   :  { %v28973_v62 = vpack.c.bf16 %v27204_v61, %v6735_v54  ;;  %27209 = vmatprep.mubr.msk.f32.mxu1 %vm1170_vm11, %v6735_v54 }
0x2ed0   :  { %28974 = vmatprep.subr.bf16.mxu1 %v28973_v62 }
0x2ed1   :  { %28976 = vmatpush3.bf16.msra.mxu1 %v28973_v62 }
0x2ed4   :  { %27210 = vmatmul.mubr.msk.f32.vlgmr.msra.gmra.mrb[82].mxu1 %vm1170_vm11, %v27204_v61 }
0x2fa7   :  { %v27211_v0 = vpop.f32.mrb[82].mxu1 }
0x2fa8   :  { %v6816_v1 = vpop.f32.mrb[83].mxu1 }
0x2fa9   :  { %v28977_v4 = vpack.c.bf16 %v27211_v0, %v6816_v1  ;;  %27216 = vmatprep.mubr.msk.f32.mxu0 %vm1170_vm11, %v6816_v1  ;;  %v7865_v1 = vsel %vm31468_vm10, %v30263_v49, %v30267_v52  ;;  %vm31469_vm10 = vcmp.eq.s32.totalorder %v30157_v27, 6 }
0x2fab   :  { %28978 = vmatprep.subr.bf16.mxu0 %v28977_v4 }
0x2fac   :  { %28980 = vmatpush3.bf16.msra.mxu0 %v28977_v4  ;;  %v7867_v4 = vsel %vm31467_vm8, 0.0, %v30282_v58 }
0x2faf   :  { %27217 = vmatmul.mubr.msk.f32.vlgmr.msra.gmra.mrb[76].mxu0 %vm1170_vm11, %v27211_v0 }
0x3082   :  { %v27218_v8 = vpop.f32.mrb[76].mxu0 }
0x3083   :  { %v6897_v9 = vpop.f32.mrb[77].mxu0 }
0x3084   :  { %v28981_v10 = vpack.c.bf16 %v27218_v8, %v6897_v9  ;;  %27223 = vmatprep.mubr.msk.f32.mxu1 %vm1170_vm11, %v6897_v9 }
0x3086   :  { %28982 = vmatprep.subr.bf16.mxu1 %v28981_v10 }
0x3087   :  { %28984 = vmatpush3.bf16.msra.mxu1 %v28981_v10 }
0x308a   :  { %27224 = vmatmul.mubr.msk.f32.vlgmr.msra.gmra.mrb[84].mxu1 %vm1170_vm11, %v27218_v8 }
0x308b   :  { %27237 = vmatprep.mubr.msk.f32.mxu1 %vm1170_vm11, %v6897_v9 }
0x315d   :  { %v27225_v12 = vpop.f32.mrb[84].mxu1 }
0x315e   :  { %v6978_v13 = vpop.f32.mrb[85].mxu1 }
0x315f   :  { %v28985_v15 = vpack.c.bf16 %v27225_v12, %v6978_v13  ;;  %27230 = vmatprep.mubr.msk.f32.mxu0 %vm1170_vm11, %v6978_v13 }
0x3161   :  { %28986 = vmatprep.subr.bf16.mxu0 %v28985_v15 }
0x3162   :  { %28988 = vmatpush3.bf16.msra.mxu0 %v28985_v15 }
0x3165   :  { %27231 = vmatmul.mubr.msk.f32.vlgmr.msra.gmra.mrb[78].mxu0 %vm1170_vm11, %v27225_v12 }
0x3238   :  { %v27232_v16 = vpop.f32.mrb[78].mxu0 }
0x3239   :  { %v7059_v17 = vpop.f32.mrb[79].mxu0 }
0x323a   :  { %v28989_v18 = vpack.c.bf16 %v27232_v16, %v7059_v17  ;;  %27244 = vmatprep.mubr.msk.f32.mxu0 %vm1170_vm11, %v7059_v17 }
0x323c   :  { %28990 = vmatprep.subr.bf16.mxu1 %v28989_v18  ;;  %28994 = vmatprep.subr.bf16.mxu0 %v28989_v18 }
0x323d   :  { %28992 = vmatpush3.bf16.msra.mxu1 %v28989_v18  ;;  %28996 = vmatpush3.bf16.msra.mxu0 %v28989_v18 }
0x3240   :  { %27238 = vmatmul.mubr.msk.f32.vlgmr.msra.gmra.mrb[86].mxu1 %vm1170_vm11, %v27218_v8  ;;  %27245 = vmatmul.mubr.msk.f32.vlgmr.msra.gmra.mrb[80].mxu0 %vm1170_vm11, %v27232_v16  ;;  %v7868_v8 = vsel %vm31467_vm8, %v30276_v55, %v30280_v57  ;;  %v7950_v16 = vrot.slane %v30172_v35, 5  ;;  %vm31470_vm8 = vcmp.eq.s32.totalorder %v30122_v50, 6 }
0x3313   :  { %v27239_v19 = vpop.f32.mrb[86].mxu1  ;;  %v27246_v20 = vpop.f32.mrb[80].mxu0 }
0x3314   :  { %v7134_v25 = vpop.f32.mrb[87].mxu1  ;;  %v7215_v26 = vpop.f32.mrb[81].mxu0 }
0x3315   :  { %v28997_v29 = vpack.c.bf16 %v27246_v20, %v7215_v26  ;;  %27251 = vmatprep.mubr.msk.f32.mxu1 %vm1170_vm11, %v7134_v25  ;;  %27258 = vmatprep.mubr.msk.f32.mxu0 %vm1170_vm11, %v7215_v26 }
0x3317   :  { %28998 = vmatprep.subr.bf16.mxu1 %v28997_v29  ;;  %29002 = vmatprep.subr.bf16.mxu0 %v28997_v29 }
0x3318   :  { %29000 = vmatpush3.bf16.msra.mxu1 %v28997_v29  ;;  %29004 = vmatpush3.bf16.msra.mxu0 %v28997_v29 }
0x331b   :  { %27252 = vmatmul.mubr.msk.f32.vlgmr.msra.gmra.mrb[88].mxu1 %vm1170_vm11, %v27239_v19  ;;  %27259 = vmatmul.mubr.msk.f32.vlgmr.msra.gmra.mrb[82].mxu0 %vm1170_vm11, %v27246_v20 }
0x33ee   :  { %v27253_v32 = vpop.f32.mrb[88].mxu1  ;;  %v27260_v34 = vpop.f32.mrb[82].mxu0 }
0x33ef   :  { %v7296_v43 = vpop.f32.mrb[89].mxu1  ;;  %v7377_v47 = vpop.f32.mrb[83].mxu0 }
0x33f0   :  { %v29005_v31 = vpack.c.bf16 %v27260_v34, %v7377_v47  ;;  %27265 = vmatprep.mubr.msk.f32.mxu1 %vm1170_vm11, %v7296_v43  ;;  %27272 = vmatprep.mubr.msk.f32.mxu0 %vm1170_vm11, %v7377_v47 }
0x33f2   :  { %29006 = vmatprep.subr.bf16.mxu1 %v29005_v31  ;;  %29010 = vmatprep.subr.bf16.mxu0 %v29005_v31 }
0x33f3   :  { %29008 = vmatpush3.bf16.msra.mxu1 %v29005_v31  ;;  %29012 = vmatpush3.bf16.msra.mxu0 %v29005_v31 }
0x33f6   :  { %27266 = vmatmul.mubr.msk.f32.vlgmr.msra.gmra.mrb[90].mxu1 %vm1170_vm11, %v27253_v32  ;;  %27273 = vmatmul.mubr.msk.f32.vlgmr.msra.gmra.mrb[84].mxu0 %vm1170_vm11, %v27260_v34 }
0x34c9   :  { %v27267_v51 = vpop.f32.mrb[90].mxu1  ;;  %v27274_v53 = vpop.f32.mrb[84].mxu0 }
0x34ca   :  { %v7458_v56 = vpop.f32.mrb[91].mxu1  ;;  %v7539_v45 = vpop.f32.mrb[85].mxu0 }
0x34cb   :  { %v29013_v59 = vpack.c.bf16 %v27274_v53, %v7539_v45  ;;  %27279 = vmatprep.mubr.msk.f32.mxu1 %vm1170_vm11, %v7458_v56  ;;  %27286 = vmatprep.mubr.msk.f32.mxu0 %vm1170_vm11, %v7539_v45 }
0x34cd   :  { %29014 = vmatprep.subr.bf16.mxu1 %v29013_v59  ;;  %29018 = vmatprep.subr.bf16.mxu0 %v29013_v59 }
0x34ce   :  { %29016 = vmatpush3.bf16.msra.mxu1 %v29013_v59  ;;  %29020 = vmatpush3.bf16.msra.mxu0 %v29013_v59 }
0x34cf   :  { %29025 = vmatprep.subr.bf16.mxu0 %v29900_v3 }
0x34d1   :  { %27280 = vmatmul.mubr.msk.f32.vlgmr.msra.gmra.mrb[92].mxu1 %vm1170_vm11, %v27267_v51  ;;  %27287 = vmatmul.mubr.msk.f32.vlgmr.msra.gmra.mrb[86].mxu0 %vm1170_vm11, %v27274_v53 }
0x34d2   :  { %27300 = vmatprep.mubr.msk.f32.mxu0 %vm29901_vm0, %v29902_v6 }
0x35a4   :  { %v27281_v60 = vpop.f32.mrb[92].mxu1  ;;  %v27288_v61 = vpop.f32.mrb[86].mxu0 }
0x35a5   :  { %v7620_v54 = vpop.f32.mrb[93].mxu1  ;;  %v7701_v62 = vpop.f32.mrb[87].mxu0 }
0x35a6   :  { %v29021_v0 = vpack.c.bf16 %v27288_v61, %v7701_v62  ;;  %27293 = vmatprep.mubr.msk.f32.mxu1 %vm1170_vm11, %v7620_v54 }
0x35a8   :  { %29022 = vmatprep.subr.bf16.mxu1 %v29021_v0 }
0x35a9   :  { %29024 = vmatpush3.bf16.msra.mxu1 %v29021_v0 }
0x35aa   :  { %27303 = vmatprep.subr.mxu1 %v7865_v1 }
0x35ac   :  { %27294 = vmatmul.mubr.msk.f32.vlgmr.msra.gmra.mrb[94].mxu1 %vm1170_vm11, %v27281_v60 }
0x35ad   :  { %27304 = vmatpush3.msra.mxu1 %v7865_v1  ;;  %27305 = vmatprep.mubr.msk.f32.mxu1 %vm442_vm3, %v7867_v4 }
0x35b0   :  { %27306 = vmatmul.mubr.msk.f32.vlgmr.msra.gmra.mrb[96].mxu1 %vm442_vm3, %v7868_v8 }
0x367f   :  { %v27295_v9 = vpop.f32.mrb[94].mxu1 }
0x3680   :  { %v7782_v10 = vpop.f32.mrb[95].mxu1 }
0x3681   :  { %v29026_v12 = vpack.c.bf16 %v27295_v9, %v7782_v10 }
0x3683   :  { %29027 = vmatpush3.bf16.msra.mxu0 %v29026_v12  ;;  %v27307_v13 = vpop.f32.mrb[96].mxu1 }
0x3684   :  { %v7941_v15 = vpop.f32.mrb[97].mxu1  ;;  %27308 = vmatprep.subr.mxu0 %v29902_v6  ;;  %v8025_v19 = vmul.f32 2.5e-05, %v27307_v13 }
0x3685   :  { %v8024_v25 = vmul.f32 2.5e-05, %v7941_v15 }
0x3686   :  { %27301 = vmatmul.mubr.msk.f32.vlgmr.msra.gmra.mrb[88].mxu0 %vm1170_vm11, %v30530_v23  ;;  %v8027_v23 = vsub.f32 %v30254_v48, %v8025_v19 }
0x3687   :  { %27309 = vmatpush3.msra.mxu0 %v7865_v1  ;;  %27310 = vmatprep.mubr.msk.f32.mxu0 %vm29901_vm0, %v29902_v6  ;;  %v8026_v34 = vsub.f32 %v30180_v36, %v8024_v25 }
0x368a   :  { %27311 = vmatmul.mubr.msk.f32.vlgmr.msra.gmra.mrb[90].mxu0 %vm442_vm3, %v7950_v16 }
0x3759   :  { %v30589_v17 = vpop.f32.mrb[88].mxu0 }
0x375a   :  { %v27302_v18 = vpop.f32.mrb[89].mxu0 }
0x375d   :  { %v8019_v20 = vpop.f32.mrb[90].mxu0 }
0x375e   :  { %v8023_v26 = vmul.f32 2.5e-05, %v8019_v20  ;;  %v27312_v29 = vpop.f32.mrb[91].mxu0 }
0x3760   :  { %v8031_v32 = vrot.slane %v8023_v26, %v30146_v7 }
0x3762   :  { %v8032_v43 = vmul.f32 0.0, %v8031_v32  ;;  %v8033_v47 = vmul.f32 %v8031_v32, %v30295_v2 }
0x3764   :  { %v8034_v31 = vadd.f32 %v8032_v43, %v8026_v34  ;;  %v8035_v51 = vadd.f32 %v8033_v47, %v8027_v23 }
0x3766   :  { %27317 = vmatprep.mubr.msk.f32.mxu1 %vm1170_vm11, %v8034_v31  ;;  %v29028_v53 = vpack.c.bf16 %v8035_v51, %v8034_v31 }
0x3768   :  { %29029 = vmatprep.subr.bf16.mxu1 %v29028_v53 }
0x3769   :  { %29031 = vmatpush3.bf16.msra.mxu1 %v29028_v53 }
0x376c   :  { %27318 = vmatmul.mubr.msk.f32.vlgmr.msra.gmra.mrb[98].mxu1 %vm1170_vm11, %v8035_v51 }
0x383f   :  { %v27319_v56 = vpop.f32.mrb[98].mxu1 }
0x3840   :  { %v8108_v45 = vpop.f32.mrb[99].mxu1 }
0x3841   :  { %v29032_v59 = vpack.c.bf16 %v27319_v56, %v8108_v45  ;;  %27324 = vmatprep.mubr.msk.f32.mxu0 %vm1170_vm11, %v8108_v45 }
0x3843   :  { %29033 = vmatprep.subr.bf16.mxu0 %v29032_v59 }
0x3844   :  { %29035 = vmatpush3.bf16.msra.mxu0 %v29032_v59 }
0x3847   :  { %27325 = vmatmul.mubr.msk.f32.vlgmr.msra.gmra.mrb[92].mxu0 %vm1170_vm11, %v27319_v56 }
0x391a   :  { %v27326_v60 = vpop.f32.mrb[92].mxu0 }
0x391b   :  { %v8189_v61 = vpop.f32.mrb[93].mxu0 }
0x391c   :  { %v29036_v54 = vpack.c.bf16 %v27326_v60, %v8189_v61  ;;  %27331 = vmatprep.mubr.msk.f32.mxu1 %vm1170_vm11, %v8189_v61  ;;  %v9238_v61 = vsel %vm31470_vm8, %v30263_v49, %v30267_v52  ;;  %vm10612_vm8 = vcmp.eq.s32.totalorder %v30157_v27, 7 }
0x391e   :  { %29037 = vmatprep.subr.bf16.mxu1 %v29036_v54 }
0x391f   :  { %29039 = vmatpush3.bf16.msra.mxu1 %v29036_v54  ;;  %v9240_v54 = vsel %vm31469_vm10, 0.0, %v30282_v58 }
0x3922   :  { %27332 = vmatmul.mubr.msk.f32.vlgmr.msra.gmra.mrb[100].mxu1 %vm1170_vm11, %v27326_v60 }
0x39f5   :  { %v27333_v62 = vpop.f32.mrb[100].mxu1 }
0x39f6   :  { %v8270_v0 = vpop.f32.mrb[101].mxu1 }
0x39f7   :  { %v29040_v1 = vpack.c.bf16 %v27333_v62, %v8270_v0  ;;  %27338 = vmatprep.mubr.msk.f32.mxu0 %vm1170_vm11, %v8270_v0 }
0x39f9   :  { %29041 = vmatprep.subr.bf16.mxu0 %v29040_v1 }
0x39fa   :  { %29043 = vmatpush3.bf16.msra.mxu0 %v29040_v1 }
0x39fd   :  { %27339 = vmatmul.mubr.msk.f32.vlgmr.msra.gmra.mrb[94].mxu0 %vm1170_vm11, %v27333_v62 }
0x39fe   :  { %27352 = vmatprep.mubr.msk.f32.mxu0 %vm1170_vm11, %v8270_v0 }
0x3ad0   :  { %v27340_v4 = vpop.f32.mrb[94].mxu0 }
0x3ad1   :  { %v8351_v8 = vpop.f32.mrb[95].mxu0 }
0x3ad2   :  { %v29044_v9 = vpack.c.bf16 %v27340_v4, %v8351_v8  ;;  %27345 = vmatprep.mubr.msk.f32.mxu1 %vm1170_vm11, %v8351_v8 }
0x3ad4   :  { %29045 = vmatprep.subr.bf16.mxu1 %v29044_v9 }
0x3ad5   :  { %29047 = vmatpush3.bf16.msra.mxu1 %v29044_v9 }
0x3ad8   :  { %27346 = vmatmul.mubr.msk.f32.vlgmr.msra.gmra.mrb[102].mxu1 %vm1170_vm11, %v27340_v4 }
0x3bab   :  { %v27347_v10 = vpop.f32.mrb[102].mxu1 }
0x3bac   :  { %v8432_v12 = vpop.f32.mrb[103].mxu1 }
0x3bad   :  { %v29048_v13 = vpack.c.bf16 %v27347_v10, %v8432_v12  ;;  %27359 = vmatprep.mubr.msk.f32.mxu1 %vm1170_vm11, %v8432_v12 }
0x3baf   :  { %29049 = vmatprep.subr.bf16.mxu0 %v29048_v13  ;;  %29053 = vmatprep.subr.bf16.mxu1 %v29048_v13 }
0x3bb0   :  { %29051 = vmatpush3.bf16.msra.mxu0 %v29048_v13  ;;  %29055 = vmatpush3.bf16.msra.mxu1 %v29048_v13 }
0x3bb3   :  { %27353 = vmatmul.mubr.msk.f32.vlgmr.msra.gmra.mrb[96].mxu0 %vm1170_vm11, %v27333_v62  ;;  %27360 = vmatmul.mubr.msk.f32.vlgmr.msra.gmra.mrb[104].mxu1 %vm1170_vm11, %v27347_v10  ;;  %v9241_v62 = vsel %vm31469_vm10, %v30276_v55, %v30280_v57  ;;  %v9323_v10 = vrot.slane %v30172_v35, 6  ;;  %vm10610_vm10 = vcmp.eq.s32.totalorder %v30122_v50, 7 }
0x3c86   :  { %v27354_v15 = vpop.f32.mrb[96].mxu0  ;;  %v27361_v16 = vpop.f32.mrb[104].mxu1 }
0x3c87   :  { %v8507_v18 = vpop.f32.mrb[97].mxu0  ;;  %v8588_v19 = vpop.f32.mrb[105].mxu1 }
0x3c88   :  { %v29056_v20 = vpack.c.bf16 %v27361_v16, %v8588_v19  ;;  %27366 = vmatprep.mubr.msk.f32.mxu0 %vm1170_vm11, %v8507_v18  ;;  %27373 = vmatprep.mubr.msk.f32.mxu1 %vm1170_vm11, %v8588_v19 }
0x3c8a   :  { %29057 = vmatprep.subr.bf16.mxu0 %v29056_v20  ;;  %29061 = vmatprep.subr.bf16.mxu1 %v29056_v20 }
0x3c8b   :  { %29059 = vmatpush3.bf16.msra.mxu0 %v29056_v20  ;;  %29063 = vmatpush3.bf16.msra.mxu1 %v29056_v20 }
0x3c8e   :  { %27367 = vmatmul.mubr.msk.f32.vlgmr.msra.gmra.mrb[98].mxu0 %vm1170_vm11, %v27354_v15  ;;  %27374 = vmatmul.mubr.msk.f32.vlgmr.msra.gmra.mrb[106].mxu1 %vm1170_vm11, %v27361_v16 }
0x3d61   :  { %v27368_v25 = vpop.f32.mrb[98].mxu0  ;;  %v27375_v26 = vpop.f32.mrb[106].mxu1 }
0x3d62   :  { %v8669_v29 = vpop.f32.mrb[99].mxu0  ;;  %v8750_v32 = vpop.f32.mrb[107].mxu1 }
0x3d63   :  { %v29064_v23 = vpack.c.bf16 %v27375_v26, %v8750_v32  ;;  %27380 = vmatprep.mubr.msk.f32.mxu0 %vm1170_vm11, %v8669_v29  ;;  %27387 = vmatprep.mubr.msk.f32.mxu1 %vm1170_vm11, %v8750_v32 }
0x3d65   :  { %29065 = vmatprep.subr.bf16.mxu0 %v29064_v23  ;;  %29069 = vmatprep.subr.bf16.mxu1 %v29064_v23 }
0x3d66   :  { %29067 = vmatpush3.bf16.msra.mxu0 %v29064_v23  ;;  %29071 = vmatpush3.bf16.msra.mxu1 %v29064_v23 }
0x3d69   :  { %27381 = vmatmul.mubr.msk.f32.vlgmr.msra.gmra.mrb[100].mxu0 %vm1170_vm11, %v27368_v25  ;;  %27388 = vmatmul.mubr.msk.f32.vlgmr.msra.gmra.mrb[108].mxu1 %vm1170_vm11, %v27375_v26 }
0x3e3c   :  { %v27382_v34 = vpop.f32.mrb[100].mxu0  ;;  %v27389_v43 = vpop.f32.mrb[108].mxu1 }
0x3e3d   :  { %v8831_v47 = vpop.f32.mrb[101].mxu0  ;;  %v8912_v31 = vpop.f32.mrb[109].mxu1 }
0x3e3e   :  { %v29072_v51 = vpack.c.bf16 %v27389_v43, %v8912_v31  ;;  %27394 = vmatprep.mubr.msk.f32.mxu0 %vm1170_vm11, %v8831_v47  ;;  %27401 = vmatprep.mubr.msk.f32.mxu1 %vm1170_vm11, %v8912_v31 }
0x3e40   :  { %29073 = vmatprep.subr.bf16.mxu0 %v29072_v51  ;;  %29077 = vmatprep.subr.bf16.mxu1 %v29072_v51 }
0x3e41   :  { %29075 = vmatpush3.bf16.msra.mxu0 %v29072_v51  ;;  %29079 = vmatpush3.bf16.msra.mxu1 %v29072_v51 }
0x3e42   :  { %29084 = vmatprep.subr.bf16.mxu1 %v29900_v3 }
0x3e44   :  { %27395 = vmatmul.mubr.msk.f32.vlgmr.msra.gmra.mrb[102].mxu0 %vm1170_vm11, %v27382_v34  ;;  %27402 = vmatmul.mubr.msk.f32.vlgmr.msra.gmra.mrb[110].mxu1 %vm1170_vm11, %v27389_v43 }
0x3e45   :  { %27415 = vmatprep.mubr.msk.f32.mxu1 %vm29901_vm0, %v29902_v6 }
0x3f17   :  { %v27396_v53 = vpop.f32.mrb[102].mxu0  ;;  %v27403_v56 = vpop.f32.mrb[110].mxu1 }
0x3f18   :  { %v8993_v45 = vpop.f32.mrb[103].mxu0  ;;  %v9074_v59 = vpop.f32.mrb[111].mxu1 }
0x3f19   :  { %v29080_v60 = vpack.c.bf16 %v27403_v56, %v9074_v59  ;;  %27408 = vmatprep.mubr.msk.f32.mxu0 %vm1170_vm11, %v8993_v45 }
0x3f1b   :  { %29081 = vmatprep.subr.bf16.mxu0 %v29080_v60 }
0x3f1c   :  { %29083 = vmatpush3.bf16.msra.mxu0 %v29080_v60 }
0x3f1d   :  { %27418 = vmatprep.subr.mxu0 %v9238_v61 }
0x3f1f   :  { %27409 = vmatmul.mubr.msk.f32.vlgmr.msra.gmra.mrb[104].mxu0 %vm1170_vm11, %v27396_v53 }
0x3f20   :  { %27419 = vmatpush3.msra.mxu0 %v9238_v61  ;;  %27420 = vmatprep.mubr.msk.f32.mxu0 %vm442_vm3, %v9240_v54 }
0x3f23   :  { %27421 = vmatmul.mubr.msk.f32.vlgmr.msra.gmra.mrb[106].mxu0 %vm442_vm3, %v9241_v62 }
0x3ff2   :  { %v27410_v0 = vpop.f32.mrb[104].mxu0 }
0x3ff3   :  { %v9155_v1 = vpop.f32.mrb[105].mxu0 }
0x3ff4   :  { %v29085_v4 = vpack.c.bf16 %v27410_v0, %v9155_v1 }
0x3ff6   :  { %29086 = vmatpush3.bf16.msra.mxu1 %v29085_v4  ;;  %v27422_v8 = vpop.f32.mrb[106].mxu0 }
0x3ff7   :  { %v9314_v9 = vpop.f32.mrb[107].mxu0  ;;  %27423 = vmatprep.subr.mxu1 %v29902_v6  ;;  %v9398_v15 = vmul.f32 2.5e-05, %v27422_v8 }
0x3ff8   :  { %v9397_v18 = vmul.f32 2.5e-05, %v9314_v9 }
0x3ff9   :  { %27416 = vmatmul.mubr.msk.f32.vlgmr.msra.gmra.mrb[112].mxu1 %vm1170_vm11, %v30589_v17  ;;  %v9400_v17 = vsub.f32 %v30254_v48, %v9398_v15 }
0x3ffa   :  { %27424 = vmatpush3.msra.mxu1 %v9238_v61  ;;  %27425 = vmatprep.mubr.msk.f32.mxu1 %vm29901_vm0, %v29902_v6  ;;  %v9399_v26 = vsub.f32 %v30180_v36, %v9397_v18 }
0x3ffd   :  { %27426 = vmatmul.mubr.msk.f32.vlgmr.msra.gmra.mrb[114].mxu1 %vm442_vm3, %v9323_v10 }
0x40cc   :  { %v30648_v12 = vpop.f32.mrb[112].mxu1 }
0x40cd   :  { %v27417_v13 = vpop.f32.mrb[113].mxu1 }
0x40d0   :  { %v9392_v16 = vpop.f32.mrb[114].mxu1 }
0x40d1   :  { %v9396_v19 = vmul.f32 2.5e-05, %v9392_v16  ;;  %v27427_v20 = vpop.f32.mrb[115].mxu1 }
0x40d3   :  { %v9404_v25 = vrot.slane %v9396_v19, %v30146_v7 }
0x40d5   :  { %v9405_v29 = vmul.f32 0.0, %v9404_v25  ;;  %v9406_v32 = vmul.f32 %v9404_v25, %v30295_v2 }
0x40d7   :  { %v9407_v23 = vadd.f32 %v9405_v29, %v9399_v26  ;;  %v9408_v34 = vadd.f32 %v9406_v32, %v9400_v17 }
0x40d9   :  { %27432 = vmatprep.mubr.msk.f32.mxu0 %vm1170_vm11, %v9407_v23  ;;  %v29087_v43 = vpack.c.bf16 %v9408_v34, %v9407_v23 }
0x40db   :  { %29088 = vmatprep.subr.bf16.mxu0 %v29087_v43 }
0x40dc   :  { %29090 = vmatpush3.bf16.msra.mxu0 %v29087_v43 }
0x40df   :  { %27433 = vmatmul.mubr.msk.f32.vlgmr.msra.gmra.mrb[108].mxu0 %vm1170_vm11, %v9408_v34 }
0x41b2   :  { %v27434_v47 = vpop.f32.mrb[108].mxu0 }
0x41b3   :  { %v9481_v31 = vpop.f32.mrb[109].mxu0 }
0x41b4   :  { %v29091_v51 = vpack.c.bf16 %v27434_v47, %v9481_v31  ;;  %27439 = vmatprep.mubr.msk.f32.mxu1 %vm1170_vm11, %v9481_v31 }
0x41b6   :  { %29092 = vmatprep.subr.bf16.mxu1 %v29091_v51 }
0x41b7   :  { %29094 = vmatpush3.bf16.msra.mxu1 %v29091_v51 }
0x41ba   :  { %27440 = vmatmul.mubr.msk.f32.vlgmr.msra.gmra.mrb[116].mxu1 %vm1170_vm11, %v27434_v47 }
0x428d   :  { %v27441_v53 = vpop.f32.mrb[116].mxu1 }
0x428e   :  { %v9562_v56 = vpop.f32.mrb[117].mxu1 }
0x428f   :  { %v29095_v45 = vpack.c.bf16 %v27441_v53, %v9562_v56  ;;  %27446 = vmatprep.mubr.msk.f32.mxu0 %vm1170_vm11, %v9562_v56  ;;  %v10611_v56 = vsel %vm10610_vm10, %v30263_v49, %v30267_v52 }
0x4291   :  { %29096 = vmatprep.subr.bf16.mxu0 %v29095_v45 }
0x4292   :  { %29098 = vmatpush3.bf16.msra.mxu0 %v29095_v45  ;;  %v10613_v45 = vsel %vm10612_vm8, 0.0, %v30282_v58  ;;  %v10696_v58 = vrot.slane %v30172_v35, 7 }
0x4295   :  { %27447 = vmatmul.mubr.msk.f32.vlgmr.msra.gmra.mrb[110].mxu0 %vm1170_vm11, %v27441_v53 }
0x4368   :  { %v27448_v59 = vpop.f32.mrb[110].mxu0 }
0x4369   :  { %v9643_v60 = vpop.f32.mrb[111].mxu0 }
0x436a   :  { %v29099_v61 = vpack.c.bf16 %v27448_v59, %v9643_v60  ;;  %27453 = vmatprep.mubr.msk.f32.mxu1 %vm1170_vm11, %v9643_v60 }
0x436c   :  { %29100 = vmatprep.subr.bf16.mxu1 %v29099_v61 }
0x436d   :  { %29102 = vmatpush3.bf16.msra.mxu1 %v29099_v61 }
0x4370   :  { %27454 = vmatmul.mubr.msk.f32.vlgmr.msra.gmra.mrb[118].mxu1 %vm1170_vm11, %v27448_v59 }
0x4371   :  { %27467 = vmatprep.mubr.msk.f32.mxu1 %vm1170_vm11, %v9643_v60 }
0x4443   :  { %v27455_v54 = vpop.f32.mrb[118].mxu1 }
0x4444   :  { %v9724_v62 = vpop.f32.mrb[119].mxu1 }
0x4445   :  { %v29103_v0 = vpack.c.bf16 %v27455_v54, %v9724_v62  ;;  %27460 = vmatprep.mubr.msk.f32.mxu0 %vm1170_vm11, %v9724_v62 }
0x4447   :  { %29104 = vmatprep.subr.bf16.mxu0 %v29103_v0 }
0x4448   :  { %29106 = vmatpush3.bf16.msra.mxu0 %v29103_v0 }
0x444b   :  { %27461 = vmatmul.mubr.msk.f32.vlgmr.msra.gmra.mrb[112].mxu0 %vm1170_vm11, %v27455_v54 }
0x451e   :  { %v27462_v1 = vpop.f32.mrb[112].mxu0 }
0x451f   :  { %v9805_v4 = vpop.f32.mrb[113].mxu0 }
0x4520   :  { %v29107_v8 = vpack.c.bf16 %v27462_v1, %v9805_v4  ;;  %27474 = vmatprep.mubr.msk.f32.mxu0 %vm1170_vm11, %v9805_v4 }
0x4522   :  { %29108 = vmatprep.subr.bf16.mxu1 %v29107_v8  ;;  %29112 = vmatprep.subr.bf16.mxu0 %v29107_v8 }
0x4523   :  { %29110 = vmatpush3.bf16.msra.mxu1 %v29107_v8  ;;  %29114 = vmatpush3.bf16.msra.mxu0 %v29107_v8 }
0x4526   :  { %27468 = vmatmul.mubr.msk.f32.vlgmr.msra.gmra.mrb[120].mxu1 %vm1170_vm11, %v27448_v59  ;;  %27475 = vmatmul.mubr.msk.f32.vlgmr.msra.gmra.mrb[114].mxu0 %vm1170_vm11, %v27462_v1  ;;  %v10614_v59 = vsel %vm10612_vm8, %v30276_v55, %v30280_v57 }
0x45f9   :  { %v27469_v9 = vpop.f32.mrb[120].mxu1  ;;  %v27476_v10 = vpop.f32.mrb[114].mxu0 }
0x45fa   :  { %v9880_v13 = vpop.f32.mrb[121].mxu1  ;;  %v9961_v15 = vpop.f32.mrb[115].mxu0 }
0x45fb   :  { %v29115_v16 = vpack.c.bf16 %v27476_v10, %v9961_v15  ;;  %27481 = vmatprep.mubr.msk.f32.mxu1 %vm1170_vm11, %v9880_v13  ;;  %27488 = vmatprep.mubr.msk.f32.mxu0 %vm1170_vm11, %v9961_v15 }
0x45fd   :  { %29116 = vmatprep.subr.bf16.mxu1 %v29115_v16  ;;  %29120 = vmatprep.subr.bf16.mxu0 %v29115_v16 }
0x45fe   :  { %29118 = vmatpush3.bf16.msra.mxu1 %v29115_v16  ;;  %29122 = vmatpush3.bf16.msra.mxu0 %v29115_v16 }
0x4601   :  { %27482 = vmatmul.mubr.msk.f32.vlgmr.msra.gmra.mrb[122].mxu1 %vm1170_vm11, %v27469_v9  ;;  %27489 = vmatmul.mubr.msk.f32.vlgmr.msra.gmra.mrb[116].mxu0 %vm1170_vm11, %v27476_v10 }
0x46d4   :  { %v27483_v18 = vpop.f32.mrb[122].mxu1  ;;  %v27490_v19 = vpop.f32.mrb[116].mxu0 }
0x46d5   :  { %v10042_v20 = vpop.f32.mrb[123].mxu1  ;;  %v10123_v25 = vpop.f32.mrb[117].mxu0 }
0x46d6   :  { %v29123_v17 = vpack.c.bf16 %v27490_v19, %v10123_v25  ;;  %27495 = vmatprep.mubr.msk.f32.mxu1 %vm1170_vm11, %v10042_v20  ;;  %27502 = vmatprep.mubr.msk.f32.mxu0 %vm1170_vm11, %v10123_v25 }
0x46d8   :  { %29124 = vmatprep.subr.bf16.mxu1 %v29123_v17  ;;  %29128 = vmatprep.subr.bf16.mxu0 %v29123_v17 }
0x46d9   :  { %29126 = vmatpush3.bf16.msra.mxu1 %v29123_v17  ;;  %29130 = vmatpush3.bf16.msra.mxu0 %v29123_v17 }
0x46dc   :  { %27496 = vmatmul.mubr.msk.f32.vlgmr.msra.gmra.mrb[124].mxu1 %vm1170_vm11, %v27483_v18  ;;  %27503 = vmatmul.mubr.msk.f32.vlgmr.msra.gmra.mrb[118].mxu0 %vm1170_vm11, %v27490_v19 }
0x47af   :  { %v27497_v26 = vpop.f32.mrb[124].mxu1  ;;  %v27504_v29 = vpop.f32.mrb[118].mxu0 }
0x47b0   :  { %v10204_v32 = vpop.f32.mrb[125].mxu1  ;;  %v10285_v23 = vpop.f32.mrb[119].mxu0 }
0x47b1   :  { %v29131_v34 = vpack.c.bf16 %v27504_v29, %v10285_v23  ;;  %27509 = vmatprep.mubr.msk.f32.mxu1 %vm1170_vm11, %v10204_v32  ;;  %27516 = vmatprep.mubr.msk.f32.mxu0 %vm1170_vm11, %v10285_v23 }
0x47b3   :  { %29132 = vmatprep.subr.bf16.mxu1 %v29131_v34  ;;  %29136 = vmatprep.subr.bf16.mxu0 %v29131_v34 }
0x47b4   :  { %29134 = vmatpush3.bf16.msra.mxu1 %v29131_v34  ;;  %29138 = vmatpush3.bf16.msra.mxu0 %v29131_v34 }
0x47b5   :  { %29143 = vmatprep.subr.bf16.mxu0 %v29900_v3 }
0x47b7   :  { %27510 = vmatmul.mubr.msk.f32.vlgmr.msra.gmra.mrb[126].mxu1 %vm1170_vm11, %v27497_v26  ;;  %27517 = vmatmul.mubr.msk.f32.vlgmr.msra.gmra.mrb[120].mxu0 %vm1170_vm11, %v27504_v29 }
0x47b8   :  { %27530 = vmatprep.mubr.msk.f32.mxu0 %vm29901_vm0, %v29902_v6 }
0x488a   :  { %v27511_v43 = vpop.f32.mrb[126].mxu1  ;;  %v27518_v47 = vpop.f32.mrb[120].mxu0 }
0x488b   :  { %v10366_v31 = vpop.f32.mrb[127].mxu1  ;;  %v10447_v51 = vpop.f32.mrb[121].mxu0 }
0x488c   :  { %v29139_v53 = vpack.c.bf16 %v27518_v47, %v10447_v51  ;;  %27523 = vmatprep.mubr.msk.f32.mxu1 %vm1170_vm11, %v10366_v31 }
0x488e   :  { %29140 = vmatprep.subr.bf16.mxu1 %v29139_v53 }
0x488f   :  { %29142 = vmatpush3.bf16.msra.mxu1 %v29139_v53 }
0x4890   :  { %27533 = vmatprep.subr.mxu1 %v10611_v56 }
0x4892   :  { %27524 = vmatmul.mubr.msk.f32.vlgmr.msra.gmra.mrb[128].mxu1 %vm1170_vm11, %v27511_v43 }
0x4893   :  { %27534 = vmatpush3.msra.mxu1 %v10611_v56  ;;  %27535 = vmatprep.mubr.msk.f32.mxu1 %vm442_vm3, %v10613_v45 }
0x4896   :  { %27536 = vmatmul.mubr.msk.f32.vlgmr.msra.gmra.mrb[130].mxu1 %vm442_vm3, %v10614_v59 }
0x4965   :  { %v27525_v52 = vpop.f32.mrb[128].mxu1 }
0x4966   :  { %v10528_v60 = vpop.f32.mrb[129].mxu1 }
0x4967   :  { %v29144_v61 = vpack.c.bf16 %v27525_v52, %v10528_v60 }
0x4969   :  { %29145 = vmatpush3.bf16.msra.mxu0 %v29144_v61  ;;  %v27537_v54 = vpop.f32.mrb[130].mxu1 }
0x496a   :  { %v10687_v62 = vpop.f32.mrb[131].mxu1  ;;  %27538 = vmatprep.subr.mxu0 %v29902_v6  ;;  %v10771_v1 = vmul.f32 2.5e-05, %v27537_v54 }
0x496b   :  { %v10770_v8 = vmul.f32 2.5e-05, %v10687_v62 }
0x496c   :  { %27531 = vmatmul.mubr.msk.f32.vlgmr.msra.gmra.mrb[122].mxu0 %vm1170_vm11, %v30648_v12  ;;  %v10773_v12 = vsub.f32 %v30254_v48, %v10771_v1 }
0x496d   :  { %27539 = vmatpush3.msra.mxu0 %v10611_v56  ;;  %27540 = vmatprep.mubr.msk.f32.mxu0 %vm29901_vm0, %v29902_v6  ;;  %v10772_v15 = vsub.f32 %v30180_v36, %v10770_v8 }
0x4970   :  { %27541 = vmatmul.mubr.msk.f32.vlgmr.msra.gmra.mrb[124].mxu0 %vm442_vm3, %v10696_v58 }
0x4a3f   :  { %v30707_v57 = vpop.f32.mrb[122].mxu0 }
0x4a40   :  { %v27532_v0 = vpop.f32.mrb[123].mxu0 }
0x4a43   :  { %v10765_v4 = vpop.f32.mrb[124].mxu0 }
0x4a44   :  { %v10769_v9 = vmul.f32 2.5e-05, %v10765_v4  ;;  %v27542_v10 = vpop.f32.mrb[125].mxu0 }
0x4a46   :  { %v10777_v13 = vrot.slane %v10769_v9, %v30146_v7 }
0x4a48   :  { %v10778_v16 = vmul.f32 0.0, %v10777_v13  ;;  %v10779_v18 = vmul.f32 %v10777_v13, %v30295_v2 }
0x4a4a   :  { %v10780_v35 = vadd.f32 %v10778_v16, %v10772_v15  ;;  %v10781_v19 = vadd.f32 %v10779_v18, %v10773_v12 }
0x4a4c   :  { %27547 = vmatprep.mubr.msk.f32.mxu1 %vm1170_vm11, %v10780_v35  ;;  %v29146_v20 = vpack.c.bf16 %v10781_v19, %v10780_v35 }
0x4a4e   :  { %29147 = vmatprep.subr.bf16.mxu1 %v29146_v20 }
0x4a4f   :  { %29149 = vmatpush3.bf16.msra.mxu1 %v29146_v20 }
0x4a52   :  { %27548 = vmatmul.mubr.msk.f32.vlgmr.msra.gmra.mrb[132].mxu1 %vm1170_vm11, %v10781_v19 }
0x4b25   :  { %v27549_v25 = vpop.f32.mrb[132].mxu1 }
0x4b26   :  { %v10854_v17 = vpop.f32.mrb[133].mxu1 }
0x4b27   :  { %v29150_v26 = vpack.c.bf16 %v27549_v25, %v10854_v17  ;;  %27554 = vmatprep.mubr.msk.f32.mxu0 %vm1170_vm11, %v10854_v17 }
0x4b29   :  { %29151 = vmatprep.subr.bf16.mxu0 %v29150_v26 }
0x4b2a   :  { %29153 = vmatpush3.bf16.msra.mxu0 %v29150_v26  ;;  %v25238_v26 = vld [vmem:[%s30073_s12 + $0x8] sm:$0xff] }
0x4b2d   :  { %27555 = vmatmul.mubr.msk.f32.vlgmr.msra.gmra.mrb[126].mxu0 %vm1170_vm11, %v27549_v25 }
0x4c00   :  { %v27556_v29 = vpop.f32.mrb[126].mxu0 }
0x4c01   :  { %v10935_v32 = vpop.f32.mrb[127].mxu0 }
0x4c02   :  { %v29154_v23 = vpack.c.bf16 %v27556_v29, %v10935_v32  ;;  %27561 = vmatprep.mubr.msk.f32.mxu1 %vm1170_vm11, %v10935_v32  ;;  %v11985_v32 = vmul.f32 %v25238_v26, %v30168_v33  ;;  %v11990_v33 = vld [vmem:[%s29978_s24 + $0x8] sm:$0xff] }
0x4c04   :  { %29155 = vmatprep.subr.bf16.mxu1 %v29154_v23 }
0x4c05   :  { %29157 = vmatpush3.bf16.msra.mxu1 %v29154_v23  ;;  %v11989_v23 = vld [vmem:[%s29978_s24] sm:$0xff] }
0x4c08   :  { %27562 = vmatmul.mubr.msk.f32.vlgmr.msra.gmra.mrb[134].mxu1 %vm1170_vm11, %v27556_v29 }
0x4cdb   :  { %v27563_v34 = vpop.f32.mrb[134].mxu1 }
0x4cdc   :  { %v11016_v43 = vpop.f32.mrb[135].mxu1 }
0x4cdd   :  { %v29158_v47 = vpack.c.bf16 %v27563_v34, %v11016_v43  ;;  %27568 = vmatprep.mubr.msk.f32.mxu0 %vm1170_vm11, %v11016_v43 }
0x4cdf   :  { %29159 = vmatprep.subr.bf16.mxu0 %v29158_v47 }
0x4ce0   :  { %29161 = vmatpush3.bf16.msra.mxu0 %v29158_v47 }
0x4ce3   :  { %27569 = vmatmul.mubr.msk.f32.vlgmr.msra.gmra.mrb[128].mxu0 %vm1170_vm11, %v27563_v34 }
0x4ce4   :  { %27582 = vmatprep.mubr.msk.f32.mxu0 %vm1170_vm11, %v11016_v43 }
0x4db6   :  { %v27570_v31 = vpop.f32.mrb[128].mxu0 }
0x4db7   :  { %v11097_v51 = vpop.f32.mrb[129].mxu0 }
0x4db8   :  { %v29162_v53 = vpack.c.bf16 %v27570_v31, %v11097_v51  ;;  %27575 = vmatprep.mubr.msk.f32.mxu1 %vm1170_vm11, %v11097_v51 }
0x4dba   :  { %29163 = vmatprep.subr.bf16.mxu1 %v29162_v53 }
0x4dbb   :  { %29165 = vmatpush3.bf16.msra.mxu1 %v29162_v53 }
0x4dbe   :  { %27576 = vmatmul.mubr.msk.f32.vlgmr.msra.gmra.mrb[136].mxu1 %vm1170_vm11, %v27570_v31  ;;  %v25239_v31 = vld [vmem:[%s30068_s4 + $0x8] sm:$0xff] }
0x4e91   :  { %v27577_v56 = vpop.f32.mrb[136].mxu1 }
0x4e92   :  { %v11178_v45 = vpop.f32.mrb[137].mxu1 }
0x4e93   :  { %v29166_v59 = vpack.c.bf16 %v27577_v56, %v11178_v45  ;;  %27589 = vmatprep.mubr.msk.f32.mxu1 %vm1170_vm11, %v11178_v45  ;;  %v12226_v45 = vld [vmem:[%s29988_s6 + $0x8] sm:$0xff] }
0x4e95   :  { %29167 = vmatprep.subr.bf16.mxu0 %v29166_v59  ;;  %29171 = vmatprep.subr.bf16.mxu1 %v29166_v59 }
0x4e96   :  { %29169 = vmatpush3.bf16.msra.mxu0 %v29166_v59  ;;  %29173 = vmatpush3.bf16.msra.mxu1 %v29166_v59 }
0x4e99   :  { %27583 = vmatmul.mubr.msk.f32.vlgmr.msra.gmra.mrb[130].mxu0 %vm1170_vm11, %v27563_v34  ;;  %27590 = vmatmul.mubr.msk.f32.vlgmr.msra.gmra.mrb[138].mxu1 %vm1170_vm11, %v27577_v56  ;;  %v11986_v34 = vadd.f32 %v30154_v24, %v11985_v32  ;;  %v12225_v56 = vld [vmem:[%s29988_s6] sm:$0xff] }
0x4e9a   :  { %v30780_v59 = vpack.c.bf16 %v12226_v45, %v12225_v56 }
0x4f6c   :  { %v27584_v52 = vpop.f32.mrb[130].mxu0  ;;  %v27591_v60 = vpop.f32.mrb[138].mxu1 }
0x4f6d   :  { %v11253_v61 = vpop.f32.mrb[131].mxu0  ;;  %v11334_v54 = vpop.f32.mrb[139].mxu1 }
0x4f6e   :  { %v29174_v62 = vpack.c.bf16 %v27591_v60, %v11334_v54  ;;  %27596 = vmatprep.mubr.msk.f32.mxu0 %vm1170_vm11, %v11253_v61  ;;  %27603 = vmatprep.mubr.msk.f32.mxu1 %vm1170_vm11, %v11334_v54 }
0x4f70   :  { %29175 = vmatprep.subr.bf16.mxu0 %v29174_v62  ;;  %29179 = vmatprep.subr.bf16.mxu1 %v29174_v62 }
0x4f71   :  { %29177 = vmatpush3.bf16.msra.mxu0 %v29174_v62  ;;  %29181 = vmatpush3.bf16.msra.mxu1 %v29174_v62 }
0x4f74   :  { %27597 = vmatmul.mubr.msk.f32.vlgmr.msra.gmra.mrb[132].mxu0 %vm1170_vm11, %v27584_v52  ;;  %27604 = vmatmul.mubr.msk.f32.vlgmr.msra.gmra.mrb[140].mxu1 %vm1170_vm11, %v27591_v60  ;;  %v12227_v52 = vld [vmem:[%s29988_s6 + $0x10] sm:$0xff]  ;;  %v12228_v60 = vld [vmem:[%s29988_s6 + $0x18] sm:$0xff]  ;;  %s31505_s6 = sld [smem:[#allocation16_spill]] }
0x4f75   :  { %v30786_v61 = vpack.c.bf16 %v12228_v60, %v12227_v52 }
0x5047   :  { %v27598_v58 = vpop.f32.mrb[132].mxu0  ;;  %v27605_v0 = vpop.f32.mrb[140].mxu1 }
0x5048   :  { %v11415_v1 = vpop.f32.mrb[133].mxu0  ;;  %v11496_v4 = vpop.f32.mrb[141].mxu1 }
0x5049   :  { %v29182_v8 = vpack.c.bf16 %v27605_v0, %v11496_v4  ;;  %27610 = vmatprep.mubr.msk.f32.mxu0 %vm1170_vm11, %v11415_v1  ;;  %27617 = vmatprep.mubr.msk.f32.mxu1 %vm1170_vm11, %v11496_v4  ;;  %v25243_v1 = vld [vmem:[%s31485_s5] ss:$0 sm:$0xff] }
0x504b   :  { %29183 = vmatprep.subr.bf16.mxu0 %v29182_v8  ;;  %29187 = vmatprep.subr.bf16.mxu1 %v29182_v8 }
0x504c   :  { %29185 = vmatpush3.bf16.msra.mxu0 %v29182_v8  ;;  %29189 = vmatpush3.bf16.msra.mxu1 %v29182_v8 }
0x504f   :  { %27611 = vmatmul.mubr.msk.f32.vlgmr.msra.gmra.mrb[134].mxu0 %vm1170_vm11, %v27598_v58  ;;  %27618 = vmatmul.mubr.msk.f32.vlgmr.msra.gmra.mrb[142].mxu1 %vm1170_vm11, %v27605_v0 }
0x5122   :  { %v27612_v9 = vpop.f32.mrb[134].mxu0  ;;  %v27619_v10 = vpop.f32.mrb[142].mxu1 }
0x5123   :  { %v11577_v13 = vpop.f32.mrb[135].mxu0  ;;  %v11658_v12 = vpop.f32.mrb[143].mxu1 }
0x5124   :  { %v29190_v15 = vpack.c.bf16 %v27619_v10, %v11658_v12  ;;  %27624 = vmatprep.mubr.msk.f32.mxu0 %vm1170_vm11, %v11577_v13  ;;  %27631 = vmatprep.mubr.msk.f32.mxu1 %vm1170_vm11, %v11658_v12  ;;  %v25244_v13 = vld [vmem:[%s31486_s9] ss:$0 sm:$0xff] }
0x5126   :  { %29191 = vmatprep.subr.bf16.mxu0 %v29190_v15  ;;  %29195 = vmatprep.subr.bf16.mxu1 %v29190_v15 }
0x5127   :  { %29193 = vmatpush3.bf16.msra.mxu0 %v29190_v15  ;;  %29197 = vmatpush3.bf16.msra.mxu1 %v29190_v15 }
0x5128   :  { %29202 = vmatprep.subr.bf16.mxu1 %v29900_v3 }
0x512a   :  { %27625 = vmatmul.mubr.msk.f32.vlgmr.msra.gmra.mrb[136].mxu0 %vm1170_vm11, %v27612_v9  ;;  %27632 = vmatmul.mubr.msk.f32.vlgmr.msra.gmra.mrb[144].mxu1 %vm1170_vm11, %v27619_v10 }
0x512b   :  { %27645 = vmatprep.mubr.msk.f32.mxu1 %vm29901_vm0, %v29902_v6 }
0x51fd   :  { %v27626_v16 = vpop.f32.mrb[136].mxu0  ;;  %v27633_v18 = vpop.f32.mrb[144].mxu1 }
0x51fe   :  { %v11739_v35 = vpop.f32.mrb[137].mxu0  ;;  %v11820_v19 = vpop.f32.mrb[145].mxu1 }
0x51ff   :  { %v29198_v20 = vpack.c.bf16 %v27633_v18, %v11820_v19  ;;  %27638 = vmatprep.mubr.msk.f32.mxu0 %vm1170_vm11, %v11739_v35 }
0x5201   :  { %29199 = vmatprep.subr.bf16.mxu0 %v29198_v20 }
0x5202   :  { %29201 = vmatpush3.bf16.msra.mxu0 %v29198_v20 }
0x5203   :  { %27648 = vmatprep.subr.mxu0 %v29902_v6 }
0x5205   :  { %27639 = vmatmul.mubr.msk.f32.vlgmr.msra.gmra.mrb[138].mxu0 %vm1170_vm11, %v27626_v16 }
0x5206   :  { %27650 = vmatprep.mubr.msk.f32.mxu0 %vm29901_vm0, %v29902_v6  ;;  %27649 = vmatpush3.msra.mxu0 %v11990_v33 }
0x5207   :  { %27658 = vmatprep.subr.mxu0 %v29902_v6 }
0x52d8   :  { %v27640_v25 = vpop.f32.mrb[138].mxu0 }
0x52d9   :  { %v11901_v17 = vpop.f32.mrb[139].mxu0 }
0x52da   :  { %v29203_v29 = vpack.c.bf16 %v27640_v25, %v11901_v17 }
0x52dc   :  { %29204 = vmatpush3.bf16.msra.mxu1 %v29203_v29  ;;  %v25247_v29 = vld [vmem:[%s30073_s12 + $0x10] sm:$0xff] }
0x52dd   :  { %27653 = vmatprep.subr.mxu1 %v29902_v6 }
0x52df   :  { %27646 = vmatmul.mubr.msk.f32.vlgmr.msra.gmra.mrb[146].mxu1 %vm1170_vm11, %v30707_v57  ;;  %v12141_v57 = vld [vmem:[%s29978_s24 + $0x10] sm:$0xff] }
0x52e0   :  { %27654 = vmatpush3.msra.mxu1 %v11989_v23  ;;  %27655 = vmatprep.mubr.msk.f32.mxu1 %vm29901_vm0, %v29902_v6 }
0x52e1   :  { %29205 = vmatprep.subr.bf16.mxu1 %v29900_v3 }
0x52e3   :  { %27656 = vmatmul.mubr.msk.f32.vlgmr.msra.gmra.mrb[148].mxu1 %vm442_vm3, %v11986_v34 }
0x52e4   :  { %27671 = vmatprep.mubr.msk.f32.mxu1 %vm29901_vm0, %v29902_v6  ;;  %29207 = vmatpush3.bf16.msra.mxu1 %v30780_v59 }
0x52e5   :  { %29208 = vmatprep.subr.bf16.mxu1 %v29900_v3 }
0x52e8   :  { %29210 = vmatpush3.bf16.msra.mxu1 %v30786_v61 }
0x53b2   :  { %v30763_v43 = vpop.f32.mrb[146].mxu1 }
0x53b3   :  { %v27647_v47 = vpop.f32.mrb[147].mxu1  ;;  %27651 = vmatmul.mubr.msk.f32.vlgmr.msra.gmra.mrb[140].mxu0 %vm442_vm3, %v30763_v43 }
0x53b4   :  { %27659 = vmatpush3.msra.mxu0 %v12141_v57  ;;  %27660 = vmatprep.mubr.msk.f32.mxu0 %vm29901_vm0, %v29902_v6 }
0x53b5   :  { %27674 = vmatprep.subr.mxu0 %v29902_v6 }
0x53b6   :  { %v12137_v51 = vpop.f32.mrb[148].mxu1 }
0x53b7   :  { %v27657_v53 = vpop.f32.mrb[149].mxu1  ;;  %27661 = vmatmul.mubr.msk.f32.vlgmr.msra.gmra.mrb[142].mxu0 %vm442_vm3, %v25239_v31 }
0x53b8   :  { %27675 = vmatpush3.msk.msra.mxu0 %vm151_vm4, %v29907_v30  ;;  %27676 = vmatprep.mubr.msk.f32.mxu0 %vm29901_vm0, %v29902_v6  ;;  %vm31487_vm4 = vcmp.eq.s32.totalorder %v30157_v27, 4 }
0x5486   :  { %v12060_v30 = vpop.f32.mrb[140].mxu0 }
0x5487   :  { %v12067_v54 = vrot.slane %v12060_v30, %v30146_v7  ;;  %v27652_v62 = vpop.f32.mrb[141].mxu0 }
0x5489   :  { %v12138_v58 = vadd.f32 %v12137_v51, %v12067_v54 }
0x548a   :  { %v12211_v0 = vpop.f32.mrb[142].mxu0 }
0x548b   :  { %v12215_v4 = vadd.f32 %v12211_v0, %v12138_v58  ;;  %v27662_v8 = vpop.f32.mrb[143].mxu0 }
0x548d   :  { %v12223_v9 = vadd.f32 %v25243_v1, %v12215_v4 }
0x548f   :  { %v12224_v10 = vmax.f32 %v12223_v9, 0.0 }
0x5491   :  { %27672 = vmatmul.mubr.msk.f32.vlgmr.msra.gmra.mrb[150].mxu1 %vm172_vm1, %v12224_v10 }
0x5564   :  { %v12305_v12 = vpop.f32.mrb[150].mxu1 }
0x5565   :  { %v12306_v15 = vadd.f32 %v25244_v13, %v12305_v12  ;;  %v27673_v16 = vpop.f32.mrb[151].mxu1 }
0x5567   :  { %v25246_v18 = vmul.f32 -1.442695, %v12306_v15 }
0x5569   :  { %29804 = vpow2.f32 %v25246_v18 }
0x5573   :  { %v29805_v35 = vpop.eup %29804 }
0x5574   :  { %v12312_v19 = vadd.f32 1.0, %v29805_v35 }
0x5576   :  { %29806 = vrcp.f32 %v12312_v19 }
0x5580   :  { %v30793_v20 = vpop.eup %29806 }
0x5581   :  { %v12317_v25 = vmul.f32 0.5, %v30793_v20 }
0x5583   :  { %v12318_v17 = vmul.f32 1.442695, %v12317_v25 }
0x5585   :  { %29808 = vpow2.f32 %v12318_v17 }
0x558f   :  { %v29809_v26 = vpop.eup %29808 }
0x5590   :  { %12321 = vrot.lane.b32.xlu1 %v29809_v26, %s29904_s0 }
0x5602   :  { %v30798_v32 = vpop.permute.xlu1 %12321 }
0x5603   :  { %v12324_v23 = vmul.f32 %v25247_v29, %v30798_v32 }
0x5605   :  { %v30802_v34 = vadd.f32 %v30793_v20, %v12324_v23 }
0x5607   :  { %12342 = vperm.xlu1 %29784, %v30802_v34   ;;  %12328 = vperm.xlu0 %29783, %v30802_v34  }
0x5608   :  { %27677 = vmatmul.mubr.msk.f32.vlgmr.msra.gmra.mrb[144].mxu0 %vm442_vm3, %v30802_v34 }
0x5609   :  { %27681 = vmatprep.mubr.msk.f32.mxu0 %vm442_vm3, %v30180_v36 }
0x560b   :  { %29785 = vset.pattern.permute.xlu1 %v29905_v28  ;;  %29786 = vset.pattern.permute.xlu0 %v29910_v39 }
0x560c   :  { %12356 = vperm.xlu1 %29785, %v30802_v34   ;;  %12370 = vperm.xlu0 %29786, %v30802_v34  }
0x5610   :  { %29787 = vset.pattern.permute.xlu1 %v29911_v40  ;;  %29789 = vset.pattern.permute.xlu0 %v29912_v41 }
0x5611   :  { %12384 = vperm.xlu1 %29787, %v30802_v34   ;;  %12412 = vperm.xlu0 %29789, %v30802_v34  }
0x5615   :  { %29788 = vset.pattern.permute.xlu1 %v29908_v37  ;;  %29791 = vset.pattern.permute.xlu0 %v29913_v42 }
0x5616   :  { %12398 = vperm.xlu1 %29788, %v30802_v34  }
0x561a   :  { %29790 = vset.pattern.permute.xlu1 %v29913_v42 }
0x561b   :  { %12426 = vperm.xlu1 %29790, %v30802_v34  }
0x5686   :  { %v12343_v28 = vpop.permute.xlu1 %12342  ;;  %v12329_v39 = vpop.permute.xlu0 %12328 }
0x5687   :  { %v12345_v40 = vmul.f32 %v12343_v28, %v30180_v36  ;;  %v12331_v41 = vmul.f32 %v12329_v39, %v30180_v36 }
0x5689   :  { %v12346_v33 = vsel %vm442_vm3, %v12345_v40, 0.0  ;;  %v12332_v57 = vsel %vm442_vm3, %v12331_v41, 0.0 }
0x568a   :  { %v12347_v47 = vrot.slane %v12346_v33, 4  ;;  %v12333_v37 = vrot.slane %v12332_v57, 4 }
0x568b   :  { %v12357_v31 = vpop.permute.xlu1 %12356  ;;  %v12371_v51 = vpop.permute.xlu0 %12370 }
0x568c   :  { %v12348_v53 = vadd.f32 %v12347_v47, %v12346_v33  ;;  %v12334_v56 = vadd.f32 %v12333_v37, %v12332_v57  ;;  %v12359_v42 = vmul.f32 %v12357_v31, %v30180_v36  ;;  %v12373_v45 = vmul.f32 %v12371_v51, %v30180_v36 }
0x568e   :  { %v12349_v52 = vrot.slane %v12348_v53, 2  ;;  %v12335_v60 = vrot.slane %v12334_v56, 2  ;;  %v12360_v30 = vsel %vm442_vm3, %v12359_v42, 0.0  ;;  %v12374_v54 = vsel %vm442_vm3, %v12373_v45, 0.0 }
0x568f   :  { %v12361_v62 = vrot.slane %v12360_v30, 4  ;;  %v12375_v58 = vrot.slane %v12374_v54, 4 }
0x5690   :  { %v12350_v0 = vadd.f32 %v12349_v52, %v12348_v53  ;;  %v12336_v1 = vadd.f32 %v12335_v60, %v12334_v56  ;;  %v12385_v4 = vpop.permute.xlu1 %12384  ;;  %v12413_v8 = vpop.permute.xlu0 %12412 }
0x5691   :  { %v12362_v9 = vadd.f32 %v12361_v62, %v12360_v30  ;;  %v12376_v10 = vadd.f32 %v12375_v58, %v12374_v54  ;;  %v12387_v13 = vmul.f32 %v12385_v4, %v30180_v36  ;;  %v12415_v12 = vmul.f32 %v12413_v8, %v30180_v36 }
0x5692   :  { %v12351_v15 = vrot.slane %v12350_v0, 1  ;;  %v12337_v16 = vrot.slane %v12336_v1, 1 }
0x5693   :  { %v12363_v18 = vrot.slane %v12362_v9, 2  ;;  %v12377_v35 = vrot.slane %v12376_v10, 2  ;;  %v12388_v19 = vsel %vm442_vm3, %v12387_v13, 0.0  ;;  %v12416_v25 = vsel %vm442_vm3, %v12415_v12, 0.0 }
0x5694   :  { %v12352_v17 = vadd.f32 %v12351_v15, %v12350_v0  ;;  %v12338_v26 = vadd.f32 %v12337_v16, %v12336_v1  ;;  %v12389_v29 = vrot.slane %v12388_v19, 4  ;;  %v12417_v23 = vrot.slane %v12416_v25, 4 }
0x5695   :  { %v12364_v28 = vadd.f32 %v12363_v18, %v12362_v9  ;;  %v12378_v39 = vadd.f32 %v12377_v35, %v12376_v10  ;;  %v12399_v40 = vpop.permute.xlu1 %12398 }
0x5696   :  { %v12390_v41 = vadd.f32 %v12389_v29, %v12388_v19  ;;  %v12418_v33 = vadd.f32 %v12417_v23, %v12416_v25  ;;  %v12353_v57 = vmul.f32 %v12352_v17, %v30223_v14  ;;  %v12339_v47 = vmul.f32 %v12338_v26, %v30227_v46 }
0x5697   :  { %v12365_v37 = vrot.slane %v12364_v28, 1  ;;  %v12401_v31 = vmul.f32 %v12399_v40, %v30180_v36  ;;  %v12379_v51 = vrot.slane %v12378_v39, 1 }
0x5698   :  { %v12391_v53 = vrot.slane %v12390_v41, 2  ;;  %v12419_v56 = vrot.slane %v12418_v33, 2  ;;  %v12354_v54 = vadd.f32 %v12353_v57, %v12339_v47 }
0x5699   :  { %v12366_v42 = vadd.f32 %v12365_v37, %v12364_v28  ;;  %v12402_v45 = vsel %vm442_vm3, %v12401_v31, 0.0  ;;  %v12380_v14 = vadd.f32 %v12379_v51, %v12378_v39 }
0x569a   :  { %v12392_v52 = vadd.f32 %v12391_v53, %v12390_v41  ;;  %v12403_v60 = vrot.slane %v12402_v45, 4  ;;  %v12427_v30 = vpop.permute.xlu1 %12426  ;;  %v12420_v46 = vadd.f32 %v12419_v56, %v12418_v33 }
0x569b   :  { %v12367_v62 = vmul.f32 %v12366_v42, %v30233_v63  ;;  %v12429_v58 = vmul.f32 %v12427_v30, %v30180_v36  ;;  %v12381_v12 = vmul.f32 %v12380_v14, %v30236_v5 }
0x569c   :  { %v12393_v0 = vrot.slane %v12392_v52, 1  ;;  %v12404_v1 = vadd.f32 %v12403_v60, %v12402_v45  ;;  %v12421_v15 = vrot.slane %v12420_v46, 1 }
0x569d   :  { %v12430_v4 = vsel %vm442_vm3, %v12429_v58, 0.0  ;;  %v12368_v8 = vadd.f32 %v12367_v62, %v12354_v54 }
0x569e   :  { %v12394_v9 = vadd.f32 %v12393_v0, %v12392_v52  ;;  %v12405_v10 = vrot.slane %v12404_v1, 2  ;;  %v12431_v13 = vrot.slane %v12430_v4, 4  ;;  %v12422_v17 = vadd.f32 %v12421_v15, %v12420_v46 }
0x569f   :  { %v12382_v35 = vadd.f32 %v12381_v12, %v12368_v8 }
0x56a0   :  { %v12406_v16 = vadd.f32 %v12405_v10, %v12404_v1  ;;  %v12432_v18 = vadd.f32 %v12431_v13, %v12430_v4  ;;  %v12395_v63 = vmul.f32 %v12394_v9, %v30239_v11  ;;  %v12423_v33 = vmul.f32 %v12422_v17, %v30242_v21 }
0x56a2   :  { %v12407_v19 = vrot.slane %v12406_v16, 1  ;;  %v12433_v25 = vrot.slane %v12432_v18, 2  ;;  %v12396_v39 = vadd.f32 %v12395_v63, %v12382_v35 }
0x56a4   :  { %v12408_v26 = vadd.f32 %v12407_v19, %v12406_v16  ;;  %v12434_v29 = vadd.f32 %v12433_v25, %v12432_v18 }
0x56a6   :  { %v12409_v23 = vmul.f32 %v12408_v26, %v30244_v22  ;;  %v12435_v28 = vrot.slane %v12434_v29, 1 }
0x56a8   :  { %v12436_v40 = vadd.f32 %v12435_v28, %v12434_v29  ;;  %v12410_v41 = vadd.f32 %v12409_v23, %v12396_v39 }
0x56aa   :  { %v12424_v5 = vadd.f32 %v12423_v33, %v12410_v41  ;;  %v12437_v57 = vmul.f32 %v12436_v40, %v30249_v38 }
0x56ac   :  { %v12438_v47 = vadd.f32 %v12437_v57, %v12424_v5 }
0x56ae   :  { %27679 = vmatprep.subr.mxu0 %v12438_v47 }
0x56af   :  { %27680 = vmatpush3.msra.mxu0 %v12438_v47 }
0x56b0   :  { %27682 = vmatmul.mubr.msk.f32.vlgmr.msra.gmra.mrb[146].mxu0 %vm442_vm3, %v30254_v48  ;;  %27689 = vmatprep.subr.mxu0 %v29902_v6 }
0x56b1   :  { %27691 = vmatprep.mubr.msk.f32.mxu0 %vm29901_vm0, %v29902_v6 }
0x56db   :  { %v12507_v11 = vpop.f32.mrb[144].mxu0 }
0x56dc   :  { %v30853_v22 = vadd.f32 %v12507_v11, %v30263_v49  ;;  %v27678_v37 = vpop.f32.mrb[145].mxu0 }
0x56de   :  { %v12586_v21 = vsel %vm1001_vm7, %v30263_v49, %v30853_v22  ;;  %vm31488_vm7 = vmmov %vm31487_vm4 }
0x56df   :  { %27684 = vmatprep.subr.mxu1 %v12586_v21  ;;  %27690 = vmatpush3.msra.mxu0 %v12586_v21 }
0x56e0   :  { %27685 = vmatpush3.msra.mxu1 %v12586_v21  ;;  %27692 = vmatmul.mubr.msk.f32.vlgmr.msra.gmra.mrb[148].mxu0 %vm442_vm3, %v30802_v34 }
0x5783   :  { %v27683_v38 = vpop.f32.mrb[146].mxu0 }
0x5784   :  { %v30862_v31 = vadd.f32 %v27683_v38, %v30276_v55  ;;  %v30864_v51 = vpop.f32.mrb[147].mxu0 }
0x5785   :  { %v12587_v53 = vsel %vm1003_vm9, 0.0, %v30864_v51 }
0x5786   :  { %27686 = vmatprep.mubr.msk.f32.mxu1 %vm442_vm3, %v12587_v53  ;;  %v12588_v56 = vsel %vm1003_vm9, %v30276_v55, %v30862_v31  ;;  %vm31489_vm9 = vcmp.eq.s32.totalorder %v30122_v50, 5 }
0x5787   :  { %27687 = vmatmul.mubr.msk.f32.vlgmr.msra.gmra.mrb[152].mxu1 %vm442_vm3, %v12588_v56 }
0x57b3   :  { %v12736_v42 = vpop.f32.mrb[148].mxu0 }
0x57b4   :  { %v27693_v45 = vpop.f32.mrb[149].mxu0  ;;  %v12740_v52 = vmul.f32 2.5e-05, %v12736_v42 }
0x57b6   :  { %v12748_v60 = vrot.slane %v12740_v52, %v30146_v7 }
0x57b8   :  { %v12750_v14 = vmul.f32 %v12748_v60, %v30295_v2  ;;  %v12749_v46 = vmul.f32 0.0, %v12748_v60 }
0x585a   :  { %v27688_v30 = vpop.f32.mrb[152].mxu1 }
0x585b   :  { %v12742_v54 = vmul.f32 2.5e-05, %v27688_v30  ;;  %v12661_v62 = vpop.f32.mrb[153].mxu1 }
0x585c   :  { %v12741_v58 = vmul.f32 2.5e-05, %v12661_v62 }
0x585d   :  { %v12744_v0 = vsub.f32 %v30254_v48, %v12742_v54 }
0x585e   :  { %v12743_v1 = vsub.f32 %v30180_v36, %v12741_v58  ;;  %v13953_v58 = vsel %vm2372_vm12, %v30263_v49, %v30853_v22  ;;  %vm31490_vm12 = vcmp.eq.s32.totalorder %v30157_v27, 5 }
0x585f   :  { %v12752_v4 = vadd.f32 %v12750_v14, %v12744_v0  ;;  %v13954_v14 = vsel %vm2374_vm13, 0.0, %v30864_v51  ;;  %v13955_v0 = vsel %vm2374_vm13, %v30276_v55, %v30862_v31  ;;  %vm31491_vm13 = vmmov %vm31490_vm12 }
0x5860   :  { %v12751_v8 = vadd.f32 %v12749_v46, %v12743_v1 }
0x5862   :  { %27698 = vmatprep.mubr.msk.f32.mxu1 %vm1170_vm11, %v12751_v8  ;;  %v29211_v9 = vpack.c.bf16 %v12752_v4, %v12751_v8 }
0x5864   :  { %29212 = vmatprep.subr.bf16.mxu1 %v29211_v9 }
0x5865   :  { %29214 = vmatpush3.bf16.msra.mxu1 %v29211_v9 }
0x5868   :  { %27699 = vmatmul.mubr.msk.f32.vlgmr.msra.gmra.mrb[154].mxu1 %vm1170_vm11, %v12752_v4 }
0x593b   :  { %v27700_v10 = vpop.f32.mrb[154].mxu1 }
0x593c   :  { %v12825_v13 = vpop.f32.mrb[155].mxu1 }
0x593d   :  { %v29215_v12 = vpack.c.bf16 %v27700_v10, %v12825_v13  ;;  %27705 = vmatprep.mubr.msk.f32.mxu0 %vm1170_vm11, %v12825_v13 }
0x593f   :  { %29216 = vmatprep.subr.bf16.mxu0 %v29215_v12 }
0x5940   :  { %29218 = vmatpush3.bf16.msra.mxu0 %v29215_v12 }
0x5943   :  { %27706 = vmatmul.mubr.msk.f32.vlgmr.msra.gmra.mrb[150].mxu0 %vm1170_vm11, %v27700_v10  ;;  %v14037_v10 = vrot.slane %v30802_v34, 1 }
0x5a16   :  { %v27707_v15 = vpop.f32.mrb[150].mxu0 }
0x5a17   :  { %v12906_v16 = vpop.f32.mrb[151].mxu0 }
0x5a18   :  { %v29219_v18 = vpack.c.bf16 %v27707_v15, %v12906_v16  ;;  %27712 = vmatprep.mubr.msk.f32.mxu1 %vm1170_vm11, %v12906_v16 }
0x5a1a   :  { %29220 = vmatprep.subr.bf16.mxu1 %v29219_v18 }
0x5a1b   :  { %29222 = vmatpush3.bf16.msra.mxu1 %v29219_v18 }
0x5a1e   :  { %27713 = vmatmul.mubr.msk.f32.vlgmr.msra.gmra.mrb[156].mxu1 %vm1170_vm11, %v27707_v15 }
0x5af1   :  { %v27714_v35 = vpop.f32.mrb[156].mxu1 }
0x5af2   :  { %v12987_v63 = vpop.f32.mrb[157].mxu1 }
0x5af3   :  { %v29223_v19 = vpack.c.bf16 %v27714_v35, %v12987_v63  ;;  %27719 = vmatprep.mubr.msk.f32.mxu0 %vm1170_vm11, %v12987_v63 }
0x5af5   :  { %29224 = vmatprep.subr.bf16.mxu0 %v29223_v19 }
0x5af6   :  { %29226 = vmatpush3.bf16.msra.mxu0 %v29223_v19 }
0x5af9   :  { %27720 = vmatmul.mubr.msk.f32.vlgmr.msra.gmra.mrb[152].mxu0 %vm1170_vm11, %v27714_v35 }
0x5afa   :  { %27733 = vmatprep.mubr.msk.f32.mxu0 %vm1170_vm11, %v12987_v63 }
0x5bcc   :  { %v27721_v25 = vpop.f32.mrb[152].mxu0 }
0x5bcd   :  { %v13068_v17 = vpop.f32.mrb[153].mxu0 }
0x5bce   :  { %v29227_v26 = vpack.c.bf16 %v27721_v25, %v13068_v17  ;;  %27726 = vmatprep.mubr.msk.f32.mxu1 %vm1170_vm11, %v13068_v17 }
0x5bd0   :  { %29228 = vmatprep.subr.bf16.mxu1 %v29227_v26 }
0x5bd1   :  { %29230 = vmatpush3.bf16.msra.mxu1 %v29227_v26 }
0x5bd4   :  { %27727 = vmatmul.mubr.msk.f32.vlgmr.msra.gmra.mrb[158].mxu1 %vm1170_vm11, %v27721_v25 }
0x5ca7   :  { %v27728_v29 = vpop.f32.mrb[158].mxu1 }
0x5ca8   :  { %v13149_v23 = vpop.f32.mrb[159].mxu1 }
0x5ca9   :  { %v29231_v28 = vpack.c.bf16 %v27728_v29, %v13149_v23  ;;  %27740 = vmatprep.mubr.msk.f32.mxu1 %vm1170_vm11, %v13149_v23 }
0x5cab   :  { %29232 = vmatprep.subr.bf16.mxu0 %v29231_v28  ;;  %29236 = vmatprep.subr.bf16.mxu1 %v29231_v28 }
0x5cac   :  { %29234 = vmatpush3.bf16.msra.mxu0 %v29231_v28  ;;  %29238 = vmatpush3.bf16.msra.mxu1 %v29231_v28 }
0x5caf   :  { %27734 = vmatmul.mubr.msk.f32.vlgmr.msra.gmra.mrb[154].mxu0 %vm1170_vm11, %v27714_v35  ;;  %27741 = vmatmul.mubr.msk.f32.vlgmr.msra.gmra.mrb[160].mxu1 %vm1170_vm11, %v27728_v29 }
0x5d82   :  { %v27735_v39 = vpop.f32.mrb[154].mxu0  ;;  %v27742_v40 = vpop.f32.mrb[160].mxu1 }
0x5d83   :  { %v13224_v41 = vpop.f32.mrb[155].mxu0  ;;  %v13305_v33 = vpop.f32.mrb[161].mxu1 }
0x5d84   :  { %v29239_v5 = vpack.c.bf16 %v27742_v40, %v13305_v33  ;;  %27747 = vmatprep.mubr.msk.f32.mxu0 %vm1170_vm11, %v13224_v41  ;;  %27754 = vmatprep.mubr.msk.f32.mxu1 %vm1170_vm11, %v13305_v33 }
0x5d86   :  { %29240 = vmatprep.subr.bf16.mxu0 %v29239_v5  ;;  %29244 = vmatprep.subr.bf16.mxu1 %v29239_v5 }
0x5d87   :  { %29242 = vmatpush3.bf16.msra.mxu0 %v29239_v5  ;;  %29246 = vmatpush3.bf16.msra.mxu1 %v29239_v5 }
0x5d8a   :  { %27748 = vmatmul.mubr.msk.f32.vlgmr.msra.gmra.mrb[156].mxu0 %vm1170_vm11, %v27735_v39  ;;  %27755 = vmatmul.mubr.msk.f32.vlgmr.msra.gmra.mrb[162].mxu1 %vm1170_vm11, %v27742_v40 }
0x5e5d   :  { %v27749_v57 = vpop.f32.mrb[156].mxu0  ;;  %v27756_v47 = vpop.f32.mrb[162].mxu1 }
0x5e5e   :  { %v13386_v11 = vpop.f32.mrb[157].mxu0  ;;  %v13467_v37 = vpop.f32.mrb[163].mxu1 }
0x5e5f   :  { %v29247_v21 = vpack.c.bf16 %v27756_v47, %v13467_v37  ;;  %27761 = vmatprep.mubr.msk.f32.mxu0 %vm1170_vm11, %v13386_v11  ;;  %27768 = vmatprep.mubr.msk.f32.mxu1 %vm1170_vm11, %v13467_v37 }
0x5e61   :  { %29248 = vmatprep.subr.bf16.mxu0 %v29247_v21  ;;  %29252 = vmatprep.subr.bf16.mxu1 %v29247_v21 }
0x5e62   :  { %29250 = vmatpush3.bf16.msra.mxu0 %v29247_v21  ;;  %29254 = vmatpush3.bf16.msra.mxu1 %v29247_v21 }
0x5e65   :  { %27762 = vmatmul.mubr.msk.f32.vlgmr.msra.gmra.mrb[158].mxu0 %vm1170_vm11, %v27749_v57  ;;  %27769 = vmatmul.mubr.msk.f32.vlgmr.msra.gmra.mrb[164].mxu1 %vm1170_vm11, %v27756_v47 }
0x5f38   :  { %v27763_v38 = vpop.f32.mrb[158].mxu0  ;;  %v27770_v53 = vpop.f32.mrb[164].mxu1 }
0x5f39   :  { %v13548_v56 = vpop.f32.mrb[159].mxu0  ;;  %v13629_v42 = vpop.f32.mrb[165].mxu1 }
0x5f3a   :  { %v29255_v45 = vpack.c.bf16 %v27770_v53, %v13629_v42  ;;  %27775 = vmatprep.mubr.msk.f32.mxu0 %vm1170_vm11, %v13548_v56  ;;  %27782 = vmatprep.mubr.msk.f32.mxu1 %vm1170_vm11, %v13629_v42 }
0x5f3c   :  { %29256 = vmatprep.subr.bf16.mxu0 %v29255_v45  ;;  %29260 = vmatprep.subr.bf16.mxu1 %v29255_v45 }
0x5f3d   :  { %29258 = vmatpush3.bf16.msra.mxu0 %v29255_v45  ;;  %29262 = vmatpush3.bf16.msra.mxu1 %v29255_v45 }
0x5f3e   :  { %29267 = vmatprep.subr.bf16.mxu1 %v29900_v3 }
0x5f40   :  { %27776 = vmatmul.mubr.msk.f32.vlgmr.msra.gmra.mrb[160].mxu0 %vm1170_vm11, %v27763_v38  ;;  %27783 = vmatmul.mubr.msk.f32.vlgmr.msra.gmra.mrb[166].mxu1 %vm1170_vm11, %v27770_v53 }
0x5f41   :  { %27796 = vmatprep.mubr.msk.f32.mxu1 %vm29901_vm0, %v29902_v6 }
0x6013   :  { %v27777_v52 = vpop.f32.mrb[160].mxu0  ;;  %v27784_v60 = vpop.f32.mrb[166].mxu1 }
0x6014   :  { %v13710_v30 = vpop.f32.mrb[161].mxu0  ;;  %v13791_v54 = vpop.f32.mrb[167].mxu1 }
0x6015   :  { %v29263_v62 = vpack.c.bf16 %v27784_v60, %v13791_v54  ;;  %27789 = vmatprep.mubr.msk.f32.mxu0 %vm1170_vm11, %v13710_v30 }
0x6017   :  { %29264 = vmatprep.subr.bf16.mxu0 %v29263_v62 }
0x6018   :  { %29266 = vmatpush3.bf16.msra.mxu0 %v29263_v62 }
0x6019   :  { %27799 = vmatprep.subr.mxu0 %v13953_v58 }
0x601b   :  { %27790 = vmatmul.mubr.msk.f32.vlgmr.msra.gmra.mrb[162].mxu0 %vm1170_vm11, %v27777_v52 }
0x601c   :  { %27800 = vmatpush3.msra.mxu0 %v13953_v58  ;;  %27801 = vmatprep.mubr.msk.f32.mxu0 %vm442_vm3, %v13954_v14 }
0x601f   :  { %27802 = vmatmul.mubr.msk.f32.vlgmr.msra.gmra.mrb[164].mxu0 %vm442_vm3, %v13955_v0 }
0x60ee   :  { %v27791_v46 = vpop.f32.mrb[162].mxu0 }
0x60ef   :  { %v13872_v1 = vpop.f32.mrb[163].mxu0 }
0x60f0   :  { %v29268_v4 = vpack.c.bf16 %v27791_v46, %v13872_v1 }
0x60f2   :  { %29269 = vmatpush3.bf16.msra.mxu1 %v29268_v4  ;;  %v27803_v8 = vpop.f32.mrb[164].mxu0 }
0x60f3   :  { %v14028_v9 = vpop.f32.mrb[165].mxu0  ;;  %27804 = vmatprep.subr.mxu1 %v29902_v6  ;;  %v14112_v15 = vmul.f32 2.5e-05, %v27803_v8 }
0x60f4   :  { %v14111_v18 = vmul.f32 2.5e-05, %v14028_v9 }
0x60f5   :  { %27797 = vmatmul.mubr.msk.f32.vlgmr.msra.gmra.mrb[168].mxu1 %vm1170_vm11, %v30763_v43  ;;  %v14114_v43 = vsub.f32 %v30254_v48, %v14112_v15 }
0x60f6   :  { %27805 = vmatpush3.msra.mxu1 %v13953_v58  ;;  %27806 = vmatprep.mubr.msk.f32.mxu1 %vm29901_vm0, %v29902_v6  ;;  %v14113_v25 = vsub.f32 %v30180_v36, %v14111_v18 }
0x60f9   :  { %27807 = vmatmul.mubr.msk.f32.vlgmr.msra.gmra.mrb[170].mxu1 %vm442_vm3, %v14037_v10 }
0x61c8   :  { %v30930_v13 = vpop.f32.mrb[168].mxu1 }
0x61c9   :  { %v27798_v12 = vpop.f32.mrb[169].mxu1 }
0x61cc   :  { %v14106_v16 = vpop.f32.mrb[170].mxu1 }
0x61cd   :  { %v14110_v35 = vmul.f32 2.5e-05, %v14106_v16  ;;  %v27808_v63 = vpop.f32.mrb[171].mxu1 }
0x61cf   :  { %v14118_v19 = vrot.slane %v14110_v35, %v30146_v7 }
0x61d1   :  { %v14119_v17 = vmul.f32 0.0, %v14118_v19  ;;  %v14120_v26 = vmul.f32 %v14118_v19, %v30295_v2  ;;  %v15324_v19 = vsel %vm3745_vm14, %v30263_v49, %v30853_v22  ;;  %vm31492_vm14 = vcmp.eq.s32.totalorder %v30122_v50, 6 }
0x61d3   :  { %v14121_v29 = vadd.f32 %v14119_v17, %v14113_v25  ;;  %v14122_v23 = vadd.f32 %v14120_v26, %v14114_v43  ;;  %v15325_v43 = vsel %vm3747_vm15, 0.0, %v30864_v51  ;;  %v15326_v25 = vsel %vm3747_vm15, %v30276_v55, %v30862_v31 }
0x61d4   :  { %vm31493_vm15 = vcmp.eq.s32.totalorder %v30157_v27, 6  ;;  %v22263_v27 = vrot.slane %v30802_v34, 7 }
0x61d5   :  { %27813 = vmatprep.mubr.msk.f32.mxu0 %vm1170_vm11, %v14121_v29  ;;  %v29270_v28 = vpack.c.bf16 %v14122_v23, %v14121_v29 }
0x61d7   :  { %29271 = vmatprep.subr.bf16.mxu0 %v29270_v28 }
0x61d8   :  { %29273 = vmatpush3.bf16.msra.mxu0 %v29270_v28 }
0x61db   :  { %27814 = vmatmul.mubr.msk.f32.vlgmr.msra.gmra.mrb[166].mxu0 %vm1170_vm11, %v14122_v23 }
0x62ae   :  { %v27815_v39 = vpop.f32.mrb[166].mxu0 }
0x62af   :  { %v14195_v40 = vpop.f32.mrb[167].mxu0 }
0x62b0   :  { %v29274_v41 = vpack.c.bf16 %v27815_v39, %v14195_v40  ;;  %27820 = vmatprep.mubr.msk.f32.mxu1 %vm1170_vm11, %v14195_v40 }
0x62b2   :  { %29275 = vmatprep.subr.bf16.mxu1 %v29274_v41 }
0x62b3   :  { %29277 = vmatpush3.bf16.msra.mxu1 %v29274_v41 }
0x62b6   :  { %27821 = vmatmul.mubr.msk.f32.vlgmr.msra.gmra.mrb[172].mxu1 %vm1170_vm11, %v27815_v39  ;;  %v15408_v39 = vrot.slane %v30802_v34, 2 }
0x6389   :  { %v27822_v33 = vpop.f32.mrb[172].mxu1 }
0x638a   :  { %v14276_v5 = vpop.f32.mrb[173].mxu1 }
0x638b   :  { %v29278_v57 = vpack.c.bf16 %v27822_v33, %v14276_v5  ;;  %27827 = vmatprep.mubr.msk.f32.mxu0 %vm1170_vm11, %v14276_v5 }
0x638d   :  { %29279 = vmatprep.subr.bf16.mxu0 %v29278_v57 }
0x638e   :  { %29281 = vmatpush3.bf16.msra.mxu0 %v29278_v57 }
0x6391   :  { %27828 = vmatmul.mubr.msk.f32.vlgmr.msra.gmra.mrb[168].mxu0 %vm1170_vm11, %v27822_v33 }
0x6464   :  { %v27829_v47 = vpop.f32.mrb[168].mxu0 }
0x6465   :  { %v14357_v11 = vpop.f32.mrb[169].mxu0 }
0x6466   :  { %v29282_v37 = vpack.c.bf16 %v27829_v47, %v14357_v11  ;;  %27834 = vmatprep.mubr.msk.f32.mxu1 %vm1170_vm11, %v14357_v11 }
0x6468   :  { %29283 = vmatprep.subr.bf16.mxu1 %v29282_v37 }
0x6469   :  { %29285 = vmatpush3.bf16.msra.mxu1 %v29282_v37 }
0x646c   :  { %27835 = vmatmul.mubr.msk.f32.vlgmr.msra.gmra.mrb[174].mxu1 %vm1170_vm11, %v27829_v47 }
0x646d   :  { %27848 = vmatprep.mubr.msk.f32.mxu1 %vm1170_vm11, %v14357_v11 }
0x653f   :  { %v27836_v21 = vpop.f32.mrb[174].mxu1 }
0x6540   :  { %v14438_v38 = vpop.f32.mrb[175].mxu1 }
0x6541   :  { %v29286_v53 = vpack.c.bf16 %v27836_v21, %v14438_v38  ;;  %27841 = vmatprep.mubr.msk.f32.mxu0 %vm1170_vm11, %v14438_v38 }
0x6543   :  { %29287 = vmatprep.subr.bf16.mxu0 %v29286_v53 }
0x6544   :  { %29289 = vmatpush3.bf16.msra.mxu0 %v29286_v53 }
0x6547   :  { %27842 = vmatmul.mubr.msk.f32.vlgmr.msra.gmra.mrb[170].mxu0 %vm1170_vm11, %v27836_v21 }
0x661a   :  { %v27843_v56 = vpop.f32.mrb[170].mxu0 }
0x661b   :  { %v14519_v42 = vpop.f32.mrb[171].mxu0 }
0x661c   :  { %v29290_v45 = vpack.c.bf16 %v27843_v56, %v14519_v42  ;;  %27855 = vmatprep.mubr.msk.f32.mxu0 %vm1170_vm11, %v14519_v42 }
0x661e   :  { %29291 = vmatprep.subr.bf16.mxu1 %v29290_v45  ;;  %29295 = vmatprep.subr.bf16.mxu0 %v29290_v45 }
0x661f   :  { %29293 = vmatpush3.bf16.msra.mxu1 %v29290_v45  ;;  %29297 = vmatpush3.bf16.msra.mxu0 %v29290_v45 }
0x6622   :  { %27849 = vmatmul.mubr.msk.f32.vlgmr.msra.gmra.mrb[176].mxu1 %vm1170_vm11, %v27829_v47  ;;  %27856 = vmatmul.mubr.msk.f32.vlgmr.msra.gmra.mrb[172].mxu0 %vm1170_vm11, %v27843_v56 }
0x66f5   :  { %v27850_v52 = vpop.f32.mrb[176].mxu1  ;;  %v27857_v60 = vpop.f32.mrb[172].mxu0 }
0x66f6   :  { %v14594_v30 = vpop.f32.mrb[177].mxu1  ;;  %v14675_v54 = vpop.f32.mrb[173].mxu0 }
0x66f7   :  { %v29298_v62 = vpack.c.bf16 %v27857_v60, %v14675_v54  ;;  %27862 = vmatprep.mubr.msk.f32.mxu1 %vm1170_vm11, %v14594_v30  ;;  %27869 = vmatprep.mubr.msk.f32.mxu0 %vm1170_vm11, %v14675_v54 }
0x66f9   :  { %29299 = vmatprep.subr.bf16.mxu1 %v29298_v62  ;;  %29303 = vmatprep.subr.bf16.mxu0 %v29298_v62 }
0x66fa   :  { %29301 = vmatpush3.bf16.msra.mxu1 %v29298_v62  ;;  %29305 = vmatpush3.bf16.msra.mxu0 %v29298_v62 }
0x66fd   :  { %27863 = vmatmul.mubr.msk.f32.vlgmr.msra.gmra.mrb[178].mxu1 %vm1170_vm11, %v27850_v52  ;;  %27870 = vmatmul.mubr.msk.f32.vlgmr.msra.gmra.mrb[174].mxu0 %vm1170_vm11, %v27857_v60 }
0x67d0   :  { %v27864_v58 = vpop.f32.mrb[178].mxu1  ;;  %v27871_v14 = vpop.f32.mrb[174].mxu0 }
0x67d1   :  { %v14756_v0 = vpop.f32.mrb[179].mxu1  ;;  %v14837_v46 = vpop.f32.mrb[175].mxu0 }
0x67d2   :  { %v29306_v1 = vpack.c.bf16 %v27871_v14, %v14837_v46  ;;  %27876 = vmatprep.mubr.msk.f32.mxu1 %vm1170_vm11, %v14756_v0  ;;  %27883 = vmatprep.mubr.msk.f32.mxu0 %vm1170_vm11, %v14837_v46 }
0x67d4   :  { %29307 = vmatprep.subr.bf16.mxu1 %v29306_v1  ;;  %29311 = vmatprep.subr.bf16.mxu0 %v29306_v1 }
0x67d5   :  { %29309 = vmatpush3.bf16.msra.mxu1 %v29306_v1  ;;  %29313 = vmatpush3.bf16.msra.mxu0 %v29306_v1 }
0x67d8   :  { %27877 = vmatmul.mubr.msk.f32.vlgmr.msra.gmra.mrb[180].mxu1 %vm1170_vm11, %v27864_v58  ;;  %27884 = vmatmul.mubr.msk.f32.vlgmr.msra.gmra.mrb[176].mxu0 %vm1170_vm11, %v27871_v14 }
0x68ab   :  { %v27878_v4 = vpop.f32.mrb[180].mxu1  ;;  %v27885_v8 = vpop.f32.mrb[176].mxu0 }
0x68ac   :  { %v14918_v9 = vpop.f32.mrb[181].mxu1  ;;  %v14999_v10 = vpop.f32.mrb[177].mxu0 }
0x68ad   :  { %v29314_v12 = vpack.c.bf16 %v27885_v8, %v14999_v10  ;;  %27890 = vmatprep.mubr.msk.f32.mxu1 %vm1170_vm11, %v14918_v9  ;;  %27897 = vmatprep.mubr.msk.f32.mxu0 %vm1170_vm11, %v14999_v10 }
0x68af   :  { %29315 = vmatprep.subr.bf16.mxu1 %v29314_v12  ;;  %29319 = vmatprep.subr.bf16.mxu0 %v29314_v12 }
0x68b0   :  { %29317 = vmatpush3.bf16.msra.mxu1 %v29314_v12  ;;  %29321 = vmatpush3.bf16.msra.mxu0 %v29314_v12 }
0x68b1   :  { %29326 = vmatprep.subr.bf16.mxu0 %v29900_v3 }
0x68b3   :  { %27891 = vmatmul.mubr.msk.f32.vlgmr.msra.gmra.mrb[182].mxu1 %vm1170_vm11, %v27878_v4  ;;  %27898 = vmatmul.mubr.msk.f32.vlgmr.msra.gmra.mrb[178].mxu0 %vm1170_vm11, %v27885_v8 }
0x68b4   :  { %27911 = vmatprep.mubr.msk.f32.mxu0 %vm29901_vm0, %v29902_v6 }
0x6986   :  { %v27892_v15 = vpop.f32.mrb[182].mxu1  ;;  %v27899_v16 = vpop.f32.mrb[178].mxu0 }
0x6987   :  { %v15080_v18 = vpop.f32.mrb[183].mxu1  ;;  %v15161_v35 = vpop.f32.mrb[179].mxu0 }
0x6988   :  { %v29322_v63 = vpack.c.bf16 %v27899_v16, %v15161_v35  ;;  %27904 = vmatprep.mubr.msk.f32.mxu1 %vm1170_vm11, %v15080_v18 }
0x698a   :  { %29323 = vmatprep.subr.bf16.mxu1 %v29322_v63 }
0x698b   :  { %29325 = vmatpush3.bf16.msra.mxu1 %v29322_v63 }
0x698c   :  { %27914 = vmatprep.subr.mxu1 %v15324_v19 }
0x698e   :  { %27905 = vmatmul.mubr.msk.f32.vlgmr.msra.gmra.mrb[184].mxu1 %vm1170_vm11, %v27892_v15 }
0x698f   :  { %27915 = vmatpush3.msra.mxu1 %v15324_v19  ;;  %27916 = vmatprep.mubr.msk.f32.mxu1 %vm442_vm3, %v15325_v43 }
0x6992   :  { %27917 = vmatmul.mubr.msk.f32.vlgmr.msra.gmra.mrb[186].mxu1 %vm442_vm3, %v15326_v25 }
0x6a61   :  { %v27906_v17 = vpop.f32.mrb[184].mxu1 }
0x6a62   :  { %v15242_v26 = vpop.f32.mrb[185].mxu1 }
0x6a63   :  { %v29327_v29 = vpack.c.bf16 %v27906_v17, %v15242_v26 }
0x6a65   :  { %29328 = vmatpush3.bf16.msra.mxu0 %v29327_v29  ;;  %v27918_v23 = vpop.f32.mrb[186].mxu1 }
0x6a66   :  { %v15399_v28 = vpop.f32.mrb[187].mxu1  ;;  %27919 = vmatprep.subr.mxu0 %v29902_v6  ;;  %v15483_v33 = vmul.f32 2.5e-05, %v27918_v23 }
0x6a67   :  { %v15482_v57 = vmul.f32 2.5e-05, %v15399_v28 }
0x6a68   :  { %27912 = vmatmul.mubr.msk.f32.vlgmr.msra.gmra.mrb[180].mxu0 %vm1170_vm11, %v30930_v13  ;;  %v15485_v13 = vsub.f32 %v30254_v48, %v15483_v33 }
0x6a69   :  { %27920 = vmatpush3.msra.mxu0 %v15324_v19  ;;  %27921 = vmatprep.mubr.msk.f32.mxu0 %vm29901_vm0, %v29902_v6  ;;  %v15484_v21 = vsub.f32 %v30180_v36, %v15482_v57 }
0x6a6c   :  { %27922 = vmatmul.mubr.msk.f32.vlgmr.msra.gmra.mrb[182].mxu0 %vm442_vm3, %v15408_v39 }
0x6b3b   :  { %v30987_v40 = vpop.f32.mrb[180].mxu0 }
0x6b3c   :  { %v27913_v41 = vpop.f32.mrb[181].mxu0 }
0x6b3f   :  { %v15477_v5 = vpop.f32.mrb[182].mxu0 }
0x6b40   :  { %v15481_v47 = vmul.f32 2.5e-05, %v15477_v5  ;;  %v27923_v11 = vpop.f32.mrb[183].mxu0 }
0x6b42   :  { %v15489_v37 = vrot.slane %v15481_v47, %v30146_v7 }
0x6b44   :  { %v15490_v38 = vmul.f32 0.0, %v15489_v37  ;;  %v15491_v53 = vmul.f32 %v15489_v37, %v30295_v2  ;;  %v16695_v37 = vsel %vm5118_vm2, %v30263_v49, %v30853_v22  ;;  %vm31494_vm2 = vmmov %vm31493_vm15 }
0x6b46   :  { %v15492_v56 = vadd.f32 %v15490_v38, %v15484_v21  ;;  %v15493_v42 = vadd.f32 %v15491_v53, %v15485_v13  ;;  %v16696_v13 = vsel %vm5120_vm5, 0.0, %v30864_v51  ;;  %v16697_v21 = vsel %vm5120_vm5, %v30276_v55, %v30862_v31 }
0x6b48   :  { %27928 = vmatprep.mubr.msk.f32.mxu1 %vm1170_vm11, %v15492_v56  ;;  %v29329_v45 = vpack.c.bf16 %v15493_v42, %v15492_v56 }
0x6b4a   :  { %29330 = vmatprep.subr.bf16.mxu1 %v29329_v45 }
0x6b4b   :  { %29332 = vmatpush3.bf16.msra.mxu1 %v29329_v45 }
0x6b4e   :  { %27929 = vmatmul.mubr.msk.f32.vlgmr.msra.gmra.mrb[188].mxu1 %vm1170_vm11, %v15493_v42 }
0x6c21   :  { %v27930_v52 = vpop.f32.mrb[188].mxu1 }
0x6c22   :  { %v15566_v60 = vpop.f32.mrb[189].mxu1 }
0x6c23   :  { %v29333_v30 = vpack.c.bf16 %v27930_v52, %v15566_v60  ;;  %27935 = vmatprep.mubr.msk.f32.mxu0 %vm1170_vm11, %v15566_v60 }
0x6c25   :  { %29334 = vmatprep.subr.bf16.mxu0 %v29333_v30 }
0x6c26   :  { %29336 = vmatpush3.bf16.msra.mxu0 %v29333_v30 }
0x6c29   :  { %27936 = vmatmul.mubr.msk.f32.vlgmr.msra.gmra.mrb[184].mxu0 %vm1170_vm11, %v27930_v52  ;;  %v16779_v52 = vrot.slane %v30802_v34, 3 }
0x6cfc   :  { %v27937_v54 = vpop.f32.mrb[184].mxu0 }
0x6cfd   :  { %v15647_v62 = vpop.f32.mrb[185].mxu0 }
0x6cfe   :  { %v29337_v58 = vpack.c.bf16 %v27937_v54, %v15647_v62  ;;  %27942 = vmatprep.mubr.msk.f32.mxu1 %vm1170_vm11, %v15647_v62 }
0x6d00   :  { %29338 = vmatprep.subr.bf16.mxu1 %v29337_v58 }
0x6d01   :  { %29340 = vmatpush3.bf16.msra.mxu1 %v29337_v58 }
0x6d04   :  { %27943 = vmatmul.mubr.msk.f32.vlgmr.msra.gmra.mrb[190].mxu1 %vm1170_vm11, %v27937_v54 }
0x6dd7   :  { %v27944_v14 = vpop.f32.mrb[190].mxu1 }
0x6dd8   :  { %v15728_v0 = vpop.f32.mrb[191].mxu1 }
0x6dd9   :  { %v29341_v46 = vpack.c.bf16 %v27944_v14, %v15728_v0  ;;  %27949 = vmatprep.mubr.msk.f32.mxu0 %vm1170_vm11, %v15728_v0 }
0x6ddb   :  { %29342 = vmatprep.subr.bf16.mxu0 %v29341_v46 }
0x6ddc   :  { %29344 = vmatpush3.bf16.msra.mxu0 %v29341_v46 }
0x6ddf   :  { %27950 = vmatmul.mubr.msk.f32.vlgmr.msra.gmra.mrb[186].mxu0 %vm1170_vm11, %v27944_v14 }
0x6de0   :  { %27963 = vmatprep.mubr.msk.f32.mxu0 %vm1170_vm11, %v15728_v0 }
0x6eb2   :  { %v27951_v1 = vpop.f32.mrb[186].mxu0 }
0x6eb3   :  { %v15809_v4 = vpop.f32.mrb[187].mxu0 }
0x6eb4   :  { %v29345_v8 = vpack.c.bf16 %v27951_v1, %v15809_v4  ;;  %27956 = vmatprep.mubr.msk.f32.mxu1 %vm1170_vm11, %v15809_v4 }
0x6eb6   :  { %29346 = vmatprep.subr.bf16.mxu1 %v29345_v8 }
0x6eb7   :  { %29348 = vmatpush3.bf16.msra.mxu1 %v29345_v8 }
0x6eba   :  { %27957 = vmatmul.mubr.msk.f32.vlgmr.msra.gmra.mrb[192].mxu1 %vm1170_vm11, %v27951_v1 }
0x6f8d   :  { %v27958_v9 = vpop.f32.mrb[192].mxu1 }
0x6f8e   :  { %v15890_v10 = vpop.f32.mrb[193].mxu1 }
0x6f8f   :  { %v29349_v12 = vpack.c.bf16 %v27958_v9, %v15890_v10  ;;  %27970 = vmatprep.mubr.msk.f32.mxu1 %vm1170_vm11, %v15890_v10 }
0x6f91   :  { %29350 = vmatprep.subr.bf16.mxu0 %v29349_v12  ;;  %29354 = vmatprep.subr.bf16.mxu1 %v29349_v12 }
0x6f92   :  { %29352 = vmatpush3.bf16.msra.mxu0 %v29349_v12  ;;  %29356 = vmatpush3.bf16.msra.mxu1 %v29349_v12 }
0x6f95   :  { %27964 = vmatmul.mubr.msk.f32.vlgmr.msra.gmra.mrb[188].mxu0 %vm1170_vm11, %v27944_v14  ;;  %27971 = vmatmul.mubr.msk.f32.vlgmr.msra.gmra.mrb[194].mxu1 %vm1170_vm11, %v27958_v9 }
0x7068   :  { %v27965_v15 = vpop.f32.mrb[188].mxu0  ;;  %v27972_v16 = vpop.f32.mrb[194].mxu1 }
0x7069   :  { %v15965_v18 = vpop.f32.mrb[189].mxu0  ;;  %v16046_v35 = vpop.f32.mrb[195].mxu1 }
0x706a   :  { %v29357_v63 = vpack.c.bf16 %v27972_v16, %v16046_v35  ;;  %27977 = vmatprep.mubr.msk.f32.mxu0 %vm1170_vm11, %v15965_v18  ;;  %27984 = vmatprep.mubr.msk.f32.mxu1 %vm1170_vm11, %v16046_v35 }
0x706c   :  { %29358 = vmatprep.subr.bf16.mxu0 %v29357_v63  ;;  %29362 = vmatprep.subr.bf16.mxu1 %v29357_v63 }
0x706d   :  { %29360 = vmatpush3.bf16.msra.mxu0 %v29357_v63  ;;  %29364 = vmatpush3.bf16.msra.mxu1 %v29357_v63 }
0x7070   :  { %27978 = vmatmul.mubr.msk.f32.vlgmr.msra.gmra.mrb[190].mxu0 %vm1170_vm11, %v27965_v15  ;;  %27985 = vmatmul.mubr.msk.f32.vlgmr.msra.gmra.mrb[196].mxu1 %vm1170_vm11, %v27972_v16 }
0x7143   :  { %v27979_v19 = vpop.f32.mrb[190].mxu0  ;;  %v27986_v43 = vpop.f32.mrb[196].mxu1 }
0x7144   :  { %v16127_v25 = vpop.f32.mrb[191].mxu0  ;;  %v16208_v17 = vpop.f32.mrb[197].mxu1 }
0x7145   :  { %v29365_v26 = vpack.c.bf16 %v27986_v43, %v16208_v17  ;;  %27991 = vmatprep.mubr.msk.f32.mxu0 %vm1170_vm11, %v16127_v25  ;;  %27998 = vmatprep.mubr.msk.f32.mxu1 %vm1170_vm11, %v16208_v17 }
0x7147   :  { %29366 = vmatprep.subr.bf16.mxu0 %v29365_v26  ;;  %29370 = vmatprep.subr.bf16.mxu1 %v29365_v26 }
0x7148   :  { %29368 = vmatpush3.bf16.msra.mxu0 %v29365_v26  ;;  %29372 = vmatpush3.bf16.msra.mxu1 %v29365_v26 }
0x714b   :  { %27992 = vmatmul.mubr.msk.f32.vlgmr.msra.gmra.mrb[192].mxu0 %vm1170_vm11, %v27979_v19  ;;  %27999 = vmatmul.mubr.msk.f32.vlgmr.msra.gmra.mrb[198].mxu1 %vm1170_vm11, %v27986_v43 }
0x721e   :  { %v27993_v29 = vpop.f32.mrb[192].mxu0  ;;  %v28000_v23 = vpop.f32.mrb[198].mxu1 }
0x721f   :  { %v16289_v28 = vpop.f32.mrb[193].mxu0  ;;  %v16370_v39 = vpop.f32.mrb[199].mxu1 }
0x7220   :  { %v29373_v41 = vpack.c.bf16 %v28000_v23, %v16370_v39  ;;  %28005 = vmatprep.mubr.msk.f32.mxu0 %vm1170_vm11, %v16289_v28  ;;  %28012 = vmatprep.mubr.msk.f32.mxu1 %vm1170_vm11, %v16370_v39 }
0x7222   :  { %29374 = vmatprep.subr.bf16.mxu0 %v29373_v41  ;;  %29378 = vmatprep.subr.bf16.mxu1 %v29373_v41 }
0x7223   :  { %29376 = vmatpush3.bf16.msra.mxu0 %v29373_v41  ;;  %29380 = vmatpush3.bf16.msra.mxu1 %v29373_v41 }
0x7224   :  { %29385 = vmatprep.subr.bf16.mxu1 %v29900_v3 }
0x7226   :  { %28006 = vmatmul.mubr.msk.f32.vlgmr.msra.gmra.mrb[194].mxu0 %vm1170_vm11, %v27993_v29  ;;  %28013 = vmatmul.mubr.msk.f32.vlgmr.msra.gmra.mrb[200].mxu1 %vm1170_vm11, %v28000_v23 }
0x7227   :  { %28026 = vmatprep.mubr.msk.f32.mxu1 %vm29901_vm0, %v29902_v6 }
0x72f9   :  { %v28007_v33 = vpop.f32.mrb[194].mxu0  ;;  %v28014_v5 = vpop.f32.mrb[200].mxu1 }
0x72fa   :  { %v16451_v57 = vpop.f32.mrb[195].mxu0  ;;  %v16532_v47 = vpop.f32.mrb[201].mxu1 }
0x72fb   :  { %v29381_v11 = vpack.c.bf16 %v28014_v5, %v16532_v47  ;;  %28019 = vmatprep.mubr.msk.f32.mxu0 %vm1170_vm11, %v16451_v57 }
0x72fd   :  { %29382 = vmatprep.subr.bf16.mxu0 %v29381_v11 }
0x72fe   :  { %29384 = vmatpush3.bf16.msra.mxu0 %v29381_v11 }
0x72ff   :  { %28029 = vmatprep.subr.mxu0 %v16695_v37 }
0x7301   :  { %28020 = vmatmul.mubr.msk.f32.vlgmr.msra.gmra.mrb[196].mxu0 %vm1170_vm11, %v28007_v33 }
0x7302   :  { %28030 = vmatpush3.msra.mxu0 %v16695_v37  ;;  %28031 = vmatprep.mubr.msk.f32.mxu0 %vm442_vm3, %v16696_v13 }
0x7305   :  { %28032 = vmatmul.mubr.msk.f32.vlgmr.msra.gmra.mrb[198].mxu0 %vm442_vm3, %v16697_v21 }
0x73d4   :  { %v28021_v38 = vpop.f32.mrb[196].mxu0 }
0x73d5   :  { %v16613_v53 = vpop.f32.mrb[197].mxu0 }
0x73d6   :  { %v29386_v56 = vpack.c.bf16 %v28021_v38, %v16613_v53 }
0x73d8   :  { %29387 = vmatpush3.bf16.msra.mxu1 %v29386_v56  ;;  %v28033_v42 = vpop.f32.mrb[198].mxu0 }
0x73d9   :  { %v16770_v45 = vpop.f32.mrb[199].mxu0  ;;  %28034 = vmatprep.subr.mxu1 %v29902_v6  ;;  %v16854_v54 = vmul.f32 2.5e-05, %v28033_v42 }
0x73da   :  { %v16853_v58 = vmul.f32 2.5e-05, %v16770_v45 }
0x73db   :  { %28027 = vmatmul.mubr.msk.f32.vlgmr.msra.gmra.mrb[202].mxu1 %vm1170_vm11, %v30987_v40  ;;  %v16856_v40 = vsub.f32 %v30254_v48, %v16854_v54 }
0x73dc   :  { %28035 = vmatpush3.msra.mxu1 %v16695_v37  ;;  %28036 = vmatprep.mubr.msk.f32.mxu1 %vm29901_vm0, %v29902_v6  ;;  %v16855_v1 = vsub.f32 %v30180_v36, %v16853_v58 }
0x73df   :  { %28037 = vmatmul.mubr.msk.f32.vlgmr.msra.gmra.mrb[204].mxu1 %vm442_vm3, %v16779_v52 }
0x74ae   :  { %v31044_v60 = vpop.f32.mrb[202].mxu1 }
0x74af   :  { %v28028_v30 = vpop.f32.mrb[203].mxu1 }
0x74b2   :  { %v16848_v62 = vpop.f32.mrb[204].mxu1 }
0x74b3   :  { %v16852_v14 = vmul.f32 2.5e-05, %v16848_v62  ;;  %v28038_v0 = vpop.f32.mrb[205].mxu1 }
0x74b5   :  { %v16860_v46 = vrot.slane %v16852_v14, %v30146_v7 }
0x74b7   :  { %v16861_v4 = vmul.f32 0.0, %v16860_v46  ;;  %v16862_v8 = vmul.f32 %v16860_v46, %v30295_v2  ;;  %v18066_v46 = vsel %vm6491_vm6, %v30263_v49, %v30853_v22 }
0x74b9   :  { %v16863_v9 = vadd.f32 %v16861_v4, %v16855_v1  ;;  %v16864_v10 = vadd.f32 %v16862_v8, %v16856_v40  ;;  %v18067_v40 = vsel %vm31487_vm4, 0.0, %v30864_v51  ;;  %v18068_v1 = vsel %vm31488_vm7, %v30276_v55, %v30862_v31 }
0x74bb   :  { %28043 = vmatprep.mubr.msk.f32.mxu0 %vm1170_vm11, %v16863_v9  ;;  %v29388_v12 = vpack.c.bf16 %v16864_v10, %v16863_v9 }
0x74bd   :  { %29389 = vmatprep.subr.bf16.mxu0 %v29388_v12 }
0x74be   :  { %29391 = vmatpush3.bf16.msra.mxu0 %v29388_v12 }
0x74c1   :  { %28044 = vmatmul.mubr.msk.f32.vlgmr.msra.gmra.mrb[200].mxu0 %vm1170_vm11, %v16864_v10 }
0x7594   :  { %v28045_v15 = vpop.f32.mrb[200].mxu0 }
0x7595   :  { %v16937_v16 = vpop.f32.mrb[201].mxu0 }
0x7596   :  { %v29392_v18 = vpack.c.bf16 %v28045_v15, %v16937_v16  ;;  %28050 = vmatprep.mubr.msk.f32.mxu1 %vm1170_vm11, %v16937_v16 }
0x7598   :  { %29393 = vmatprep.subr.bf16.mxu1 %v29392_v18 }
0x7599   :  { %29395 = vmatpush3.bf16.msra.mxu1 %v29392_v18 }
0x759c   :  { %28051 = vmatmul.mubr.msk.f32.vlgmr.msra.gmra.mrb[206].mxu1 %vm1170_vm11, %v28045_v15  ;;  %v18150_v15 = vrot.slane %v30802_v34, 4 }
0x766f   :  { %v28052_v35 = vpop.f32.mrb[206].mxu1 }
0x7670   :  { %v17018_v63 = vpop.f32.mrb[207].mxu1 }
0x7671   :  { %v29396_v19 = vpack.c.bf16 %v28052_v35, %v17018_v63  ;;  %28057 = vmatprep.mubr.msk.f32.mxu0 %vm1170_vm11, %v17018_v63 }
0x7673   :  { %29397 = vmatprep.subr.bf16.mxu0 %v29396_v19 }
0x7674   :  { %29399 = vmatpush3.bf16.msra.mxu0 %v29396_v19 }
0x7677   :  { %28058 = vmatmul.mubr.msk.f32.vlgmr.msra.gmra.mrb[202].mxu0 %vm1170_vm11, %v28052_v35 }
0x774a   :  { %v28059_v43 = vpop.f32.mrb[202].mxu0 }
0x774b   :  { %v17099_v25 = vpop.f32.mrb[203].mxu0 }
0x774c   :  { %v29400_v17 = vpack.c.bf16 %v28059_v43, %v17099_v25  ;;  %28064 = vmatprep.mubr.msk.f32.mxu1 %vm1170_vm11, %v17099_v25 }
0x774e   :  { %29401 = vmatprep.subr.bf16.mxu1 %v29400_v17 }
0x774f   :  { %29403 = vmatpush3.bf16.msra.mxu1 %v29400_v17 }
0x7752   :  { %28065 = vmatmul.mubr.msk.f32.vlgmr.msra.gmra.mrb[208].mxu1 %vm1170_vm11, %v28059_v43 }
0x7753   :  { %28078 = vmatprep.mubr.msk.f32.mxu1 %vm1170_vm11, %v17099_v25 }
0x7825   :  { %v28066_v26 = vpop.f32.mrb[208].mxu1 }
0x7826   :  { %v17180_v29 = vpop.f32.mrb[209].mxu1 }
0x7827   :  { %v29404_v23 = vpack.c.bf16 %v28066_v26, %v17180_v29  ;;  %28071 = vmatprep.mubr.msk.f32.mxu0 %vm1170_vm11, %v17180_v29 }
0x7829   :  { %29405 = vmatprep.subr.bf16.mxu0 %v29404_v23 }
0x782a   :  { %29407 = vmatpush3.bf16.msra.mxu0 %v29404_v23 }
0x782d   :  { %28072 = vmatmul.mubr.msk.f32.vlgmr.msra.gmra.mrb[204].mxu0 %vm1170_vm11, %v28066_v26 }
0x7900   :  { %v28073_v28 = vpop.f32.mrb[204].mxu0 }
0x7901   :  { %v17261_v39 = vpop.f32.mrb[205].mxu0 }
0x7902   :  { %v29408_v41 = vpack.c.bf16 %v28073_v28, %v17261_v39  ;;  %28085 = vmatprep.mubr.msk.f32.mxu0 %vm1170_vm11, %v17261_v39 }
0x7904   :  { %29409 = vmatprep.subr.bf16.mxu1 %v29408_v41  ;;  %29413 = vmatprep.subr.bf16.mxu0 %v29408_v41 }
0x7905   :  { %29411 = vmatpush3.bf16.msra.mxu1 %v29408_v41  ;;  %29415 = vmatpush3.bf16.msra.mxu0 %v29408_v41 }
0x7908   :  { %28079 = vmatmul.mubr.msk.f32.vlgmr.msra.gmra.mrb[210].mxu1 %vm1170_vm11, %v28059_v43  ;;  %28086 = vmatmul.mubr.msk.f32.vlgmr.msra.gmra.mrb[206].mxu0 %vm1170_vm11, %v28073_v28 }
0x79db   :  { %v28080_v33 = vpop.f32.mrb[210].mxu1  ;;  %v28087_v5 = vpop.f32.mrb[206].mxu0 }
0x79dc   :  { %v17336_v57 = vpop.f32.mrb[211].mxu1  ;;  %v17417_v47 = vpop.f32.mrb[207].mxu0 }
0x79dd   :  { %v29416_v11 = vpack.c.bf16 %v28087_v5, %v17417_v47  ;;  %28092 = vmatprep.mubr.msk.f32.mxu1 %vm1170_vm11, %v17336_v57  ;;  %28099 = vmatprep.mubr.msk.f32.mxu0 %vm1170_vm11, %v17417_v47 }
0x79df   :  { %29417 = vmatprep.subr.bf16.mxu1 %v29416_v11  ;;  %29421 = vmatprep.subr.bf16.mxu0 %v29416_v11 }
0x79e0   :  { %29419 = vmatpush3.bf16.msra.mxu1 %v29416_v11  ;;  %29423 = vmatpush3.bf16.msra.mxu0 %v29416_v11 }
0x79e3   :  { %28093 = vmatmul.mubr.msk.f32.vlgmr.msra.gmra.mrb[212].mxu1 %vm1170_vm11, %v28080_v33  ;;  %28100 = vmatmul.mubr.msk.f32.vlgmr.msra.gmra.mrb[208].mxu0 %vm1170_vm11, %v28087_v5 }
0x7ab6   :  { %v28094_v37 = vpop.f32.mrb[212].mxu1  ;;  %v28101_v13 = vpop.f32.mrb[208].mxu0 }
0x7ab7   :  { %v17498_v21 = vpop.f32.mrb[213].mxu1  ;;  %v17579_v38 = vpop.f32.mrb[209].mxu0 }
0x7ab8   :  { %v29424_v53 = vpack.c.bf16 %v28101_v13, %v17579_v38  ;;  %28106 = vmatprep.mubr.msk.f32.mxu1 %vm1170_vm11, %v17498_v21  ;;  %28113 = vmatprep.mubr.msk.f32.mxu0 %vm1170_vm11, %v17579_v38 }
0x7aba   :  { %29425 = vmatprep.subr.bf16.mxu1 %v29424_v53  ;;  %29429 = vmatprep.subr.bf16.mxu0 %v29424_v53 }
0x7abb   :  { %29427 = vmatpush3.bf16.msra.mxu1 %v29424_v53  ;;  %29431 = vmatpush3.bf16.msra.mxu0 %v29424_v53 }
0x7abe   :  { %28107 = vmatmul.mubr.msk.f32.vlgmr.msra.gmra.mrb[214].mxu1 %vm1170_vm11, %v28094_v37  ;;  %28114 = vmatmul.mubr.msk.f32.vlgmr.msra.gmra.mrb[210].mxu0 %vm1170_vm11, %v28101_v13 }
0x7b91   :  { %v28108_v56 = vpop.f32.mrb[214].mxu1  ;;  %v28115_v42 = vpop.f32.mrb[210].mxu0 }
0x7b92   :  { %v17660_v45 = vpop.f32.mrb[215].mxu1  ;;  %v17741_v52 = vpop.f32.mrb[211].mxu0 }
0x7b93   :  { %v29432_v30 = vpack.c.bf16 %v28115_v42, %v17741_v52  ;;  %28120 = vmatprep.mubr.msk.f32.mxu1 %vm1170_vm11, %v17660_v45  ;;  %28127 = vmatprep.mubr.msk.f32.mxu0 %vm1170_vm11, %v17741_v52 }
0x7b95   :  { %29433 = vmatprep.subr.bf16.mxu1 %v29432_v30  ;;  %29437 = vmatprep.subr.bf16.mxu0 %v29432_v30 }
0x7b96   :  { %29435 = vmatpush3.bf16.msra.mxu1 %v29432_v30  ;;  %29439 = vmatpush3.bf16.msra.mxu0 %v29432_v30 }
0x7b97   :  { %29444 = vmatprep.subr.bf16.mxu0 %v29900_v3 }
0x7b99   :  { %28121 = vmatmul.mubr.msk.f32.vlgmr.msra.gmra.mrb[216].mxu1 %vm1170_vm11, %v28108_v56  ;;  %28128 = vmatmul.mubr.msk.f32.vlgmr.msra.gmra.mrb[212].mxu0 %vm1170_vm11, %v28115_v42 }
0x7b9a   :  { %28141 = vmatprep.mubr.msk.f32.mxu0 %vm29901_vm0, %v29902_v6 }
0x7c6c   :  { %v28122_v54 = vpop.f32.mrb[216].mxu1  ;;  %v28129_v62 = vpop.f32.mrb[212].mxu0 }
0x7c6d   :  { %v17822_v58 = vpop.f32.mrb[217].mxu1  ;;  %v17903_v14 = vpop.f32.mrb[213].mxu0 }
0x7c6e   :  { %v29440_v0 = vpack.c.bf16 %v28129_v62, %v17903_v14  ;;  %28134 = vmatprep.mubr.msk.f32.mxu1 %vm1170_vm11, %v17822_v58 }
0x7c70   :  { %29441 = vmatprep.subr.bf16.mxu1 %v29440_v0 }
0x7c71   :  { %29443 = vmatpush3.bf16.msra.mxu1 %v29440_v0 }
0x7c72   :  { %28144 = vmatprep.subr.mxu1 %v18066_v46 }
0x7c74   :  { %28135 = vmatmul.mubr.msk.f32.vlgmr.msra.gmra.mrb[218].mxu1 %vm1170_vm11, %v28122_v54 }
0x7c75   :  { %28145 = vmatpush3.msra.mxu1 %v18066_v46  ;;  %28146 = vmatprep.mubr.msk.f32.mxu1 %vm442_vm3, %v18067_v40 }
0x7c78   :  { %28147 = vmatmul.mubr.msk.f32.vlgmr.msra.gmra.mrb[220].mxu1 %vm442_vm3, %v18068_v1 }
0x7d47   :  { %v28136_v4 = vpop.f32.mrb[218].mxu1 }
0x7d48   :  { %v17984_v8 = vpop.f32.mrb[219].mxu1 }
0x7d49   :  { %v29445_v9 = vpack.c.bf16 %v28136_v4, %v17984_v8 }
0x7d4b   :  { %29446 = vmatpush3.bf16.msra.mxu0 %v29445_v9  ;;  %v28148_v10 = vpop.f32.mrb[220].mxu1 }
0x7d4c   :  { %v18141_v12 = vpop.f32.mrb[221].mxu1  ;;  %28149 = vmatprep.subr.mxu0 %v29902_v6  ;;  %v18225_v35 = vmul.f32 2.5e-05, %v28148_v10 }
0x7d4d   :  { %v18224_v19 = vmul.f32 2.5e-05, %v18141_v12 }
0x7d4e   :  { %28142 = vmatmul.mubr.msk.f32.vlgmr.msra.gmra.mrb[214].mxu0 %vm1170_vm11, %v31044_v60  ;;  %v18227_v60 = vsub.f32 %v30254_v48, %v18225_v35 }
0x7d4f   :  { %28150 = vmatpush3.msra.mxu0 %v18066_v46  ;;  %28151 = vmatprep.mubr.msk.f32.mxu0 %vm29901_vm0, %v29902_v6  ;;  %v18226_v26 = vsub.f32 %v30180_v36, %v18224_v19 }
0x7d52   :  { %28152 = vmatmul.mubr.msk.f32.vlgmr.msra.gmra.mrb[216].mxu0 %vm442_vm3, %v18150_v15 }
0x7e21   :  { %v31101_v16 = vpop.f32.mrb[214].mxu0 }
0x7e22   :  { %v28143_v18 = vpop.f32.mrb[215].mxu0 }
0x7e25   :  { %v18219_v63 = vpop.f32.mrb[216].mxu0 }
0x7e26   :  { %v18223_v43 = vmul.f32 2.5e-05, %v18219_v63  ;;  %v28153_v25 = vpop.f32.mrb[217].mxu0 }
0x7e28   :  { %v18231_v17 = vrot.slane %v18223_v43, %v30146_v7 }
0x7e2a   :  { %v18232_v29 = vmul.f32 0.0, %v18231_v17  ;;  %v18233_v23 = vmul.f32 %v18231_v17, %v30295_v2  ;;  %v19437_v17 = vsel %vm31489_vm9, %v30263_v49, %v30853_v22 }
0x7e2c   :  { %v18234_v28 = vadd.f32 %v18232_v29, %v18226_v26  ;;  %v18235_v39 = vadd.f32 %v18233_v23, %v18227_v60  ;;  %v19438_v60 = vsel %vm31490_vm12, 0.0, %v30864_v51  ;;  %v19439_v26 = vsel %vm31491_vm13, %v30276_v55, %v30862_v31 }
0x7e2e   :  { %28158 = vmatprep.mubr.msk.f32.mxu1 %vm1170_vm11, %v18234_v28  ;;  %v29447_v41 = vpack.c.bf16 %v18235_v39, %v18234_v28 }
0x7e30   :  { %29448 = vmatprep.subr.bf16.mxu1 %v29447_v41 }
0x7e31   :  { %29450 = vmatpush3.bf16.msra.mxu1 %v29447_v41 }
0x7e34   :  { %28159 = vmatmul.mubr.msk.f32.vlgmr.msra.gmra.mrb[222].mxu1 %vm1170_vm11, %v18235_v39 }
0x7f07   :  { %v28160_v33 = vpop.f32.mrb[222].mxu1 }
0x7f08   :  { %v18308_v5 = vpop.f32.mrb[223].mxu1 }
0x7f09   :  { %v29451_v57 = vpack.c.bf16 %v28160_v33, %v18308_v5  ;;  %28165 = vmatprep.mubr.msk.f32.mxu0 %vm1170_vm11, %v18308_v5 }
0x7f0b   :  { %29452 = vmatprep.subr.bf16.mxu0 %v29451_v57 }
0x7f0c   :  { %29454 = vmatpush3.bf16.msra.mxu0 %v29451_v57 }
0x7f0f   :  { %28166 = vmatmul.mubr.msk.f32.vlgmr.msra.gmra.mrb[218].mxu0 %vm1170_vm11, %v28160_v33  ;;  %v19521_v33 = vrot.slane %v30802_v34, 5 }
0x7fe2   :  { %v28167_v47 = vpop.f32.mrb[218].mxu0 }
0x7fe3   :  { %v18389_v11 = vpop.f32.mrb[219].mxu0 }
0x7fe4   :  { %v29455_v37 = vpack.c.bf16 %v28167_v47, %v18389_v11  ;;  %28172 = vmatprep.mubr.msk.f32.mxu1 %vm1170_vm11, %v18389_v11 }
0x7fe6   :  { %29456 = vmatprep.subr.bf16.mxu1 %v29455_v37 }
0x7fe7   :  { %29458 = vmatpush3.bf16.msra.mxu1 %v29455_v37 }
0x7fea   :  { %28173 = vmatmul.mubr.msk.f32.vlgmr.msra.gmra.mrb[224].mxu1 %vm1170_vm11, %v28167_v47 }
0x80bd   :  { %v28174_v13 = vpop.f32.mrb[224].mxu1 }
0x80be   :  { %v18470_v21 = vpop.f32.mrb[225].mxu1 }
0x80bf   :  { %v29459_v38 = vpack.c.bf16 %v28174_v13, %v18470_v21  ;;  %28179 = vmatprep.mubr.msk.f32.mxu0 %vm1170_vm11, %v18470_v21 }
0x80c1   :  { %29460 = vmatprep.subr.bf16.mxu0 %v29459_v38 }
0x80c2   :  { %29462 = vmatpush3.bf16.msra.mxu0 %v29459_v38 }
0x80c5   :  { %28180 = vmatmul.mubr.msk.f32.vlgmr.msra.gmra.mrb[220].mxu0 %vm1170_vm11, %v28174_v13 }
0x80c6   :  { %28193 = vmatprep.mubr.msk.f32.mxu0 %vm1170_vm11, %v18470_v21 }
0x8198   :  { %v28181_v53 = vpop.f32.mrb[220].mxu0 }
0x8199   :  { %v18551_v56 = vpop.f32.mrb[221].mxu0 }
0x819a   :  { %v29463_v42 = vpack.c.bf16 %v28181_v53, %v18551_v56  ;;  %28186 = vmatprep.mubr.msk.f32.mxu1 %vm1170_vm11, %v18551_v56 }
0x819c   :  { %29464 = vmatprep.subr.bf16.mxu1 %v29463_v42 }
0x819d   :  { %29466 = vmatpush3.bf16.msra.mxu1 %v29463_v42 }
0x81a0   :  { %28187 = vmatmul.mubr.msk.f32.vlgmr.msra.gmra.mrb[226].mxu1 %vm1170_vm11, %v28181_v53 }
0x8273   :  { %v28188_v45 = vpop.f32.mrb[226].mxu1 }
0x8274   :  { %v18632_v52 = vpop.f32.mrb[227].mxu1 }
0x8275   :  { %v29467_v30 = vpack.c.bf16 %v28188_v45, %v18632_v52  ;;  %28200 = vmatprep.mubr.msk.f32.mxu1 %vm1170_vm11, %v18632_v52 }
0x8277   :  { %29468 = vmatprep.subr.bf16.mxu0 %v29467_v30  ;;  %29472 = vmatprep.subr.bf16.mxu1 %v29467_v30 }
0x8278   :  { %29470 = vmatpush3.bf16.msra.mxu0 %v29467_v30  ;;  %29474 = vmatpush3.bf16.msra.mxu1 %v29467_v30 }
0x827b   :  { %28194 = vmatmul.mubr.msk.f32.vlgmr.msra.gmra.mrb[222].mxu0 %vm1170_vm11, %v28174_v13  ;;  %28201 = vmatmul.mubr.msk.f32.vlgmr.msra.gmra.mrb[228].mxu1 %vm1170_vm11, %v28188_v45 }
0x834e   :  { %v28195_v54 = vpop.f32.mrb[222].mxu0  ;;  %v28202_v62 = vpop.f32.mrb[228].mxu1 }
0x834f   :  { %v18707_v58 = vpop.f32.mrb[223].mxu0  ;;  %v18788_v14 = vpop.f32.mrb[229].mxu1 }
0x8350   :  { %v29475_v0 = vpack.c.bf16 %v28202_v62, %v18788_v14  ;;  %28207 = vmatprep.mubr.msk.f32.mxu0 %vm1170_vm11, %v18707_v58  ;;  %28214 = vmatprep.mubr.msk.f32.mxu1 %vm1170_vm11, %v18788_v14 }
0x8352   :  { %29476 = vmatprep.subr.bf16.mxu0 %v29475_v0  ;;  %29480 = vmatprep.subr.bf16.mxu1 %v29475_v0 }
0x8353   :  { %29478 = vmatpush3.bf16.msra.mxu0 %v29475_v0  ;;  %29482 = vmatpush3.bf16.msra.mxu1 %v29475_v0 }
0x8356   :  { %28208 = vmatmul.mubr.msk.f32.vlgmr.msra.gmra.mrb[224].mxu0 %vm1170_vm11, %v28195_v54  ;;  %28215 = vmatmul.mubr.msk.f32.vlgmr.msra.gmra.mrb[230].mxu1 %vm1170_vm11, %v28202_v62 }
0x8429   :  { %v28209_v46 = vpop.f32.mrb[224].mxu0  ;;  %v28216_v40 = vpop.f32.mrb[230].mxu1 }
0x842a   :  { %v18869_v1 = vpop.f32.mrb[225].mxu0  ;;  %v18950_v4 = vpop.f32.mrb[231].mxu1 }
0x842b   :  { %v29483_v8 = vpack.c.bf16 %v28216_v40, %v18950_v4  ;;  %28221 = vmatprep.mubr.msk.f32.mxu0 %vm1170_vm11, %v18869_v1  ;;  %28228 = vmatprep.mubr.msk.f32.mxu1 %vm1170_vm11, %v18950_v4 }
0x842d   :  { %29484 = vmatprep.subr.bf16.mxu0 %v29483_v8  ;;  %29488 = vmatprep.subr.bf16.mxu1 %v29483_v8 }
0x842e   :  { %29486 = vmatpush3.bf16.msra.mxu0 %v29483_v8  ;;  %29490 = vmatpush3.bf16.msra.mxu1 %v29483_v8 }
0x8431   :  { %28222 = vmatmul.mubr.msk.f32.vlgmr.msra.gmra.mrb[226].mxu0 %vm1170_vm11, %v28209_v46  ;;  %28229 = vmatmul.mubr.msk.f32.vlgmr.msra.gmra.mrb[232].mxu1 %vm1170_vm11, %v28216_v40 }
0x8504   :  { %v28223_v9 = vpop.f32.mrb[226].mxu0  ;;  %v28230_v10 = vpop.f32.mrb[232].mxu1 }
0x8505   :  { %v19031_v12 = vpop.f32.mrb[227].mxu0  ;;  %v19112_v15 = vpop.f32.mrb[233].mxu1 }
0x8506   :  { %v29491_v18 = vpack.c.bf16 %v28230_v10, %v19112_v15  ;;  %28235 = vmatprep.mubr.msk.f32.mxu0 %vm1170_vm11, %v19031_v12  ;;  %28242 = vmatprep.mubr.msk.f32.mxu1 %vm1170_vm11, %v19112_v15 }
0x8508   :  { %29492 = vmatprep.subr.bf16.mxu0 %v29491_v18  ;;  %29496 = vmatprep.subr.bf16.mxu1 %v29491_v18 }
0x8509   :  { %29494 = vmatpush3.bf16.msra.mxu0 %v29491_v18  ;;  %29498 = vmatpush3.bf16.msra.mxu1 %v29491_v18 }
0x850a   :  { %29503 = vmatprep.subr.bf16.mxu1 %v29900_v3 }
0x850c   :  { %28236 = vmatmul.mubr.msk.f32.vlgmr.msra.gmra.mrb[228].mxu0 %vm1170_vm11, %v28223_v9  ;;  %28243 = vmatmul.mubr.msk.f32.vlgmr.msra.gmra.mrb[234].mxu1 %vm1170_vm11, %v28230_v10 }
0x850d   :  { %28256 = vmatprep.mubr.msk.f32.mxu1 %vm29901_vm0, %v29902_v6 }
0x85df   :  { %v28237_v35 = vpop.f32.mrb[228].mxu0  ;;  %v28244_v63 = vpop.f32.mrb[234].mxu1 }
0x85e0   :  { %v19193_v19 = vpop.f32.mrb[229].mxu0  ;;  %v19274_v43 = vpop.f32.mrb[235].mxu1 }
0x85e1   :  { %v29499_v25 = vpack.c.bf16 %v28244_v63, %v19274_v43  ;;  %28249 = vmatprep.mubr.msk.f32.mxu0 %vm1170_vm11, %v19193_v19 }
0x85e3   :  { %29500 = vmatprep.subr.bf16.mxu0 %v29499_v25 }
0x85e4   :  { %29502 = vmatpush3.bf16.msra.mxu0 %v29499_v25 }
0x85e5   :  { %28259 = vmatprep.subr.mxu0 %v19437_v17 }
0x85e7   :  { %28250 = vmatmul.mubr.msk.f32.vlgmr.msra.gmra.mrb[230].mxu0 %vm1170_vm11, %v28237_v35 }
0x85e8   :  { %28260 = vmatpush3.msra.mxu0 %v19437_v17  ;;  %28261 = vmatprep.mubr.msk.f32.mxu0 %vm442_vm3, %v19438_v60 }
0x85eb   :  { %28262 = vmatmul.mubr.msk.f32.vlgmr.msra.gmra.mrb[232].mxu0 %vm442_vm3, %v19439_v26 }
0x86ba   :  { %v28251_v29 = vpop.f32.mrb[230].mxu0 }
0x86bb   :  { %v19355_v23 = vpop.f32.mrb[231].mxu0 }
0x86bc   :  { %v29504_v28 = vpack.c.bf16 %v28251_v29, %v19355_v23 }
0x86be   :  { %29505 = vmatpush3.bf16.msra.mxu1 %v29504_v28  ;;  %v28263_v39 = vpop.f32.mrb[232].mxu0 }
0x86bf   :  { %v19512_v41 = vpop.f32.mrb[233].mxu0  ;;  %28264 = vmatprep.subr.mxu1 %v29902_v6  ;;  %v19596_v47 = vmul.f32 2.5e-05, %v28263_v39 }
0x86c0   :  { %v19595_v37 = vmul.f32 2.5e-05, %v19512_v41 }
0x86c1   :  { %28257 = vmatmul.mubr.msk.f32.vlgmr.msra.gmra.mrb[236].mxu1 %vm1170_vm11, %v31101_v16  ;;  %v19598_v16 = vsub.f32 %v30254_v48, %v19596_v47 }
0x86c2   :  { %28265 = vmatpush3.msra.mxu1 %v19437_v17  ;;  %28266 = vmatprep.mubr.msk.f32.mxu1 %vm29901_vm0, %v29902_v6  ;;  %v19597_v53 = vsub.f32 %v30180_v36, %v19595_v37 }
0x86c5   :  { %28267 = vmatmul.mubr.msk.f32.vlgmr.msra.gmra.mrb[238].mxu1 %vm442_vm3, %v19521_v33 }
0x8794   :  { %v31158_v5 = vpop.f32.mrb[236].mxu1 }
0x8795   :  { %v28258_v57 = vpop.f32.mrb[237].mxu1 }
0x8798   :  { %v19590_v11 = vpop.f32.mrb[238].mxu1 }
0x8799   :  { %v19594_v13 = vmul.f32 2.5e-05, %v19590_v11  ;;  %v28268_v21 = vpop.f32.mrb[239].mxu1 }
0x879b   :  { %v19602_v38 = vrot.slane %v19594_v13, %v30146_v7 }
0x879d   :  { %v19603_v56 = vmul.f32 0.0, %v19602_v38  ;;  %v19604_v42 = vmul.f32 %v19602_v38, %v30295_v2  ;;  %v20808_v38 = vsel %vm31492_vm14, %v30263_v49, %v30853_v22 }
0x879f   :  { %v19605_v45 = vadd.f32 %v19603_v56, %v19597_v53  ;;  %v19606_v52 = vadd.f32 %v19604_v42, %v19598_v16  ;;  %v20809_v16 = vsel %vm31493_vm15, 0.0, %v30864_v51  ;;  %v20810_v53 = vsel %vm31494_vm2, %v30276_v55, %v30862_v31 }
0x87a1   :  { %28273 = vmatprep.mubr.msk.f32.mxu0 %vm1170_vm11, %v19605_v45  ;;  %v29506_v30 = vpack.c.bf16 %v19606_v52, %v19605_v45 }
0x87a3   :  { %29507 = vmatprep.subr.bf16.mxu0 %v29506_v30 }
0x87a4   :  { %29509 = vmatpush3.bf16.msra.mxu0 %v29506_v30 }
0x87a7   :  { %28274 = vmatmul.mubr.msk.f32.vlgmr.msra.gmra.mrb[234].mxu0 %vm1170_vm11, %v19606_v52 }
0x887a   :  { %v28275_v54 = vpop.f32.mrb[234].mxu0 }
0x887b   :  { %v19679_v62 = vpop.f32.mrb[235].mxu0 }
0x887c   :  { %v29510_v58 = vpack.c.bf16 %v28275_v54, %v19679_v62  ;;  %28280 = vmatprep.mubr.msk.f32.mxu1 %vm1170_vm11, %v19679_v62 }
0x887e   :  { %29511 = vmatprep.subr.bf16.mxu1 %v29510_v58 }
0x887f   :  { %29513 = vmatpush3.bf16.msra.mxu1 %v29510_v58 }
0x8882   :  { %28281 = vmatmul.mubr.msk.f32.vlgmr.msra.gmra.mrb[240].mxu1 %vm1170_vm11, %v28275_v54  ;;  %v20892_v54 = vrot.slane %v30802_v34, 6 }
0x8955   :  { %v28282_v14 = vpop.f32.mrb[240].mxu1 }
0x8956   :  { %v19760_v0 = vpop.f32.mrb[241].mxu1 }
0x8957   :  { %v29514_v46 = vpack.c.bf16 %v28282_v14, %v19760_v0  ;;  %28287 = vmatprep.mubr.msk.f32.mxu0 %vm1170_vm11, %v19760_v0 }
0x8959   :  { %29515 = vmatprep.subr.bf16.mxu0 %v29514_v46 }
0x895a   :  { %29517 = vmatpush3.bf16.msra.mxu0 %v29514_v46 }
0x895d   :  { %28288 = vmatmul.mubr.msk.f32.vlgmr.msra.gmra.mrb[236].mxu0 %vm1170_vm11, %v28282_v14 }
0x8a30   :  { %v28289_v40 = vpop.f32.mrb[236].mxu0 }
0x8a31   :  { %v19841_v1 = vpop.f32.mrb[237].mxu0 }
0x8a32   :  { %v29518_v4 = vpack.c.bf16 %v28289_v40, %v19841_v1  ;;  %28294 = vmatprep.mubr.msk.f32.mxu1 %vm1170_vm11, %v19841_v1 }
0x8a34   :  { %29519 = vmatprep.subr.bf16.mxu1 %v29518_v4 }
0x8a35   :  { %29521 = vmatpush3.bf16.msra.mxu1 %v29518_v4 }
0x8a38   :  { %28295 = vmatmul.mubr.msk.f32.vlgmr.msra.gmra.mrb[242].mxu1 %vm1170_vm11, %v28289_v40 }
0x8a39   :  { %28308 = vmatprep.mubr.msk.f32.mxu1 %vm1170_vm11, %v19841_v1 }
0x8b0b   :  { %v28296_v8 = vpop.f32.mrb[242].mxu1 }
0x8b0c   :  { %v19922_v9 = vpop.f32.mrb[243].mxu1 }
0x8b0d   :  { %v29522_v10 = vpack.c.bf16 %v28296_v8, %v19922_v9  ;;  %28301 = vmatprep.mubr.msk.f32.mxu0 %vm1170_vm11, %v19922_v9 }
0x8b0f   :  { %29523 = vmatprep.subr.bf16.mxu0 %v29522_v10 }
0x8b10   :  { %29525 = vmatpush3.bf16.msra.mxu0 %v29522_v10 }
0x8b13   :  { %28302 = vmatmul.mubr.msk.f32.vlgmr.msra.gmra.mrb[238].mxu0 %vm1170_vm11, %v28296_v8 }
0x8be6   :  { %v28303_v12 = vpop.f32.mrb[238].mxu0 }
0x8be7   :  { %v20003_v15 = vpop.f32.mrb[239].mxu0 }
0x8be8   :  { %v29526_v18 = vpack.c.bf16 %v28303_v12, %v20003_v15  ;;  %28315 = vmatprep.mubr.msk.f32.mxu0 %vm1170_vm11, %v20003_v15 }
0x8bea   :  { %29527 = vmatprep.subr.bf16.mxu1 %v29526_v18  ;;  %29531 = vmatprep.subr.bf16.mxu0 %v29526_v18 }
0x8beb   :  { %29529 = vmatpush3.bf16.msra.mxu1 %v29526_v18  ;;  %29533 = vmatpush3.bf16.msra.mxu0 %v29526_v18 }
0x8bee   :  { %28309 = vmatmul.mubr.msk.f32.vlgmr.msra.gmra.mrb[244].mxu1 %vm1170_vm11, %v28289_v40  ;;  %28316 = vmatmul.mubr.msk.f32.vlgmr.msra.gmra.mrb[240].mxu0 %vm1170_vm11, %v28303_v12 }
0x8cc1   :  { %v28310_v35 = vpop.f32.mrb[244].mxu1  ;;  %v28317_v63 = vpop.f32.mrb[240].mxu0 }
0x8cc2   :  { %v20078_v19 = vpop.f32.mrb[245].mxu1  ;;  %v20159_v43 = vpop.f32.mrb[241].mxu0 }
0x8cc3   :  { %v29534_v25 = vpack.c.bf16 %v28317_v63, %v20159_v43  ;;  %28322 = vmatprep.mubr.msk.f32.mxu1 %vm1170_vm11, %v20078_v19  ;;  %28329 = vmatprep.mubr.msk.f32.mxu0 %vm1170_vm11, %v20159_v43 }
0x8cc5   :  { %29535 = vmatprep.subr.bf16.mxu1 %v29534_v25  ;;  %29539 = vmatprep.subr.bf16.mxu0 %v29534_v25 }
0x8cc6   :  { %29537 = vmatpush3.bf16.msra.mxu1 %v29534_v25  ;;  %29541 = vmatpush3.bf16.msra.mxu0 %v29534_v25 }
0x8cc9   :  { %28323 = vmatmul.mubr.msk.f32.vlgmr.msra.gmra.mrb[246].mxu1 %vm1170_vm11, %v28310_v35  ;;  %28330 = vmatmul.mubr.msk.f32.vlgmr.msra.gmra.mrb[242].mxu0 %vm1170_vm11, %v28317_v63 }
0x8d9c   :  { %v28324_v17 = vpop.f32.mrb[246].mxu1  ;;  %v28331_v60 = vpop.f32.mrb[242].mxu0 }
0x8d9d   :  { %v20240_v26 = vpop.f32.mrb[247].mxu1  ;;  %v20321_v29 = vpop.f32.mrb[243].mxu0 }
0x8d9e   :  { %v29542_v23 = vpack.c.bf16 %v28331_v60, %v20321_v29  ;;  %28336 = vmatprep.mubr.msk.f32.mxu1 %vm1170_vm11, %v20240_v26  ;;  %28343 = vmatprep.mubr.msk.f32.mxu0 %vm1170_vm11, %v20321_v29 }
0x8da0   :  { %29543 = vmatprep.subr.bf16.mxu1 %v29542_v23  ;;  %29547 = vmatprep.subr.bf16.mxu0 %v29542_v23 }
0x8da1   :  { %29545 = vmatpush3.bf16.msra.mxu1 %v29542_v23  ;;  %29549 = vmatpush3.bf16.msra.mxu0 %v29542_v23 }
0x8da4   :  { %28337 = vmatmul.mubr.msk.f32.vlgmr.msra.gmra.mrb[248].mxu1 %vm1170_vm11, %v28324_v17  ;;  %28344 = vmatmul.mubr.msk.f32.vlgmr.msra.gmra.mrb[244].mxu0 %vm1170_vm11, %v28331_v60 }
0x8e77   :  { %v28338_v28 = vpop.f32.mrb[248].mxu1  ;;  %v28345_v39 = vpop.f32.mrb[244].mxu0 }
0x8e78   :  { %v20402_v41 = vpop.f32.mrb[249].mxu1  ;;  %v20483_v33 = vpop.f32.mrb[245].mxu0 }
0x8e79   :  { %v29550_v57 = vpack.c.bf16 %v28345_v39, %v20483_v33  ;;  %28350 = vmatprep.mubr.msk.f32.mxu1 %vm1170_vm11, %v20402_v41  ;;  %28357 = vmatprep.mubr.msk.f32.mxu0 %vm1170_vm11, %v20483_v33 }
0x8e7b   :  { %29551 = vmatprep.subr.bf16.mxu1 %v29550_v57  ;;  %29555 = vmatprep.subr.bf16.mxu0 %v29550_v57 }
0x8e7c   :  { %29553 = vmatpush3.bf16.msra.mxu1 %v29550_v57  ;;  %29557 = vmatpush3.bf16.msra.mxu0 %v29550_v57 }
0x8e7d   :  { %29562 = vmatprep.subr.bf16.mxu0 %v29900_v3 }
0x8e7f   :  { %28351 = vmatmul.mubr.msk.f32.vlgmr.msra.gmra.mrb[250].mxu1 %vm1170_vm11, %v28338_v28  ;;  %28358 = vmatmul.mubr.msk.f32.vlgmr.msra.gmra.mrb[246].mxu0 %vm1170_vm11, %v28345_v39 }
0x8e80   :  { %28371 = vmatprep.mubr.msk.f32.mxu0 %vm29901_vm0, %v29902_v6 }
0x8f52   :  { %v28352_v47 = vpop.f32.mrb[250].mxu1  ;;  %v28359_v11 = vpop.f32.mrb[246].mxu0 }
0x8f53   :  { %v20564_v37 = vpop.f32.mrb[251].mxu1  ;;  %v20645_v13 = vpop.f32.mrb[247].mxu0 }
0x8f54   :  { %v29558_v21 = vpack.c.bf16 %v28359_v11, %v20645_v13  ;;  %28364 = vmatprep.mubr.msk.f32.mxu1 %vm1170_vm11, %v20564_v37 }
0x8f56   :  { %29559 = vmatprep.subr.bf16.mxu1 %v29558_v21 }
0x8f57   :  { %29561 = vmatpush3.bf16.msra.mxu1 %v29558_v21 }
0x8f58   :  { %28374 = vmatprep.subr.mxu1 %v20808_v38 }
0x8f5a   :  { %28365 = vmatmul.mubr.msk.f32.vlgmr.msra.gmra.mrb[252].mxu1 %vm1170_vm11, %v28352_v47 }
0x8f5b   :  { %28375 = vmatpush3.msra.mxu1 %v20808_v38  ;;  %28376 = vmatprep.mubr.msk.f32.mxu1 %vm442_vm3, %v20809_v16 }
0x8f5e   :  { %28377 = vmatmul.mubr.msk.f32.vlgmr.msra.gmra.mrb[254].mxu1 %vm442_vm3, %v20810_v53 }
0x902d   :  { %v28366_v56 = vpop.f32.mrb[252].mxu1 }
0x902e   :  { %v20726_v42 = vpop.f32.mrb[253].mxu1 }
0x902f   :  { %v29563_v45 = vpack.c.bf16 %v28366_v56, %v20726_v42 }
0x9031   :  { %29564 = vmatpush3.bf16.msra.mxu0 %v29563_v45  ;;  %v28378_v52 = vpop.f32.mrb[254].mxu1 }
0x9032   :  { %v20883_v30 = vpop.f32.mrb[255].mxu1  ;;  %28379 = vmatprep.subr.mxu0 %v29902_v6  ;;  %v20967_v14 = vmul.f32 2.5e-05, %v28378_v52 }
0x9033   :  { %v20966_v46 = vmul.f32 2.5e-05, %v20883_v30 }
0x9034   :  { %28372 = vmatmul.mubr.msk.f32.vlgmr.msra.gmra.mrb[248].mxu0 %vm1170_vm11, %v31158_v5  ;;  %v20969_v5 = vsub.f32 %v30254_v48, %v20967_v14 }
0x9035   :  { %28380 = vmatpush3.msra.mxu0 %v20808_v38  ;;  %28381 = vmatprep.mubr.msk.f32.mxu0 %vm29901_vm0, %v29902_v6  ;;  %v20968_v8 = vsub.f32 %v30180_v36, %v20966_v46 }
0x9038   :  { %28382 = vmatmul.mubr.msk.f32.vlgmr.msra.gmra.mrb[250].mxu0 %vm442_vm3, %v20892_v54 }
0x9107   :  { %v31215_v62 = vpop.f32.mrb[248].mxu0 }
0x9108   :  { %v28373_v58 = vpop.f32.mrb[249].mxu0 }
0x910b   :  { %v20961_v0 = vpop.f32.mrb[250].mxu0 }
0x910c   :  { %v20965_v40 = vmul.f32 2.5e-05, %v20961_v0  ;;  %v28383_v1 = vpop.f32.mrb[251].mxu0 }
0x910e   :  { %v20973_v4 = vrot.slane %v20965_v40, %v30146_v7 }
0x9110   :  { %v20974_v9 = vmul.f32 0.0, %v20973_v4  ;;  %v20975_v10 = vmul.f32 %v20973_v4, %v30295_v2  ;;  %v22179_v4 = vsel %vm10610_vm10, %v30263_v49, %v30853_v22 }
0x9112   :  { %v20976_v12 = vadd.f32 %v20974_v9, %v20968_v8  ;;  %v20977_v15 = vadd.f32 %v20975_v10, %v20969_v5  ;;  %v22180_v5 = vsel %vm10612_vm8, 0.0, %v30864_v51  ;;  %v22181_v8 = vsel %vm10612_vm8, %v30276_v55, %v30862_v31 }
0x9114   :  { %28388 = vmatprep.mubr.msk.f32.mxu1 %vm1170_vm11, %v20976_v12  ;;  %v29565_v18 = vpack.c.bf16 %v20977_v15, %v20976_v12 }
0x9116   :  { %29566 = vmatprep.subr.bf16.mxu1 %v29565_v18 }
0x9117   :  { %29568 = vmatpush3.bf16.msra.mxu1 %v29565_v18 }
0x911a   :  { %28389 = vmatmul.mubr.msk.f32.vlgmr.msra.gmra.mrb[0].mxu1 %vm1170_vm11, %v20977_v15 }
0x91ed   :  { %v28390_v35 = vpop.f32.mrb[0].mxu1 }
0x91ee   :  { %v21050_v63 = vpop.f32.mrb[1].mxu1 }
0x91ef   :  { %v29569_v19 = vpack.c.bf16 %v28390_v35, %v21050_v63  ;;  %28395 = vmatprep.mubr.msk.f32.mxu0 %vm1170_vm11, %v21050_v63 }
0x91f1   :  { %29570 = vmatprep.subr.bf16.mxu0 %v29569_v19 }
0x91f2   :  { %29572 = vmatpush3.bf16.msra.mxu0 %v29569_v19 }
0x91f5   :  { %28396 = vmatmul.mubr.msk.f32.vlgmr.msra.gmra.mrb[252].mxu0 %vm1170_vm11, %v28390_v35 }
0x92c8   :  { %v28397_v43 = vpop.f32.mrb[252].mxu0 }
0x92c9   :  { %v21131_v25 = vpop.f32.mrb[253].mxu0 }
0x92ca   :  { %v29573_v17 = vpack.c.bf16 %v28397_v43, %v21131_v25  ;;  %28402 = vmatprep.mubr.msk.f32.mxu1 %vm1170_vm11, %v21131_v25 }
0x92cc   :  { %29574 = vmatprep.subr.bf16.mxu1 %v29573_v17 }
0x92cd   :  { %29576 = vmatpush3.bf16.msra.mxu1 %v29573_v17 }
0x92d0   :  { %28403 = vmatmul.mubr.msk.f32.vlgmr.msra.gmra.mrb[2].mxu1 %vm1170_vm11, %v28397_v43 }
0x93a3   :  { %v28404_v60 = vpop.f32.mrb[2].mxu1 }
0x93a4   :  { %v21212_v26 = vpop.f32.mrb[3].mxu1 }
0x93a5   :  { %v29577_v29 = vpack.c.bf16 %v28404_v60, %v21212_v26  ;;  %28409 = vmatprep.mubr.msk.f32.mxu0 %vm1170_vm11, %v21212_v26 }
0x93a7   :  { %29578 = vmatprep.subr.bf16.mxu0 %v29577_v29 }
0x93a8   :  { %29580 = vmatpush3.bf16.msra.mxu0 %v29577_v29 }
0x93ab   :  { %28410 = vmatmul.mubr.msk.f32.vlgmr.msra.gmra.mrb[254].mxu0 %vm1170_vm11, %v28404_v60 }
0x93ac   :  { %28423 = vmatprep.mubr.msk.f32.mxu0 %vm1170_vm11, %v21212_v26 }
0x947e   :  { %v28411_v23 = vpop.f32.mrb[254].mxu0 }
0x947f   :  { %v21293_v28 = vpop.f32.mrb[255].mxu0 }
0x9480   :  { %v29581_v39 = vpack.c.bf16 %v28411_v23, %v21293_v28  ;;  %28416 = vmatprep.mubr.msk.f32.mxu1 %vm1170_vm11, %v21293_v28 }
0x9482   :  { %29582 = vmatprep.subr.bf16.mxu1 %v29581_v39 }
0x9483   :  { %29584 = vmatpush3.bf16.msra.mxu1 %v29581_v39 }
0x9486   :  { %28417 = vmatmul.mubr.msk.f32.vlgmr.msra.gmra.mrb[4].mxu1 %vm1170_vm11, %v28411_v23 }
0x9559   :  { %v28418_v41 = vpop.f32.mrb[4].mxu1 }
0x955a   :  { %v21374_v33 = vpop.f32.mrb[5].mxu1 }
0x955b   :  { %v29585_v57 = vpack.c.bf16 %v28418_v41, %v21374_v33  ;;  %28430 = vmatprep.mubr.msk.f32.mxu1 %vm1170_vm11, %v21374_v33 }
0x955d   :  { %29586 = vmatprep.subr.bf16.mxu0 %v29585_v57  ;;  %29590 = vmatprep.subr.bf16.mxu1 %v29585_v57 }
0x955e   :  { %29588 = vmatpush3.bf16.msra.mxu0 %v29585_v57  ;;  %29592 = vmatpush3.bf16.msra.mxu1 %v29585_v57 }
0x9561   :  { %28424 = vmatmul.mubr.msk.f32.vlgmr.msra.gmra.mrb[0].mxu0 %vm1170_vm11, %v28404_v60  ;;  %28431 = vmatmul.mubr.msk.f32.vlgmr.msra.gmra.mrb[6].mxu1 %vm1170_vm11, %v28418_v41 }
0x9634   :  { %v28425_v47 = vpop.f32.mrb[0].mxu0  ;;  %v28432_v11 = vpop.f32.mrb[6].mxu1 }
0x9635   :  { %v21449_v37 = vpop.f32.mrb[1].mxu0  ;;  %v21530_v13 = vpop.f32.mrb[7].mxu1 }
0x9636   :  { %v29593_v21 = vpack.c.bf16 %v28432_v11, %v21530_v13  ;;  %28437 = vmatprep.mubr.msk.f32.mxu0 %vm1170_vm11, %v21449_v37  ;;  %28444 = vmatprep.mubr.msk.f32.mxu1 %vm1170_vm11, %v21530_v13 }
0x9638   :  { %29594 = vmatprep.subr.bf16.mxu0 %v29593_v21  ;;  %29598 = vmatprep.subr.bf16.mxu1 %v29593_v21 }
0x9639   :  { %29596 = vmatpush3.bf16.msra.mxu0 %v29593_v21  ;;  %29600 = vmatpush3.bf16.msra.mxu1 %v29593_v21 }
0x963c   :  { %28438 = vmatmul.mubr.msk.f32.vlgmr.msra.gmra.mrb[2].mxu0 %vm1170_vm11, %v28425_v47  ;;  %28445 = vmatmul.mubr.msk.f32.vlgmr.msra.gmra.mrb[8].mxu1 %vm1170_vm11, %v28432_v11 }
0x970f   :  { %v28439_v38 = vpop.f32.mrb[2].mxu0  ;;  %v28446_v16 = vpop.f32.mrb[8].mxu1 }
0x9710   :  { %v21611_v53 = vpop.f32.mrb[3].mxu0  ;;  %v21692_v56 = vpop.f32.mrb[9].mxu1 }
0x9711   :  { %v29601_v42 = vpack.c.bf16 %v28446_v16, %v21692_v56  ;;  %28451 = vmatprep.mubr.msk.f32.mxu0 %vm1170_vm11, %v21611_v53  ;;  %28458 = vmatprep.mubr.msk.f32.mxu1 %vm1170_vm11, %v21692_v56 }
0x9713   :  { %29602 = vmatprep.subr.bf16.mxu0 %v29601_v42  ;;  %29606 = vmatprep.subr.bf16.mxu1 %v29601_v42 }
0x9714   :  { %29604 = vmatpush3.bf16.msra.mxu0 %v29601_v42  ;;  %29608 = vmatpush3.bf16.msra.mxu1 %v29601_v42 }
0x9717   :  { %28452 = vmatmul.mubr.msk.f32.vlgmr.msra.gmra.mrb[4].mxu0 %vm1170_vm11, %v28439_v38  ;;  %28459 = vmatmul.mubr.msk.f32.vlgmr.msra.gmra.mrb[10].mxu1 %vm1170_vm11, %v28446_v16 }
0x97ea   :  { %v28453_v45 = vpop.f32.mrb[4].mxu0  ;;  %v28460_v52 = vpop.f32.mrb[10].mxu1 }
0x97eb   :  { %v21773_v30 = vpop.f32.mrb[5].mxu0  ;;  %v21854_v54 = vpop.f32.mrb[11].mxu1 }
0x97ec   :  { %v29609_v58 = vpack.c.bf16 %v28460_v52, %v21854_v54  ;;  %28465 = vmatprep.mubr.msk.f32.mxu0 %vm1170_vm11, %v21773_v30  ;;  %28472 = vmatprep.mubr.msk.f32.mxu1 %vm1170_vm11, %v21854_v54 }
0x97ee   :  { %29610 = vmatprep.subr.bf16.mxu0 %v29609_v58  ;;  %29614 = vmatprep.subr.bf16.mxu1 %v29609_v58 }
0x97ef   :  { %29612 = vmatpush3.bf16.msra.mxu0 %v29609_v58  ;;  %29616 = vmatpush3.bf16.msra.mxu1 %v29609_v58 }
0x97f0   :  { %29621 = vmatprep.subr.bf16.mxu1 %v29900_v3 }
0x97f2   :  { %28466 = vmatmul.mubr.msk.f32.vlgmr.msra.gmra.mrb[6].mxu0 %vm1170_vm11, %v28453_v45  ;;  %28473 = vmatmul.mubr.msk.f32.vlgmr.msra.gmra.mrb[12].mxu1 %vm1170_vm11, %v28460_v52 }
0x97f3   :  { %28486 = vmatprep.mubr.msk.f32.mxu1 %vm29901_vm0, %v29902_v6 }
0x98c5   :  { %v28467_v14 = vpop.f32.mrb[6].mxu0  ;;  %v28474_v0 = vpop.f32.mrb[12].mxu1 }
0x98c6   :  { %v21935_v46 = vpop.f32.mrb[7].mxu0  ;;  %v22016_v40 = vpop.f32.mrb[13].mxu1 }
0x98c7   :  { %v29617_v1 = vpack.c.bf16 %v28474_v0, %v22016_v40  ;;  %28479 = vmatprep.mubr.msk.f32.mxu0 %vm1170_vm11, %v21935_v46 }
0x98c9   :  { %29618 = vmatprep.subr.bf16.mxu0 %v29617_v1 }
0x98ca   :  { %29620 = vmatpush3.bf16.msra.mxu0 %v29617_v1 }
0x98cb   :  { %28489 = vmatprep.subr.mxu0 %v22179_v4 }
0x98cd   :  { %28480 = vmatmul.mubr.msk.f32.vlgmr.msra.gmra.mrb[8].mxu0 %vm1170_vm11, %v28467_v14 }
0x98ce   :  { %28490 = vmatpush3.msra.mxu0 %v22179_v4  ;;  %28491 = vmatprep.mubr.msk.f32.mxu0 %vm442_vm3, %v22180_v5 }
0x98d1   :  { %28492 = vmatmul.mubr.msk.f32.vlgmr.msra.gmra.mrb[10].mxu0 %vm442_vm3, %v22181_v8 }
0x99a0   :  { %v28481_v9 = vpop.f32.mrb[8].mxu0 }
0x99a1   :  { %v22097_v50 = vpop.f32.mrb[9].mxu0 }
0x99a2   :  { %v29622_v49 = vpack.c.bf16 %v28481_v9, %v22097_v50  ;;  %v29840_v50 = vld [vmem:[%s29978_s24 + $0x8] sm:$0xff] }
0x99a4   :  { %29623 = vmatpush3.bf16.msra.mxu1 %v29622_v49  ;;  %v28493_v22 = vpop.f32.mrb[10].mxu0 }
0x99a5   :  { %v22254_v10 = vpop.f32.mrb[11].mxu0  ;;  %28494 = vmatprep.subr.mxu1 %v29902_v6  ;;  %v22338_v51 = vmul.f32 2.5e-05, %v28493_v22 }
0x99a6   :  { %v22337_v15 = vmul.f32 2.5e-05, %v22254_v10  ;;  %v25508_v10 = vld [vmem:[%s30073_s12 + $0x18] sm:$0xff] }
0x99a7   :  { %28487 = vmatmul.mubr.msk.f32.vlgmr.msra.gmra.mrb[14].mxu1 %vm1170_vm11, %v31215_v62  ;;  %v22340_v62 = vsub.f32 %v30254_v48, %v22338_v51  ;;  %v29841_v51 = vld [vmem:[%s29978_s24] sm:$0xff] }
0x99a8   :  { %28495 = vmatpush3.msra.mxu1 %v22179_v4  ;;  %28496 = vmatprep.mubr.msk.f32.mxu1 %vm29901_vm0, %v29902_v6  ;;  %v22339_v19 = vsub.f32 %v30180_v36, %v22337_v15  ;;  %v29842_v15 = vld [vmem:[%s29978_s24 + $0x10] sm:$0xff]  ;;  %s31504_s24 = sld [smem:[#allocation17_spill]] }
0x99ab   :  { %28497 = vmatmul.mubr.msk.f32.vlgmr.msra.gmra.mrb[16].mxu1 %vm442_vm3, %v22263_v27 }
0x9a7a   :  { %v31272_v55 = vpop.f32.mrb[14].mxu1 }
0x9a7b   :  { %v28488_v31 = vpop.f32.mrb[15].mxu1 }
0x9a7c   :  { %v23552_v31 = vmul.f32 %v25508_v10, %v30798_v32 }
0x9a7e   :  { %v22332_v12 = vpop.f32.mrb[16].mxu1 }
0x9a7f   :  { %v22336_v18 = vmul.f32 2.5e-05, %v22332_v12  ;;  %v28498_v35 = vpop.f32.mrb[17].mxu1  ;;  %v23553_v12 = vadd.f32 %v30793_v20, %v23552_v31 }
0x9a81   :  { %v22344_v63 = vrot.slane %v22336_v18, %v30146_v7  ;;  %v25509_v18 = vld [vmem:[%s30068_s4 + $0x10] sm:$0xff] }
0x9a83   :  { %v22345_v43 = vmul.f32 0.0, %v22344_v63  ;;  %v22346_v25 = vmul.f32 %v22344_v63, %v30295_v2 }
0x9a85   :  { %v22347_v34 = vadd.f32 %v22345_v43, %v22339_v19  ;;  %v22348_v17 = vadd.f32 %v22346_v25, %v22340_v62 }
0x9a87   :  { %28503 = vmatprep.mubr.msk.f32.mxu0 %vm1170_vm11, %v22347_v34  ;;  %v29624_v60 = vpack.c.bf16 %v22348_v17, %v22347_v34 }
0x9a89   :  { %29625 = vmatprep.subr.bf16.mxu0 %v29624_v60 }
0x9a8a   :  { %29627 = vmatpush3.bf16.msra.mxu0 %v29624_v60  ;;  %v29843_v60 = vld [vmem:[%s31485_s5] ss:$0 sm:$0xff] }
0x9a8d   :  { %28504 = vmatmul.mubr.msk.f32.vlgmr.msra.gmra.mrb[12].mxu0 %vm1170_vm11, %v22348_v17 }
0x9b60   :  { %v28505_v26 = vpop.f32.mrb[12].mxu0 }
0x9b61   :  { %v22421_v29 = vpop.f32.mrb[13].mxu0 }
0x9b62   :  { %v29628_v23 = vpack.c.bf16 %v28505_v26, %v22421_v29  ;;  %28510 = vmatprep.mubr.msk.f32.mxu1 %vm1170_vm11, %v22421_v29 }
0x9b64   :  { %29629 = vmatprep.subr.bf16.mxu1 %v29628_v23 }
0x9b65   :  { %29631 = vmatpush3.bf16.msra.mxu1 %v29628_v23 }
0x9b68   :  { %28511 = vmatmul.mubr.msk.f32.vlgmr.msra.gmra.mrb[18].mxu1 %vm1170_vm11, %v28505_v26 }
0x9c3b   :  { %v28512_v36 = vpop.f32.mrb[18].mxu1 }
0x9c3c   :  { %v22502_v48 = vpop.f32.mrb[19].mxu1 }
0x9c3d   :  { %v29632_v2 = vpack.c.bf16 %v28512_v36, %v22502_v48  ;;  %28517 = vmatprep.mubr.msk.f32.mxu0 %vm1170_vm11, %v22502_v48  ;;  %v24023_v48 = vld [vmem:[%s31495_s13 + $0x10] sm:$0xff] }
0x9c3f   :  { %29633 = vmatprep.subr.bf16.mxu0 %v29632_v2 }
0x9c40   :  { %29635 = vmatpush3.bf16.msra.mxu0 %v29632_v2  ;;  %v25516_v2 = vld [vmem:[%s30068_s4 + $0x18] sm:$0xff] }
0x9c43   :  { %28518 = vmatmul.mubr.msk.f32.vlgmr.msra.gmra.mrb[14].mxu0 %vm1170_vm11, %v28512_v36 }
0x9d16   :  { %v28519_v28 = vpop.f32.mrb[14].mxu0 }
0x9d17   :  { %v22583_v39 = vpop.f32.mrb[15].mxu0 }
0x9d18   :  { %v29636_v41 = vpack.c.bf16 %v28519_v28, %v22583_v39  ;;  %28524 = vmatprep.mubr.msk.f32.mxu1 %vm1170_vm11, %v22583_v39 }
0x9d1a   :  { %29637 = vmatprep.subr.bf16.mxu1 %v29636_v41 }
0x9d1b   :  { %29639 = vmatpush3.bf16.msra.mxu1 %v29636_v41  ;;  %v29844_v41 = vld [vmem:[%s31486_s9] ss:$0 sm:$0xff] }
0x9d1e   :  { %28525 = vmatmul.mubr.msk.f32.vlgmr.msra.gmra.mrb[20].mxu1 %vm1170_vm11, %v28519_v28 }
0x9d1f   :  { %28538 = vmatprep.mubr.msk.f32.mxu1 %vm1170_vm11, %v22583_v39 }
0x9df1   :  { %v28526_v33 = vpop.f32.mrb[20].mxu1 }
0x9df2   :  { %v22664_v57 = vpop.f32.mrb[21].mxu1 }
0x9df3   :  { %v29640_v47 = vpack.c.bf16 %v28526_v33, %v22664_v57  ;;  %28531 = vmatprep.mubr.msk.f32.mxu0 %vm1170_vm11, %v22664_v57 }
0x9df5   :  { %29641 = vmatprep.subr.bf16.mxu0 %v29640_v47 }
0x9df6   :  { %29643 = vmatpush3.bf16.msra.mxu0 %v29640_v47 }
0x9df9   :  { %28532 = vmatmul.mubr.msk.f32.vlgmr.msra.gmra.mrb[16].mxu0 %vm1170_vm11, %v28526_v33 }
0x9ecc   :  { %v28533_v11 = vpop.f32.mrb[16].mxu0 }
0x9ecd   :  { %v22745_v37 = vpop.f32.mrb[17].mxu0 }
0x9ece   :  { %v29644_v13 = vpack.c.bf16 %v28533_v11, %v22745_v37  ;;  %28545 = vmatprep.mubr.msk.f32.mxu0 %vm1170_vm11, %v22745_v37 }
0x9ed0   :  { %29645 = vmatprep.subr.bf16.mxu1 %v29644_v13  ;;  %29649 = vmatprep.subr.bf16.mxu0 %v29644_v13 }
0x9ed1   :  { %29647 = vmatpush3.bf16.msra.mxu1 %v29644_v13  ;;  %29651 = vmatpush3.bf16.msra.mxu0 %v29644_v13 }
0x9ed4   :  { %28539 = vmatmul.mubr.msk.f32.vlgmr.msra.gmra.mrb[22].mxu1 %vm1170_vm11, %v28519_v28  ;;  %28546 = vmatmul.mubr.msk.f32.vlgmr.msra.gmra.mrb[18].mxu0 %vm1170_vm11, %v28533_v11  ;;  %v24211_v28 = vld [vmem:[%s31496_s17 + $0x8] sm:$0xff] }
0x9fa7   :  { %v28540_v21 = vpop.f32.mrb[22].mxu1  ;;  %v28547_v38 = vpop.f32.mrb[18].mxu0 }
0x9fa8   :  { %v22820_v16 = vpop.f32.mrb[23].mxu1  ;;  %v22901_v53 = vpop.f32.mrb[19].mxu0 }
0x9fa9   :  { %v29652_v56 = vpack.c.bf16 %v28547_v38, %v22901_v53  ;;  %28552 = vmatprep.mubr.msk.f32.mxu1 %vm1170_vm11, %v22820_v16  ;;  %28559 = vmatprep.mubr.msk.f32.mxu0 %vm1170_vm11, %v22901_v53 }
0x9fab   :  { %29653 = vmatprep.subr.bf16.mxu1 %v29652_v56  ;;  %29657 = vmatprep.subr.bf16.mxu0 %v29652_v56 }
0x9fac   :  { %29655 = vmatpush3.bf16.msra.mxu1 %v29652_v56  ;;  %29659 = vmatpush3.bf16.msra.mxu0 %v29652_v56 }
0x9faf   :  { %28553 = vmatmul.mubr.msk.f32.vlgmr.msra.gmra.mrb[24].mxu1 %vm1170_vm11, %v28540_v21  ;;  %28560 = vmatmul.mubr.msk.f32.vlgmr.msra.gmra.mrb[20].mxu0 %vm1170_vm11, %v28547_v38 }
0xa082   :  { %v28554_v42 = vpop.f32.mrb[24].mxu1  ;;  %v28561_v45 = vpop.f32.mrb[20].mxu0 }
0xa083   :  { %v22982_v52 = vpop.f32.mrb[25].mxu1  ;;  %v23063_v30 = vpop.f32.mrb[21].mxu0 }
0xa084   :  { %v29660_v54 = vpack.c.bf16 %v28561_v45, %v23063_v30  ;;  %28566 = vmatprep.mubr.msk.f32.mxu1 %vm1170_vm11, %v22982_v52  ;;  %28573 = vmatprep.mubr.msk.f32.mxu0 %vm1170_vm11, %v23063_v30  ;;  %v25515_v30 = vld [vmem:[%s30073_s12 + $0x20] sm:$0xff] }
0xa086   :  { %29661 = vmatprep.subr.bf16.mxu1 %v29660_v54  ;;  %29665 = vmatprep.subr.bf16.mxu0 %v29660_v54 }
0xa087   :  { %29663 = vmatpush3.bf16.msra.mxu1 %v29660_v54  ;;  %29667 = vmatpush3.bf16.msra.mxu0 %v29660_v54 }
0xa08a   :  { %28567 = vmatmul.mubr.msk.f32.vlgmr.msra.gmra.mrb[26].mxu1 %vm1170_vm11, %v28554_v42  ;;  %28574 = vmatmul.mubr.msk.f32.vlgmr.msra.gmra.mrb[22].mxu0 %vm1170_vm11, %v28561_v45  ;;  %v23874_v45 = vld [vmem:[%s31495_s13] sm:$0xff] }
0xa15d   :  { %v28568_v58 = vpop.f32.mrb[26].mxu1  ;;  %v28575_v14 = vpop.f32.mrb[22].mxu0 }
0xa15e   :  { %v23144_v0 = vpop.f32.mrb[27].mxu1  ;;  %v23225_v46 = vpop.f32.mrb[23].mxu0 }
0xa15f   :  { %v29668_v40 = vpack.c.bf16 %v28575_v14, %v23225_v46  ;;  %28580 = vmatprep.mubr.msk.f32.mxu1 %vm1170_vm11, %v23144_v0  ;;  %28587 = vmatprep.mubr.msk.f32.mxu0 %vm1170_vm11, %v23225_v46  ;;  %v24107_v0 = vld [vmem:[%s31497_s21] sm:$0xff]  ;;  %v24108_v46 = vld [vmem:[%s31497_s21 + $0x8] sm:$0xff] }
0xa161   :  { %29669 = vmatprep.subr.bf16.mxu1 %v29668_v40  ;;  %29673 = vmatprep.subr.bf16.mxu0 %v29668_v40 }
0xa162   :  { %29671 = vmatpush3.bf16.msra.mxu1 %v29668_v40  ;;  %29675 = vmatpush3.bf16.msra.mxu0 %v29668_v40  ;;  %v29690_v40 = vpack.c.bf16 %v24108_v46, %v24107_v0 }
0xa163   :  { %29680 = vmatprep.subr.bf16.mxu0 %v29900_v3 }
0xa165   :  { %28581 = vmatmul.mubr.msk.f32.vlgmr.msra.gmra.mrb[28].mxu1 %vm1170_vm11, %v28568_v58  ;;  %28588 = vmatmul.mubr.msk.f32.vlgmr.msra.gmra.mrb[24].mxu0 %vm1170_vm11, %v28575_v14 }
0xa166   :  { %28601 = vmatprep.mubr.msk.f32.mxu0 %vm29901_vm0, %v29902_v6 }
0xa238   :  { %v28582_v1 = vpop.f32.mrb[28].mxu1  ;;  %v28589_v4 = vpop.f32.mrb[24].mxu0 }
0xa239   :  { %v23306_v5 = vpop.f32.mrb[29].mxu1  ;;  %v23387_v8 = vpop.f32.mrb[25].mxu0 }
0xa23a   :  { %v29676_v9 = vpack.c.bf16 %v28589_v4, %v23387_v8  ;;  %28594 = vmatprep.mubr.msk.f32.mxu1 %vm1170_vm11, %v23306_v5  ;;  %v24110_v4 = vld [vmem:[%s31497_s21 + $0x18] sm:$0xff] }
0xa23c   :  { %29677 = vmatprep.subr.bf16.mxu1 %v29676_v9 }
0xa23d   :  { %29679 = vmatpush3.bf16.msra.mxu1 %v29676_v9 }
0xa23e   :  { %28604 = vmatprep.subr.mxu1 %v29902_v6 }
0xa240   :  { %28595 = vmatmul.mubr.msk.f32.vlgmr.msra.gmra.mrb[30].mxu1 %vm1170_vm11, %v28582_v1  ;;  %v24109_v1 = vld [vmem:[%s31497_s21 + $0x10] sm:$0xff] }
0xa241   :  { %28605 = vmatpush3.msra.mxu1 %v29840_v50  ;;  %28606 = vmatprep.mubr.msk.f32.mxu1 %vm29901_vm0, %v29902_v6  ;;  %v29693_v5 = vpack.c.bf16 %v24110_v4, %v24109_v1 }
0xa242   :  { %28614 = vmatprep.subr.mxu1 %v29902_v6 }
0xa313   :  { %v28596_v49 = vpop.f32.mrb[30].mxu1 }
0xa314   :  { %v23468_v22 = vpop.f32.mrb[31].mxu1 }
0xa315   :  { %v29681_v27 = vpack.c.bf16 %v28596_v49, %v23468_v22  ;;  %v25520_v22 = vld [vmem:[%s31498_s25] ss:$0 sm:$0xff] }
0xa317   :  { %29682 = vmatpush3.bf16.msra.mxu0 %v29681_v27 }
0xa318   :  { %28609 = vmatprep.subr.mxu0 %v29902_v6 }
0xa31a   :  { %28602 = vmatmul.mubr.msk.f32.vlgmr.msra.gmra.mrb[26].mxu0 %vm1170_vm11, %v31272_v55  ;;  %vm24799_vm11 = vcmask 57344  }
0xa31b   :  { %28610 = vmatpush3.msra.mxu0 %v29841_v51  ;;  %28611 = vmatprep.mubr.msk.f32.mxu0 %vm29901_vm0, %v29902_v6  ;;  %v25521_v51 = vld [vmem:[%s31499_s29] ss:$0 sm:$0xff] }
0xa31c   :  { %29683 = vmatprep.subr.bf16.mxu0 %v29900_v3 }
0xa31e   :  { %28612 = vmatmul.mubr.msk.f32.vlgmr.msra.gmra.mrb[28].mxu0 %vm442_vm3, %v23553_v12 }
0xa31f   :  { %29685 = vmatpush3.bf16.msra.mxu0 %v30780_v59  ;;  %28627 = vmatprep.mubr.msk.f32.mxu0 %vm29901_vm0, %v29902_v6  ;;  %v23875_v59 = vld [vmem:[%s31495_s13 + $0x8] sm:$0xff] }
0xa320   :  { %29686 = vmatprep.subr.bf16.mxu0 %v29900_v3 }
0xa323   :  { %29688 = vmatpush3.bf16.msra.mxu0 %v30786_v61 }
0xa324   :  { %28640 = vmatprep.subr.mxu0 %v29902_v6 }
0xa3ed   :  { %v23546_v32 = vpop.f32.mrb[26].mxu0 }
0xa3ee   :  { %v28603_v55 = vpop.f32.mrb[27].mxu0  ;;  %28607 = vmatmul.mubr.msk.f32.vlgmr.msra.gmra.mrb[32].mxu1 %vm442_vm3, %v23546_v32 }
0xa3ef   :  { %28615 = vmatpush3.msra.mxu1 %v29842_v15  ;;  %28616 = vmatprep.mubr.msk.f32.mxu1 %vm29901_vm0, %v29902_v6 }
0xa3f0   :  { %28630 = vmatprep.subr.mxu1 %v29902_v6 }
0xa3f1   :  { %v23702_v35 = vpop.f32.mrb[28].mxu0 }
0xa3f2   :  { %v28613_v63 = vpop.f32.mrb[29].mxu0  ;;  %28617 = vmatmul.mubr.msk.f32.vlgmr.msra.gmra.mrb[34].mxu1 %vm442_vm3, %v25509_v18 }
0xa3f3   :  { %28631 = vmatpush3.msra.mxu1 %v23875_v59  ;;  %28632 = vmatprep.mubr.msk.f32.mxu1 %vm29901_vm0, %v29902_v6 }
0xa3f4   :  { %28635 = vmatprep.subr.mxu1 %v29902_v6 }
0xa3f6   :  { %28633 = vmatmul.mubr.msk.f32.vlgmr.msra.gmra.mrb[36].mxu1 %vm442_vm3, %v23546_v32 }
0xa3f7   :  { %28637 = vmatprep.mubr.msk.f32.mxu1 %vm29901_vm0, %v29902_v6  ;;  %28636 = vmatpush3.msra.mxu1 %v23874_v45 }
0xa3f8   :  { %29689 = vmatprep.subr.bf16.mxu1 %v29900_v3 }
0xa4c1   :  { %v23625_v61 = vpop.f32.mrb[32].mxu1 }
0xa4c2   :  { %v23632_v62 = vrot.slane %v23625_v61, %v30146_v7  ;;  %v28608_v19 = vpop.f32.mrb[33].mxu1 }
0xa4c3   :  { %v24359_v19 = vld [vmem:[%s31496_s17 + $0x10] sm:$0xff] }
0xa4c4   :  { %v23703_v43 = vadd.f32 %v23702_v35, %v23632_v62  ;;  %v24210_v62 = vld [vmem:[%s31496_s17] sm:$0xff] }
0xa4c5   :  { %v23775_v25 = vpop.f32.mrb[34].mxu1 }
0xa4c6   :  { %v23779_v34 = vadd.f32 %v23775_v25, %v23703_v43  ;;  %v28618_v17 = vpop.f32.mrb[35].mxu1  ;;  %v25525_v43 = vld [vmem:[%s30068_s4 + $0x20] sm:$0xff] }
0xa4c8   :  { %v23780_v26 = vadd.f32 %v29843_v60, %v23779_v34 }
0xa4c9   :  { %v23942_v29 = vpop.f32.mrb[36].mxu1 }
0xa4ca   :  { %v23781_v23 = vmax.f32 %v23780_v26, 0.0  ;;  %v28634_v36 = vpop.f32.mrb[37].mxu1  ;;  %v23949_v8 = vrot.slane %v23942_v29, %v30146_v7 }
0xa4cc   :  { %28628 = vmatmul.mubr.msk.f32.vlgmr.msra.gmra.mrb[30].mxu0 %vm172_vm1, %v23781_v23 }
0xa4cd   :  { %28641 = vmatpush3.msra.mxu0 %v24023_v48  ;;  %28642 = vmatprep.mubr.msk.f32.mxu0 %vm29901_vm0, %v29902_v6 }
0xa4ce   :  { %28656 = vmatprep.subr.mxu0 %v29902_v6 }
0xa4d0   :  { %28643 = vmatmul.mubr.msk.f32.vlgmr.msra.gmra.mrb[32].mxu0 %vm442_vm3, %v25516_v2 }
0xa4d1   :  { %28657 = vmatpush3.msra.mxu0 %v24211_v28  ;;  %28658 = vmatprep.mubr.msk.f32.mxu0 %vm29901_vm0, %v29902_v6 }
0xa4d2   :  { %28661 = vmatprep.subr.mxu0 %v29902_v6 }
0xa4d4   :  { %28659 = vmatmul.mubr.msk.f32.vlgmr.msra.gmra.mrb[34].mxu0 %vm442_vm3, %v23546_v32 }
0xa4d5   :  { %28663 = vmatprep.mubr.msk.f32.mxu0 %vm29901_vm0, %v29902_v6  ;;  %28662 = vmatpush3.msra.mxu0 %v24210_v62 }
0xa4d6   :  { %29695 = vmatprep.subr.bf16.mxu0 %v29900_v3 }
0xa59f   :  { %v23851_v39 = vpop.f32.mrb[30].mxu0 }
0xa5a0   :  { %v23852_v33 = vadd.f32 %v29844_v41, %v23851_v39  ;;  %v28629_v57 = vpop.f32.mrb[31].mxu0 }
0xa5a1   :  { %v24444_v57 = vld [vmem:[%s31500_s3 + $0x8] sm:$0xff] }
0xa5a2   :  { %v25514_v47 = vmul.f32 -1.442695, %v23852_v33  ;;  %v24443_v33 = vld [vmem:[%s31500_s3] sm:$0xff] }
0xa5a3   :  { %v24093_v11 = vpop.f32.mrb[32].mxu0 }
0xa5a4   :  { %29810 = vpow2.f32 %v25514_v47  ;;  %v28644_v37 = vpop.f32.mrb[33].mxu0  ;;  %v29696_v47 = vpack.c.bf16 %v24444_v57, %v24443_v33 }
0xa5a5   :  { %v24445_v37 = vld [vmem:[%s31500_s3 + $0x10] sm:$0xff] }
0xa5a7   :  { %v31362_v13 = vpop.f32.mrb[34].mxu0 }
0xa5a8   :  { %v28660_v21 = vpop.f32.mrb[35].mxu0 }
0xa5a9   :  { %v24446_v21 = vld [vmem:[%s31500_s3 + $0x18] sm:$0xff] }
0xa5ae   :  { %v29811_v38 = vpop.eup %29810 }
0xa5af   :  { %v23858_v16 = vadd.f32 1.0, %v29811_v38  ;;  %v29699_v38 = vpack.c.bf16 %v24446_v21, %v24445_v37 }
0xa5b1   :  { %29812 = vrcp.f32 %v23858_v16 }
0xa5bb   :  { %v31364_v53 = vpop.eup %29812 }
0xa5bc   :  { %v23863_v56 = vmul.f32 0.5, %v31364_v53 }
0xa5be   :  { %v23864_v42 = vmul.f32 1.442695, %v23863_v56 }
0xa5c0   :  { %29814 = vpow2.f32 %v23864_v42 }
0xa5ca   :  { %v29815_v52 = vpop.eup %29814 }
0xa5cb   :  { %23867 = vrot.lane.b32.xlu1 %v29815_v52, %s29904_s0 }
0xa63d   :  { %v23868_v54 = vpop.permute.xlu1 %23867 }
0xa63e   :  { %v23870_v58 = vmul.f32 %v25515_v30, %v23868_v54 }
0xa640   :  { %v23871_v14 = vadd.f32 %v31364_v53, %v23870_v58  ;;  %v24285_v58 = vrot.slane %v31362_v13, %v30146_v7 }
0xa642   :  { %28638 = vmatmul.mubr.msk.f32.vlgmr.msra.gmra.mrb[38].mxu1 %vm442_vm3, %v23871_v14 }
0xa643   :  { %28653 = vmatprep.mubr.msk.f32.mxu1 %vm29901_vm0, %v29902_v6  ;;  %29691 = vmatpush3.bf16.msra.mxu1 %v29690_v40  ;;  %v25529_v40 = vld [vmem:[%s31501_s8] ss:$0 sm:$0xff] }
0xa644   :  { %29692 = vmatprep.subr.bf16.mxu1 %v29900_v3 }
0xa647   :  { %29694 = vmatpush3.bf16.msra.mxu1 %v29693_v5 }
0xa648   :  { %28666 = vmatprep.subr.mxu1 %v29902_v6 }
0xa715   :  { %v24019_v9 = vpop.f32.mrb[38].mxu1 }
0xa716   :  { %v24020_v50 = vadd.f32 %v24019_v9, %v23949_v8  ;;  %v28639_v49 = vpop.f32.mrb[39].mxu1  ;;  %v24547_v8 = vld [vmem:[%s31502_s14 + $0x8] sm:$0xff]  ;;  %v25530_v9 = vld [vmem:[%s31503_s19] ss:$0 sm:$0xff] }
0xa718   :  { %v24097_v10 = vadd.f32 %v24093_v11, %v24020_v50 }
0xa71a   :  { %v24105_v27 = vadd.f32 %v25520_v22, %v24097_v10 }
0xa71c   :  { %v24106_v31 = vmax.f32 %v24105_v27, 0.0 }
0xa71e   :  { %28654 = vmatmul.mubr.msk.f32.vlgmr.msra.gmra.mrb[40].mxu1 %vm172_vm1, %v24106_v31 }
0xa71f   :  { %28668 = vmatprep.mubr.msk.f32.mxu1 %vm29901_vm0, %v29902_v6  ;;  %28667 = vmatpush3.msra.mxu1 %v24359_v19 }
0xa720   :  { %28682 = vmatprep.subr.mxu1 %v29902_v6 }
0xa722   :  { %28669 = vmatmul.mubr.msk.f32.vlgmr.msra.gmra.mrb[42].mxu1 %vm442_vm3, %v25525_v43 }
0xa723   :  { %28684 = vmatprep.mubr.msk.f32.mxu1 %vm29901_vm0, %v29902_v6  ;;  %28683 = vmatpush3.msra.mxu1 %v24547_v8 }
0xa724   :  { %28687 = vmatprep.subr.mxu1 %v29902_v6 }
0xa7f1   :  { %v24187_v12 = vpop.f32.mrb[40].mxu1 }
0xa7f2   :  { %v24188_v32 = vadd.f32 %v25521_v51, %v24187_v12  ;;  %v28655_v55 = vpop.f32.mrb[41].mxu1  ;;  %v25534_v12 = vld [vmem:[%s30068_s4 + $0x28] sm:$0xff] }
0xa7f3   :  { %28685 = vmatmul.mubr.msk.f32.vlgmr.msra.gmra.mrb[44].mxu1 %vm442_vm3, %v25534_v12 }
0xa7f4   :  { %v25523_v15 = vmul.f32 -1.442695, %v24188_v32  ;;  %v24546_v32 = vld [vmem:[%s31502_s14] sm:$0xff]  ;;  %28689 = vmatprep.mubr.msk.f32.mxu1 %vm29901_vm0, %v29902_v6 }
0xa7f5   :  { %v24429_v41 = vpop.f32.mrb[42].mxu1  ;;  %28688 = vmatpush3.msra.mxu1 %v24546_v32 }
0xa7f6   :  { %29816 = vpow2.f32 %v25523_v15  ;;  %v28670_v11 = vpop.f32.mrb[43].mxu1 }
0xa800   :  { %v29817_v18 = vpop.eup %29816 }
0xa801   :  { %v24194_v59 = vadd.f32 1.0, %v29817_v18 }
0xa803   :  { %29818 = vrcp.f32 %v24194_v59 }
0xa804   :  { %29820 = vlog2.f32 %v30119_v44 }
0xa80d   :  { %v31387_v35 = vpop.eup %29818 }
0xa80e   :  { %v24199_v63 = vmul.f32 0.5, %v31387_v35  ;;  %v29821_v25 = vpop.eup %29820 }
0xa80f   :  { %v24794_v17 = vmul.f32 0.6931472, %v29821_v25 }
0xa810   :  { %v24200_v61 = vmul.f32 1.442695, %v24199_v63 }
0xa812   :  { %29822 = vpow2.f32 %v24200_v61  ;;  %v25533_v61 = vld [vmem:[%s30073_s12 + $0x30] sm:$0xff] }
0xa813   :  { %29824 = vlog2.f32 %v30793_v20  ;;  %v25524_v20 = vld [vmem:[%s30073_s12 + $0x28] sm:$0xff]  ;;  %s31506_s12 = sld [smem:[#allocation18_spill]] }
0xa81c   :  { %v29823_v34 = vpop.eup %29822 }
0xa81d   :  { %24203 = vrot.lane.b32.xlu0 %v29823_v34, %s29904_s0  ;;  %v29825_v60 = vpop.eup %29824 }
0xa81e   :  { %v24831_v26 = vmul.f32 0.6931472, %v29825_v60 }
0xa821   :  { %24796 = vrot.lane.b32.xlu0 %v24794_v17, %s29904_s0 }
0xa825   :  { %24833 = vrot.lane.b32.xlu0 %v24831_v26, %s29904_s0 }
0xa88f   :  { %v24204_v29 = vpop.permute.xlu0 %24203 }
0xa890   :  { %v24206_v23 = vmul.f32 %v25524_v20, %v24204_v29 }
0xa892   :  { %v24207_v36 = vadd.f32 %v31387_v35, %v24206_v23  ;;  %v24703_v23 = vld [vmem:[%s31504_s24] sm:$0xff] }
0xa893   :  { %v24797_v48 = vpop.permute.xlu0 %24796 }
0xa894   :  { %28664 = vmatmul.mubr.msk.f32.vlgmr.msra.gmra.mrb[36].mxu0 %vm442_vm3, %v24207_v36  ;;  %v24800_v2 = vsel %vm24799_vm11, %v24797_v48, 0.0  ;;  %v24704_v36 = vld [vmem:[%s31504_s24 + $0x8] sm:$0xff] }
0xa895   :  { %24801 = vadd.xlane.f32.xlu0 %v24800_v2  ;;  %28679 = vmatprep.mubr.msk.f32.mxu0 %vm29901_vm0, %v29902_v6  ;;  %v29702_v48 = vpack.c.bf16 %v24704_v36, %v24703_v23  ;;  %v24705_v2 = vld [vmem:[%s31504_s24 + $0x10] sm:$0xff] }
0xa896   :  { %29697 = vmatpush3.bf16.msra.mxu0 %v29696_v47 }
0xa897   :  { %v24834_v28 = vpop.permute.xlu0 %24833  ;;  %29698 = vmatprep.subr.bf16.mxu0 %v29900_v3 }
0xa898   :  { %v24836_v39 = vsel %vm442_vm3, %v24834_v28, 0.0  ;;  %v24706_v28 = vld [vmem:[%s31504_s24 + $0x18] sm:$0xff] }
0xa899   :  { %24837 = vadd.xlane.f32.xlu0 %v24836_v39  ;;  %v29705_v39 = vpack.c.bf16 %v24706_v28, %v24705_v2 }
0xa89a   :  { %29700 = vmatpush3.bf16.msra.mxu0 %v29699_v38 }
0xa89b   :  { %29701 = vmatprep.subr.bf16.mxu0 %v29900_v3 }
0xa922   :  { %v24802_v16 = vpop.xlane.xlu0 %24801 }
0xa923   :  { %v24803_v56 = vrot.slane %v24802_v16, 4 }
0xa925   :  { %v24804_v42 = vadd.f32 %v24803_v56, %v24802_v16 }
0xa927   :  { %v24805_v45 = vrot.slane %v24804_v42, 2 }
0xa929   :  { %v24806_v52 = vadd.f32 %v24805_v45, %v24804_v42 }
0xa92b   :  { %v24807_v30 = vrot.slane %v24806_v52, 1 }
0xa92d   :  { %v24808_v54 = vadd.f32 %v24807_v30, %v24806_v52 }
0xa92f   :  { %29707 = vpush %v24808_v54 }
0xa960   :  { %s29708_s20 = spop %29707 }
0xa967   :  { %v24355_v14 = vpop.f32.mrb[36].mxu0 }
0xa968   :  { %v24356_v0 = vadd.f32 %v24355_v14, %v24285_v58  ;;  %v28665_v46 = vpop.f32.mrb[37].mxu0 }
0xa96a   :  { %v24433_v1 = vadd.f32 %v24429_v41, %v24356_v0  ;;  %v24838_v41 = vpop.xlane.xlu0 %24837 }
0xa96b   :  { %v24839_v33 = vrot.slane %v24838_v41, 4 }
0xa96c   :  { %v24441_v4 = vadd.f32 %v25529_v40, %v24433_v1 }
0xa96d   :  { %v24840_v57 = vadd.f32 %v24839_v33, %v24838_v41  ;;  %v24810_v41 = vstv %s29708_s20 }
0xa96e   :  { %v24442_v5 = vmax.f32 %v24441_v4, 0.0  ;;  %v25537_v4 = vld [vmem:[%s31505_s6] ss:$0 sm:$0xff] }
0xa96f   :  { %v24841_v47 = vrot.slane %v24840_v57, 2 }
0xa970   :  { %28680 = vmatmul.mubr.msk.f32.vlgmr.msra.gmra.mrb[38].mxu0 %vm172_vm1, %v24442_v5 }
0xa971   :  { %28700 = vmatprep.mubr.msk.f32.mxu0 %vm29901_vm0, %v29902_v6  ;;  %29703 = vmatpush3.bf16.msra.mxu0 %v29702_v48  ;;  %v24842_v16 = vadd.f32 %v24841_v47, %v24840_v57  ;;  %v24811_v57 = vsub.f32 0.0, %v24810_v41  ;;  %vm24921_vm0 = vcmask 0  }
0xa972   :  { %29704 = vmatprep.subr.bf16.mxu0 %v29900_v3 }
0xa973   :  { %v24843_v30 = vrot.slane %v24842_v16, 1 }
0xa975   :  { %29706 = vmatpush3.bf16.msra.mxu0 %v29705_v39  ;;  %v24844_v0 = vadd.f32 %v24843_v30, %v24842_v16 }
0xaa43   :  { %v24523_v7 = vpop.f32.mrb[38].mxu0 }
0xaa44   :  { %v24524_v13 = vadd.f32 %v25530_v9, %v24523_v7  ;;  %v28681_v50 = vpop.f32.mrb[39].mxu0 }
0xaa46   :  { %v25532_v49 = vmul.f32 -1.442695, %v24524_v13  ;;  %v25538_v13 = vld [vmem:[%s31506_s12] ss:$0 sm:$0xff] }
0xaa48   :  { %29826 = vpow2.f32 %v25532_v49 }
0xaa52   :  { %v29827_v22 = vpop.eup %29826 }
0xaa53   :  { %v24530_v10 = vadd.f32 1.0, %v29827_v22 }
0xaa55   :  { %29828 = vrcp.f32 %v24530_v10 }
0xaa56   :  { %29830 = vlog2.f32 %v30154_v24 }
0xaa5f   :  { %v29829_v27 = vpop.eup %29828 }
0xaa60   :  { %v24535_v31 = vmul.f32 0.5, %v29829_v27  ;;  %v29831_v55 = vpop.eup %29830  ;;  %v24867_v43 = vsub.f32 %v30154_v24, %v29829_v27  ;;  %v24617_v24 = vpop.f32.mrb[44].mxu1 }
0xaa61   :  { %v24813_v18 = vmul.f32 0.6931472, %v29831_v55  ;;  %v28686_v29 = vpop.f32.mrb[45].mxu1 }
0xaa62   :  { %v24536_v51 = vmul.f32 1.442695, %v24535_v31  ;;  %v24889_v34 = vmul.f32 %v24867_v43, %v24867_v43 }
0xaa64   :  { %29832 = vpow2.f32 %v24536_v51  ;;  %v24891_v26 = vrot.slane %v24889_v34, 7 }
0xaa65   :  { %29834 = vlog2.f32 %v31364_v53 }
0xaa66   :  { %v24893_v20 = vsel %vm24799_vm11, %v24891_v26, 0.0 }
0xaa6e   :  { %v29833_v15 = vpop.eup %29832 }
0xaa6f   :  { %24539 = vrot.lane.b32.xlu1 %v29833_v15, %s29904_s0  ;;  %v29835_v59 = vpop.eup %29834 }
0xaa70   :  { %v24849_v63 = vmul.f32 0.6931472, %v29835_v59 }
0xaa73   :  { %24815 = vrot.lane.b32.xlu1 %v24813_v18, %s29904_s0 }
0xaa77   :  { %24851 = vrot.lane.b32.xlu1 %v24849_v63, %s29904_s0 }
0xaae1   :  { %v24540_v62 = vpop.permute.xlu1 %24539 }
0xaae2   :  { %v24542_v19 = vmul.f32 %v25533_v61, %v24540_v62 }
0xaae4   :  { %v24543_v6 = vadd.f32 %v29829_v27, %v24542_v19 }
0xaae5   :  { %v24816_v53 = vpop.permute.xlu1 %24815 }
0xaae6   :  { %28690 = vmatmul.mubr.msk.f32.vlgmr.msra.gmra.mrb[46].mxu1 %vm442_vm3, %v24543_v6  ;;  %v24818_v25 = vsel %vm442_vm3, %v24816_v53, 0.0 }
0xaae7   :  { %24819 = vadd.xlane.f32.xlu1 %v24818_v25 }
0xaae9   :  { %v24852_v17 = vpop.permute.xlu1 %24851 }
0xaaea   :  { %v24854_v60 = vsel %vm442_vm3, %v24852_v17, 0.0 }
0xaaeb   :  { %24855 = vadd.xlane.f32.xlu0 %v24854_v60 }
0xaaef   :  { %24894 = vadd.xlane.f32.xlu0 %v24893_v20 }
0xab74   :  { %v24820_v11 = vpop.xlane.xlu1 %24819 }
0xab75   :  { %v24821_v37 = vrot.slane %v24820_v11, 4 }
0xab77   :  { %v24822_v21 = vadd.f32 %v24821_v37, %v24820_v11 }
0xab78   :  { %v24856_v38 = vpop.xlane.xlu0 %24855 }
0xab79   :  { %v24823_v56 = vrot.slane %v24822_v21, 2  ;;  %v24857_v42 = vrot.slane %v24856_v38, 4 }
0xab7b   :  { %v24858_v45 = vadd.f32 %v24857_v42, %v24856_v38  ;;  %v24824_v52 = vadd.f32 %v24823_v56, %v24822_v21 }
0xab7c   :  { %v24895_v62 = vpop.xlane.xlu0 %24894 }
0xab7d   :  { %v24859_v3 = vrot.slane %v24858_v45, 2  ;;  %v24825_v54 = vrot.slane %v24824_v52, 1  ;;  %v24896_v19 = vrot.slane %v24895_v62, 4 }
0xab7f   :  { %v24826_v58 = vadd.f32 %v24825_v54, %v24824_v52  ;;  %v24860_v14 = vadd.f32 %v24859_v3, %v24858_v45  ;;  %v24897_v43 = vadd.f32 %v24896_v19, %v24895_v62 }
0xab81   :  { %29709 = vpush %v24826_v58  ;;  %v24861_v46 = vrot.slane %v24860_v14, 1  ;;  %v24898_v6 = vrot.slane %v24897_v43, 2 }
0xab82   :  { %29711 = vpush %v24844_v0 }
0xab83   :  { %v24862_v40 = vadd.f32 %v24861_v46, %v24860_v14 }
0xab85   :  { %29713 = vpush %v24862_v40 }
0xabb2   :  { %s29710_s27 = spop %29709 }
0xabb3   :  { %v24828_v33 = vstv %s29710_s27  ;;  %s29712_s4 = spop %29711 }
0xabb4   :  { %v24829_v47 = vsub.f32 %v24811_v57, %v24828_v33  ;;  %v24846_v38 = vstv %s29712_s4 }
0xabb6   :  { %s29714_s22 = spop %29713  ;;  %v24847_v56 = vsub.f32 %v24829_v47, %v24846_v38 }
0xabb7   :  { %v24864_v42 = vstv %s29714_s22 }
0xabb8   :  { %v24865_v3 = vsub.f32 %v24847_v56, %v24864_v42 }
0xabb9   :  { %v24690_v1 = vpop.f32.mrb[46].mxu1 }
0xabba   :  { %v24691_v5 = vadd.f32 %v24690_v1, %v24617_v24  ;;  %v28691_v8 = vpop.f32.mrb[47].mxu1 }
0xabbc   :  { %v24701_v9 = vadd.f32 %v25537_v4, %v24691_v5 }
0xabbe   :  { %v24702_v7 = vmax.f32 %v24701_v9, 0.0 }
0xabc0   :  { %28701 = vmatmul.mubr.msk.f32.vlgmr.msra.gmra.mrb[40].mxu0 %vm172_vm1, %v24702_v7 }
0xac93   :  { %v24783_v50 = vpop.f32.mrb[40].mxu0 }
0xac94   :  { %v24784_v49 = vadd.f32 %v25538_v13, %v24783_v50  ;;  %v28702_v22 = vpop.f32.mrb[41].mxu0 }
0xac96   :  { %v25540_v10 = vmul.f32 -1.442695, %v24784_v49 }
0xac98   :  { %29836 = vpow2.f32 %v25540_v10 }
0xaca2   :  { %v29837_v27 = vpop.eup %29836 }
0xaca3   :  { %v24790_v31 = vadd.f32 1.0, %v29837_v27 }
0xaca5   :  { %29838 = vrcp.f32 %v24790_v31 }
0xacaf   :  { %v29839_v51 = vpop.eup %29838 }
0xacb0   :  { %v24866_v12 = vsub.f32 %v29839_v51, %v31387_v35  ;;  %v24869_v32 = vrot.slane %v29839_v51, 7  ;;  %v24899_v35 = vadd.f32 %v24898_v6, %v24897_v43 }
0xacb2   :  { %v24872_v55 = vmul.f32 %v24866_v12, %v24866_v12  ;;  %v24871_v15 = vsub.f32 %v30119_v44, %v24869_v32  ;;  %v24900_v24 = vrot.slane %v24899_v35, 1 }
0xacb4   :  { %v24874_v18 = vrot.slane %v24872_v55, 7  ;;  %v24906_v63 = vmul.f32 %v24871_v15, %v24871_v15  ;;  %v24901_v2 = vadd.f32 %v24900_v24, %v24899_v35 }
0xacb6   :  { %v24876_v59 = vsel %vm24799_vm11, %v24874_v18, 0.0  ;;  %v24907_v61 = vsel %vm24799_vm11, %v24906_v63, 0.0 }
0xacb7   :  { %24877 = vadd.xlane.f32.xlu1 %v24876_v59 }
0xacbb   :  { %24908 = vadd.xlane.f32.xlu1 %v24907_v61 }
0xad44   :  { %v24878_v53 = vpop.xlane.xlu1 %24877 }
0xad45   :  { %v24879_v25 = vrot.slane %v24878_v53, 4 }
0xad47   :  { %v24880_v34 = vadd.f32 %v24879_v25, %v24878_v53 }
0xad48   :  { %v24909_v17 = vpop.xlane.xlu1 %24908 }
0xad49   :  { %v24881_v60 = vrot.slane %v24880_v34, 2  ;;  %v24910_v26 = vrot.slane %v24909_v17, 4 }
0xad4b   :  { %v24911_v44 = vadd.f32 %v24910_v26, %v24909_v17  ;;  %v24882_v20 = vadd.f32 %v24881_v60, %v24880_v34 }
0xad4d   :  { %v24912_v29 = vrot.slane %v24911_v44, 2  ;;  %v24883_v23 = vrot.slane %v24882_v20, 1 }
0xad4f   :  { %v24913_v36 = vadd.f32 %v24912_v29, %v24911_v44  ;;  %v24884_v48 = vadd.f32 %v24883_v23, %v24882_v20 }
0xad51   :  { %29715 = vpush %v24884_v48  ;;  %v24914_v28 = vrot.slane %v24913_v36, 1 }
0xad52   :  { %29717 = vpush %v24901_v2 }
0xad53   :  { %v24915_v39 = vadd.f32 %v24914_v28, %v24913_v36 }
0xad55   :  { %29719 = vpush %v24915_v39 }
0xad82   :  { %s29716_s23 = spop %29715 }
0xad83   :  { %v24886_v11 = vstv %s29716_s23  ;;  %s29718_s26 = spop %29717 }
0xad84   :  { %v24888_v37 = vmul.f32 0.125, %v24886_v11  ;;  %v24903_v21 = vstv %s29718_s26 }
0xad85   :  { %v24904_v16 = vmul.f32 0.125, %v24903_v21 }
0xad86   :  { %s29720_s28 = spop %29719 }
0xad87   :  { %v24917_v45 = vstv %s29720_s28  ;;  %v24905_v52 = vadd.f32 %v24904_v16, %v24888_v37 }
0xad88   :  { %v24918_v30 = vmul.f32 0.125, %v24917_v45 }
0xad8a   :  { %v24919_v54 = vadd.f32 %v24918_v30, %v24905_v52 }
0xad8c   :  { %v24920_v58 = vadd.f32 %v24919_v54, %v24865_v3 }
0xad8e   :  { %24922 = vst.msk [vmem:[#allocation2] sm:$0x1] %vm24921_vm0, %v24920_v58 }
0xad8f   :  { %29856 = shalt.err (!%p29853_p4)
}
0xad90   :  { %s29857_s11 = scalar_lea.hbm %s30078_s30, 16 }
0xad91   :  { %p29858_p5 = scmp.ne.s32.totalorder %s30078_s30, %s29857_s11  ;;  %p29861_p6 = scmp.lt.u32.totalorder %s29857_s11, %s30078_s30 }
0xad93   :  { %p29863_p7 = pnand %p29861_p6, %p29858_p5 }
0xad95   :  { %29866 = shalt.err (!%p29863_p7)
}
0xad96   :  { %24932 = dma.vmem_to_hbm [thread:$0]  %s24930_s2, 16, %s30078_s30, [#allocation3]  }
0xad97   :  { %29867 = dma.done.wait [#allocation3], 16  }
0xad98   :  { %29868 = vsyncadd [#allocation3], 4294967280 }
0xad99   :  { %24936 = vsyncpa [#allocation3], 1 }

</bundles_post_ra>
